<compile_context>
chip_gen: v7x
topology: tpu7x:2x2x1
jax: 0.10.0
libtpu: 0.0.40
codegen_flags: <defaults>
</compile_context>

<pallas_src>
import numpy as np
import jax
import jax.numpy as jnp
from jax import lax
from jax.experimental import pallas as pl
from jax.experimental.pallas import tpu as pltpu

LANES = 128      # padded channel width (lane-dense, MXU-friendly N)
FC_HIDDEN = 50   # fixed by the module: nn.Linear(n_kernels * 4 * 4, 50)


# ----------------------------------------------------------------------------
# Fused forward-pass kernel (one batch tile per grid step)
# ----------------------------------------------------------------------------
def _convnet_kernel(x_ref, w1_ref, b1_ref, w2_ref, b2_ref, w3_ref, b3_ref,
                    w4_ref, b4_ref, out_ref, p1_ref, slab_ref):
    tb = x_ref.shape[0]
    f32, bf16 = jnp.float32, jnp.bfloat16

    # ---- Conv1 (5x5, 1 -> nk) on the MXU, fused with the H direction of
    #      MaxPool2d(2).  rows[s][b, ip, w] = x[b, 2*ip + s, w].
    rows = [x_ref[:, pl.ds(s, 12, 2), :] for s in range(6)]      # (tb,12,28)
    lhs_e = jnp.concatenate(rows[0:5], axis=-1).reshape(tb * 12, 5 * 28)
    lhs_o = jnp.concatenate(rows[1:6], axis=-1).reshape(tb * 12, 5 * 28)
    w1 = w1_ref[...]                                             # (140, 3072)
    ae = jnp.dot(lhs_e.astype(bf16), w1, preferred_element_type=f32)
    ao = jnp.dot(lhs_o.astype(bf16), w1, preferred_element_type=f32)
    rp = jnp.maximum(ae, ao)            # (tb*12, 24*128): H-pooled, pre-bias

    # ---- W direction of pool1 + bias + ReLU (monotone, so pooling first is
    #      exact); store pooled activation as bf16 NHWC scratch (tb,12,12,128).
    b1 = b1_ref[...]                                             # (1, 128)
    for jp in range(12):
        blk = jnp.maximum(rp[:, 256 * jp:256 * jp + 128],
                          rp[:, 256 * jp + 128:256 * jp + 256])  # (tb*12,128)
        act = jnp.maximum(blk + b1, 0.0).astype(bf16)
        p1_ref[:, :, jp, :] = act.reshape(tb, 12, 128)

    # ---- Conv2 (5x5, nk -> nk): bf16 im2col slab in VMEM + ONE K=3200 matmul.
    for di in range(5):
        for dj in range(5):
            k = di * 5 + dj
            piece = p1_ref[:, di:di + 8, dj:dj + 8, :]           # (tb,8,8,128)
            slab_ref[:, 128 * k:128 * (k + 1)] = piece.reshape(tb * 64, 128)
    a2 = jnp.dot(slab_ref[...], w2_ref[...], preferred_element_type=f32)
    a2 = jnp.maximum(a2 + b2_ref[...], 0.0).reshape(tb, 8, 8, 128)

    # ---- MaxPool2d(2) fused with the NCHW flatten: p2's lane blocks are
    #      ordered (h*4+w), the channel->flat-index permutation lives in w3.
    cols = []
    for h in range(4):
        for w in range(4):
            q = jnp.maximum(
                jnp.maximum(a2[:, 2 * h, 2 * w, :], a2[:, 2 * h, 2 * w + 1, :]),
                jnp.maximum(a2[:, 2 * h + 1, 2 * w, :],
                            a2[:, 2 * h + 1, 2 * w + 1, :]))
            cols.append(q)                                       # (tb, 128)
    p2 = jnp.concatenate(cols, axis=-1)                          # (tb, 2048)

    # ---- fc1 + ReLU, fc2 -> padded logits (real ones in the low lanes).
    h1 = jnp.dot(p2.astype(bf16), w3_ref[...], preferred_element_type=f32)
    h1 = jnp.maximum(h1 + b3_ref[...], 0.0)
    logits = jnp.dot(h1.astype(bf16), w4_ref[...],
                     preferred_element_type=f32) + b4_ref[...]
    out_ref[:, 0, :] = logits.astype(out_ref.dtype)


# ----------------------------------------------------------------------------
# Wrapper: one fused pallas_call, batch-tiled grid
# ----------------------------------------------------------------------------
def _pick_batch_tile(B):
    # Prefer >= 2 grid steps (v7x megacore sharding) and tb <= 8; tb | B.
    target = max(min(B // 2, 8), 1)
    for tb in range(target, 0, -1):
        if B % tb == 0:
            return tb
    return 1


def convnet_forward(x_nchw, kp, output_size, *, batch_tile=None):
    B = x_nchw.shape[0]
    assert x_nchw.shape[1:] == (1, 28, 28), "ConvNet geometry needs 1x28x28"
    tb = batch_tile if batch_tile is not None else _pick_batch_tile(B)
    assert B % tb == 0, "batch must be divisible by the batch tile"

    x = x_nchw.astype(jnp.float32).reshape(B, 28, 28)   # squeeze channel dim

    grid_spec = pltpu.PrefetchScalarGridSpec(
        num_scalar_prefetch=0,
        grid=(B // tb,),
        in_specs=[
            pl.BlockSpec((tb, 28, 28), lambda b: (b, 0, 0)),          # images
            pl.BlockSpec((5 * 28, 24 * LANES), lambda b: (0, 0)),     # w1
            pl.BlockSpec((1, LANES), lambda b: (0, 0)),               # b1
            pl.BlockSpec((25 * LANES, LANES), lambda b: (0, 0)),      # w2
            pl.BlockSpec((1, LANES), lambda b: (0, 0)),               # b2
            pl.BlockSpec((16 * LANES, LANES), lambda b: (0, 0)),      # w3
            pl.BlockSpec((1, LANES), lambda b: (0, 0)),               # b3
            pl.BlockSpec((LANES, LANES), lambda b: (0, 0)),           # w4
            pl.BlockSpec((1, LANES), lambda b: (0, 0)),               # b4
        ],
        out_specs=pl.BlockSpec((tb, 1, LANES), lambda b: (b, 0, 0)),
        scratch_shapes=[
            pltpu.VMEM((tb, 12, 12, LANES), jnp.bfloat16),   # pooled conv1 act
            pltpu.VMEM((tb * 64, 25 * LANES), jnp.bfloat16), # conv2 im2col slab
        ],
    )
    out = pl.pallas_call(
        _convnet_kernel,
        out_shape=jax.ShapeDtypeStruct((B, 1, LANES), jnp.float32),
        grid_spec=grid_spec,
        compiler_params=pltpu.CompilerParams(
            dimension_semantics=("parallel",),
            vmem_limit_bytes=32 * 1024 * 1024,   # safe on v5e/v6e/v7x budgets
        ),
    )(x, kp["w1"], kp["b1"], kp["w2"], kp["b2"], kp["w3"], kp["b3"],
      kp["w4"], kp["b4"])
    return out[:, 0, :output_size]


# ----------------------------------------------------------------------------
# One-time parameter preparation: banded conv1 weight, flattened conv2/fc1
# weights, 128-lane channel padding, torch-flatten permutation folded into fc1.
# ----------------------------------------------------------------------------
def prepare_params(params, n_kernels, output_size):
    nk = n_kernels
    assert nk <= LANES and output_size <= LANES and FC_HIDDEN <= LANES
    f32np = np.float32

    # w1 (banded): w1t[di*28 + w, j*128 + c] = conv1_w[c, 0, di, w - j].
    cw = np.asarray(params["conv1_w"], f32np)[:, 0]              # (nk, 5, 5)
    w1t = np.zeros((5, 28, 24, LANES), f32np)
    for di in range(5):
        for dj in range(5):
            for j in range(24):
                w1t[di, j + dj, j, :nk] = cw[:, di, dj]
    w1 = jnp.asarray(w1t.reshape(5 * 28, 24 * LANES), dtype=jnp.bfloat16)
    b1 = np.zeros((1, LANES), f32np)
    b1[0, :nk] = np.asarray(params["conv1_b"], f32np)

    # w2 (im2col-flat): w2f[(di*5+dj)*128 + ci, co] = conv2_w[co, ci, di, dj].
    c2 = np.asarray(params["conv2_w"], f32np)                    # (co,ci,5,5)
    w2f = np.zeros((25 * LANES, LANES), f32np)
    for di in range(5):
        for dj in range(5):
            k = di * 5 + dj
            w2f[k * LANES:k * LANES + nk, :nk] = c2[:, :, di, dj].T
    b2 = np.zeros((1, LANES), f32np)
    b2[0, :nk] = np.asarray(params["conv2_b"], f32np)

    # w3: torch flatten index = c*16 + h*4 + w  ->  kernel lane-block (h*4+w,c).
    f1 = np.asarray(params["fc1_w"], f32np).reshape(FC_HIDDEN, nk, 4, 4)
    w3f = np.zeros((16 * LANES, LANES), f32np)
    for h in range(4):
        for w in range(4):
            blk = h * 4 + w
            w3f[blk * LANES:blk * LANES + nk, :FC_HIDDEN] = f1[:, :, h, w].T
    b3 = np.zeros((1, LANES), f32np)
    b3[0, :FC_HIDDEN] = np.asarray(params["fc1_b"], f32np)

    w4f = np.zeros((LANES, LANES), f32np)
    w4f[:FC_HIDDEN, :output_size] = np.asarray(params["fc2_w"], f32np).T
    b4 = np.zeros((1, LANES), f32np)
    b4[0, :output_size] = np.asarray(params["fc2_b"], f32np)

    return {"w1": w1, "b1": jnp.asarray(b1),
            "w2": jnp.asarray(w2f, dtype=jnp.bfloat16), "b2": jnp.asarray(b2),
            "w3": jnp.asarray(w3f, dtype=jnp.bfloat16), "b3": jnp.asarray(b3),
            "w4": jnp.asarray(w4f, dtype=jnp.bfloat16), "b4": jnp.asarray(b4)}


# ----------------------------------------------------------------------------
# Deterministic synthetic parameters (torch layout, shapes from ConvNet)
# ----------------------------------------------------------------------------
def init_params(key, n_kernels, output_size):
    ks = jax.random.split(key, 8)
    s = 0.1
    return {
        "conv1_w": s * jax.random.normal(ks[0], (n_kernels, 1, 5, 5), jnp.float32),
        "conv1_b": s * jax.random.normal(ks[1], (n_kernels,), jnp.float32),
        "conv2_w": s * jax.random.normal(ks[2], (n_kernels, n_kernels, 5, 5), jnp.float32),
        "conv2_b": s * jax.random.normal(ks[3], (n_kernels,), jnp.float32),
        "fc1_w":   s * jax.random.normal(ks[4], (FC_HIDDEN, n_kernels * 4 * 4), jnp.float32),
        "fc1_b":   s * jax.random.normal(ks[5], (FC_HIDDEN,), jnp.float32),
        "fc2_w":   s * jax.random.normal(ks[6], (output_size, FC_HIDDEN), jnp.float32),
        "fc2_b":   s * jax.random.normal(ks[7], (output_size,), jnp.float32),
    }


# ----------------------------------------------------------------------------
# Pure-JAX f32 reference of the PyTorch module (for tolerance validation).
# ----------------------------------------------------------------------------
def reference_forward(x_nchw, p):
    dn = ("NCHW", "OIHW", "NCHW")
    y = lax.conv_general_dilated(x_nchw, p["conv1_w"], (1, 1), "VALID",
                                 dimension_numbers=dn)
    y = jnp.maximum(y + p["conv1_b"][None, :, None, None], 0.0)
    y = lax.reduce_window(y, -jnp.inf, lax.max, (1, 1, 2, 2), (1, 1, 2, 2), "VALID")
    y = lax.conv_general_dilated(y, p["conv2_w"], (1, 1), "VALID",
                                 dimension_numbers=dn)
    y = jnp.maximum(y + p["conv2_b"][None, :, None, None], 0.0)
    y = lax.reduce_window(y, -jnp.inf, lax.max, (1, 1, 2, 2), (1, 1, 2, 2), "VALID")
    y = y.reshape(y.shape[0], -1)
    y = jnp.maximum(y @ p["fc1_w"].T + p["fc1_b"], 0.0)
    return y @ p["fc2_w"].T + p["fc2_b"]


if __name__ == "__main__":
    # ConvNet geometry requires 28x28 single-channel inputs
    # (28 -conv5-> 24 -pool-> 12 -conv5-> 8 -pool-> 4, flatten = nk*4*4).
    batch, n_kernels, output_size = 2, 8, 10
    key = jax.random.PRNGKey(0)
    k_x, k_p = jax.random.split(key)
    x = jax.random.normal(k_x, (batch, 1, 28, 28), jnp.float32)   # NCHW input
    raw_params = init_params(k_p, n_kernels, output_size)
    kparams = prepare_params(raw_params, n_kernels, output_size)

    fwd = jax.jit(convnet_forward, static_argnums=(2,))
    out = fwd(x, kparams, output_size)
    jax.block_until_ready(out)
    assert out.shape == (batch, output_size)

    # bf16 matmul inputs / f32 accumulation -> validate with loose tolerance.
    ref = reference_forward(x, raw_params)
    max_err = float(jnp.max(jnp.abs(out - ref)))
    assert max_err < 0.1, f"mismatch vs f32 reference: max_abs_err={max_err}"
    print("KERNEL_OK")
</pallas_src>

<mosaic_0001>
module attributes {stable_mosaic.version = 11 : i64} {
  func.func @_convnet_kernel(%arg0: i32, %arg1: memref<1x28x28xf32, #tpu.memory_space<vmem>>, %arg2: memref<140x3072xbf16, #tpu.memory_space<vmem>>, %arg3: memref<1x128xf32, #tpu.memory_space<vmem>>, %arg4: memref<3200x128xbf16, #tpu.memory_space<vmem>>, %arg5: memref<1x128xf32, #tpu.memory_space<vmem>>, %arg6: memref<2048x128xbf16, #tpu.memory_space<vmem>>, %arg7: memref<1x128xf32, #tpu.memory_space<vmem>>, %arg8: memref<128x128xbf16, #tpu.memory_space<vmem>>, %arg9: memref<1x128xf32, #tpu.memory_space<vmem>>, %arg10: memref<1x1x128xf32, #tpu.memory_space<vmem>>, %arg11: memref<1x12x12x128xbf16, #tpu.memory_space<vmem>>, %arg12: memref<64x3200xbf16, #tpu.memory_space<vmem>>) attributes {dimension_semantics = [#tpu.dimension_semantics<parallel>], iteration_bounds = array<i64: 2>, scalar_prefetch = 0 : i64, scratch_operands = 2 : i64, tpu.core_type = #tpu.core_type<tc>, window_params = [{transform_indices = @transform_0, window_bounds = array<i64: 1, 28, 28>}, {pipeline_mode = #tpu.pipeline_mode<synchronous>, transform_indices = @transform_1, window_bounds = array<i64: 140, 3072>}, {pipeline_mode = #tpu.pipeline_mode<synchronous>, transform_indices = @transform_2, window_bounds = array<i64: 1, 128>}, {pipeline_mode = #tpu.pipeline_mode<synchronous>, transform_indices = @transform_3, window_bounds = array<i64: 3200, 128>}, {pipeline_mode = #tpu.pipeline_mode<synchronous>, transform_indices = @transform_4, window_bounds = array<i64: 1, 128>}, {pipeline_mode = #tpu.pipeline_mode<synchronous>, transform_indices = @transform_5, window_bounds = array<i64: 2048, 128>}, {pipeline_mode = #tpu.pipeline_mode<synchronous>, transform_indices = @transform_6, window_bounds = array<i64: 1, 128>}, {pipeline_mode = #tpu.pipeline_mode<synchronous>, transform_indices = @transform_7, window_bounds = array<i64: 128, 128>}, {pipeline_mode = #tpu.pipeline_mode<synchronous>, transform_indices = @transform_8, window_bounds = array<i64: 1, 128>}, {transform_indices = @transform_9, window_bounds = array<i64: 1, 1, 128>}]} {
    %c0 = arith.constant 0 : index
    %c0_0 = arith.constant 0 : index
    %c0_1 = arith.constant 0 : index
    %0 = tpu.strided_load %arg1[%c0, %c0_0, %c0_1] {strides = array<i32: 1, 2, 1>} : memref<1x28x28xf32, #tpu.memory_space<vmem>>, vector<1x12x28xf32>
    %c0_2 = arith.constant 0 : index
    %c1 = arith.constant 1 : index
    %c0_3 = arith.constant 0 : index
    %1 = tpu.strided_load %arg1[%c0_2, %c1, %c0_3] {strides = array<i32: 1, 2, 1>} : memref<1x28x28xf32, #tpu.memory_space<vmem>>, vector<1x12x28xf32>
    %c0_4 = arith.constant 0 : index
    %c2 = arith.constant 2 : index
    %c0_5 = arith.constant 0 : index
    %2 = tpu.strided_load %arg1[%c0_4, %c2, %c0_5] {strides = array<i32: 1, 2, 1>} : memref<1x28x28xf32, #tpu.memory_space<vmem>>, vector<1x12x28xf32>
    %c0_6 = arith.constant 0 : index
    %c3 = arith.constant 3 : index
    %c0_7 = arith.constant 0 : index
    %3 = tpu.strided_load %arg1[%c0_6, %c3, %c0_7] {strides = array<i32: 1, 2, 1>} : memref<1x28x28xf32, #tpu.memory_space<vmem>>, vector<1x12x28xf32>
    %c0_8 = arith.constant 0 : index
    %c4 = arith.constant 4 : index
    %c0_9 = arith.constant 0 : index
    %4 = tpu.strided_load %arg1[%c0_8, %c4, %c0_9] {strides = array<i32: 1, 2, 1>} : memref<1x28x28xf32, #tpu.memory_space<vmem>>, vector<1x12x28xf32>
    %c0_10 = arith.constant 0 : index
    %c5 = arith.constant 5 : index
    %c0_11 = arith.constant 0 : index
    %5 = tpu.strided_load %arg1[%c0_10, %c5, %c0_11] {strides = array<i32: 1, 2, 1>} : memref<1x28x28xf32, #tpu.memory_space<vmem>>, vector<1x12x28xf32>
    %6 = tpu.concatenate %0, %1, %2, %3, %4 in 2 : vector<1x12x28xf32>, vector<1x12x28xf32>, vector<1x12x28xf32>, vector<1x12x28xf32>, vector<1x12x28xf32> -> vector<1x12x140xf32>
    %7 = vector.shape_cast %6 : vector<1x12x140xf32> to vector<12x140xf32>
    %8 = tpu.concatenate %1, %2, %3, %4, %5 in 2 : vector<1x12x28xf32>, vector<1x12x28xf32>, vector<1x12x28xf32>, vector<1x12x28xf32>, vector<1x12x28xf32> -> vector<1x12x140xf32>
    %9 = vector.shape_cast %8 : vector<1x12x140xf32> to vector<12x140xf32>
    %c0_12 = arith.constant 0 : index
    %c0_13 = arith.constant 0 : index
    %10 = vector.load %arg2[%c0_12, %c0_13] : memref<140x3072xbf16, #tpu.memory_space<vmem>>, vector<140x3072xbf16>
    %11 = arith.truncf %7 : vector<12x140xf32> to vector<12x140xbf16>
    %cst = arith.constant dense<0.000000e+00> : vector<12x3072xf32>
    %12 = tpu.matmul %11, %10, %cst {dimension_numbers = #tpu.dot_dimension_numbers<[1], [0], [0], [1], [0, 0, 1, 1], [], []>} : vector<12x140xbf16>, vector<140x3072xbf16>, vector<12x3072xf32> -> vector<12x3072xf32>
    %13 = arith.truncf %9 : vector<12x140xf32> to vector<12x140xbf16>
    %cst_14 = arith.constant dense<0.000000e+00> : vector<12x3072xf32>
    %14 = tpu.matmul %13, %10, %cst_14 {dimension_numbers = #tpu.dot_dimension_numbers<[1], [0], [0], [1], [0, 0, 1, 1], [], []>} : vector<12x140xbf16>, vector<140x3072xbf16>, vector<12x3072xf32> -> vector<12x3072xf32>
    %15 = arith.maximumf %12, %14 : vector<12x3072xf32>
    %c0_15 = arith.constant 0 : index
    %c0_16 = arith.constant 0 : index
    %16 = vector.load %arg3[%c0_15, %c0_16] : memref<1x128xf32, #tpu.memory_space<vmem>>, vector<1x128xf32>
    %17 = vector.extract_strided_slice %15 {offsets = [0, 0], sizes = [12, 128], strides = [1, 1]} : vector<12x3072xf32> to vector<12x128xf32>
    %18 = vector.extract_strided_slice %15 {offsets = [0, 128], sizes = [12, 128], strides = [1, 1]} : vector<12x3072xf32> to vector<12x128xf32>
    %19 = arith.maximumf %17, %18 : vector<12x128xf32>
    %20 = vector.broadcast %16 : vector<1x128xf32> to vector<12x128xf32>
    %21 = arith.addf %19, %20 : vector<12x128xf32>
    %cst_17 = arith.constant 0.000000e+00 : f32
    %22 = vector.broadcast %cst_17 : f32 to vector<12x128xf32>
    %23 = arith.maximumf %21, %22 : vector<12x128xf32>
    %24 = arith.truncf %23 : vector<12x128xf32> to vector<12x128xbf16>
    %25 = vector.shape_cast %24 : vector<12x128xbf16> to vector<1x12x128xbf16>
    %c0_18 = arith.constant 0 : index
    %c0_19 = arith.constant 0 : index
    %c0_20 = arith.constant 0 : index
    %c0_21 = arith.constant 0 : index
    %26 = vector.load %arg11[%c0_18, %c0_19, %c0_20, %c0_21] : memref<1x12x12x128xbf16, #tpu.memory_space<vmem>>, vector<1x12x1x128xbf16>
    %27 = vector.shape_cast %26 : vector<1x12x1x128xbf16> to vector<1x12x128xbf16>
    %28 = vector.shape_cast %25 : vector<1x12x128xbf16> to vector<1x12x1x128xbf16>
    tpu.vector_store %arg11[%c0_18, %c0_19, %c0_20, %c0_21], %28 {strides = array<i32>} : memref<1x12x12x128xbf16, #tpu.memory_space<vmem>>, vector<1x12x1x128xbf16>,
    %29 = vector.extract_strided_slice %15 {offsets = [0, 256], sizes = [12, 128], strides = [1, 1]} : vector<12x3072xf32> to vector<12x128xf32>
    %30 = vector.extract_strided_slice %15 {offsets = [0, 384], sizes = [12, 128], strides = [1, 1]} : vector<12x3072xf32> to vector<12x128xf32>
    %31 = arith.maximumf %29, %30 : vector<12x128xf32>
    %32 = vector.broadcast %16 : vector<1x128xf32> to vector<12x128xf32>
    %33 = arith.addf %31, %32 : vector<12x128xf32>
    %cst_22 = arith.constant 0.000000e+00 : f32
    %34 = vector.broadcast %cst_22 : f32 to vector<12x128xf32>
    %35 = arith.maximumf %33, %34 : vector<12x128xf32>
    %36 = arith.truncf %35 : vector<12x128xf32> to vector<12x128xbf16>
    %37 = vector.shape_cast %36 : vector<12x128xbf16> to vector<1x12x128xbf16>
    %c0_23 = arith.constant 0 : index
    %c0_24 = arith.constant 0 : index
    %c1_25 = arith.constant 1 : index
    %c0_26 = arith.constant 0 : index
    %38 = vector.load %arg11[%c0_23, %c0_24, %c1_25, %c0_26] : memref<1x12x12x128xbf16, #tpu.memory_space<vmem>>, vector<1x12x1x128xbf16>
    %39 = vector.shape_cast %38 : vector<1x12x1x128xbf16> to vector<1x12x128xbf16>
    %40 = vector.shape_cast %37 : vector<1x12x128xbf16> to vector<1x12x1x128xbf16>
    tpu.vector_store %arg11[%c0_23, %c0_24, %c1_25, %c0_26], %40 {strides = array<i32>} : memref<1x12x12x128xbf16, #tpu.memory_space<vmem>>, vector<1x12x1x128xbf16>,
    %41 = vector.extract_strided_slice %15 {offsets = [0, 512], sizes = [12, 128], strides = [1, 1]} : vector<12x3072xf32> to vector<12x128xf32>
    %42 = vector.extract_strided_slice %15 {offsets = [0, 640], sizes = [12, 128], strides = [1, 1]} : vector<12x3072xf32> to vector<12x128xf32>
    %43 = arith.maximumf %41, %42 : vector<12x128xf32>
    %44 = vector.broadcast %16 : vector<1x128xf32> to vector<12x128xf32>
    %45 = arith.addf %43, %44 : vector<12x128xf32>
    %cst_27 = arith.constant 0.000000e+00 : f32
    %46 = vector.broadcast %cst_27 : f32 to vector<12x128xf32>
    %47 = arith.maximumf %45, %46 : vector<12x128xf32>
    %48 = arith.truncf %47 : vector<12x128xf32> to vector<12x128xbf16>
    %49 = vector.shape_cast %48 : vector<12x128xbf16> to vector<1x12x128xbf16>
    %c0_28 = arith.constant 0 : index
    %c0_29 = arith.constant 0 : index
    %c2_30 = arith.constant 2 : index
    %c0_31 = arith.constant 0 : index
    %50 = vector.load %arg11[%c0_28, %c0_29, %c2_30, %c0_31] : memref<1x12x12x128xbf16, #tpu.memory_space<vmem>>, vector<1x12x1x128xbf16>
    %51 = vector.shape_cast %50 : vector<1x12x1x128xbf16> to vector<1x12x128xbf16>
    %52 = vector.shape_cast %49 : vector<1x12x128xbf16> to vector<1x12x1x128xbf16>
    tpu.vector_store %arg11[%c0_28, %c0_29, %c2_30, %c0_31], %52 {strides = array<i32>} : memref<1x12x12x128xbf16, #tpu.memory_space<vmem>>, vector<1x12x1x128xbf16>,
    %53 = vector.extract_strided_slice %15 {offsets = [0, 768], sizes = [12, 128], strides = [1, 1]} : vector<12x3072xf32> to vector<12x128xf32>
    %54 = vector.extract_strided_slice %15 {offsets = [0, 896], sizes = [12, 128], strides = [1, 1]} : vector<12x3072xf32> to vector<12x128xf32>
    %55 = arith.maximumf %53, %54 : vector<12x128xf32>
    %56 = vector.broadcast %16 : vector<1x128xf32> to vector<12x128xf32>
    %57 = arith.addf %55, %56 : vector<12x128xf32>
    %cst_32 = arith.constant 0.000000e+00 : f32
    %58 = vector.broadcast %cst_32 : f32 to vector<12x128xf32>
    %59 = arith.maximumf %57, %58 : vector<12x128xf32>
    %60 = arith.truncf %59 : vector<12x128xf32> to vector<12x128xbf16>
    %61 = vector.shape_cast %60 : vector<12x128xbf16> to vector<1x12x128xbf16>
    %c0_33 = arith.constant 0 : index
    %c0_34 = arith.constant 0 : index
    %c3_35 = arith.constant 3 : index
    %c0_36 = arith.constant 0 : index
    %62 = vector.load %arg11[%c0_33, %c0_34, %c3_35, %c0_36] : memref<1x12x12x128xbf16, #tpu.memory_space<vmem>>, vector<1x12x1x128xbf16>
    %63 = vector.shape_cast %62 : vector<1x12x1x128xbf16> to vector<1x12x128xbf16>
    %64 = vector.shape_cast %61 : vector<1x12x128xbf16> to vector<1x12x1x128xbf16>
    tpu.vector_store %arg11[%c0_33, %c0_34, %c3_35, %c0_36], %64 {strides = array<i32>} : memref<1x12x12x128xbf16, #tpu.memory_space<vmem>>, vector<1x12x1x128xbf16>,
    %65 = vector.extract_strided_slice %15 {offsets = [0, 1024], sizes = [12, 128], strides = [1, 1]} : vector<12x3072xf32> to vector<12x128xf32>
    %66 = vector.extract_strided_slice %15 {offsets = [0, 1152], sizes = [12, 128], strides = [1, 1]} : vector<12x3072xf32> to vector<12x128xf32>
    %67 = arith.maximumf %65, %66 : vector<12x128xf32>
    %68 = vector.broadcast %16 : vector<1x128xf32> to vector<12x128xf32>
    %69 = arith.addf %67, %68 : vector<12x128xf32>
    %cst_37 = arith.constant 0.000000e+00 : f32
    %70 = vector.broadcast %cst_37 : f32 to vector<12x128xf32>
    %71 = arith.maximumf %69, %70 : vector<12x128xf32>
    %72 = arith.truncf %71 : vector<12x128xf32> to vector<12x128xbf16>
    %73 = vector.shape_cast %72 : vector<12x128xbf16> to vector<1x12x128xbf16>
    %c0_38 = arith.constant 0 : index
    %c0_39 = arith.constant 0 : index
    %c4_40 = arith.constant 4 : index
    %c0_41 = arith.constant 0 : index
    %74 = vector.load %arg11[%c0_38, %c0_39, %c4_40, %c0_41] : memref<1x12x12x128xbf16, #tpu.memory_space<vmem>>, vector<1x12x1x128xbf16>
    %75 = vector.shape_cast %74 : vector<1x12x1x128xbf16> to vector<1x12x128xbf16>
    %76 = vector.shape_cast %73 : vector<1x12x128xbf16> to vector<1x12x1x128xbf16>
    tpu.vector_store %arg11[%c0_38, %c0_39, %c4_40, %c0_41], %76 {strides = array<i32>} : memref<1x12x12x128xbf16, #tpu.memory_space<vmem>>, vector<1x12x1x128xbf16>,
    %77 = vector.extract_strided_slice %15 {offsets = [0, 1280], sizes = [12, 128], strides = [1, 1]} : vector<12x3072xf32> to vector<12x128xf32>
    %78 = vector.extract_strided_slice %15 {offsets = [0, 1408], sizes = [12, 128], strides = [1, 1]} : vector<12x3072xf32> to vector<12x128xf32>
    %79 = arith.maximumf %77, %78 : vector<12x128xf32>
    %80 = vector.broadcast %16 : vector<1x128xf32> to vector<12x128xf32>
    %81 = arith.addf %79, %80 : vector<12x128xf32>
    %cst_42 = arith.constant 0.000000e+00 : f32
    %82 = vector.broadcast %cst_42 : f32 to vector<12x128xf32>
    %83 = arith.maximumf %81, %82 : vector<12x128xf32>
    %84 = arith.truncf %83 : vector<12x128xf32> to vector<12x128xbf16>
    %85 = vector.shape_cast %84 : vector<12x128xbf16> to vector<1x12x128xbf16>
    %c0_43 = arith.constant 0 : index
    %c0_44 = arith.constant 0 : index
    %c5_45 = arith.constant 5 : index
    %c0_46 = arith.constant 0 : index
    %86 = vector.load %arg11[%c0_43, %c0_44, %c5_45, %c0_46] : memref<1x12x12x128xbf16, #tpu.memory_space<vmem>>, vector<1x12x1x128xbf16>
    %87 = vector.shape_cast %86 : vector<1x12x1x128xbf16> to vector<1x12x128xbf16>
    %88 = vector.shape_cast %85 : vector<1x12x128xbf16> to vector<1x12x1x128xbf16>
    tpu.vector_store %arg11[%c0_43, %c0_44, %c5_45, %c0_46], %88 {strides = array<i32>} : memref<1x12x12x128xbf16, #tpu.memory_space<vmem>>, vector<1x12x1x128xbf16>,
    %89 = vector.extract_strided_slice %15 {offsets = [0, 1536], sizes = [12, 128], strides = [1, 1]} : vector<12x3072xf32> to vector<12x128xf32>
    %90 = vector.extract_strided_slice %15 {offsets = [0, 1664], sizes = [12, 128], strides = [1, 1]} : vector<12x3072xf32> to vector<12x128xf32>
    %91 = arith.maximumf %89, %90 : vector<12x128xf32>
    %92 = vector.broadcast %16 : vector<1x128xf32> to vector<12x128xf32>
    %93 = arith.addf %91, %92 : vector<12x128xf32>
    %cst_47 = arith.constant 0.000000e+00 : f32
    %94 = vector.broadcast %cst_47 : f32 to vector<12x128xf32>
    %95 = arith.maximumf %93, %94 : vector<12x128xf32>
    %96 = arith.truncf %95 : vector<12x128xf32> to vector<12x128xbf16>
    %97 = vector.shape_cast %96 : vector<12x128xbf16> to vector<1x12x128xbf16>
    %c0_48 = arith.constant 0 : index
    %c0_49 = arith.constant 0 : index
    %c6 = arith.constant 6 : index
    %c0_50 = arith.constant 0 : index
    %98 = vector.load %arg11[%c0_48, %c0_49, %c6, %c0_50] : memref<1x12x12x128xbf16, #tpu.memory_space<vmem>>, vector<1x12x1x128xbf16>
    %99 = vector.shape_cast %98 : vector<1x12x1x128xbf16> to vector<1x12x128xbf16>
    %100 = vector.shape_cast %97 : vector<1x12x128xbf16> to vector<1x12x1x128xbf16>
    tpu.vector_store %arg11[%c0_48, %c0_49, %c6, %c0_50], %100 {strides = array<i32>} : memref<1x12x12x128xbf16, #tpu.memory_space<vmem>>, vector<1x12x1x128xbf16>,
    %101 = vector.extract_strided_slice %15 {offsets = [0, 1792], sizes = [12, 128], strides = [1, 1]} : vector<12x3072xf32> to vector<12x128xf32>
    %102 = vector.extract_strided_slice %15 {offsets = [0, 1920], sizes = [12, 128], strides = [1, 1]} : vector<12x3072xf32> to vector<12x128xf32>
    %103 = arith.maximumf %101, %102 : vector<12x128xf32>
    %104 = vector.broadcast %16 : vector<1x128xf32> to vector<12x128xf32>
    %105 = arith.addf %103, %104 : vector<12x128xf32>
    %cst_51 = arith.constant 0.000000e+00 : f32
    %106 = vector.broadcast %cst_51 : f32 to vector<12x128xf32>
    %107 = arith.maximumf %105, %106 : vector<12x128xf32>
    %108 = arith.truncf %107 : vector<12x128xf32> to vector<12x128xbf16>
    %109 = vector.shape_cast %108 : vector<12x128xbf16> to vector<1x12x128xbf16>
    %c0_52 = arith.constant 0 : index
    %c0_53 = arith.constant 0 : index
    %c7 = arith.constant 7 : index
    %c0_54 = arith.constant 0 : index
    %110 = vector.load %arg11[%c0_52, %c0_53, %c7, %c0_54] : memref<1x12x12x128xbf16, #tpu.memory_space<vmem>>, vector<1x12x1x128xbf16>
    %111 = vector.shape_cast %110 : vector<1x12x1x128xbf16> to vector<1x12x128xbf16>
    %112 = vector.shape_cast %109 : vector<1x12x128xbf16> to vector<1x12x1x128xbf16>
    tpu.vector_store %arg11[%c0_52, %c0_53, %c7, %c0_54], %112 {strides = array<i32>} : memref<1x12x12x128xbf16, #tpu.memory_space<vmem>>, vector<1x12x1x128xbf16>,
    %113 = vector.extract_strided_slice %15 {offsets = [0, 2048], sizes = [12, 128], strides = [1, 1]} : vector<12x3072xf32> to vector<12x128xf32>
    %114 = vector.extract_strided_slice %15 {offsets = [0, 2176], sizes = [12, 128], strides = [1, 1]} : vector<12x3072xf32> to vector<12x128xf32>
    %115 = arith.maximumf %113, %114 : vector<12x128xf32>
    %116 = vector.broadcast %16 : vector<1x128xf32> to vector<12x128xf32>
    %117 = arith.addf %115, %116 : vector<12x128xf32>
    %cst_55 = arith.constant 0.000000e+00 : f32
    %118 = vector.broadcast %cst_55 : f32 to vector<12x128xf32>
    %119 = arith.maximumf %117, %118 : vector<12x128xf32>
    %120 = arith.truncf %119 : vector<12x128xf32> to vector<12x128xbf16>
    %121 = vector.shape_cast %120 : vector<12x128xbf16> to vector<1x12x128xbf16>
    %c0_56 = arith.constant 0 : index
    %c0_57 = arith.constant 0 : index
    %c8 = arith.constant 8 : index
    %c0_58 = arith.constant 0 : index
    %122 = vector.load %arg11[%c0_56, %c0_57, %c8, %c0_58] : memref<1x12x12x128xbf16, #tpu.memory_space<vmem>>, vector<1x12x1x128xbf16>
    %123 = vector.shape_cast %122 : vector<1x12x1x128xbf16> to vector<1x12x128xbf16>
    %124 = vector.shape_cast %121 : vector<1x12x128xbf16> to vector<1x12x1x128xbf16>
    tpu.vector_store %arg11[%c0_56, %c0_57, %c8, %c0_58], %124 {strides = array<i32>} : memref<1x12x12x128xbf16, #tpu.memory_space<vmem>>, vector<1x12x1x128xbf16>,
    %125 = vector.extract_strided_slice %15 {offsets = [0, 2304], sizes = [12, 128], strides = [1, 1]} : vector<12x3072xf32> to vector<12x128xf32>
    %126 = vector.extract_strided_slice %15 {offsets = [0, 2432], sizes = [12, 128], strides = [1, 1]} : vector<12x3072xf32> to vector<12x128xf32>
    %127 = arith.maximumf %125, %126 : vector<12x128xf32>
    %128 = vector.broadcast %16 : vector<1x128xf32> to vector<12x128xf32>
    %129 = arith.addf %127, %128 : vector<12x128xf32>
    %cst_59 = arith.constant 0.000000e+00 : f32
    %130 = vector.broadcast %cst_59 : f32 to vector<12x128xf32>
    %131 = arith.maximumf %129, %130 : vector<12x128xf32>
    %132 = arith.truncf %131 : vector<12x128xf32> to vector<12x128xbf16>
    %133 = vector.shape_cast %132 : vector<12x128xbf16> to vector<1x12x128xbf16>
    %c0_60 = arith.constant 0 : index
    %c0_61 = arith.constant 0 : index
    %c9 = arith.constant 9 : index
    %c0_62 = arith.constant 0 : index
    %134 = vector.load %arg11[%c0_60, %c0_61, %c9, %c0_62] : memref<1x12x12x128xbf16, #tpu.memory_space<vmem>>, vector<1x12x1x128xbf16>
    %135 = vector.shape_cast %134 : vector<1x12x1x128xbf16> to vector<1x12x128xbf16>
    %136 = vector.shape_cast %133 : vector<1x12x128xbf16> to vector<1x12x1x128xbf16>
    tpu.vector_store %arg11[%c0_60, %c0_61, %c9, %c0_62], %136 {strides = array<i32>} : memref<1x12x12x128xbf16, #tpu.memory_space<vmem>>, vector<1x12x1x128xbf16>,
    %137 = vector.extract_strided_slice %15 {offsets = [0, 2560], sizes = [12, 128], strides = [1, 1]} : vector<12x3072xf32> to vector<12x128xf32>
    %138 = vector.extract_strided_slice %15 {offsets = [0, 2688], sizes = [12, 128], strides = [1, 1]} : vector<12x3072xf32> to vector<12x128xf32>
    %139 = arith.maximumf %137, %138 : vector<12x128xf32>
    %140 = vector.broadcast %16 : vector<1x128xf32> to vector<12x128xf32>
    %141 = arith.addf %139, %140 : vector<12x128xf32>
    %cst_63 = arith.constant 0.000000e+00 : f32
    %142 = vector.broadcast %cst_63 : f32 to vector<12x128xf32>
    %143 = arith.maximumf %141, %142 : vector<12x128xf32>
    %144 = arith.truncf %143 : vector<12x128xf32> to vector<12x128xbf16>
    %145 = vector.shape_cast %144 : vector<12x128xbf16> to vector<1x12x128xbf16>
    %c0_64 = arith.constant 0 : index
    %c0_65 = arith.constant 0 : index
    %c10 = arith.constant 10 : index
    %c0_66 = arith.constant 0 : index
    %146 = vector.load %arg11[%c0_64, %c0_65, %c10, %c0_66] : memref<1x12x12x128xbf16, #tpu.memory_space<vmem>>, vector<1x12x1x128xbf16>
    %147 = vector.shape_cast %146 : vector<1x12x1x128xbf16> to vector<1x12x128xbf16>
    %148 = vector.shape_cast %145 : vector<1x12x128xbf16> to vector<1x12x1x128xbf16>
    tpu.vector_store %arg11[%c0_64, %c0_65, %c10, %c0_66], %148 {strides = array<i32>} : memref<1x12x12x128xbf16, #tpu.memory_space<vmem>>, vector<1x12x1x128xbf16>,
    %149 = vector.extract_strided_slice %15 {offsets = [0, 2816], sizes = [12, 128], strides = [1, 1]} : vector<12x3072xf32> to vector<12x128xf32>
    %150 = vector.extract_strided_slice %15 {offsets = [0, 2944], sizes = [12, 128], strides = [1, 1]} : vector<12x3072xf32> to vector<12x128xf32>
    %151 = arith.maximumf %149, %150 : vector<12x128xf32>
    %152 = vector.broadcast %16 : vector<1x128xf32> to vector<12x128xf32>
    %153 = arith.addf %151, %152 : vector<12x128xf32>
    %cst_67 = arith.constant 0.000000e+00 : f32
    %154 = vector.broadcast %cst_67 : f32 to vector<12x128xf32>
    %155 = arith.maximumf %153, %154 : vector<12x128xf32>
    %156 = arith.truncf %155 : vector<12x128xf32> to vector<12x128xbf16>
    %157 = vector.shape_cast %156 : vector<12x128xbf16> to vector<1x12x128xbf16>
    %c0_68 = arith.constant 0 : index
    %c0_69 = arith.constant 0 : index
    %c11 = arith.constant 11 : index
    %c0_70 = arith.constant 0 : index
    %158 = vector.load %arg11[%c0_68, %c0_69, %c11, %c0_70] : memref<1x12x12x128xbf16, #tpu.memory_space<vmem>>, vector<1x12x1x128xbf16>
    %159 = vector.shape_cast %158 : vector<1x12x1x128xbf16> to vector<1x12x128xbf16>
    %160 = vector.shape_cast %157 : vector<1x12x128xbf16> to vector<1x12x1x128xbf16>
    tpu.vector_store %arg11[%c0_68, %c0_69, %c11, %c0_70], %160 {strides = array<i32>} : memref<1x12x12x128xbf16, #tpu.memory_space<vmem>>, vector<1x12x1x128xbf16>,
    %c0_71 = arith.constant 0 : index
    %c0_72 = arith.constant 0 : index
    %c0_73 = arith.constant 0 : index
    %c0_74 = arith.constant 0 : index
    %161 = vector.load %arg11[%c0_71, %c0_72, %c0_73, %c0_74] : memref<1x12x12x128xbf16, #tpu.memory_space<vmem>>, vector<1x8x8x128xbf16>
    %162 = vector.shape_cast %161 : vector<1x8x8x128xbf16> to vector<64x128xbf16>
    %c0_75 = arith.constant 0 : index
    %c0_76 = arith.constant 0 : index
    %163 = vector.load %arg12[%c0_75, %c0_76] : memref<64x3200xbf16, #tpu.memory_space<vmem>>, vector<64x128xbf16>
    tpu.vector_store %arg12[%c0_75, %c0_76], %162 {strides = array<i32>} : memref<64x3200xbf16, #tpu.memory_space<vmem>>, vector<64x128xbf16>,
    %c0_77 = arith.constant 0 : index
    %c0_78 = arith.constant 0 : index
    %c1_79 = arith.constant 1 : index
    %c0_80 = arith.constant 0 : index
    %164 = vector.load %arg11[%c0_77, %c0_78, %c1_79, %c0_80] : memref<1x12x12x128xbf16, #tpu.memory_space<vmem>>, vector<1x8x8x128xbf16>
    %165 = vector.shape_cast %164 : vector<1x8x8x128xbf16> to vector<64x128xbf16>
    %c0_81 = arith.constant 0 : index
    %c128 = arith.constant 128 : index
    %166 = vector.load %arg12[%c0_81, %c128] : memref<64x3200xbf16, #tpu.memory_space<vmem>>, vector<64x128xbf16>
    tpu.vector_store %arg12[%c0_81, %c128], %165 {strides = array<i32>} : memref<64x3200xbf16, #tpu.memory_space<vmem>>, vector<64x128xbf16>,
    %c0_82 = arith.constant 0 : index
    %c0_83 = arith.constant 0 : index
    %c2_84 = arith.constant 2 : index
    %c0_85 = arith.constant 0 : index
    %167 = vector.load %arg11[%c0_82, %c0_83, %c2_84, %c0_85] : memref<1x12x12x128xbf16, #tpu.memory_space<vmem>>, vector<1x8x8x128xbf16>
    %168 = vector.shape_cast %167 : vector<1x8x8x128xbf16> to vector<64x128xbf16>
    %c0_86 = arith.constant 0 : index
    %c256 = arith.constant 256 : index
    %169 = vector.load %arg12[%c0_86, %c256] : memref<64x3200xbf16, #tpu.memory_space<vmem>>, vector<64x128xbf16>
    tpu.vector_store %arg12[%c0_86, %c256], %168 {strides = array<i32>} : memref<64x3200xbf16, #tpu.memory_space<vmem>>, vector<64x128xbf16>,
    %c0_87 = arith.constant 0 : index
    %c0_88 = arith.constant 0 : index
    %c3_89 = arith.constant 3 : index
    %c0_90 = arith.constant 0 : index
    %170 = vector.load %arg11[%c0_87, %c0_88, %c3_89, %c0_90] : memref<1x12x12x128xbf16, #tpu.memory_space<vmem>>, vector<1x8x8x128xbf16>
    %171 = vector.shape_cast %170 : vector<1x8x8x128xbf16> to vector<64x128xbf16>
    %c0_91 = arith.constant 0 : index
    %c384 = arith.constant 384 : index
    %172 = vector.load %arg12[%c0_91, %c384] : memref<64x3200xbf16, #tpu.memory_space<vmem>>, vector<64x128xbf16>
    tpu.vector_store %arg12[%c0_91, %c384], %171 {strides = array<i32>} : memref<64x3200xbf16, #tpu.memory_space<vmem>>, vector<64x128xbf16>,
    %c0_92 = arith.constant 0 : index
    %c0_93 = arith.constant 0 : index
    %c4_94 = arith.constant 4 : index
    %c0_95 = arith.constant 0 : index
    %173 = vector.load %arg11[%c0_92, %c0_93, %c4_94, %c0_95] : memref<1x12x12x128xbf16, #tpu.memory_space<vmem>>, vector<1x8x8x128xbf16>
    %174 = vector.shape_cast %173 : vector<1x8x8x128xbf16> to vector<64x128xbf16>
    %c0_96 = arith.constant 0 : index
    %c512 = arith.constant 512 : index
    %175 = vector.load %arg12[%c0_96, %c512] : memref<64x3200xbf16, #tpu.memory_space<vmem>>, vector<64x128xbf16>
    tpu.vector_store %arg12[%c0_96, %c512], %174 {strides = array<i32>} : memref<64x3200xbf16, #tpu.memory_space<vmem>>, vector<64x128xbf16>,
    %c0_97 = arith.constant 0 : index
    %c1_98 = arith.constant 1 : index
    %c0_99 = arith.constant 0 : index
    %c0_100 = arith.constant 0 : index
    %176 = vector.load %arg11[%c0_97, %c1_98, %c0_99, %c0_100] : memref<1x12x12x128xbf16, #tpu.memory_space<vmem>>, vector<1x8x8x128xbf16>
    %177 = vector.shape_cast %176 : vector<1x8x8x128xbf16> to vector<64x128xbf16>
    %c0_101 = arith.constant 0 : index
    %c640 = arith.constant 640 : index
    %178 = vector.load %arg12[%c0_101, %c640] : memref<64x3200xbf16, #tpu.memory_space<vmem>>, vector<64x128xbf16>
    tpu.vector_store %arg12[%c0_101, %c640], %177 {strides = array<i32>} : memref<64x3200xbf16, #tpu.memory_space<vmem>>, vector<64x128xbf16>,
    %c0_102 = arith.constant 0 : index
    %c1_103 = arith.constant 1 : index
    %c1_104 = arith.constant 1 : index
    %c0_105 = arith.constant 0 : index
    %179 = vector.load %arg11[%c0_102, %c1_103, %c1_104, %c0_105] : memref<1x12x12x128xbf16, #tpu.memory_space<vmem>>, vector<1x8x8x128xbf16>
    %180 = vector.shape_cast %179 : vector<1x8x8x128xbf16> to vector<64x128xbf16>
    %c0_106 = arith.constant 0 : index
    %c768 = arith.constant 768 : index
    %181 = vector.load %arg12[%c0_106, %c768] : memref<64x3200xbf16, #tpu.memory_space<vmem>>, vector<64x128xbf16>
    tpu.vector_store %arg12[%c0_106, %c768], %180 {strides = array<i32>} : memref<64x3200xbf16, #tpu.memory_space<vmem>>, vector<64x128xbf16>,
    %c0_107 = arith.constant 0 : index
    %c1_108 = arith.constant 1 : index
    %c2_109 = arith.constant 2 : index
    %c0_110 = arith.constant 0 : index
    %182 = vector.load %arg11[%c0_107, %c1_108, %c2_109, %c0_110] : memref<1x12x12x128xbf16, #tpu.memory_space<vmem>>, vector<1x8x8x128xbf16>
    %183 = vector.shape_cast %182 : vector<1x8x8x128xbf16> to vector<64x128xbf16>
    %c0_111 = arith.constant 0 : index
    %c896 = arith.constant 896 : index
    %184 = vector.load %arg12[%c0_111, %c896] : memref<64x3200xbf16, #tpu.memory_space<vmem>>, vector<64x128xbf16>
    tpu.vector_store %arg12[%c0_111, %c896], %183 {strides = array<i32>} : memref<64x3200xbf16, #tpu.memory_space<vmem>>, vector<64x128xbf16>,
    %c0_112 = arith.constant 0 : index
    %c1_113 = arith.constant 1 : index
    %c3_114 = arith.constant 3 : index
    %c0_115 = arith.constant 0 : index
    %185 = vector.load %arg11[%c0_112, %c1_113, %c3_114, %c0_115] : memref<1x12x12x128xbf16, #tpu.memory_space<vmem>>, vector<1x8x8x128xbf16>
    %186 = vector.shape_cast %185 : vector<1x8x8x128xbf16> to vector<64x128xbf16>
    %c0_116 = arith.constant 0 : index
    %c1024 = arith.constant 1024 : index
    %187 = vector.load %arg12[%c0_116, %c1024] : memref<64x3200xbf16, #tpu.memory_space<vmem>>, vector<64x128xbf16>
    tpu.vector_store %arg12[%c0_116, %c1024], %186 {strides = array<i32>} : memref<64x3200xbf16, #tpu.memory_space<vmem>>, vector<64x128xbf16>,
    %c0_117 = arith.constant 0 : index
    %c1_118 = arith.constant 1 : index
    %c4_119 = arith.constant 4 : index
    %c0_120 = arith.constant 0 : index
    %188 = vector.load %arg11[%c0_117, %c1_118, %c4_119, %c0_120] : memref<1x12x12x128xbf16, #tpu.memory_space<vmem>>, vector<1x8x8x128xbf16>
    %189 = vector.shape_cast %188 : vector<1x8x8x128xbf16> to vector<64x128xbf16>
    %c0_121 = arith.constant 0 : index
    %c1152 = arith.constant 1152 : index
    %190 = vector.load %arg12[%c0_121, %c1152] : memref<64x3200xbf16, #tpu.memory_space<vmem>>, vector<64x128xbf16>
    tpu.vector_store %arg12[%c0_121, %c1152], %189 {strides = array<i32>} : memref<64x3200xbf16, #tpu.memory_space<vmem>>, vector<64x128xbf16>,
    %c0_122 = arith.constant 0 : index
    %c2_123 = arith.constant 2 : index
    %c0_124 = arith.constant 0 : index
    %c0_125 = arith.constant 0 : index
    %191 = vector.load %arg11[%c0_122, %c2_123, %c0_124, %c0_125] : memref<1x12x12x128xbf16, #tpu.memory_space<vmem>>, vector<1x8x8x128xbf16>
    %192 = vector.shape_cast %191 : vector<1x8x8x128xbf16> to vector<64x128xbf16>
    %c0_126 = arith.constant 0 : index
    %c1280 = arith.constant 1280 : index
    %193 = vector.load %arg12[%c0_126, %c1280] : memref<64x3200xbf16, #tpu.memory_space<vmem>>, vector<64x128xbf16>
    tpu.vector_store %arg12[%c0_126, %c1280], %192 {strides = array<i32>} : memref<64x3200xbf16, #tpu.memory_space<vmem>>, vector<64x128xbf16>,
    %c0_127 = arith.constant 0 : index
    %c2_128 = arith.constant 2 : index
    %c1_129 = arith.constant 1 : index
    %c0_130 = arith.constant 0 : index
    %194 = vector.load %arg11[%c0_127, %c2_128, %c1_129, %c0_130] : memref<1x12x12x128xbf16, #tpu.memory_space<vmem>>, vector<1x8x8x128xbf16>
    %195 = vector.shape_cast %194 : vector<1x8x8x128xbf16> to vector<64x128xbf16>
    %c0_131 = arith.constant 0 : index
    %c1408 = arith.constant 1408 : index
    %196 = vector.load %arg12[%c0_131, %c1408] : memref<64x3200xbf16, #tpu.memory_space<vmem>>, vector<64x128xbf16>
    tpu.vector_store %arg12[%c0_131, %c1408], %195 {strides = array<i32>} : memref<64x3200xbf16, #tpu.memory_space<vmem>>, vector<64x128xbf16>,
    %c0_132 = arith.constant 0 : index
    %c2_133 = arith.constant 2 : index
    %c2_134 = arith.constant 2 : index
    %c0_135 = arith.constant 0 : index
    %197 = vector.load %arg11[%c0_132, %c2_133, %c2_134, %c0_135] : memref<1x12x12x128xbf16, #tpu.memory_space<vmem>>, vector<1x8x8x128xbf16>
    %198 = vector.shape_cast %197 : vector<1x8x8x128xbf16> to vector<64x128xbf16>
    %c0_136 = arith.constant 0 : index
    %c1536 = arith.constant 1536 : index
    %199 = vector.load %arg12[%c0_136, %c1536] : memref<64x3200xbf16, #tpu.memory_space<vmem>>, vector<64x128xbf16>
    tpu.vector_store %arg12[%c0_136, %c1536], %198 {strides = array<i32>} : memref<64x3200xbf16, #tpu.memory_space<vmem>>, vector<64x128xbf16>,
    %c0_137 = arith.constant 0 : index
    %c2_138 = arith.constant 2 : index
    %c3_139 = arith.constant 3 : index
    %c0_140 = arith.constant 0 : index
    %200 = vector.load %arg11[%c0_137, %c2_138, %c3_139, %c0_140] : memref<1x12x12x128xbf16, #tpu.memory_space<vmem>>, vector<1x8x8x128xbf16>
    %201 = vector.shape_cast %200 : vector<1x8x8x128xbf16> to vector<64x128xbf16>
    %c0_141 = arith.constant 0 : index
    %c1664 = arith.constant 1664 : index
    %202 = vector.load %arg12[%c0_141, %c1664] : memref<64x3200xbf16, #tpu.memory_space<vmem>>, vector<64x128xbf16>
    tpu.vector_store %arg12[%c0_141, %c1664], %201 {strides = array<i32>} : memref<64x3200xbf16, #tpu.memory_space<vmem>>, vector<64x128xbf16>,
    %c0_142 = arith.constant 0 : index
    %c2_143 = arith.constant 2 : index
    %c4_144 = arith.constant 4 : index
    %c0_145 = arith.constant 0 : index
    %203 = vector.load %arg11[%c0_142, %c2_143, %c4_144, %c0_145] : memref<1x12x12x128xbf16, #tpu.memory_space<vmem>>, vector<1x8x8x128xbf16>
    %204 = vector.shape_cast %203 : vector<1x8x8x128xbf16> to vector<64x128xbf16>
    %c0_146 = arith.constant 0 : index
    %c1792 = arith.constant 1792 : index
    %205 = vector.load %arg12[%c0_146, %c1792] : memref<64x3200xbf16, #tpu.memory_space<vmem>>, vector<64x128xbf16>
    tpu.vector_store %arg12[%c0_146, %c1792], %204 {strides = array<i32>} : memref<64x3200xbf16, #tpu.memory_space<vmem>>, vector<64x128xbf16>,
    %c0_147 = arith.constant 0 : index
    %c3_148 = arith.constant 3 : index
    %c0_149 = arith.constant 0 : index
    %c0_150 = arith.constant 0 : index
    %206 = vector.load %arg11[%c0_147, %c3_148, %c0_149, %c0_150] : memref<1x12x12x128xbf16, #tpu.memory_space<vmem>>, vector<1x8x8x128xbf16>
    %207 = vector.shape_cast %206 : vector<1x8x8x128xbf16> to vector<64x128xbf16>
    %c0_151 = arith.constant 0 : index
    %c1920 = arith.constant 1920 : index
    %208 = vector.load %arg12[%c0_151, %c1920] : memref<64x3200xbf16, #tpu.memory_space<vmem>>, vector<64x128xbf16>
    tpu.vector_store %arg12[%c0_151, %c1920], %207 {strides = array<i32>} : memref<64x3200xbf16, #tpu.memory_space<vmem>>, vector<64x128xbf16>,
    %c0_152 = arith.constant 0 : index
    %c3_153 = arith.constant 3 : index
    %c1_154 = arith.constant 1 : index
    %c0_155 = arith.constant 0 : index
    %209 = vector.load %arg11[%c0_152, %c3_153, %c1_154, %c0_155] : memref<1x12x12x128xbf16, #tpu.memory_space<vmem>>, vector<1x8x8x128xbf16>
    %210 = vector.shape_cast %209 : vector<1x8x8x128xbf16> to vector<64x128xbf16>
    %c0_156 = arith.constant 0 : index
    %c2048 = arith.constant 2048 : index
    %211 = vector.load %arg12[%c0_156, %c2048] : memref<64x3200xbf16, #tpu.memory_space<vmem>>, vector<64x128xbf16>
    tpu.vector_store %arg12[%c0_156, %c2048], %210 {strides = array<i32>} : memref<64x3200xbf16, #tpu.memory_space<vmem>>, vector<64x128xbf16>,
    %c0_157 = arith.constant 0 : index
    %c3_158 = arith.constant 3 : index
    %c2_159 = arith.constant 2 : index
    %c0_160 = arith.constant 0 : index
    %212 = vector.load %arg11[%c0_157, %c3_158, %c2_159, %c0_160] : memref<1x12x12x128xbf16, #tpu.memory_space<vmem>>, vector<1x8x8x128xbf16>
    %213 = vector.shape_cast %212 : vector<1x8x8x128xbf16> to vector<64x128xbf16>
    %c0_161 = arith.constant 0 : index
    %c2176 = arith.constant 2176 : index
    %214 = vector.load %arg12[%c0_161, %c2176] : memref<64x3200xbf16, #tpu.memory_space<vmem>>, vector<64x128xbf16>
    tpu.vector_store %arg12[%c0_161, %c2176], %213 {strides = array<i32>} : memref<64x3200xbf16, #tpu.memory_space<vmem>>, vector<64x128xbf16>,
    %c0_162 = arith.constant 0 : index
    %c3_163 = arith.constant 3 : index
    %c3_164 = arith.constant 3 : index
    %c0_165 = arith.constant 0 : index
    %215 = vector.load %arg11[%c0_162, %c3_163, %c3_164, %c0_165] : memref<1x12x12x128xbf16, #tpu.memory_space<vmem>>, vector<1x8x8x128xbf16>
    %216 = vector.shape_cast %215 : vector<1x8x8x128xbf16> to vector<64x128xbf16>
    %c0_166 = arith.constant 0 : index
    %c2304 = arith.constant 2304 : index
    %217 = vector.load %arg12[%c0_166, %c2304] : memref<64x3200xbf16, #tpu.memory_space<vmem>>, vector<64x128xbf16>
    tpu.vector_store %arg12[%c0_166, %c2304], %216 {strides = array<i32>} : memref<64x3200xbf16, #tpu.memory_space<vmem>>, vector<64x128xbf16>,
    %c0_167 = arith.constant 0 : index
    %c3_168 = arith.constant 3 : index
    %c4_169 = arith.constant 4 : index
    %c0_170 = arith.constant 0 : index
    %218 = vector.load %arg11[%c0_167, %c3_168, %c4_169, %c0_170] : memref<1x12x12x128xbf16, #tpu.memory_space<vmem>>, vector<1x8x8x128xbf16>
    %219 = vector.shape_cast %218 : vector<1x8x8x128xbf16> to vector<64x128xbf16>
    %c0_171 = arith.constant 0 : index
    %c2432 = arith.constant 2432 : index
    %220 = vector.load %arg12[%c0_171, %c2432] : memref<64x3200xbf16, #tpu.memory_space<vmem>>, vector<64x128xbf16>
    tpu.vector_store %arg12[%c0_171, %c2432], %219 {strides = array<i32>} : memref<64x3200xbf16, #tpu.memory_space<vmem>>, vector<64x128xbf16>,
    %c0_172 = arith.constant 0 : index
    %c4_173 = arith.constant 4 : index
    %c0_174 = arith.constant 0 : index
    %c0_175 = arith.constant 0 : index
    %221 = vector.load %arg11[%c0_172, %c4_173, %c0_174, %c0_175] : memref<1x12x12x128xbf16, #tpu.memory_space<vmem>>, vector<1x8x8x128xbf16>
    %222 = vector.shape_cast %221 : vector<1x8x8x128xbf16> to vector<64x128xbf16>
    %c0_176 = arith.constant 0 : index
    %c2560 = arith.constant 2560 : index
    %223 = vector.load %arg12[%c0_176, %c2560] : memref<64x3200xbf16, #tpu.memory_space<vmem>>, vector<64x128xbf16>
    tpu.vector_store %arg12[%c0_176, %c2560], %222 {strides = array<i32>} : memref<64x3200xbf16, #tpu.memory_space<vmem>>, vector<64x128xbf16>,
    %c0_177 = arith.constant 0 : index
    %c4_178 = arith.constant 4 : index
    %c1_179 = arith.constant 1 : index
    %c0_180 = arith.constant 0 : index
    %224 = vector.load %arg11[%c0_177, %c4_178, %c1_179, %c0_180] : memref<1x12x12x128xbf16, #tpu.memory_space<vmem>>, vector<1x8x8x128xbf16>
    %225 = vector.shape_cast %224 : vector<1x8x8x128xbf16> to vector<64x128xbf16>
    %c0_181 = arith.constant 0 : index
    %c2688 = arith.constant 2688 : index
    %226 = vector.load %arg12[%c0_181, %c2688] : memref<64x3200xbf16, #tpu.memory_space<vmem>>, vector<64x128xbf16>
    tpu.vector_store %arg12[%c0_181, %c2688], %225 {strides = array<i32>} : memref<64x3200xbf16, #tpu.memory_space<vmem>>, vector<64x128xbf16>,
    %c0_182 = arith.constant 0 : index
    %c4_183 = arith.constant 4 : index
    %c2_184 = arith.constant 2 : index
    %c0_185 = arith.constant 0 : index
    %227 = vector.load %arg11[%c0_182, %c4_183, %c2_184, %c0_185] : memref<1x12x12x128xbf16, #tpu.memory_space<vmem>>, vector<1x8x8x128xbf16>
    %228 = vector.shape_cast %227 : vector<1x8x8x128xbf16> to vector<64x128xbf16>
    %c0_186 = arith.constant 0 : index
    %c2816 = arith.constant 2816 : index
    %229 = vector.load %arg12[%c0_186, %c2816] : memref<64x3200xbf16, #tpu.memory_space<vmem>>, vector<64x128xbf16>
    tpu.vector_store %arg12[%c0_186, %c2816], %228 {strides = array<i32>} : memref<64x3200xbf16, #tpu.memory_space<vmem>>, vector<64x128xbf16>,
    %c0_187 = arith.constant 0 : index
    %c4_188 = arith.constant 4 : index
    %c3_189 = arith.constant 3 : index
    %c0_190 = arith.constant 0 : index
    %230 = vector.load %arg11[%c0_187, %c4_188, %c3_189, %c0_190] : memref<1x12x12x128xbf16, #tpu.memory_space<vmem>>, vector<1x8x8x128xbf16>
    %231 = vector.shape_cast %230 : vector<1x8x8x128xbf16> to vector<64x128xbf16>
    %c0_191 = arith.constant 0 : index
    %c2944 = arith.constant 2944 : index
    %232 = vector.load %arg12[%c0_191, %c2944] : memref<64x3200xbf16, #tpu.memory_space<vmem>>, vector<64x128xbf16>
    tpu.vector_store %arg12[%c0_191, %c2944], %231 {strides = array<i32>} : memref<64x3200xbf16, #tpu.memory_space<vmem>>, vector<64x128xbf16>,
    %c0_192 = arith.constant 0 : index
    %c4_193 = arith.constant 4 : index
    %c4_194 = arith.constant 4 : index
    %c0_195 = arith.constant 0 : index
    %233 = vector.load %arg11[%c0_192, %c4_193, %c4_194, %c0_195] : memref<1x12x12x128xbf16, #tpu.memory_space<vmem>>, vector<1x8x8x128xbf16>
    %234 = vector.shape_cast %233 : vector<1x8x8x128xbf16> to vector<64x128xbf16>
    %c0_196 = arith.constant 0 : index
    %c3072 = arith.constant 3072 : index
    %235 = vector.load %arg12[%c0_196, %c3072] : memref<64x3200xbf16, #tpu.memory_space<vmem>>, vector<64x128xbf16>
    tpu.vector_store %arg12[%c0_196, %c3072], %234 {strides = array<i32>} : memref<64x3200xbf16, #tpu.memory_space<vmem>>, vector<64x128xbf16>,
    %c0_197 = arith.constant 0 : index
    %c0_198 = arith.constant 0 : index
    %236 = vector.load %arg12[%c0_197, %c0_198] : memref<64x3200xbf16, #tpu.memory_space<vmem>>, vector<64x3200xbf16>
    %c0_199 = arith.constant 0 : index
    %c0_200 = arith.constant 0 : index
    %237 = vector.load %arg4[%c0_199, %c0_200] : memref<3200x128xbf16, #tpu.memory_space<vmem>>, vector<3200x128xbf16>
    %cst_201 = arith.constant dense<0.000000e+00> : vector<64x128xf32>
    %238 = tpu.matmul %236, %237, %cst_201 {dimension_numbers = #tpu.dot_dimension_numbers<[1], [0], [0], [1], [0, 0, 1, 1], [], []>} : vector<64x3200xbf16>, vector<3200x128xbf16>, vector<64x128xf32> -> vector<64x128xf32>
    %c0_202 = arith.constant 0 : index
    %c0_203 = arith.constant 0 : index
    %239 = vector.load %arg5[%c0_202, %c0_203] : memref<1x128xf32, #tpu.memory_space<vmem>>, vector<1x128xf32>
    %240 = vector.broadcast %239 : vector<1x128xf32> to vector<64x128xf32>
    %241 = arith.addf %238, %240 : vector<64x128xf32>
    %cst_204 = arith.constant 0.000000e+00 : f32
    %242 = vector.broadcast %cst_204 : f32 to vector<64x128xf32>
    %243 = arith.maximumf %241, %242 : vector<64x128xf32>
    %244 = vector.shape_cast %243 : vector<64x128xf32> to vector<1x8x8x128xf32>
    %245 = vector.extract_strided_slice %244 {offsets = [0, 0, 0, 0], sizes = [1, 1, 1, 128], strides = [1, 1, 1, 1]} : vector<1x8x8x128xf32> to vector<1x1x1x128xf32>
    %246 = vector.shape_cast %245 : vector<1x1x1x128xf32> to vector<1x128xf32>
    %247 = vector.extract_strided_slice %244 {offsets = [0, 0, 1, 0], sizes = [1, 1, 1, 128], strides = [1, 1, 1, 1]} : vector<1x8x8x128xf32> to vector<1x1x1x128xf32>
    %248 = vector.shape_cast %247 : vector<1x1x1x128xf32> to vector<1x128xf32>
    %249 = arith.maximumf %246, %248 : vector<1x128xf32>
    %250 = vector.extract_strided_slice %244 {offsets = [0, 1, 0, 0], sizes = [1, 1, 1, 128], strides = [1, 1, 1, 1]} : vector<1x8x8x128xf32> to vector<1x1x1x128xf32>
    %251 = vector.shape_cast %250 : vector<1x1x1x128xf32> to vector<1x128xf32>
    %252 = vector.extract_strided_slice %244 {offsets = [0, 1, 1, 0], sizes = [1, 1, 1, 128], strides = [1, 1, 1, 1]} : vector<1x8x8x128xf32> to vector<1x1x1x128xf32>
    %253 = vector.shape_cast %252 : vector<1x1x1x128xf32> to vector<1x128xf32>
    %254 = arith.maximumf %251, %253 : vector<1x128xf32>
    %255 = arith.maximumf %249, %254 : vector<1x128xf32>
    %256 = vector.extract_strided_slice %244 {offsets = [0, 0, 2, 0], sizes = [1, 1, 1, 128], strides = [1, 1, 1, 1]} : vector<1x8x8x128xf32> to vector<1x1x1x128xf32>
    %257 = vector.shape_cast %256 : vector<1x1x1x128xf32> to vector<1x128xf32>
    %258 = vector.extract_strided_slice %244 {offsets = [0, 0, 3, 0], sizes = [1, 1, 1, 128], strides = [1, 1, 1, 1]} : vector<1x8x8x128xf32> to vector<1x1x1x128xf32>
    %259 = vector.shape_cast %258 : vector<1x1x1x128xf32> to vector<1x128xf32>
    %260 = arith.maximumf %257, %259 : vector<1x128xf32>
    %261 = vector.extract_strided_slice %244 {offsets = [0, 1, 2, 0], sizes = [1, 1, 1, 128], strides = [1, 1, 1, 1]} : vector<1x8x8x128xf32> to vector<1x1x1x128xf32>
    %262 = vector.shape_cast %261 : vector<1x1x1x128xf32> to vector<1x128xf32>
    %263 = vector.extract_strided_slice %244 {offsets = [0, 1, 3, 0], sizes = [1, 1, 1, 128], strides = [1, 1, 1, 1]} : vector<1x8x8x128xf32> to vector<1x1x1x128xf32>
    %264 = vector.shape_cast %263 : vector<1x1x1x128xf32> to vector<1x128xf32>
    %265 = arith.maximumf %262, %264 : vector<1x128xf32>
    %266 = arith.maximumf %260, %265 : vector<1x128xf32>
    %267 = vector.extract_strided_slice %244 {offsets = [0, 0, 4, 0], sizes = [1, 1, 1, 128], strides = [1, 1, 1, 1]} : vector<1x8x8x128xf32> to vector<1x1x1x128xf32>
    %268 = vector.shape_cast %267 : vector<1x1x1x128xf32> to vector<1x128xf32>
    %269 = vector.extract_strided_slice %244 {offsets = [0, 0, 5, 0], sizes = [1, 1, 1, 128], strides = [1, 1, 1, 1]} : vector<1x8x8x128xf32> to vector<1x1x1x128xf32>
    %270 = vector.shape_cast %269 : vector<1x1x1x128xf32> to vector<1x128xf32>
    %271 = arith.maximumf %268, %270 : vector<1x128xf32>
    %272 = vector.extract_strided_slice %244 {offsets = [0, 1, 4, 0], sizes = [1, 1, 1, 128], strides = [1, 1, 1, 1]} : vector<1x8x8x128xf32> to vector<1x1x1x128xf32>
    %273 = vector.shape_cast %272 : vector<1x1x1x128xf32> to vector<1x128xf32>
    %274 = vector.extract_strided_slice %244 {offsets = [0, 1, 5, 0], sizes = [1, 1, 1, 128], strides = [1, 1, 1, 1]} : vector<1x8x8x128xf32> to vector<1x1x1x128xf32>
    %275 = vector.shape_cast %274 : vector<1x1x1x128xf32> to vector<1x128xf32>
    %276 = arith.maximumf %273, %275 : vector<1x128xf32>
    %277 = arith.maximumf %271, %276 : vector<1x128xf32>
    %278 = vector.extract_strided_slice %244 {offsets = [0, 0, 6, 0], sizes = [1, 1, 1, 128], strides = [1, 1, 1, 1]} : vector<1x8x8x128xf32> to vector<1x1x1x128xf32>
    %279 = vector.shape_cast %278 : vector<1x1x1x128xf32> to vector<1x128xf32>
    %280 = vector.extract_strided_slice %244 {offsets = [0, 0, 7, 0], sizes = [1, 1, 1, 128], strides = [1, 1, 1, 1]} : vector<1x8x8x128xf32> to vector<1x1x1x128xf32>
    %281 = vector.shape_cast %280 : vector<1x1x1x128xf32> to vector<1x128xf32>
    %282 = arith.maximumf %279, %281 : vector<1x128xf32>
    %283 = vector.extract_strided_slice %244 {offsets = [0, 1, 6, 0], sizes = [1, 1, 1, 128], strides = [1, 1, 1, 1]} : vector<1x8x8x128xf32> to vector<1x1x1x128xf32>
    %284 = vector.shape_cast %283 : vector<1x1x1x128xf32> to vector<1x128xf32>
    %285 = vector.extract_strided_slice %244 {offsets = [0, 1, 7, 0], sizes = [1, 1, 1, 128], strides = [1, 1, 1, 1]} : vector<1x8x8x128xf32> to vector<1x1x1x128xf32>
    %286 = vector.shape_cast %285 : vector<1x1x1x128xf32> to vector<1x128xf32>
    %287 = arith.maximumf %284, %286 : vector<1x128xf32>
    %288 = arith.maximumf %282, %287 : vector<1x128xf32>
    %289 = vector.extract_strided_slice %244 {offsets = [0, 2, 0, 0], sizes = [1, 1, 1, 128], strides = [1, 1, 1, 1]} : vector<1x8x8x128xf32> to vector<1x1x1x128xf32>
    %290 = vector.shape_cast %289 : vector<1x1x1x128xf32> to vector<1x128xf32>
    %291 = vector.extract_strided_slice %244 {offsets = [0, 2, 1, 0], sizes = [1, 1, 1, 128], strides = [1, 1, 1, 1]} : vector<1x8x8x128xf32> to vector<1x1x1x128xf32>
    %292 = vector.shape_cast %291 : vector<1x1x1x128xf32> to vector<1x128xf32>
    %293 = arith.maximumf %290, %292 : vector<1x128xf32>
    %294 = vector.extract_strided_slice %244 {offsets = [0, 3, 0, 0], sizes = [1, 1, 1, 128], strides = [1, 1, 1, 1]} : vector<1x8x8x128xf32> to vector<1x1x1x128xf32>
    %295 = vector.shape_cast %294 : vector<1x1x1x128xf32> to vector<1x128xf32>
    %296 = vector.extract_strided_slice %244 {offsets = [0, 3, 1, 0], sizes = [1, 1, 1, 128], strides = [1, 1, 1, 1]} : vector<1x8x8x128xf32> to vector<1x1x1x128xf32>
    %297 = vector.shape_cast %296 : vector<1x1x1x128xf32> to vector<1x128xf32>
    %298 = arith.maximumf %295, %297 : vector<1x128xf32>
    %299 = arith.maximumf %293, %298 : vector<1x128xf32>
    %300 = vector.extract_strided_slice %244 {offsets = [0, 2, 2, 0], sizes = [1, 1, 1, 128], strides = [1, 1, 1, 1]} : vector<1x8x8x128xf32> to vector<1x1x1x128xf32>
    %301 = vector.shape_cast %300 : vector<1x1x1x128xf32> to vector<1x128xf32>
    %302 = vector.extract_strided_slice %244 {offsets = [0, 2, 3, 0], sizes = [1, 1, 1, 128], strides = [1, 1, 1, 1]} : vector<1x8x8x128xf32> to vector<1x1x1x128xf32>
    %303 = vector.shape_cast %302 : vector<1x1x1x128xf32> to vector<1x128xf32>
    %304 = arith.maximumf %301, %303 : vector<1x128xf32>
    %305 = vector.extract_strided_slice %244 {offsets = [0, 3, 2, 0], sizes = [1, 1, 1, 128], strides = [1, 1, 1, 1]} : vector<1x8x8x128xf32> to vector<1x1x1x128xf32>
    %306 = vector.shape_cast %305 : vector<1x1x1x128xf32> to vector<1x128xf32>
    %307 = vector.extract_strided_slice %244 {offsets = [0, 3, 3, 0], sizes = [1, 1, 1, 128], strides = [1, 1, 1, 1]} : vector<1x8x8x128xf32> to vector<1x1x1x128xf32>
    %308 = vector.shape_cast %307 : vector<1x1x1x128xf32> to vector<1x128xf32>
    %309 = arith.maximumf %306, %308 : vector<1x128xf32>
    %310 = arith.maximumf %304, %309 : vector<1x128xf32>
    %311 = vector.extract_strided_slice %244 {offsets = [0, 2, 4, 0], sizes = [1, 1, 1, 128], strides = [1, 1, 1, 1]} : vector<1x8x8x128xf32> to vector<1x1x1x128xf32>
    %312 = vector.shape_cast %311 : vector<1x1x1x128xf32> to vector<1x128xf32>
    %313 = vector.extract_strided_slice %244 {offsets = [0, 2, 5, 0], sizes = [1, 1, 1, 128], strides = [1, 1, 1, 1]} : vector<1x8x8x128xf32> to vector<1x1x1x128xf32>
    %314 = vector.shape_cast %313 : vector<1x1x1x128xf32> to vector<1x128xf32>
    %315 = arith.maximumf %312, %314 : vector<1x128xf32>
    %316 = vector.extract_strided_slice %244 {offsets = [0, 3, 4, 0], sizes = [1, 1, 1, 128], strides = [1, 1, 1, 1]} : vector<1x8x8x128xf32> to vector<1x1x1x128xf32>
    %317 = vector.shape_cast %316 : vector<1x1x1x128xf32> to vector<1x128xf32>
    %318 = vector.extract_strided_slice %244 {offsets = [0, 3, 5, 0], sizes = [1, 1, 1, 128], strides = [1, 1, 1, 1]} : vector<1x8x8x128xf32> to vector<1x1x1x128xf32>
    %319 = vector.shape_cast %318 : vector<1x1x1x128xf32> to vector<1x128xf32>
    %320 = arith.maximumf %317, %319 : vector<1x128xf32>
    %321 = arith.maximumf %315, %320 : vector<1x128xf32>
    %322 = vector.extract_strided_slice %244 {offsets = [0, 2, 6, 0], sizes = [1, 1, 1, 128], strides = [1, 1, 1, 1]} : vector<1x8x8x128xf32> to vector<1x1x1x128xf32>
    %323 = vector.shape_cast %322 : vector<1x1x1x128xf32> to vector<1x128xf32>
    %324 = vector.extract_strided_slice %244 {offsets = [0, 2, 7, 0], sizes = [1, 1, 1, 128], strides = [1, 1, 1, 1]} : vector<1x8x8x128xf32> to vector<1x1x1x128xf32>
    %325 = vector.shape_cast %324 : vector<1x1x1x128xf32> to vector<1x128xf32>
    %326 = arith.maximumf %323, %325 : vector<1x128xf32>
    %327 = vector.extract_strided_slice %244 {offsets = [0, 3, 6, 0], sizes = [1, 1, 1, 128], strides = [1, 1, 1, 1]} : vector<1x8x8x128xf32> to vector<1x1x1x128xf32>
    %328 = vector.shape_cast %327 : vector<1x1x1x128xf32> to vector<1x128xf32>
    %329 = vector.extract_strided_slice %244 {offsets = [0, 3, 7, 0], sizes = [1, 1, 1, 128], strides = [1, 1, 1, 1]} : vector<1x8x8x128xf32> to vector<1x1x1x128xf32>
    %330 = vector.shape_cast %329 : vector<1x1x1x128xf32> to vector<1x128xf32>
    %331 = arith.maximumf %328, %330 : vector<1x128xf32>
    %332 = arith.maximumf %326, %331 : vector<1x128xf32>
    %333 = vector.extract_strided_slice %244 {offsets = [0, 4, 0, 0], sizes = [1, 1, 1, 128], strides = [1, 1, 1, 1]} : vector<1x8x8x128xf32> to vector<1x1x1x128xf32>
    %334 = vector.shape_cast %333 : vector<1x1x1x128xf32> to vector<1x128xf32>
    %335 = vector.extract_strided_slice %244 {offsets = [0, 4, 1, 0], sizes = [1, 1, 1, 128], strides = [1, 1, 1, 1]} : vector<1x8x8x128xf32> to vector<1x1x1x128xf32>
    %336 = vector.shape_cast %335 : vector<1x1x1x128xf32> to vector<1x128xf32>
    %337 = arith.maximumf %334, %336 : vector<1x128xf32>
    %338 = vector.extract_strided_slice %244 {offsets = [0, 5, 0, 0], sizes = [1, 1, 1, 128], strides = [1, 1, 1, 1]} : vector<1x8x8x128xf32> to vector<1x1x1x128xf32>
    %339 = vector.shape_cast %338 : vector<1x1x1x128xf32> to vector<1x128xf32>
    %340 = vector.extract_strided_slice %244 {offsets = [0, 5, 1, 0], sizes = [1, 1, 1, 128], strides = [1, 1, 1, 1]} : vector<1x8x8x128xf32> to vector<1x1x1x128xf32>
    %341 = vector.shape_cast %340 : vector<1x1x1x128xf32> to vector<1x128xf32>
    %342 = arith.maximumf %339, %341 : vector<1x128xf32>
    %343 = arith.maximumf %337, %342 : vector<1x128xf32>
    %344 = vector.extract_strided_slice %244 {offsets = [0, 4, 2, 0], sizes = [1, 1, 1, 128], strides = [1, 1, 1, 1]} : vector<1x8x8x128xf32> to vector<1x1x1x128xf32>
    %345 = vector.shape_cast %344 : vector<1x1x1x128xf32> to vector<1x128xf32>
    %346 = vector.extract_strided_slice %244 {offsets = [0, 4, 3, 0], sizes = [1, 1, 1, 128], strides = [1, 1, 1, 1]} : vector<1x8x8x128xf32> to vector<1x1x1x128xf32>
    %347 = vector.shape_cast %346 : vector<1x1x1x128xf32> to vector<1x128xf32>
    %348 = arith.maximumf %345, %347 : vector<1x128xf32>
    %349 = vector.extract_strided_slice %244 {offsets = [0, 5, 2, 0], sizes = [1, 1, 1, 128], strides = [1, 1, 1, 1]} : vector<1x8x8x128xf32> to vector<1x1x1x128xf32>
    %350 = vector.shape_cast %349 : vector<1x1x1x128xf32> to vector<1x128xf32>
    %351 = vector.extract_strided_slice %244 {offsets = [0, 5, 3, 0], sizes = [1, 1, 1, 128], strides = [1, 1, 1, 1]} : vector<1x8x8x128xf32> to vector<1x1x1x128xf32>
    %352 = vector.shape_cast %351 : vector<1x1x1x128xf32> to vector<1x128xf32>
    %353 = arith.maximumf %350, %352 : vector<1x128xf32>
    %354 = arith.maximumf %348, %353 : vector<1x128xf32>
    %355 = vector.extract_strided_slice %244 {offsets = [0, 4, 4, 0], sizes = [1, 1, 1, 128], strides = [1, 1, 1, 1]} : vector<1x8x8x128xf32> to vector<1x1x1x128xf32>
    %356 = vector.shape_cast %355 : vector<1x1x1x128xf32> to vector<1x128xf32>
    %357 = vector.extract_strided_slice %244 {offsets = [0, 4, 5, 0], sizes = [1, 1, 1, 128], strides = [1, 1, 1, 1]} : vector<1x8x8x128xf32> to vector<1x1x1x128xf32>
    %358 = vector.shape_cast %357 : vector<1x1x1x128xf32> to vector<1x128xf32>
    %359 = arith.maximumf %356, %358 : vector<1x128xf32>
    %360 = vector.extract_strided_slice %244 {offsets = [0, 5, 4, 0], sizes = [1, 1, 1, 128], strides = [1, 1, 1, 1]} : vector<1x8x8x128xf32> to vector<1x1x1x128xf32>
    %361 = vector.shape_cast %360 : vector<1x1x1x128xf32> to vector<1x128xf32>
    %362 = vector.extract_strided_slice %244 {offsets = [0, 5, 5, 0], sizes = [1, 1, 1, 128], strides = [1, 1, 1, 1]} : vector<1x8x8x128xf32> to vector<1x1x1x128xf32>
    %363 = vector.shape_cast %362 : vector<1x1x1x128xf32> to vector<1x128xf32>
    %364 = arith.maximumf %361, %363 : vector<1x128xf32>
    %365 = arith.maximumf %359, %364 : vector<1x128xf32>
    %366 = vector.extract_strided_slice %244 {offsets = [0, 4, 6, 0], sizes = [1, 1, 1, 128], strides = [1, 1, 1, 1]} : vector<1x8x8x128xf32> to vector<1x1x1x128xf32>
    %367 = vector.shape_cast %366 : vector<1x1x1x128xf32> to vector<1x128xf32>
    %368 = vector.extract_strided_slice %244 {offsets = [0, 4, 7, 0], sizes = [1, 1, 1, 128], strides = [1, 1, 1, 1]} : vector<1x8x8x128xf32> to vector<1x1x1x128xf32>
    %369 = vector.shape_cast %368 : vector<1x1x1x128xf32> to vector<1x128xf32>
    %370 = arith.maximumf %367, %369 : vector<1x128xf32>
    %371 = vector.extract_strided_slice %244 {offsets = [0, 5, 6, 0], sizes = [1, 1, 1, 128], strides = [1, 1, 1, 1]} : vector<1x8x8x128xf32> to vector<1x1x1x128xf32>
    %372 = vector.shape_cast %371 : vector<1x1x1x128xf32> to vector<1x128xf32>
    %373 = vector.extract_strided_slice %244 {offsets = [0, 5, 7, 0], sizes = [1, 1, 1, 128], strides = [1, 1, 1, 1]} : vector<1x8x8x128xf32> to vector<1x1x1x128xf32>
    %374 = vector.shape_cast %373 : vector<1x1x1x128xf32> to vector<1x128xf32>
    %375 = arith.maximumf %372, %374 : vector<1x128xf32>
    %376 = arith.maximumf %370, %375 : vector<1x128xf32>
    %377 = vector.extract_strided_slice %244 {offsets = [0, 6, 0, 0], sizes = [1, 1, 1, 128], strides = [1, 1, 1, 1]} : vector<1x8x8x128xf32> to vector<1x1x1x128xf32>
    %378 = vector.shape_cast %377 : vector<1x1x1x128xf32> to vector<1x128xf32>
    %379 = vector.extract_strided_slice %244 {offsets = [0, 6, 1, 0], sizes = [1, 1, 1, 128], strides = [1, 1, 1, 1]} : vector<1x8x8x128xf32> to vector<1x1x1x128xf32>
    %380 = vector.shape_cast %379 : vector<1x1x1x128xf32> to vector<1x128xf32>
    %381 = arith.maximumf %378, %380 : vector<1x128xf32>
    %382 = vector.extract_strided_slice %244 {offsets = [0, 7, 0, 0], sizes = [1, 1, 1, 128], strides = [1, 1, 1, 1]} : vector<1x8x8x128xf32> to vector<1x1x1x128xf32>
    %383 = vector.shape_cast %382 : vector<1x1x1x128xf32> to vector<1x128xf32>
    %384 = vector.extract_strided_slice %244 {offsets = [0, 7, 1, 0], sizes = [1, 1, 1, 128], strides = [1, 1, 1, 1]} : vector<1x8x8x128xf32> to vector<1x1x1x128xf32>
    %385 = vector.shape_cast %384 : vector<1x1x1x128xf32> to vector<1x128xf32>
    %386 = arith.maximumf %383, %385 : vector<1x128xf32>
    %387 = arith.maximumf %381, %386 : vector<1x128xf32>
    %388 = vector.extract_strided_slice %244 {offsets = [0, 6, 2, 0], sizes = [1, 1, 1, 128], strides = [1, 1, 1, 1]} : vector<1x8x8x128xf32> to vector<1x1x1x128xf32>
    %389 = vector.shape_cast %388 : vector<1x1x1x128xf32> to vector<1x128xf32>
    %390 = vector.extract_strided_slice %244 {offsets = [0, 6, 3, 0], sizes = [1, 1, 1, 128], strides = [1, 1, 1, 1]} : vector<1x8x8x128xf32> to vector<1x1x1x128xf32>
    %391 = vector.shape_cast %390 : vector<1x1x1x128xf32> to vector<1x128xf32>
    %392 = arith.maximumf %389, %391 : vector<1x128xf32>
    %393 = vector.extract_strided_slice %244 {offsets = [0, 7, 2, 0], sizes = [1, 1, 1, 128], strides = [1, 1, 1, 1]} : vector<1x8x8x128xf32> to vector<1x1x1x128xf32>
    %394 = vector.shape_cast %393 : vector<1x1x1x128xf32> to vector<1x128xf32>
    %395 = vector.extract_strided_slice %244 {offsets = [0, 7, 3, 0], sizes = [1, 1, 1, 128], strides = [1, 1, 1, 1]} : vector<1x8x8x128xf32> to vector<1x1x1x128xf32>
    %396 = vector.shape_cast %395 : vector<1x1x1x128xf32> to vector<1x128xf32>
    %397 = arith.maximumf %394, %396 : vector<1x128xf32>
    %398 = arith.maximumf %392, %397 : vector<1x128xf32>
    %399 = vector.extract_strided_slice %244 {offsets = [0, 6, 4, 0], sizes = [1, 1, 1, 128], strides = [1, 1, 1, 1]} : vector<1x8x8x128xf32> to vector<1x1x1x128xf32>
    %400 = vector.shape_cast %399 : vector<1x1x1x128xf32> to vector<1x128xf32>
    %401 = vector.extract_strided_slice %244 {offsets = [0, 6, 5, 0], sizes = [1, 1, 1, 128], strides = [1, 1, 1, 1]} : vector<1x8x8x128xf32> to vector<1x1x1x128xf32>
    %402 = vector.shape_cast %401 : vector<1x1x1x128xf32> to vector<1x128xf32>
    %403 = arith.maximumf %400, %402 : vector<1x128xf32>
    %404 = vector.extract_strided_slice %244 {offsets = [0, 7, 4, 0], sizes = [1, 1, 1, 128], strides = [1, 1, 1, 1]} : vector<1x8x8x128xf32> to vector<1x1x1x128xf32>
    %405 = vector.shape_cast %404 : vector<1x1x1x128xf32> to vector<1x128xf32>
    %406 = vector.extract_strided_slice %244 {offsets = [0, 7, 5, 0], sizes = [1, 1, 1, 128], strides = [1, 1, 1, 1]} : vector<1x8x8x128xf32> to vector<1x1x1x128xf32>
    %407 = vector.shape_cast %406 : vector<1x1x1x128xf32> to vector<1x128xf32>
    %408 = arith.maximumf %405, %407 : vector<1x128xf32>
    %409 = arith.maximumf %403, %408 : vector<1x128xf32>
    %410 = vector.extract_strided_slice %244 {offsets = [0, 6, 6, 0], sizes = [1, 1, 1, 128], strides = [1, 1, 1, 1]} : vector<1x8x8x128xf32> to vector<1x1x1x128xf32>
    %411 = vector.shape_cast %410 : vector<1x1x1x128xf32> to vector<1x128xf32>
    %412 = vector.extract_strided_slice %244 {offsets = [0, 6, 7, 0], sizes = [1, 1, 1, 128], strides = [1, 1, 1, 1]} : vector<1x8x8x128xf32> to vector<1x1x1x128xf32>
    %413 = vector.shape_cast %412 : vector<1x1x1x128xf32> to vector<1x128xf32>
    %414 = arith.maximumf %411, %413 : vector<1x128xf32>
    %415 = vector.extract_strided_slice %244 {offsets = [0, 7, 6, 0], sizes = [1, 1, 1, 128], strides = [1, 1, 1, 1]} : vector<1x8x8x128xf32> to vector<1x1x1x128xf32>
    %416 = vector.shape_cast %415 : vector<1x1x1x128xf32> to vector<1x128xf32>
    %417 = vector.extract_strided_slice %244 {offsets = [0, 7, 7, 0], sizes = [1, 1, 1, 128], strides = [1, 1, 1, 1]} : vector<1x8x8x128xf32> to vector<1x1x1x128xf32>
    %418 = vector.shape_cast %417 : vector<1x1x1x128xf32> to vector<1x128xf32>
    %419 = arith.maximumf %416, %418 : vector<1x128xf32>
    %420 = arith.maximumf %414, %419 : vector<1x128xf32>
    %421 = tpu.concatenate %255, %266, %277, %288, %299, %310, %321, %332, %343, %354, %365, %376, %387, %398, %409, %420 in 1 : vector<1x128xf32>, vector<1x128xf32>, vector<1x128xf32>, vector<1x128xf32>, vector<1x128xf32>, vector<1x128xf32>, vector<1x128xf32>, vector<1x128xf32>, vector<1x128xf32>, vector<1x128xf32>, vector<1x128xf32>, vector<1x128xf32>, vector<1x128xf32>, vector<1x128xf32>, vector<1x128xf32>, vector<1x128xf32> -> vector<1x2048xf32>
    %422 = arith.truncf %421 : vector<1x2048xf32> to vector<1x2048xbf16>
    %c0_205 = arith.constant 0 : index
    %c0_206 = arith.constant 0 : index
    %423 = vector.load %arg6[%c0_205, %c0_206] : memref<2048x128xbf16, #tpu.memory_space<vmem>>, vector<2048x128xbf16>
    %cst_207 = arith.constant dense<0.000000e+00> : vector<1x128xf32>
    %424 = tpu.matmul %422, %423, %cst_207 {dimension_numbers = #tpu.dot_dimension_numbers<[1], [0], [0], [1], [0, 0, 1, 1], [], []>} : vector<1x2048xbf16>, vector<2048x128xbf16>, vector<1x128xf32> -> vector<1x128xf32>
    %c0_208 = arith.constant 0 : index
    %c0_209 = arith.constant 0 : index
    %425 = vector.load %arg7[%c0_208, %c0_209] : memref<1x128xf32, #tpu.memory_space<vmem>>, vector<1x128xf32>
    %426 = arith.addf %424, %425 : vector<1x128xf32>
    %cst_210 = arith.constant 0.000000e+00 : f32
    %427 = vector.broadcast %cst_210 : f32 to vector<1x128xf32>
    %428 = arith.maximumf %426, %427 : vector<1x128xf32>
    %429 = arith.truncf %428 : vector<1x128xf32> to vector<1x128xbf16>
    %c0_211 = arith.constant 0 : index
    %c0_212 = arith.constant 0 : index
    %430 = vector.load %arg8[%c0_211, %c0_212] : memref<128x128xbf16, #tpu.memory_space<vmem>>, vector<128x128xbf16>
    %cst_213 = arith.constant dense<0.000000e+00> : vector<1x128xf32>
    %431 = tpu.matmul %429, %430, %cst_213 {dimension_numbers = #tpu.dot_dimension_numbers<[1], [0], [0], [1], [0, 0, 1, 1], [], []>} : vector<1x128xbf16>, vector<128x128xbf16>, vector<1x128xf32> -> vector<1x128xf32>
    %c0_214 = arith.constant 0 : index
    %c0_215 = arith.constant 0 : index
    %432 = vector.load %arg9[%c0_214, %c0_215] : memref<1x128xf32, #tpu.memory_space<vmem>>, vector<1x128xf32>
    %433 = arith.addf %431, %432 : vector<1x128xf32>
    %c0_216 = arith.constant 0 : index
    %c0_217 = arith.constant 0 : index
    %c0_218 = arith.constant 0 : index
    %434 = vector.load %arg10[%c0_216, %c0_217, %c0_218] : memref<1x1x128xf32, #tpu.memory_space<vmem>>, vector<1x1x128xf32>
    %435 = vector.shape_cast %434 : vector<1x1x128xf32> to vector<1x128xf32>
    %436 = vector.shape_cast %433 : vector<1x128xf32> to vector<1x1x128xf32>
    tpu.vector_store %arg10[%c0_216, %c0_217, %c0_218], %436 {strides = array<i32>} : memref<1x1x128xf32, #tpu.memory_space<vmem>>, vector<1x1x128xf32>,
    return
  }
  func.func @transform_0(%arg0: i32) -> (i32, i32, i32) {
    %c0_i32 = arith.constant 0 : i32
    %c0_i32_0 = arith.constant 0 : i32
    %c0_i32_1 = arith.constant 0 : i32
    return %arg0, %c0_i32, %c0_i32_0 : i32, i32, i32
  }
  func.func @transform_1(%arg0: i32) -> (i32, i32) {
    %c0_i32 = arith.constant 0 : i32
    %c0_i32_0 = arith.constant 0 : i32
    %c0_i32_1 = arith.constant 0 : i32
    return %c0_i32, %c0_i32_0 : i32, i32
  }
  func.func @transform_2(%arg0: i32) -> (i32, i32) {
    %c0_i32 = arith.constant 0 : i32
    %c0_i32_0 = arith.constant 0 : i32
    %c0_i32_1 = arith.constant 0 : i32
    return %c0_i32, %c0_i32_0 : i32, i32
  }
  func.func @transform_3(%arg0: i32) -> (i32, i32) {
    %c0_i32 = arith.constant 0 : i32
    %c0_i32_0 = arith.constant 0 : i32
    %c0_i32_1 = arith.constant 0 : i32
    return %c0_i32, %c0_i32_0 : i32, i32
  }
  func.func @transform_4(%arg0: i32) -> (i32, i32) {
    %c0_i32 = arith.constant 0 : i32
    %c0_i32_0 = arith.constant 0 : i32
    %c0_i32_1 = arith.constant 0 : i32
    return %c0_i32, %c0_i32_0 : i32, i32
  }
  func.func @transform_5(%arg0: i32) -> (i32, i32) {
    %c0_i32 = arith.constant 0 : i32
    %c0_i32_0 = arith.constant 0 : i32
    %c0_i32_1 = arith.constant 0 : i32
    return %c0_i32, %c0_i32_0 : i32, i32
  }
  func.func @transform_6(%arg0: i32) -> (i32, i32) {
    %c0_i32 = arith.constant 0 : i32
    %c0_i32_0 = arith.constant 0 : i32
    %c0_i32_1 = arith.constant 0 : i32
    return %c0_i32, %c0_i32_0 : i32, i32
  }
  func.func @transform_7(%arg0: i32) -> (i32, i32) {
    %c0_i32 = arith.constant 0 : i32
    %c0_i32_0 = arith.constant 0 : i32
    %c0_i32_1 = arith.constant 0 : i32
    return %c0_i32, %c0_i32_0 : i32, i32
  }
  func.func @transform_8(%arg0: i32) -> (i32, i32) {
    %c0_i32 = arith.constant 0 : i32
    %c0_i32_0 = arith.constant 0 : i32
    %c0_i32_1 = arith.constant 0 : i32
    return %c0_i32, %c0_i32_0 : i32, i32
  }
  func.func @transform_9(%arg0: i32) -> (i32, i32, i32) {
    %c0_i32 = arith.constant 0 : i32
    %c0_i32_0 = arith.constant 0 : i32
    %c0_i32_1 = arith.constant 0 : i32
    return %arg0, %c0_i32, %c0_i32_0 : i32, i32, i32
  }
}

</mosaic_0001>

<bundles_post_ra>
// kernel: convnet_forward.1
= control target key start
LH: loop header
LB: loop body
LE: loop exit
PB: predicated region body
PF: predicated region fallthrough
CT: control target
= control target key end

     0   :  { %s17627_s0 = inlined_call_operand.vmem [shape: f32[2,28,28], index: 0, kind: input, shape index: {}]   ;;  %s17628_s1 = inlined_call_operand.hbm [shape: bf16[140,3072], index: 1, kind: input, shape index: {}]   ;;  %s17629_s2 = inlined_call_operand.vmem [shape: f32[1,128], index: 2, kind: input, shape index: {}]   ;;  %s17630_s3 = inlined_call_operand.hbm [shape: bf16[3200,128], index: 3, kind: input, shape index: {}]   ;;  %s17631_s4 = inlined_call_operand.vmem [shape: f32[1,128], index: 4, kind: input, shape index: {}]   ;;  %s17632_s5 = inlined_call_operand.hbm [shape: bf16[2048,128], index: 5, kind: input, shape index: {}]   ;;  %s17633_s6 = inlined_call_operand.vmem [shape: f32[1,128], index: 6, kind: input, shape index: {}]   ;;  %s17634_s7 = inlined_call_operand.vmem [shape: bf16[128,128], index: 7, kind: input, shape index: {}]   ;;  %s17635_s8 = inlined_call_operand.vmem [shape: f32[1,128], index: 8, kind: input, shape index: {}]   ;;  %s17636_s9 = inlined_call_operand.hbm [shape: f32[2,1,128], index: 9, kind: output, shape index: {}]  }
   0x1   :  { %17809 = sst [smem:[#allocation181_spill]] %s17630_s3 }
   0x2   :  { %14 = vsyncpa [#allocation5], 0 }
   0x3   :  { %15 = vsyncpa [#allocation8], 0 }
   0x4   :  { %16 = vsyncpa [#allocation6], 0 }
   0x5   :  { %18 = vsyncpa [#allocation6 + $0x1], 0  ;;  %s14658_s30 = smov 0   ;;  %s14660_s10 = smov 0  }
   0x6   :  { %s14662_s11 = smov 0   ;;  %s14664_s12 = smov 0  }
   0x7 LB: > { %17810 = sst [smem:[#allocation14_spill]] %s14586_s11  ;;  %s14679_s13 = sadd.s32 4294967295, %s14590_s12   ;;  %s14590_s12 = sphi %s14664_s12, %s18239_s12   ;;  %s14586_s11 = sphi %s14662_s11, %s18241_s11   ;;  %s14582_s10 = sphi %s14660_s10, %s18243_s10   ;;  %s14578_s30 = sphi %s14658_s30, %s18242_s30  }
   0x8   : > { %s12337_s14 = sadd.s32 4294967294, %s14590_s12   ;;  %s14683_s15 = sadd.s32 1, %s14590_s12  }
   0x9   : > { %17811 = sst [smem:[#allocation15_spill]] %s14683_s15  ;;  %s225_s16 = sadd.s32 1, %s14586_s11 }
   0xa   : > { %s222_s17 = ssub.s32 %s14590_s12, %s14683_s15  ;;  %p235_p0 = scmp.ne.s32.totalorder %s14586_s11, %s14582_s10 }
   0xb   : > { %p223_p1 = scmp.eq.s32.totalorder %s222_s17, 0  ;;  %p236_p2 = scmp.eq.s32.totalorder %s14679_s13, 1 }
   0xc   : > { %p241_p3 = scmp.ne.s32.totalorder %s14582_s10, %s14578_s30  ;;  %p242_p4 = scmp.eq.s32.totalorder %s12337_s14, 1 }
   0xd   : > { %s14694_s18 = scalar_select %p223_p1, %s14586_s11, %s225_s16  }
   0xe   : > { %p14696_p5 = por %p236_p2, %p235_p0  ;;  %p14700_p6 = por %p242_p4, %p241_p3 }
   0xf   : > { %17812 = sst [smem:[#allocation16_spill]] %s14694_s18  ;;  %p12338_p7 = scmp.ge.s32.totalorder %s14590_s12, 1 }
  0x10   : > { %s17813_s19 = scalar_select %p14696_p5, 1, 0 }
  0x11   : > { %s17814_s20 = scalar_select %p14700_p6, 1, 0 }
  0x12   : > { %p249_p8 = scmp.lt.s32.totalorder %s14590_s12, 3  ;;  %p17637_p9 = scmp.eq.s32.totalorder %s14679_s13, 0 }
  0x13   : > { %17815 = sst [smem:[#allocation17_spill]] %s17814_s20  ;;  %s14592_s22 = smov [#allocation7]  }
  0x14   : > { %p14707_p10 = pnand %p12338_p7, %p249_p8  ;;  %s277_s23 = sshll.u32 %s14592_s22, 4  ;;  %s278_s23 = int_to_ptr.vmem [resolvable:$true] %s277_s23 }
  0x15   : > { %s14593_s25 = smov [#allocation4]   ;;  %s17818_s3 = sld [smem:[#allocation181_spill]] }
  0x16   : > { %s17816_s21 = scalar_select %p14707_p10, 1, 0 }
  0x17   : > { %p13965_p11 = pneg %p14707_p10  ;;  %s261_s26 = sshll.u32 %s14593_s25, 4  ;;  %s14719_s26 = int_to_ptr.vmem [resolvable:$true] %s261_s26 }
  0x19   : > { %p14715_p12 = pnand %p17637_p9, %p13965_p11 }
  0x1b   : > { %s14436_s29 = scalar_lea.hbm %s17818_s3, 25600  ;;  %p14729_p0 = pneg %p14715_p12 }
  0x1c   : > { %p14437_p13 = scmp.ne.s32.totalorder %s17818_s3, %s14436_s29  ;;  %p14443_p3 = scmp.lt.u32.totalorder %s14436_s29, %s17818_s3 }
  0x1e   : > { %p14439_p1 = pnand %p14729_p0, %p14437_p13 }
  0x20   : > { %p14440_p2 = pneg %p14439_p1 }
  0x22   : > { %p14445_p4 = pnand %p14443_p3, %p14440_p2 }
  0x24   : > { %14448 = shalt.err (!%p14445_p4)
}
  0x25   : > { %s14449_s27 = scalar_lea.vmem %s278_s23, 25600  ;;  %p14457_p9 = scmp.lt.s32.totalorder %s278_s23, %s278_s23 }
  0x26   : > { %p14450_p7 = scmp.ne.s32.totalorder %s278_s23, %s14449_s27  ;;  %p14458_p6 = scmp.lt.s32.totalorder %s14449_s27, %s14449_s27 }
  0x28   : > { %p14452_p8 = pnand %p14450_p7, %p14729_p0  ;;  %p14459_p5 = por %p14458_p6, %p14457_p9 }
  0x2a   : > { %p14453_p11 = pneg %p14452_p8 }
  0x2c   : > { %p14460_p10 = pnand %p14459_p5, %p14453_p11 }
  0x2e   : > { %14463 = shalt.err (!%p14460_p10)
}
  0x2f   : > { %s17644_s28 = smov 64   ;;  %s17645_s14 = smov 4  }
  0x30   : > { %13971 = dma.hbm_to_vmem [thread:$0]  (!%p14715_p12), %s17818_s3, 25600, %s278_s23, [#allocation8], %s17644_s28, %s17644_s28, %s17645_s14  }
  0x31   : > { %s14464_s18 = scalar_lea.hbm %s17628_s1, 27648 }
  0x32   : > { %p14465_p5 = scmp.ne.s32.totalorder %s17628_s1, %s14464_s18  ;;  %p14471_p10 = scmp.lt.u32.totalorder %s14464_s18, %s17628_s1 }
  0x34   : > { %p14467_p6 = pnand %p14465_p5, %p14729_p0 }
  0x36   : > { %p14468_p9 = pneg %p14467_p6 }
  0x38   : > { %p14473_p13 = pnand %p14471_p10, %p14468_p9 }
  0x3a   : > { %14476 = shalt.err (!%p14473_p13)
}
  0x3b   : > { %s14477_s23 = scalar_lea.vmem %s14719_s26, 27648  ;;  %p14485_p4 = scmp.lt.s32.totalorder %s14719_s26, %s14719_s26 }
  0x3c   : > { %p14478_p1 = scmp.ne.s32.totalorder %s14719_s26, %s14477_s23  ;;  %p14486_p7 = scmp.lt.s32.totalorder %s14477_s23, %s14477_s23 }
  0x3e   : > { %p14480_p2 = pnand %p14478_p1, %p14729_p0  ;;  %p14487_p8 = por %p14486_p7, %p14485_p4 }
  0x40   : > { %p14481_p3 = pneg %p14480_p2 }
  0x42   : > { %p14488_p11 = pnand %p14487_p8, %p14481_p3 }
  0x44   : > { %14491 = shalt.err (!%p14488_p11)
}
  0x45   : > { %s14596_s11 = smov 1536   ;;  %s14597_s15 = smov 96  }
  0x46   : > { %13968 = dma.hbm_to_vmem [thread:$0]  (!%p14715_p12), %s17628_s1, 27648, %s14719_s26, [#allocation5], %s14596_s11, %s14596_s11, %s14597_s15  }
  0x47   : > { %s14598_s29 = smov [#allocation9]   ;;  %s14492_s27 = scalar_lea.hbm %s17632_s5, 16384 }
  0x48   : > { %s293_s16 = sshll.u32 %s14598_s29, 4  ;;  %p14493_p5 = scmp.ne.s32.totalorder %s17632_s5, %s14492_s27  ;;  %s294_s16 = int_to_ptr.vmem [resolvable:$true] %s293_s16 }
  0x49   : > { %p14499_p10 = scmp.lt.u32.totalorder %s14492_s27, %s17632_s5 }
  0x4a   : > { %p14495_p6 = pnand %p14493_p5, %p14729_p0 }
  0x4c   : > { %p14496_p9 = pneg %p14495_p6 }
  0x4e   : > { %p14501_p13 = pnand %p14499_p10, %p14496_p9 }
  0x50   : > { %14504 = shalt.err (!%p14501_p13)
}
  0x51   : > { %s14505_s26 = scalar_lea.vmem %s294_s16, 16384  ;;  %p14513_p4 = scmp.lt.s32.totalorder %s294_s16, %s294_s16 }
  0x52   : > { %p14506_p1 = scmp.ne.s32.totalorder %s294_s16, %s14505_s26  ;;  %p14514_p7 = scmp.lt.s32.totalorder %s14505_s26, %s14505_s26 }
  0x54   : > { %p14508_p2 = pnand %p14506_p1, %p14729_p0  ;;  %p14515_p8 = por %p14514_p7, %p14513_p4 }
  0x56   : > { %p14509_p3 = pneg %p14508_p2 }
  0x58   : > { %p14516_p11 = pnand %p14515_p8, %p14509_p3 }
  0x5a   : > { %14519 = shalt.err (!%p14516_p11)
}
  0x5b   : > { %s17820_s28 = smov 4   ;;  %s17821_s11 = smov 64  }
  0x5c   : > { %13974 = dma.hbm_to_vmem [thread:$0]  (!%p14715_p12), %s17632_s5, 16384, %s294_s16, [#allocation8], %s17821_s11, %s17821_s11, %s17820_s28  }
  0x5d   : > { %p17822_p5 = scmp.ne.s32.totalorder %s17816_s21, 0 }
  0x5f   : > { %326 = sbr.rel (%p17822_p5) target bundleno = 1956 (0x7a4), region = 56 }
  0x66   : > { %p17823_p0 = scmp.eq.s32.totalorder %s14679_s13, 0 }
  0x68   : > { %14565 = dma.done.wait (%p17823_p0), [#allocation5], 27648   ;;  %p17824_p6 = pmov %p17823_p0 }
  0x69   : > { %p17825_p9 = pmov %p17823_p0 }
  0x6a   : > { %14567 = vsyncadd (%p17824_p6), [#allocation5], 4294939648 }
  0x6b   : > { %14569 = dma.done.wait (%p17825_p9), [#allocation8], 41984   ;;  %p17826_p10 = pmov %p17823_p0 }
  0x6c   : > { %p369_p13 = scmp.lt.s32.totalorder %s14679_s13, 1  ;;  %v476_v2 = vld [vmem:[#allocation4] sm:$0xff]  ;;  %v477_v11 = vld [vmem:[#allocation4 + $0x8] sm:$0xff]  ;;  %s14599_s20 = smov 28   ;;  %v478_v51 = vld [vmem:[#allocation4 + $0x10] sm:$0xff]  ;;  %vm1754_vm0 = vcmask 1045504  }
  0x6d   : > { %14571 = vsyncadd (%p17826_p10), [#allocation8], 4294925312  ;;  %v488_v6 = vld [vmem:[#allocation4 + $0x60] sm:$0xff]  ;;  %v489_v16 = vld [vmem:[#allocation4 + $0x68] sm:$0xff]  ;;  %s14600_s29 = smov 84   ;;  %s14601_s16 = smov 56  }
  0x6e   : > { %s370_s24 = scalar_select %p369_p13, %s14679_s13, 1  ;;  %v14815_v10 = vcombine.high %v476_v2, %v488_v6  ;;  %v14817_v12 = vcombine.low %v476_v2, %v488_v6  ;;  %v14828_v18 = vcombine.high %v477_v11, %v489_v16  ;;  %v14830_v19 = vcombine.low %v477_v11, %v489_v16  ;;  %v500_v20 = vld [vmem:[#allocation4 + $0xc0] sm:$0xff]  ;;  %v501_v22 = vld [vmem:[#allocation4 + $0xc8] sm:$0xff]  ;;  %v490_v52 = vld [vmem:[#allocation4 + $0x70] sm:$0xff] }
  0x6f   : > { %v512_v21 = vld [vmem:[#allocation4 + $0x120] sm:$0xff]  ;;  %v513_v24 = vld [vmem:[#allocation4 + $0x128] sm:$0xff]  ;;  %s14602_s22 = smov 112   ;;  %v14876_v54 = vcombine.low %v478_v51, %v490_v52  ;;  %v479_v55 = vld [vmem:[#allocation4 + $0x18] sm:$0xff]  ;;  %vm430_vm1 = vcmask 228352   ;;  %vm433_vm2 = vcmask 457728  }
  0x70   : > { %s13229_s17 = sshll.u32 %s370_s24, 5  ;;  %1827 = vmatprep.subr.bf16.mxu0 %v14815_v10  ;;  %v14833_v23 = vcombine.high %v500_v20, %v512_v21  ;;  %v14835_v25 = vcombine.low %v500_v20, %v512_v21  ;;  %v524_v26 = vld [vmem:[#allocation4 + $0x180] sm:$0xff]  ;;  %1870 = vmatprep.subr.bf16.mxu1 %v14828_v18  ;;  %v14838_v28 = vcombine.high %v501_v22, %v513_v24  ;;  %v525_v30 = vld [vmem:[#allocation4 + $0x188] sm:$0xff]  ;;  %v491_v56 = vld [vmem:[#allocation4 + $0x78] sm:$0xff]  ;;  %vm436_vm3 = vcmask 687104   ;;  %s367_s14 = sand.u32 1, %s14582_s10  }
  0x71   : > { %s14807_s18 = scalar_lea.vmem %s17627_s0, %s13229_s17  ;;  %1828 = vmatpush1.bf16.msra.mxu0 %v14817_v12  ;;  %v536_v27 = vld [vmem:[#allocation4 + $0x1e0] sm:$0xff]  ;;  %v537_v31 = vld [vmem:[#allocation4 + $0x1e8] sm:$0xff]  ;;  %1871 = vmatpush1.bf16.msra.mxu1 %v14830_v19  ;;  %v14844_v32 = vcombine.low %v501_v22, %v513_v24  ;;  %17827 = vst [vmem:[#allocation18_spill] sm:$0xff] %v14876_v54  ;;  %v14881_v60 = vcombine.low %v479_v55, %v491_v56  ;;  %vm439_vm4 = vcmask 916480   ;;  %vm1750_vm5 = vcmask 97280   ;;  %s13226_s15 = sshll.u32 %s14679_s13, 4 }
  0x72   : > { %v12350_v0 = vld [vmem:[%s14807_s18 + $0x1] ss:$2 sm:$0xff]  ;;  %v12351_v1 = vld [vmem:[%s14807_s18 + $0x11] ss:$2 sm:$0xf]  ;;  %v14840_v29 = vcombine.high %v524_v26, %v536_v27  ;;  %v548_v33 = vld [vmem:[#allocation4 + $0x240] sm:$0xff]  ;;  %1829 = vmatprep.subr.bf16.mxu0 %v14833_v23  ;;  %v14849_v35 = vcombine.high %v525_v30, %v537_v31  ;;  %1872 = vmatprep.subr.bf16.mxu1 %v14838_v28  ;;  %v14853_v36 = vcombine.low %v524_v26, %v536_v27 }
  0x73   : > { %v14033_v3 = vpack.i.bf16 %v12351_v1, %v12350_v0  ;;  %v12354_v4 = vld [vmem:[%s14807_s18 + $0x3] ss:$2 sm:$0xff]  ;;  %v12355_v5 = vld [vmem:[%s14807_s18 + $0x13] ss:$2 sm:$0xf]  ;;  %v14859_v40 = vcombine.low %v525_v30, %v537_v31  ;;  %17828 = vst [vmem:[#allocation19_spill] sm:$0xff] %v14881_v60 }
  0x74   : > { %v14043_v7 = vpack.i.bf16 %v12355_v5, %v12354_v4  ;;  %v12352_v8 = vld [vmem:[%s14807_s18 + $0x2] ss:$2 sm:$0xff]  ;;  %v12353_v9 = vld [vmem:[%s14807_s18 + $0x12] ss:$2 sm:$0xf]  ;;  %vm3094_vm6 = vcmask 1040384  }
  0x75   : > { %14034 = vrot.lane.b32.xlu0 %v14033_v3, %s14599_s20  ;;  %v14820_v13 = vpack.i.bf16 %v12353_v9, %v12352_v8  ;;  %v12356_v14 = vld [vmem:[%s14807_s18 + $0x4] ss:$2 sm:$0xff]  ;;  %v12357_v15 = vld [vmem:[%s14807_s18 + $0x14] ss:$2 sm:$0xf]  ;;  %1830 = vmatpush1.bf16.msra.mxu0 %v14835_v25  ;;  %vm3521_vm11 = vcmask 1041409  }
  0x76   : > { %14044 = vrot.lane.b32.xlu1 %v14043_v7, %s14600_s29  ;;  %v14825_v17 = vpack.i.bf16 %v12357_v15, %v12356_v14  ;;  %v560_v34 = vld [vmem:[#allocation4 + $0x2a0] sm:$0xff]  ;;  %v549_v37 = vld [vmem:[#allocation4 + $0x248] sm:$0xff]  ;;  %1831 = vmatprep.subr.bf16.mxu0 %v14840_v29  ;;  %vm3095_vm7 = vsmask.f32 256  ;;  %vm3308_vm9 = vsmask.f32 7938 }
  0x77   : > { %v561_v38 = vld [vmem:[#allocation4 + $0x2a8] sm:$0xff]  ;;  %v14856_v39 = vcombine.high %v548_v33, %v560_v34  ;;  %1873 = vmatpush1.bf16.msra.mxu1 %v14844_v32  ;;  %v572_v41 = vld [vmem:[#allocation4 + $0x300] sm:$0xff]  ;;  %v14865_v44 = vcombine.low %v548_v33, %v560_v34  ;;  %vm16014_vm8 = vmand %vm3094_vm6, %vm3095_vm7  ;;  %vm3522_vm12 = vsmask.f32 1280  ;;  %vm3735_vm14 = vsmask.f32 7942 }
  0x78   : > { %v584_v42 = vld [vmem:[#allocation4 + $0x360] sm:$0xff]  ;;  %1874 = vmatprep.subr.bf16.mxu1 %v14849_v35  ;;  %v14862_v43 = vcombine.high %v549_v37, %v561_v38  ;;  %v573_v45 = vld [vmem:[#allocation4 + $0x308] sm:$0xff]  ;;  %v14871_v49 = vcombine.low %v549_v37, %v561_v38  ;;  %vm16073_vm10 = vmand %vm3094_vm6, %vm3308_vm9  ;;  %vm4376_vm6 = vsmask.f32 3328  ;;  %vm4589_vm9 = vsmask.f32 7950 }
  0x79   : > { %14039 = vrot.lane.b32.xlu0 %v14820_v13, %s14601_s16  ;;  %1832 = vmatpush1.bf16.msra.mxu0 %v14853_v36  ;;  %v585_v46 = vld [vmem:[#allocation4 + $0x368] sm:$0xff]  ;;  %v14868_v47 = vcombine.high %v572_v41, %v584_v42  ;;  %v596_v48 = vld [vmem:[#allocation4 + $0x3c0] sm:$0xff]  ;;  %v14879_v57 = vcombine.low %v572_v41, %v584_v42  ;;  %v14934_v42 = vcombine.high %v478_v51, %v490_v52  ;;  %vm16151_vm13 = vmand %vm3521_vm11, %vm3522_vm12  ;;  %vm5958_vm12 = vcmask 1041408   ;;  %s368_s21 = scalar_lea.vmem [#allocation10], %s367_s14  ;;  %p18236_p1 = scmp.ne.s32.totalorder %s17813_s19, 0 }
  0x7a   : > { %14049 = vrot.lane.b32.xlu1 %v14825_v17, %s14602_s22  ;;  %1833 = vmatprep.subr.bf16.mxu0 %v14856_v39  ;;  %v608_v50 = vld [vmem:[#allocation4 + $0x420] sm:$0xff]  ;;  %v14874_v53 = vcombine.high %v573_v45, %v585_v46  ;;  %v597_v58 = vld [vmem:[#allocation4 + $0x3c8] sm:$0xff]  ;;  %v14887_v62 = vcombine.low %v573_v45, %v585_v46  ;;  %v14942_v46 = vcombine.high %v479_v55, %v491_v56  ;;  %vm16211_vm15 = vmand %vm3521_vm11, %vm3735_vm14  ;;  %vm5760_vm14 = vsmask.f32 6416  ;;  %s14607_s25 = smov [#allocation10]  }
  0x7b   : > { %1875 = vmatpush1.bf16.msra.mxu1 %v14859_v40  ;;  %v609_v59 = vld [vmem:[#allocation4 + $0x428] sm:$0xff]  ;;  %v14884_v61 = vcombine.high %v596_v48, %v608_v50  ;;  %v620_v63 = vld [vmem:[#allocation4 + $0x480] sm:$0xff]  ;;  %v14893_v2 = vcombine.low %v596_v48, %v608_v50  ;;  %17839 = vst [vmem:[#allocation30_spill] sm:$0xff] %v14934_v42  ;;  %s14524_s27 = sshll.u32 %s14607_s25, 4  ;;  %s14525_s27 = int_to_ptr.vmem [resolvable:$false] %s14524_s27 }
  0x7c   : > { %1876 = vmatprep.subr.bf16.mxu1 %v14862_v43  ;;  %v632_v0 = vld [vmem:[#allocation4 + $0x4e0] sm:$0xff]  ;;  %v14890_v1 = vcombine.high %v597_v58, %v609_v59  ;;  %v621_v3 = vld [vmem:[#allocation4 + $0x488] sm:$0xff]  ;;  %v14899_v6 = vcombine.low %v597_v58, %v609_v59  ;;  %17841 = vst [vmem:[#allocation32_spill] sm:$0xff] %v14942_v46  ;;  %v12349_v59 = vld [vmem:[%s14807_s18 + $0x10] ss:$2 sm:$0xf] }
  0x7d   : > { %1834 = vmatpush1.bf16.msra.mxu0 %v14865_v44  ;;  %v633_v4 = vld [vmem:[#allocation4 + $0x4e8] sm:$0xff]  ;;  %v14896_v5 = vcombine.high %v620_v63, %v632_v0  ;;  %v656_v8 = vld [vmem:[#allocation4 + $0x5a0] sm:$0xff]  ;;  %v14905_v15 = vcombine.low %v620_v63, %v632_v0  ;;  %14054 = vrot.lane.b32.xlu0 %v14820_v13, %s14599_s20  ;;  %s14526_s23 = scalar_lea.vmem %s14525_s27, 32 }
  0x7e   : > { %14059 = vrot.lane.b32.xlu1 %v14043_v7, %s14601_s16  ;;  %1835 = vmatprep.subr.bf16.mxu0 %v14868_v47  ;;  %v644_v7 = vld [vmem:[#allocation4 + $0x540] sm:$0xff]  ;;  %v14902_v9 = vcombine.high %v621_v3, %v633_v4  ;;  %v645_v11 = vld [vmem:[#allocation4 + $0x548] sm:$0xff]  ;;  %v14911_v24 = vcombine.low %v621_v3, %v633_v4  ;;  %s17585_s16 = scalar_lea.hbm %s17636_s9, %s13226_s15 }
  0x7f   : > { %1877 = vmatpush1.bf16.msra.mxu1 %v14871_v49  ;;  %v657_v14 = vld [vmem:[#allocation4 + $0x5a8] sm:$0xff]  ;;  %17830 = vst [vmem:[#allocation21_spill] sm:$0xff] %v14905_v15  ;;  %v14908_v16 = vcombine.high %v644_v7, %v656_v8  ;;  %v668_v20 = vld [vmem:[#allocation4 + $0x600] sm:$0xff]  ;;  %v14917_v30 = vcombine.low %v644_v7, %v656_v8 }
  0x80   : > { %1878 = vmatprep.subr.bf16.mxu1 %v14874_v53  ;;  %17829 = vst [vmem:[#allocation20_spill] sm:$0xff] %v14902_v9  ;;  %v680_v21 = vld [vmem:[#allocation4 + $0x660] sm:$0x33]  ;;  %v669_v22 = vld [vmem:[#allocation4 + $0x608] sm:$0xff]  ;;  %17832 = vst [vmem:[#allocation23_spill] sm:$0xff] %v14911_v24  ;;  %v14914_v27 = vcombine.high %v645_v11, %v657_v14  ;;  %v14923_v34 = vcombine.low %v645_v11, %v657_v14 }
  0x81   : > { %1836 = vmatpush1.bf16.msra.mxu0 %v14879_v57  ;;  %17831 = vst [vmem:[#allocation22_spill] sm:$0xff] %v14908_v16  ;;  %v681_v26 = vld [vmem:[#allocation4 + $0x668] sm:$0x33]  ;;  %17834 = vst [vmem:[#allocation25_spill] sm:$0xff] %v14917_v30  ;;  %v14920_v31 = vcombine.high %v668_v20, %v680_v21  ;;  %v12552_v33 = vcombine.low %v668_v20, %v680_v21  ;;  %14064 = vrot.lane.b32.xlu0 %v14825_v17, %s14600_s29  ;;  %v502_v21 = vld [vmem:[#allocation4 + $0xd0] sm:$0xff] }
  0x82   : > { %1837 = vmatprep.subr.bf16.mxu0 %v14884_v61  ;;  %17833 = vst [vmem:[#allocation24_spill] sm:$0xff] %v14914_v27  ;;  %17836 = vst [vmem:[#allocation27_spill] sm:$0xff] %v14923_v34  ;;  %v12554_v37 = vcombine.low %v669_v22, %v681_v26  ;;  %v14926_v38 = vcombine.high %v669_v22, %v681_v26  ;;  %v12358_v48 = vld [vmem:[%s14807_s18 + $0x5] ss:$2 sm:$0xff]  ;;  %v375_v63 = vld [vmem:[%s14807_s18] ss:$2 sm:$0xff] }
  0x83   : > { %1879 = vmatpush1.bf16.msra.mxu1 %v14887_v62  ;;  %17835 = vst [vmem:[#allocation26_spill] sm:$0xff] %v14920_v31  ;;  %v14932_v41 = vsel %vm1754_vm0, %v12552_v33, 0  ;;  %v12359_v50 = vld [vmem:[%s14807_s18 + $0x15] ss:$2 sm:$0xf]  ;;  %v514_v22 = vld [vmem:[#allocation4 + $0x130] sm:$0xff] }
  0x84   : > { %1880 = vmatprep.subr.bf16.mxu1 %v14890_v1  ;;  %17837 = vst [vmem:[#allocation28_spill] sm:$0xff] %v14926_v38  ;;  %17838 = vst [vmem:[#allocation29_spill] sm:$0xff] %v14932_v41  ;;  %v14938_v45 = vsel %vm1754_vm0, %v12554_v37, 0  ;;  %v14068_v51 = vpack.i.bf16 %v12359_v50, %v12358_v48  ;;  %v503_v26 = vld [vmem:[#allocation4 + $0xd8] sm:$0xff] }
  0x85   : > { %1838 = vmatpush1.bf16.msra.mxu0 %v14893_v2  ;;  %17840 = vst [vmem:[#allocation31_spill] sm:$0xff] %v14938_v45  ;;  %v515_v48 = vld [vmem:[#allocation4 + $0x138] sm:$0xff] }
  0x86   : > { %1839 = vmatprep.subr.bf16.mxu0 %v14896_v5  ;;  %14069 = vrot.lane.b32.xlu1 %v14068_v51, %s14602_s22  ;;  %s12239_s22 = scalar_lea.sflag [#allocation6], %s367_s14 }
  0x87   : > { %1881 = vmatpush1.bf16.msra.mxu1 %v14899_v6 }
  0x88   : > { %1882 = vmatprep.subr.bf16.mxu1 %v14902_v9 }
  0x89   : > { %1840 = vmatpush1.bf16.msra.mxu0 %v14905_v15  ;;  %v636_v15 = vld [vmem:[#allocation4 + $0x500] sm:$0xff] }
  0x8a   : > { %1841 = vmatprep.subr.bf16.mxu0 %v14908_v16  ;;  %v601_v16 = vld [vmem:[#allocation4 + $0x3e8] sm:$0xff] }
  0x8b   : > { %1883 = vmatpush1.bf16.msra.mxu1 %v14911_v24 }
  0x8c   : > { %1884 = vmatprep.subr.bf16.mxu1 %v14914_v27  ;;  %v612_v27 = vld [vmem:[#allocation4 + $0x440] sm:$0xff] }
  0x8d   : > { %1842 = vmatpush1.bf16.msra.mxu0 %v14917_v30 }
  0x8e   : > { %12576 = vmatprep.subr.msk.bf16.mxu0 %vm1754_vm0, %v14920_v31  ;;  %v677_v31 = vld [vmem:[#allocation4 + $0x648] sm:$0xff] }
  0x8f   : > { %1885 = vmatpush1.bf16.msra.mxu1 %v14923_v34 }
  0x90   : > { %12578 = vmatprep.subr.msk.bf16.mxu1 %vm1754_vm0, %v14926_v38  ;;  %v688_v38 = vld [vmem:[#allocation4 + $0x6a0] sm:$0x33] }
  0x91   : > { %1844 = vmatpush1.bf16.msra.mxu0 %v14932_v41  ;;  %v676_v41 = vld [vmem:[#allocation4 + $0x640] sm:$0xff] }
  0x92   : > { %1913 = vmatprep.subr.bf16.mxu0 %v14934_v42  ;;  %v577_v42 = vld [vmem:[#allocation4 + $0x328] sm:$0xff] }
  0x93   : > { %1887 = vmatpush1.bf16.msra.mxu1 %v14938_v45  ;;  %v589_v45 = vld [vmem:[#allocation4 + $0x388] sm:$0xff] }
  0x94   : > { %1956 = vmatprep.subr.bf16.mxu1 %v14942_v46 }
  0xe7   : > { %v14035_v52 = vpop.permute.xlu0 %14034 }
  0xe8   : > { %v14045_v55 = vpop.permute.xlu1 %14044  ;;  %v14037_v56 = vunpack.i.h.bf16 %v14035_v52  ;;  %v14036_v58 = vunpack.i.l.bf16 %v14035_v52 }
  0xe9   : > { %v14047_v13 = vunpack.i.h.bf16 %v14045_v55  ;;  %v14046_v3 = vunpack.i.l.bf16 %v14045_v55 }
  0xea   : > { %v431_v17 = vsel %vm430_vm1, %v375_v63, %v14036_v58  ;;  %v432_v11 = vsel %vm430_vm1, %v12349_v59, %v14037_v56  ;;  %v526_v59 = vld [vmem:[#allocation4 + $0x190] sm:$0xff] }
  0xeb   : > { %v14040_v0 = vpop.permute.xlu0 %14039  ;;  %v538_v63 = vld [vmem:[#allocation4 + $0x1f0] sm:$0xff] }
  0xec   : > { %v14042_v4 = vunpack.i.h.bf16 %v14040_v0  ;;  %v14041_v7 = vunpack.i.l.bf16 %v14040_v0  ;;  %v14050_v8 = vpop.permute.xlu1 %14049  ;;  %v527_v0 = vld [vmem:[#allocation4 + $0x198] sm:$0xff] }
  0xed   : > { %v14052_v14 = vunpack.i.h.bf16 %v14050_v8  ;;  %v14051_v20 = vunpack.i.l.bf16 %v14050_v8  ;;  %v14983_v8 = vcombine.low %v503_v26, %v515_v48 }
  0xee   : > { %v434_v33 = vsel %vm433_vm2, %v431_v17, %v14041_v7  ;;  %v435_v37 = vsel %vm433_vm2, %v432_v11, %v14042_v4  ;;  %v539_v4 = vld [vmem:[#allocation4 + $0x1f8] sm:$0xff]  ;;  %v14981_v7 = vcombine.low %v502_v21, %v514_v22  ;;  %v14989_v17 = vcombine.high %v526_v59, %v538_v63 }
  0xef   : > { %v437_v50 = vsel %vm436_vm3, %v434_v33, %v14046_v3  ;;  %v438_v51 = vsel %vm436_vm3, %v435_v37, %v14047_v13  ;;  %v14963_v52 = vpack.c.bf16 %v14052_v14, %v14051_v20  ;;  %v14973_v3 = vcombine.high %v502_v21, %v514_v22  ;;  %17845 = vst [vmem:[#allocation36_spill] sm:$0xff] %v14983_v8  ;;  %v551_v33 = vld [vmem:[#allocation4 + $0x258] sm:$0xff] }
  0xf0   : > { %v440_v55 = vsel %vm439_vm4, %v437_v50, %v14051_v20  ;;  %v441_v56 = vsel %vm439_vm4, %v438_v51, %v14052_v14  ;;  %v14975_v13 = vcombine.high %v503_v26, %v515_v48  ;;  %17844 = vst [vmem:[#allocation35_spill] sm:$0xff] %v14981_v7  ;;  %17846 = vst [vmem:[#allocation37_spill] sm:$0xff] %v14989_v17  ;;  %v550_v14 = vld [vmem:[#allocation4 + $0x250] sm:$0xff]  ;;  %v563_v21 = vld [vmem:[#allocation4 + $0x2b8] sm:$0xff] }
  0xf1   : > { %v14967_v58 = vpack.c.bf16 %v441_v56, %v440_v55  ;;  %12577 = vmatprep.mubr.msk.bf16.mxu0 %vm1750_vm5, %v14963_v52  ;;  %12579 = vmatprep.mubr.msk.bf16.mxu1 %vm1750_vm5, %v14963_v52  ;;  %17842 = vst [vmem:[#allocation33_spill] sm:$0xff] %v14973_v3  ;;  %v14991_v11 = vcombine.high %v527_v0, %v539_v4  ;;  %v562_v20 = vld [vmem:[#allocation4 + $0x2b0] sm:$0xff]  ;;  %v575_v55 = vld [vmem:[#allocation4 + $0x318] sm:$0xff] }
  0xf2   : > { %17843 = vst [vmem:[#allocation34_spill] sm:$0xff] %v14975_v13  ;;  %v14997_v22 = vcombine.low %v526_v59, %v538_v63  ;;  %v14999_v26 = vcombine.low %v527_v0, %v539_v4  ;;  %v15003_v37 = vcombine.high %v550_v14, %v562_v20  ;;  %v15005_v48 = vcombine.high %v551_v33, %v563_v21  ;;  %v574_v50 = vld [vmem:[#allocation4 + $0x310] sm:$0xff]  ;;  %v587_v56 = vld [vmem:[#allocation4 + $0x378] sm:$0xff] }
  0xf3   : > { %1860 = vmatmul.mubr.bf16.vlgmr.msra.gmra.mrb[0].mxu0 %v14967_v58  ;;  %1903 = vmatmul.mubr.bf16.vlgmr.msra.gmra.mrb[0].mxu1 %v14967_v58  ;;  %17847 = vst [vmem:[#allocation38_spill] sm:$0xff] %v14991_v11  ;;  %v586_v51 = vld [vmem:[#allocation4 + $0x370] sm:$0xff]  ;;  %v15009_v59 = vcombine.low %v550_v14, %v562_v20  ;;  %v15011_v63 = vcombine.low %v551_v33, %v563_v21 }
  0xf4   : > { %1914 = vmatpush1.bf16.msra.mxu0 %v14876_v54  ;;  %1957 = vmatpush1.bf16.msra.mxu1 %v14881_v60  ;;  %17848 = vst [vmem:[#allocation39_spill] sm:$0xff] %v14997_v22  ;;  %17849 = vst [vmem:[#allocation40_spill] sm:$0xff] %v14999_v26  ;;  %v15015_v0 = vcombine.high %v574_v50, %v586_v51  ;;  %v15017_v4 = vcombine.high %v575_v55, %v587_v56  ;;  %v576_v54 = vld [vmem:[#allocation4 + $0x320] sm:$0xff] }
  0xf5   : > { %12581 = vmatprep.mubr.msk.bf16.mxu0 %vm1750_vm5, %v14963_v52  ;;  %12583 = vmatprep.mubr.msk.bf16.mxu1 %vm1750_vm5, %v14963_v52  ;;  %17850 = vst [vmem:[#allocation41_spill] sm:$0xff] %v15003_v37  ;;  %17851 = vst [vmem:[#allocation42_spill] sm:$0xff] %v15005_v48  ;;  %v15021_v14 = vcombine.low %v574_v50, %v586_v51  ;;  %v15023_v20 = vcombine.low %v575_v55, %v587_v56  ;;  %v646_v55 = vld [vmem:[#allocation4 + $0x550] sm:$0xff] }
  0xf6   : > { %1915 = vmatprep.subr.bf16.mxu0 %v14973_v3  ;;  %1958 = vmatprep.subr.bf16.mxu1 %v14975_v13  ;;  %17852 = vst [vmem:[#allocation43_spill] sm:$0xff] %v15009_v59  ;;  %17853 = vst [vmem:[#allocation44_spill] sm:$0xff] %v15011_v63  ;;  %v481_v13 = vld [vmem:[#allocation4 + $0x28] sm:$0xff]  ;;  %v15127_v3 = vld [vmem:[#allocation4 + $0x698] sm:$0x33] }
  0xf7   : > { %17854 = vst [vmem:[#allocation45_spill] sm:$0xff] %v15015_v0  ;;  %17855 = vst [vmem:[#allocation46_spill] sm:$0xff] %v15017_v4 }
  0xf8   : > { %1916 = vmatpush1.bf16.msra.mxu0 %v14981_v7  ;;  %1959 = vmatpush1.bf16.msra.mxu1 %v14983_v8  ;;  %v599_v8 = vld [vmem:[#allocation4 + $0x3d8] sm:$0xff]  ;;  %17856 = vst [vmem:[#allocation47_spill] sm:$0xff] %v15021_v14  ;;  %17857 = vst [vmem:[#allocation48_spill] sm:$0xff] %v15023_v20 }
  0xf9   : > { %1917 = vmatprep.subr.bf16.mxu0 %v14989_v17  ;;  %1960 = vmatprep.subr.bf16.mxu1 %v14991_v11  ;;  %v598_v11 = vld [vmem:[#allocation4 + $0x3d0] sm:$0xff]  ;;  %v611_v7 = vld [vmem:[#allocation4 + $0x438] sm:$0xff] }
  0xfa   : > { %v610_v17 = vld [vmem:[#allocation4 + $0x430] sm:$0xff]  ;;  %v15029_v21 = vcombine.high %v599_v8, %v611_v7  ;;  %v15035_v51 = vcombine.low %v599_v8, %v611_v7 }
  0xfb   : > { %v15027_v33 = vcombine.high %v598_v11, %v610_v17  ;;  %v15033_v50 = vcombine.low %v598_v11, %v610_v17 }
  0xfc   : > { %1918 = vmatpush1.bf16.msra.mxu0 %v14997_v22  ;;  %1961 = vmatpush1.bf16.msra.mxu1 %v14999_v26  ;;  %17859 = vst [vmem:[#allocation50_spill] sm:$0xff] %v15029_v21  ;;  %v623_v26 = vld [vmem:[#allocation4 + $0x498] sm:$0xff]  ;;  %17861 = vst [vmem:[#allocation52_spill] sm:$0xff] %v15035_v51 }
  0xfd   : > { %1919 = vmatprep.subr.bf16.mxu0 %v15003_v37  ;;  %1962 = vmatprep.subr.bf16.mxu1 %v15005_v48  ;;  %17858 = vst [vmem:[#allocation49_spill] sm:$0xff] %v15027_v33  ;;  %v622_v48 = vld [vmem:[#allocation4 + $0x490] sm:$0xff]  ;;  %v635_v22 = vld [vmem:[#allocation4 + $0x4f8] sm:$0xff]  ;;  %17860 = vst [vmem:[#allocation51_spill] sm:$0xff] %v15033_v50 }
  0xfe   : > { %v634_v37 = vld [vmem:[#allocation4 + $0x4f0] sm:$0xff]  ;;  %v15047_v7 = vcombine.low %v623_v26, %v635_v22 }
  0xff   : > { %v15039_v56 = vcombine.high %v622_v48, %v634_v37  ;;  %v15045_v17 = vcombine.low %v622_v48, %v634_v37 }
 0x100   : > { %1920 = vmatpush1.bf16.msra.mxu0 %v15009_v59  ;;  %1963 = vmatpush1.bf16.msra.mxu1 %v15011_v63  ;;  %v647_v63 = vld [vmem:[#allocation4 + $0x558] sm:$0xff]  ;;  %17865 = vst [vmem:[#allocation56_spill] sm:$0xff] %v15047_v7 }
 0x101   : > { %1921 = vmatprep.subr.bf16.mxu0 %v15015_v0  ;;  %1964 = vmatprep.subr.bf16.mxu1 %v15017_v4  ;;  %17862 = vst [vmem:[#allocation53_spill] sm:$0xff] %v15039_v56  ;;  %v15041_v4 = vcombine.high %v623_v26, %v635_v22  ;;  %v658_v0 = vld [vmem:[#allocation4 + $0x5b0] sm:$0xff]  ;;  %v659_v59 = vld [vmem:[#allocation4 + $0x5b8] sm:$0xff]  ;;  %17864 = vst [vmem:[#allocation55_spill] sm:$0xff] %v15045_v17 }
 0x102   : > { %v15051_v8 = vcombine.high %v646_v55, %v658_v0  ;;  %v15053_v11 = vcombine.high %v647_v63, %v659_v59  ;;  %v15057_v37 = vcombine.low %v646_v55, %v658_v0  ;;  %v15059_v22 = vcombine.low %v647_v63, %v659_v59  ;;  %v517_v55 = vld [vmem:[#allocation4 + $0x148] sm:$0xff] }
 0x103   : > { %17863 = vst [vmem:[#allocation54_spill] sm:$0xff] %v15041_v4 }
 0x104   : > { %1922 = vmatpush1.bf16.msra.mxu0 %v15021_v14  ;;  %1965 = vmatpush1.bf16.msra.mxu1 %v15023_v20  ;;  %17866 = vst [vmem:[#allocation57_spill] sm:$0xff] %v15051_v8  ;;  %17867 = vst [vmem:[#allocation58_spill] sm:$0xff] %v15053_v11  ;;  %v671_v20 = vld [vmem:[#allocation4 + $0x618] sm:$0xff] }
 0x105   : > { %1923 = vmatprep.subr.bf16.mxu0 %v15027_v33  ;;  %1966 = vmatprep.subr.bf16.mxu1 %v15029_v21  ;;  %v670_v21 = vld [vmem:[#allocation4 + $0x610] sm:$0xff]  ;;  %v683_v14 = vld [vmem:[#allocation4 + $0x678] sm:$0x33]  ;;  %17868 = vst [vmem:[#allocation59_spill] sm:$0xff] %v15057_v37  ;;  %17869 = vst [vmem:[#allocation60_spill] sm:$0xff] %v15059_v22 }
 0x106   : > { %v682_v33 = vld [vmem:[#allocation4 + $0x670] sm:$0x33]  ;;  %v15065_v48 = vcombine.high %v671_v20, %v683_v14 }
 0x107   : > { %v15061_v26 = vcombine.high %v670_v21, %v682_v33 }
 0x108   : > { %1924 = vmatpush1.bf16.msra.mxu0 %v15033_v50  ;;  %1967 = vmatpush1.bf16.msra.mxu1 %v15035_v51  ;;  %17871 = vst [vmem:[#allocation62_spill] sm:$0xff] %v15065_v48  ;;  %v480_v51 = vld [vmem:[#allocation4 + $0x20] sm:$0xff] }
 0x109   : > { %1925 = vmatprep.subr.bf16.mxu0 %v15039_v56  ;;  %1968 = vmatprep.subr.bf16.mxu1 %v15041_v4  ;;  %17870 = vst [vmem:[#allocation61_spill] sm:$0xff] %v15061_v26  ;;  %v12556_v4 = vcombine.low %v670_v21, %v682_v33  ;;  %v12558_v56 = vcombine.low %v671_v20, %v683_v14  ;;  %v492_v50 = vld [vmem:[#allocation4 + $0x80] sm:$0xff]  ;;  %v505_v21 = vld [vmem:[#allocation4 + $0xe8] sm:$0xff] }
 0x10a   : > { %v15079_v0 = vcombine.high %v480_v51, %v492_v50  ;;  %v504_v20 = vld [vmem:[#allocation4 + $0xe0] sm:$0xff] }
 0x10b   : > { %v15074_v59 = vsel %vm1754_vm0, %v12556_v4, 0  ;;  %v15077_v63 = vsel %vm1754_vm0, %v12558_v56, 0  ;;  %v516_v33 = vld [vmem:[#allocation4 + $0x140] sm:$0xff] }
 0x10c   : > { %1926 = vmatpush1.bf16.msra.mxu0 %v15045_v17  ;;  %1969 = vmatpush1.bf16.msra.mxu1 %v15047_v7  ;;  %v493_v17 = vld [vmem:[#allocation4 + $0x88] sm:$0xff]  ;;  %17872 = vst [vmem:[#allocation63_spill] sm:$0xff] %v15074_v59  ;;  %17873 = vst [vmem:[#allocation64_spill] sm:$0xff] %v15077_v63  ;;  %v528_v56 = vld [vmem:[#allocation4 + $0x1a0] sm:$0xff] }
 0x10d   : > { %1927 = vmatprep.subr.bf16.mxu0 %v15051_v8  ;;  %1970 = vmatprep.subr.bf16.mxu1 %v15053_v11  ;;  %17874 = vst [vmem:[#allocation65_spill] sm:$0xff] %v15079_v0  ;;  %v15081_v14 = vcombine.high %v481_v13, %v493_v17  ;;  %v15088_v4 = vcombine.low %v481_v13, %v493_v17  ;;  %v541_v8 = vld [vmem:[#allocation4 + $0x208] sm:$0xff] }
 0x10e   : > { %v15093_v11 = vcombine.high %v505_v21, %v517_v55  ;;  %v15100_v13 = vcombine.low %v504_v20, %v516_v33  ;;  %v15105_v17 = vcombine.low %v505_v21, %v517_v55  ;;  %v15113_v7 = vld [vmem:[#allocation4 + $0x628] sm:$0xff]  ;;  %v15121_v21 = vld [vmem:[#allocation4 + $0x630] sm:$0xff] }
 0x10f   : > { %17875 = vst [vmem:[#allocation66_spill] sm:$0xff] %v15081_v14  ;;  %17877 = vst [vmem:[#allocation68_spill] sm:$0xff] %v15088_v4  ;;  %v15123_v55 = vld [vmem:[#allocation4 + $0x690] sm:$0x33] }
 0x110   : > { %1928 = vmatpush1.bf16.msra.mxu0 %v15057_v37  ;;  %1971 = vmatpush1.bf16.msra.mxu1 %v15059_v22  ;;  %v529_v22 = vld [vmem:[#allocation4 + $0x1a8] sm:$0xff]  ;;  %v15091_v37 = vcombine.high %v504_v20, %v516_v33  ;;  %17879 = vst [vmem:[#allocation70_spill] sm:$0xff] %v15093_v11  ;;  %17880 = vst [vmem:[#allocation71_spill] sm:$0xff] %v15100_v13  ;;  %v12564_v34 = vcombine.low %v15121_v21, %v15123_v55 }
 0x111   : > { %12580 = vmatprep.subr.msk.bf16.mxu0 %vm1754_vm0, %v15061_v26  ;;  %12582 = vmatprep.subr.msk.bf16.mxu1 %vm1754_vm0, %v15065_v48  ;;  %v15085_v26 = vcombine.low %v480_v51, %v492_v50  ;;  %v540_v48 = vld [vmem:[#allocation4 + $0x200] sm:$0xff]  ;;  %17881 = vst [vmem:[#allocation72_spill] sm:$0xff] %v15105_v17  ;;  %v15117_v20 = vcombine.high %v529_v22, %v541_v8  ;;  %v15119_v33 = vld [vmem:[#allocation4 + $0x688] sm:$0x33] }
 0x112   : > { %17878 = vst [vmem:[#allocation69_spill] sm:$0xff] %v15091_v37  ;;  %v552_v50 = vld [vmem:[#allocation4 + $0x260] sm:$0xff]  ;;  %v15130_v60 = vcombine.low %v528_v56, %v540_v48  ;;  %v15171_v9 = vsel %vm1754_vm0, %v12564_v34, 0 }
 0x113   : > { %17876 = vst [vmem:[#allocation67_spill] sm:$0xff] %v15085_v26  ;;  %v564_v51 = vld [vmem:[#allocation4 + $0x2c0] sm:$0xff]  ;;  %17883 = vst [vmem:[#allocation74_spill] sm:$0xff] %v15117_v20 }
 0x114   : > { %1930 = vmatpush1.bf16.msra.mxu0 %v15074_v59  ;;  %1973 = vmatpush1.bf16.msra.mxu1 %v15077_v63  ;;  %v565_v63 = vld [vmem:[#allocation4 + $0x2c8] sm:$0xff]  ;;  %v15109_v59 = vld [vmem:[#allocation4 + $0x620] sm:$0xff]  ;;  %17884 = vst [vmem:[#allocation75_spill] sm:$0xff] %v15130_v60  ;;  %v15136_v46 = vcombine.high %v552_v50, %v564_v51  ;;  %17891 = vst [vmem:[#allocation82_spill] sm:$0xff] %v15171_v9 }
 0x115   : > { %1999 = vmatprep.subr.bf16.mxu0 %v15079_v0  ;;  %2042 = vmatprep.subr.bf16.mxu1 %v15081_v14  ;;  %v15107_v14 = vcombine.high %v528_v56, %v540_v48  ;;  %v553_v0 = vld [vmem:[#allocation4 + $0x268] sm:$0xff]  ;;  %v12562_v56 = vcombine.low %v15113_v7, %v15119_v33 }
 0x116   : > { %17886 = vst [vmem:[#allocation77_spill] sm:$0xff] %v15136_v46 }
 0x117   : > { %1946 = vmatmul.mubr.bf16.vlgmr.msra.gmra.mrb[4].mxu0 %v14967_v58  ;;  %1989 = vmatmul.mubr.bf16.vlgmr.msra.gmra.mrb[4].mxu1 %v14967_v58  ;;  %17882 = vst [vmem:[#allocation73_spill] sm:$0xff] %v15107_v14  ;;  %v15165_v24 = vsel %vm1754_vm0, %v12562_v56, 0 }
 0x118   : > { %2000 = vmatpush1.bf16.msra.mxu0 %v15085_v26  ;;  %12585 = vmatprep.mubr.msk.bf16.mxu0 %vm1750_vm5, %v14963_v52  ;;  %v15111_v26 = vld [vmem:[#allocation4 + $0x680] sm:$0x33]  ;;  %17890 = vst [vmem:[#allocation81_spill] sm:$0xff] %v15165_v24 }
 0x119   : > { %2043 = vmatpush1.bf16.msra.mxu1 %v15088_v4  ;;  %12587 = vmatprep.mubr.msk.bf16.mxu1 %vm1750_vm5, %v14963_v52  ;;  %v15125_v4 = vld [vmem:[#allocation4 + $0x638] sm:$0xff]  ;;  %v12560_v48 = vcombine.low %v15109_v59, %v15111_v26 }
 0x11a   : > { %2001 = vmatprep.subr.bf16.mxu0 %v15091_v37  ;;  %2044 = vmatprep.subr.bf16.mxu1 %v15093_v11  ;;  %v588_v37 = vld [vmem:[#allocation4 + $0x380] sm:$0xff]  ;;  %v15134_v11 = vcombine.low %v529_v22, %v541_v8  ;;  %v15146_v8 = vcombine.low %v552_v50, %v564_v51  ;;  %v15148_v22 = vcombine.low %v553_v0, %v565_v63 }
 0x11b   : > { %v15156_v30 = vcombine.high %v576_v54, %v588_v37  ;;  %v12568_v50 = vcombine.low %v676_v41, %v688_v38  ;;  %v15178_v38 = vcombine.low %v577_v42, %v589_v45 }
 0x11c   : > { %2002 = vmatpush1.bf16.msra.mxu0 %v15100_v13  ;;  %17885 = vst [vmem:[#allocation76_spill] sm:$0xff] %v15134_v11  ;;  %v15139_v13 = vcombine.high %v553_v0, %v565_v63  ;;  %v15159_v63 = vcombine.high %v577_v42, %v589_v45  ;;  %v15162_v0 = vsel %vm1754_vm0, %v12560_v48, 0  ;;  %v637_v48 = vld [vmem:[#allocation4 + $0x508] sm:$0xff]  ;;  %v648_v42 = vld [vmem:[#allocation4 + $0x560] sm:$0xff] }
 0x11d   : > { %2045 = vmatpush1.bf16.msra.mxu1 %v15105_v17  ;;  %2003 = vmatprep.subr.bf16.mxu0 %v15107_v14  ;;  %v689_v14 = vld [vmem:[#allocation4 + $0x6a8] sm:$0x33]  ;;  %v600_v17 = vld [vmem:[#allocation4 + $0x3e0] sm:$0xff]  ;;  %17887 = vst [vmem:[#allocation78_spill] sm:$0xff] %v15156_v30  ;;  %17889 = vst [vmem:[#allocation80_spill] sm:$0xff] %v15162_v0 }
 0x11e   : > { %2046 = vmatprep.subr.bf16.mxu1 %v15117_v20  ;;  %v12566_v20 = vcombine.low %v15125_v4, %v15127_v3  ;;  %v12570_v51 = vcombine.low %v677_v31, %v689_v14  ;;  %17888 = vst [vmem:[#allocation79_spill] sm:$0xff] %v15159_v63  ;;  %v15180_v41 = vcombine.high %v600_v17, %v612_v27  ;;  %v625_v14 = vld [vmem:[#allocation4 + $0x4a8] sm:$0xff]  ;;  %v660_v45 = vld [vmem:[#allocation4 + $0x5c0] sm:$0xff] }
 0x120   : > { %2004 = vmatpush1.bf16.msra.mxu0 %v15130_v60  ;;  %v613_v60 = vld [vmem:[#allocation4 + $0x448] sm:$0xff]  ;;  %v15174_v31 = vsel %vm1754_vm0, %v12566_v20, 0  ;;  %17893 = vst [vmem:[#allocation84_spill] sm:$0xff] %v15180_v41  ;;  %v15192_v20 = vcombine.low %v600_v17, %v612_v27  ;;  %v15208_v17 = vcombine.low %v625_v14, %v637_v48 }
 0x121   : > { %2047 = vmatpush1.bf16.msra.mxu1 %v15134_v11  ;;  %2005 = vmatprep.subr.bf16.mxu0 %v15136_v46  ;;  %v15168_v46 = vcombine.low %v576_v54, %v588_v37  ;;  %v624_v11 = vld [vmem:[#allocation4 + $0x4a0] sm:$0xff]  ;;  %17892 = vst [vmem:[#allocation83_spill] sm:$0xff] %v15174_v31  ;;  %v15183_v54 = vsel %vm1754_vm0, %v12568_v50, 0  ;;  %v15186_v37 = vsel %vm1754_vm0, %v12570_v51, 0  ;;  %v15189_v34 = vcombine.high %v601_v16, %v613_v60  ;;  %v649_v51 = vld [vmem:[#allocation4 + $0x568] sm:$0xff] }
 0x122   : > { %2048 = vmatprep.subr.bf16.mxu1 %v15139_v13  ;;  %17894 = vst [vmem:[#allocation85_spill] sm:$0xff] %v15183_v54  ;;  %17895 = vst [vmem:[#allocation86_spill] sm:$0xff] %v15186_v37  ;;  %v15196_v56 = vcombine.low %v601_v16, %v613_v60  ;;  %v15198_v50 = vcombine.high %v624_v11, %v636_v15  ;;  %v15204_v27 = vcombine.low %v624_v11, %v636_v15 }
 0x123   : > { %17896 = vst [vmem:[#allocation87_spill] sm:$0xff] %v15189_v34  ;;  %17897 = vst [vmem:[#allocation88_spill] sm:$0xff] %v15192_v20  ;;  %v15210_v60 = vcombine.high %v648_v42, %v660_v45  ;;  %v15224_v11 = vcombine.high %v15109_v59, %v15111_v26  ;;  %v518_v26 = vld [vmem:[#allocation4 + $0x150] sm:$0xff] }
 0x124   : > { %2006 = vmatpush1.bf16.msra.mxu0 %v15146_v8  ;;  %17898 = vst [vmem:[#allocation89_spill] sm:$0xff] %v15204_v27  ;;  %17899 = vst [vmem:[#allocation90_spill] sm:$0xff] %v15208_v17 }
 0x125   : > { %2049 = vmatpush1.bf16.msra.mxu1 %v15148_v22  ;;  %2007 = vmatprep.subr.bf16.mxu0 %v15156_v30  ;;  %v661_v30 = vld [vmem:[#allocation4 + $0x5c8] sm:$0xff]  ;;  %17900 = vst [vmem:[#allocation91_spill] sm:$0xff] %v15210_v60  ;;  %17904 = vst [vmem:[#allocation95_spill] sm:$0xff] %v15224_v11 }
 0x126   : > { %2050 = vmatprep.subr.bf16.mxu1 %v15159_v63  ;;  %v15201_v63 = vcombine.high %v625_v14, %v637_v48  ;;  %v15213_v16 = vcombine.high %v649_v51, %v661_v30  ;;  %v15220_v15 = vcombine.low %v649_v51, %v661_v30  ;;  %v483_v14 = vld [vmem:[#allocation4 + $0x38] sm:$0xff] }
 0x127   : > { %v495_v48 = vld [vmem:[#allocation4 + $0x98] sm:$0xff] }
 0x128   : > { %2008 = vmatpush1.bf16.msra.mxu0 %v15168_v46  ;;  %17901 = vst [vmem:[#allocation92_spill] sm:$0xff] %v15213_v16  ;;  %17903 = vst [vmem:[#allocation94_spill] sm:$0xff] %v15220_v15  ;;  %v15239_v59 = vcombine.high %v483_v14, %v495_v48  ;;  %v507_v51 = vld [vmem:[#allocation4 + $0xf8] sm:$0xff] }
 0x129   : > { %2051 = vmatpush1.bf16.msra.mxu1 %v15178_v38  ;;  %2009 = vmatprep.subr.bf16.mxu0 %v15180_v41  ;;  %v482_v41 = vld [vmem:[#allocation4 + $0x30] sm:$0xff] }
 0x12a   : > { %2052 = vmatprep.subr.bf16.mxu1 %v15189_v34  ;;  %v15216_v34 = vcombine.low %v648_v42, %v660_v45  ;;  %v15229_v42 = vcombine.high %v15113_v7, %v15119_v33  ;;  %v506_v45 = vld [vmem:[#allocation4 + $0xf0] sm:$0xff]  ;;  %17907 = vst [vmem:[#allocation98_spill] sm:$0xff] %v15239_v59 }
 0x12b   : > { %v530_v33 = vld [vmem:[#allocation4 + $0x1b0] sm:$0xff] }
 0x12c   : > { %2010 = vmatpush1.bf16.msra.mxu0 %v15192_v20  ;;  %17902 = vst [vmem:[#allocation93_spill] sm:$0xff] %v15216_v34  ;;  %v494_v20 = vld [vmem:[#allocation4 + $0x90] sm:$0xff]  ;;  %17905 = vst [vmem:[#allocation96_spill] sm:$0xff] %v15229_v42 }
 0x12d   : > { %2053 = vmatpush1.bf16.msra.mxu1 %v15196_v56  ;;  %2011 = vmatprep.subr.bf16.mxu0 %v15198_v50  ;;  %v15235_v30 = vcombine.high %v482_v41, %v494_v20  ;;  %v15242_v7 = vcombine.low %v482_v41, %v494_v20  ;;  %v15256_v41 = vcombine.low %v506_v45, %v518_v26  ;;  %v554_v20 = vld [vmem:[#allocation4 + $0x270] sm:$0xff] }
 0x12e   : > { %2054 = vmatprep.subr.bf16.mxu1 %v15201_v63 }
 0x12f   : > { %17906 = vst [vmem:[#allocation97_spill] sm:$0xff] %v15235_v30  ;;  %17908 = vst [vmem:[#allocation99_spill] sm:$0xff] %v15242_v7 }
 0x130   : > { %2012 = vmatpush1.bf16.msra.mxu0 %v15204_v27  ;;  %17911 = vst [vmem:[#allocation102_spill] sm:$0xff] %v15256_v41 }
 0x131   : > { %2055 = vmatpush1.bf16.msra.mxu1 %v15208_v17  ;;  %2013 = vmatprep.subr.bf16.mxu0 %v15210_v60  ;;  %v543_v60 = vld [vmem:[#allocation4 + $0x218] sm:$0xff] }
 0x132   : > { %2056 = vmatprep.subr.bf16.mxu1 %v15213_v16  ;;  %v519_v16 = vld [vmem:[#allocation4 + $0x158] sm:$0xff] }
 0x133   : > { %v15252_v17 = vcombine.high %v507_v51, %v519_v16 }
 0x134   : > { %2014 = vmatpush1.bf16.msra.mxu0 %v15216_v34  ;;  %v531_v34 = vld [vmem:[#allocation4 + $0x1b8] sm:$0xff] }
 0x135   : > { %2057 = vmatpush1.bf16.msra.mxu1 %v15220_v15  ;;  %12584 = vmatprep.subr.msk.bf16.mxu0 %vm1754_vm0, %v15224_v11  ;;  %v542_v15 = vld [vmem:[#allocation4 + $0x210] sm:$0xff]  ;;  %v15246_v11 = vcombine.low %v483_v14, %v495_v48  ;;  %v15261_v14 = vcombine.low %v507_v51, %v519_v16  ;;  %v15276_v51 = vcombine.low %v531_v34, %v543_v60 }
 0x136   : > { %12586 = vmatprep.subr.msk.bf16.mxu1 %vm1754_vm0, %v15229_v42  ;;  %v15249_v42 = vcombine.high %v506_v45, %v518_v26  ;;  %v15263_v48 = vcombine.high %v530_v33, %v542_v15  ;;  %v15268_v45 = vcombine.high %v531_v34, %v543_v60  ;;  %v15272_v26 = vcombine.low %v530_v33, %v542_v15  ;;  %v590_v16 = vld [vmem:[#allocation4 + $0x390] sm:$0xff] }
 0x137   : > { %17909 = vst [vmem:[#allocation100_spill] sm:$0xff] %v15246_v11  ;;  %17912 = vst [vmem:[#allocation103_spill] sm:$0xff] %v15261_v14  ;;  %v602_v33 = vld [vmem:[#allocation4 + $0x3f0] sm:$0xff] }
 0x138   : > { %2016 = vmatpush1.bf16.msra.mxu0 %v15162_v0  ;;  %17910 = vst [vmem:[#allocation101_spill] sm:$0xff] %v15249_v42  ;;  %17913 = vst [vmem:[#allocation104_spill] sm:$0xff] %v15263_v48  ;;  %v579_v0 = vld [vmem:[#allocation4 + $0x338] sm:$0xff] }
 0x139   : > { %2059 = vmatpush1.bf16.msra.mxu1 %v15165_v24  ;;  %2085 = vmatprep.subr.bf16.mxu0 %v15235_v30  ;;  %v566_v30 = vld [vmem:[#allocation4 + $0x2d0] sm:$0xff]  ;;  %v567_v24 = vld [vmem:[#allocation4 + $0x2d8] sm:$0xff]  ;;  %17914 = vst [vmem:[#allocation105_spill] sm:$0xff] %v15268_v45  ;;  %17915 = vst [vmem:[#allocation106_spill] sm:$0xff] %v15272_v26 }
 0x13a   : > { %2128 = vmatprep.subr.bf16.mxu1 %v15239_v59  ;;  %v555_v59 = vld [vmem:[#allocation4 + $0x278] sm:$0xff]  ;;  %17916 = vst [vmem:[#allocation107_spill] sm:$0xff] %v15276_v51  ;;  %v15284_v15 = vcombine.low %v554_v20, %v566_v30 }
 0x13b   : > { %2032 = vmatmul.mubr.bf16.vlgmr.msra.gmra.mrb[8].mxu0 %v14967_v58  ;;  %v15281_v27 = vcombine.high %v555_v59, %v567_v24  ;;  %v15288_v34 = vcombine.low %v555_v59, %v567_v24 }
 0x13c   : > { %2075 = vmatmul.mubr.bf16.vlgmr.msra.gmra.mrb[8].mxu1 %v14967_v58  ;;  %2086 = vmatpush1.bf16.msra.mxu0 %v15242_v7  ;;  %v15278_v7 = vcombine.high %v554_v20, %v566_v30  ;;  %17919 = vst [vmem:[#allocation110_spill] sm:$0xff] %v15284_v15  ;;  %v626_v20 = vld [vmem:[#allocation4 + $0x4b0] sm:$0xff] }
 0x13d   : > { %12589 = vmatprep.mubr.msk.bf16.mxu0 %vm1750_vm5, %v14963_v52  ;;  %2129 = vmatpush1.bf16.msra.mxu1 %v15246_v11  ;;  %v578_v11 = vld [vmem:[#allocation4 + $0x330] sm:$0xff]  ;;  %17918 = vst [vmem:[#allocation109_spill] sm:$0xff] %v15281_v27  ;;  %17920 = vst [vmem:[#allocation111_spill] sm:$0xff] %v15288_v34 }
 0x13e   : > { %12591 = vmatprep.mubr.msk.bf16.mxu1 %vm1750_vm5, %v14963_v52  ;;  %2087 = vmatprep.subr.bf16.mxu0 %v15249_v42  ;;  %17917 = vst [vmem:[#allocation108_spill] sm:$0xff] %v15278_v7  ;;  %v591_v42 = vld [vmem:[#allocation4 + $0x398] sm:$0xff]  ;;  %v15290_v60 = vcombine.high %v578_v11, %v590_v16  ;;  %v15296_v30 = vcombine.low %v578_v11, %v590_v16  ;;  %v650_v16 = vld [vmem:[#allocation4 + $0x570] sm:$0xff] }
 0x13f   : > { %2130 = vmatprep.subr.bf16.mxu1 %v15252_v17  ;;  %v15300_v24 = vcombine.low %v579_v0, %v591_v42 }
 0x140   : > { %2088 = vmatpush1.bf16.msra.mxu0 %v15256_v41  ;;  %v614_v41 = vld [vmem:[#allocation4 + $0x450] sm:$0xff]  ;;  %17921 = vst [vmem:[#allocation112_spill] sm:$0xff] %v15290_v60 }
 0x141   : > { %2131 = vmatpush1.bf16.msra.mxu1 %v15261_v14  ;;  %2089 = vmatprep.subr.bf16.mxu0 %v15263_v48  ;;  %v603_v48 = vld [vmem:[#allocation4 + $0x3f8] sm:$0xff]  ;;  %v15302_v59 = vcombine.high %v602_v33, %v614_v41  ;;  %v15308_v11 = vcombine.low %v602_v33, %v614_v41 }
 0x142   : > { %2132 = vmatprep.subr.bf16.mxu1 %v15268_v45  ;;  %v615_v14 = vld [vmem:[#allocation4 + $0x458] sm:$0xff]  ;;  %v15293_v45 = vcombine.high %v579_v0, %v591_v42 }
 0x143   : > { %17923 = vst [vmem:[#allocation114_spill] sm:$0xff] %v15302_v59  ;;  %17925 = vst [vmem:[#allocation116_spill] sm:$0xff] %v15308_v11  ;;  %v15312_v0 = vcombine.low %v603_v48, %v615_v14 }
 0x144   : > { %2090 = vmatpush1.bf16.msra.mxu0 %v15272_v26  ;;  %17922 = vst [vmem:[#allocation113_spill] sm:$0xff] %v15293_v45  ;;  %v638_v26 = vld [vmem:[#allocation4 + $0x510] sm:$0xff] }
 0x145   : > { %2133 = vmatpush1.bf16.msra.mxu1 %v15276_v51  ;;  %2091 = vmatprep.subr.bf16.mxu0 %v15278_v7  ;;  %v627_v7 = vld [vmem:[#allocation4 + $0x4b8] sm:$0xff]  ;;  %v15314_v42 = vcombine.high %v626_v20, %v638_v26  ;;  %v15320_v41 = vcombine.low %v626_v20, %v638_v26  ;;  %v497_v20 = vld [vmem:[#allocation4 + $0xa8] sm:$0xff] }
 0x146   : > { %2134 = vmatprep.subr.bf16.mxu1 %v15281_v27  ;;  %v639_v51 = vld [vmem:[#allocation4 + $0x518] sm:$0xff]  ;;  %v15305_v27 = vcombine.high %v603_v48, %v615_v14 }
 0x147   : > { %17926 = vst [vmem:[#allocation117_spill] sm:$0xff] %v15320_v41  ;;  %v15324_v33 = vcombine.low %v627_v7, %v639_v51 }
 0x148   : > { %2092 = vmatpush1.bf16.msra.mxu0 %v15284_v15  ;;  %17924 = vst [vmem:[#allocation115_spill] sm:$0xff] %v15305_v27  ;;  %v662_v15 = vld [vmem:[#allocation4 + $0x5d0] sm:$0xff] }
 0x149   : > { %2135 = vmatpush1.bf16.msra.mxu1 %v15288_v34  ;;  %2093 = vmatprep.subr.bf16.mxu0 %v15290_v60  ;;  %v651_v60 = vld [vmem:[#allocation4 + $0x578] sm:$0xff]  ;;  %17927 = vst [vmem:[#allocation118_spill] sm:$0xff] %v15324_v33  ;;  %v15326_v14 = vcombine.high %v650_v16, %v662_v15 }
 0x14a   : > { %2136 = vmatprep.subr.bf16.mxu1 %v15293_v45  ;;  %v663_v34 = vld [vmem:[#allocation4 + $0x5d8] sm:$0xff]  ;;  %v15317_v45 = vcombine.high %v627_v7, %v639_v51  ;;  %v15340_v7 = vcombine.high %v15121_v21, %v15123_v55  ;;  %v485_v51 = vld [vmem:[#allocation4 + $0x48] sm:$0xff]  ;;  %v520_v21 = vld [vmem:[#allocation4 + $0x160] sm:$0xff] }
 0x14b   : > { %17928 = vst [vmem:[#allocation119_spill] sm:$0xff] %v15326_v14  ;;  %v15329_v48 = vcombine.high %v651_v60, %v663_v34  ;;  %v15336_v26 = vcombine.low %v651_v60, %v663_v34  ;;  %v508_v60 = vld [vmem:[#allocation4 + $0x100] sm:$0xff]  ;;  %v15355_v55 = vcombine.high %v485_v51, %v497_v20 }
 0x14c   : > { %2094 = vmatpush1.bf16.msra.mxu0 %v15296_v30  ;;  %17932 = vst [vmem:[#allocation123_spill] sm:$0xff] %v15340_v7 }
 0x14d   : > { %2137 = vmatpush1.bf16.msra.mxu1 %v15300_v24  ;;  %2095 = vmatprep.subr.bf16.mxu0 %v15302_v59  ;;  %17929 = vst [vmem:[#allocation120_spill] sm:$0xff] %v15329_v48  ;;  %v484_v59 = vld [vmem:[#allocation4 + $0x40] sm:$0xff]  ;;  %17931 = vst [vmem:[#allocation122_spill] sm:$0xff] %v15336_v26 }
 0x14e   : > { %2138 = vmatprep.subr.bf16.mxu1 %v15305_v27  ;;  %v15332_v27 = vcombine.low %v650_v16, %v662_v15  ;;  %v15345_v15 = vcombine.high %v15125_v4, %v15127_v3  ;;  %17935 = vst [vmem:[#allocation126_spill] sm:$0xff] %v15355_v55  ;;  %v509_v16 = vld [vmem:[#allocation4 + $0x108] sm:$0xff]  ;;  %v532_v4 = vld [vmem:[#allocation4 + $0x1c0] sm:$0xff] }
 0x150   : > { %2096 = vmatpush1.bf16.msra.mxu0 %v15308_v11  ;;  %17930 = vst [vmem:[#allocation121_spill] sm:$0xff] %v15332_v27  ;;  %v496_v11 = vld [vmem:[#allocation4 + $0xa0] sm:$0xff]  ;;  %17933 = vst [vmem:[#allocation124_spill] sm:$0xff] %v15345_v15 }
 0x151   : > { %2139 = vmatpush1.bf16.msra.mxu1 %v15312_v0  ;;  %2097 = vmatprep.subr.bf16.mxu0 %v15314_v42  ;;  %v15351_v34 = vcombine.high %v484_v59, %v496_v11  ;;  %v15358_v3 = vcombine.low %v484_v59, %v496_v11  ;;  %v15372_v59 = vcombine.low %v508_v60, %v520_v21  ;;  %v556_v11 = vld [vmem:[#allocation4 + $0x280] sm:$0xff] }
 0x152   : > { %2140 = vmatprep.subr.bf16.mxu1 %v15317_v45 }
 0x153   : > { %17934 = vst [vmem:[#allocation125_spill] sm:$0xff] %v15351_v34  ;;  %17936 = vst [vmem:[#allocation127_spill] sm:$0xff] %v15358_v3 }
 0x154   : > { %2098 = vmatpush1.bf16.msra.mxu0 %v15320_v41  ;;  %17939 = vst [vmem:[#allocation130_spill] sm:$0xff] %v15372_v59 }
 0x155   : > { %2141 = vmatpush1.bf16.msra.mxu1 %v15324_v33  ;;  %2099 = vmatprep.subr.bf16.mxu0 %v15326_v14  ;;  %v545_v14 = vld [vmem:[#allocation4 + $0x228] sm:$0xff] }
 0x156   : > { %2142 = vmatprep.subr.bf16.mxu1 %v15329_v48  ;;  %v521_v48 = vld [vmem:[#allocation4 + $0x168] sm:$0xff] }
 0x157   : > { %v15368_v33 = vcombine.high %v509_v16, %v521_v48 }
 0x158   : > { %2100 = vmatpush1.bf16.msra.mxu0 %v15332_v27  ;;  %v533_v27 = vld [vmem:[#allocation4 + $0x1c8] sm:$0xff] }
 0x159   : > { %2143 = vmatpush1.bf16.msra.mxu1 %v15336_v26  ;;  %12588 = vmatprep.subr.msk.bf16.mxu0 %vm1754_vm0, %v15340_v7  ;;  %v544_v26 = vld [vmem:[#allocation4 + $0x220] sm:$0xff]  ;;  %v15362_v7 = vcombine.low %v485_v51, %v497_v20  ;;  %v15377_v51 = vcombine.low %v509_v16, %v521_v48  ;;  %v15392_v16 = vcombine.low %v533_v27, %v545_v14 }
 0x15a   : > { %12590 = vmatprep.subr.msk.bf16.mxu1 %vm1754_vm0, %v15345_v15  ;;  %v15365_v15 = vcombine.high %v508_v60, %v520_v21  ;;  %v15379_v20 = vcombine.high %v532_v4, %v544_v26  ;;  %v15384_v60 = vcombine.high %v533_v27, %v545_v14  ;;  %v15388_v21 = vcombine.low %v532_v4, %v544_v26  ;;  %v592_v48 = vld [vmem:[#allocation4 + $0x3a0] sm:$0xff] }
 0x15b   : > { %17937 = vst [vmem:[#allocation128_spill] sm:$0xff] %v15362_v7  ;;  %17940 = vst [vmem:[#allocation131_spill] sm:$0xff] %v15377_v51  ;;  %v604_v4 = vld [vmem:[#allocation4 + $0x400] sm:$0xff] }
 0x15c   : > { %2102 = vmatpush1.bf16.msra.mxu0 %v15171_v9  ;;  %17938 = vst [vmem:[#allocation129_spill] sm:$0xff] %v15365_v15  ;;  %17941 = vst [vmem:[#allocation132_spill] sm:$0xff] %v15379_v20  ;;  %v581_v9 = vld [vmem:[#allocation4 + $0x348] sm:$0xff] }
 0x15d   : > { %2145 = vmatpush1.bf16.msra.mxu1 %v15174_v31  ;;  %2171 = vmatprep.subr.bf16.mxu0 %v15351_v34  ;;  %v568_v34 = vld [vmem:[#allocation4 + $0x2e0] sm:$0xff]  ;;  %v569_v31 = vld [vmem:[#allocation4 + $0x2e8] sm:$0xff]  ;;  %17942 = vst [vmem:[#allocation133_spill] sm:$0xff] %v15384_v60  ;;  %17943 = vst [vmem:[#allocation134_spill] sm:$0xff] %v15388_v21 }
 0x15e   : > { %2214 = vmatprep.subr.bf16.mxu1 %v15355_v55  ;;  %v557_v55 = vld [vmem:[#allocation4 + $0x288] sm:$0xff]  ;;  %17944 = vst [vmem:[#allocation135_spill] sm:$0xff] %v15392_v16  ;;  %v15400_v26 = vcombine.low %v556_v11, %v568_v34 }
 0x15f   : > { %2118 = vmatmul.mubr.bf16.vlgmr.msra.gmra.mrb[12].mxu0 %v14967_v58  ;;  %v15397_v41 = vcombine.high %v557_v55, %v569_v31  ;;  %v15404_v27 = vcombine.low %v557_v55, %v569_v31 }
 0x160   : > { %2161 = vmatmul.mubr.bf16.vlgmr.msra.gmra.mrb[12].mxu1 %v14967_v58  ;;  %2172 = vmatpush1.bf16.msra.mxu0 %v15358_v3  ;;  %v15394_v3 = vcombine.high %v556_v11, %v568_v34  ;;  %17947 = vst [vmem:[#allocation138_spill] sm:$0xff] %v15400_v26  ;;  %v628_v11 = vld [vmem:[#allocation4 + $0x4c0] sm:$0xff] }
 0x161   : > { %12593 = vmatprep.mubr.msk.bf16.mxu0 %vm1750_vm5, %v14963_v52  ;;  %2215 = vmatpush1.bf16.msra.mxu1 %v15362_v7  ;;  %v580_v7 = vld [vmem:[#allocation4 + $0x340] sm:$0xff]  ;;  %17946 = vst [vmem:[#allocation137_spill] sm:$0xff] %v15397_v41  ;;  %17948 = vst [vmem:[#allocation139_spill] sm:$0xff] %v15404_v27 }
 0x162   : > { %12595 = vmatprep.mubr.msk.bf16.mxu1 %vm1750_vm5, %v14963_v52  ;;  %2173 = vmatprep.subr.bf16.mxu0 %v15365_v15  ;;  %17945 = vst [vmem:[#allocation136_spill] sm:$0xff] %v15394_v3  ;;  %v593_v15 = vld [vmem:[#allocation4 + $0x3a8] sm:$0xff]  ;;  %v15406_v14 = vcombine.high %v580_v7, %v592_v48  ;;  %v15412_v34 = vcombine.low %v580_v7, %v592_v48  ;;  %v652_v48 = vld [vmem:[#allocation4 + $0x580] sm:$0xff] }
 0x163   : > { %2216 = vmatprep.subr.bf16.mxu1 %v15368_v33  ;;  %v15416_v31 = vcombine.low %v581_v9, %v593_v15 }
 0x164   : > { %2174 = vmatpush1.bf16.msra.mxu0 %v15372_v59  ;;  %v616_v59 = vld [vmem:[#allocation4 + $0x460] sm:$0xff]  ;;  %17949 = vst [vmem:[#allocation140_spill] sm:$0xff] %v15406_v14 }
 0x165   : > { %2217 = vmatpush1.bf16.msra.mxu1 %v15377_v51  ;;  %2175 = vmatprep.subr.bf16.mxu0 %v15379_v20  ;;  %v605_v20 = vld [vmem:[#allocation4 + $0x408] sm:$0xff]  ;;  %v15418_v55 = vcombine.high %v604_v4, %v616_v59  ;;  %v15424_v7 = vcombine.low %v604_v4, %v616_v59 }
 0x166   : > { %2218 = vmatprep.subr.bf16.mxu1 %v15384_v60  ;;  %v617_v51 = vld [vmem:[#allocation4 + $0x468] sm:$0xff]  ;;  %v15409_v60 = vcombine.high %v581_v9, %v593_v15 }
 0x167   : > { %17951 = vst [vmem:[#allocation142_spill] sm:$0xff] %v15418_v55  ;;  %17953 = vst [vmem:[#allocation144_spill] sm:$0xff] %v15424_v7  ;;  %v15428_v9 = vcombine.low %v605_v20, %v617_v51 }
 0x168   : > { %2176 = vmatpush1.bf16.msra.mxu0 %v15388_v21  ;;  %17950 = vst [vmem:[#allocation141_spill] sm:$0xff] %v15409_v60  ;;  %v640_v21 = vld [vmem:[#allocation4 + $0x520] sm:$0xff] }
 0x169   : > { %2219 = vmatpush1.bf16.msra.mxu1 %v15392_v16  ;;  %2177 = vmatprep.subr.bf16.mxu0 %v15394_v3  ;;  %v629_v3 = vld [vmem:[#allocation4 + $0x4c8] sm:$0xff]  ;;  %17954 = vst [vmem:[#allocation145_spill] sm:$0xff] %v15428_v9  ;;  %v15430_v15 = vcombine.high %v628_v11, %v640_v21  ;;  %v15436_v59 = vcombine.low %v628_v11, %v640_v21 }
 0x16a   : > { %2220 = vmatprep.subr.bf16.mxu1 %v15397_v41  ;;  %v641_v16 = vld [vmem:[#allocation4 + $0x528] sm:$0xff]  ;;  %v15421_v41 = vcombine.high %v605_v20, %v617_v51 }
 0x16b   : > { %17955 = vst [vmem:[#allocation146_spill] sm:$0xff] %v15430_v15  ;;  %17957 = vst [vmem:[#allocation148_spill] sm:$0xff] %v15436_v59  ;;  %v15440_v4 = vcombine.low %v629_v3, %v641_v16 }
 0x16c   : > { %2178 = vmatpush1.bf16.msra.mxu0 %v15400_v26  ;;  %17952 = vst [vmem:[#allocation143_spill] sm:$0xff] %v15421_v41  ;;  %v664_v26 = vld [vmem:[#allocation4 + $0x5e0] sm:$0xff] }
 0x16d   : > { %2221 = vmatpush1.bf16.msra.mxu1 %v15404_v27  ;;  %2179 = vmatprep.subr.bf16.mxu0 %v15406_v14  ;;  %v653_v14 = vld [vmem:[#allocation4 + $0x588] sm:$0xff]  ;;  %17958 = vst [vmem:[#allocation149_spill] sm:$0xff] %v15440_v4  ;;  %v15442_v51 = vcombine.high %v652_v48, %v664_v26 }
 0x16e   : > { %2222 = vmatprep.subr.bf16.mxu1 %v15409_v60  ;;  %v665_v27 = vld [vmem:[#allocation4 + $0x5e8] sm:$0xff]  ;;  %v15433_v60 = vcombine.high %v629_v3, %v641_v16  ;;  %v14429_v3 = vld [vmem:[#allocation4 + $0x640] sm:$0xff] }
 0x16f   : > { %17959 = vst [vmem:[#allocation150_spill] sm:$0xff] %v15442_v51  ;;  %v15445_v20 = vcombine.high %v653_v14, %v665_v27  ;;  %v15452_v21 = vcombine.low %v653_v14, %v665_v27  ;;  %v14430_v16 = vld [vmem:[#allocation4 + $0x6a0] sm:$0x33]  ;;  %v510_v14 = vld [vmem:[#allocation4 + $0x110] sm:$0xff] }
 0x170   : > { %2180 = vmatpush1.bf16.msra.mxu0 %v15412_v34  ;;  %17956 = vst [vmem:[#allocation147_spill] sm:$0xff] %v15433_v60  ;;  %v15454_v11 = vcombine.high %v14429_v3, %v14430_v16  ;;  %v511_v16 = vld [vmem:[#allocation4 + $0x118] sm:$0xff] }
 0x171   : > { %2223 = vmatpush1.bf16.msra.mxu1 %v15416_v31  ;;  %2181 = vmatprep.subr.bf16.mxu0 %v15418_v55  ;;  %17960 = vst [vmem:[#allocation151_spill] sm:$0xff] %v15445_v20  ;;  %v486_v55 = vld [vmem:[#allocation4 + $0x50] sm:$0xff]  ;;  %17962 = vst [vmem:[#allocation153_spill] sm:$0xff] %v15452_v21 }
 0x172   : > { %2224 = vmatprep.subr.bf16.mxu1 %v15421_v41  ;;  %v15448_v41 = vcombine.low %v652_v48, %v664_v26  ;;  %17963 = vst [vmem:[#allocation154_spill] sm:$0xff] %v15454_v11  ;;  %v522_v48 = vld [vmem:[#allocation4 + $0x170] sm:$0xff] }
 0x174   : > { %2182 = vmatpush1.bf16.msra.mxu0 %v15424_v7  ;;  %17961 = vst [vmem:[#allocation152_spill] sm:$0xff] %v15448_v41  ;;  %v498_v7 = vld [vmem:[#allocation4 + $0xb0] sm:$0xff] }
 0x175   : > { %2225 = vmatpush1.bf16.msra.mxu1 %v15428_v9  ;;  %2183 = vmatprep.subr.bf16.mxu0 %v15430_v15  ;;  %v487_v15 = vld [vmem:[#allocation4 + $0x58] sm:$0xff]  ;;  %v14431_v9 = vld [vmem:[#allocation4 + $0x648] sm:$0xff]  ;;  %v15463_v27 = vcombine.high %v486_v55, %v498_v7 }
 0x176   : > { %2226 = vmatprep.subr.bf16.mxu1 %v15433_v60  ;;  %v499_v60 = vld [vmem:[#allocation4 + $0xb8] sm:$0xff] }
 0x177   : > { %17965 = vst [vmem:[#allocation156_spill] sm:$0xff] %v15463_v27  ;;  %v15467_v3 = vcombine.high %v487_v15, %v499_v60 }
 0x178   : > { %2184 = vmatpush1.bf16.msra.mxu0 %v15436_v59  ;;  %v14432_v59 = vld [vmem:[#allocation4 + $0x6a8] sm:$0x33] }
 0x179   : > { %2227 = vmatpush1.bf16.msra.mxu1 %v15440_v4  ;;  %2185 = vmatprep.subr.bf16.mxu0 %v15442_v51  ;;  %v15457_v26 = vcombine.high %v14431_v9, %v14432_v59  ;;  %17966 = vst [vmem:[#allocation157_spill] sm:$0xff] %v15467_v3  ;;  %v15470_v9 = vcombine.low %v486_v55, %v498_v7  ;;  %v534_v59 = vld [vmem:[#allocation4 + $0x1d0] sm:$0xff]  ;;  %v547_v51 = vld [vmem:[#allocation4 + $0x238] sm:$0xff] }
 0x17a   : > { %2228 = vmatprep.subr.bf16.mxu1 %v15445_v20  ;;  %v523_v20 = vld [vmem:[#allocation4 + $0x178] sm:$0xff]  ;;  %v15484_v55 = vcombine.low %v510_v14, %v522_v48  ;;  %v558_v7 = vld [vmem:[#allocation4 + $0x290] sm:$0xff] }
 0x17b   : > { %17964 = vst [vmem:[#allocation155_spill] sm:$0xff] %v15457_v26  ;;  %17967 = vst [vmem:[#allocation158_spill] sm:$0xff] %v15470_v9  ;;  %v15480_v4 = vcombine.high %v511_v16, %v523_v20 }
 0x17c   : > { %2186 = vmatpush1.bf16.msra.mxu0 %v15448_v41  ;;  %v535_v41 = vld [vmem:[#allocation4 + $0x1d8] sm:$0xff]  ;;  %17971 = vst [vmem:[#allocation162_spill] sm:$0xff] %v15484_v55 }
 0x17d   : > { %2229 = vmatpush1.bf16.msra.mxu1 %v15452_v21  ;;  %12592 = vmatprep.subr.msk.bf16.mxu0 %vm1754_vm0, %v15454_v11  ;;  %v546_v21 = vld [vmem:[#allocation4 + $0x230] sm:$0xff]  ;;  %v15474_v11 = vcombine.low %v487_v15, %v499_v60  ;;  %17970 = vst [vmem:[#allocation161_spill] sm:$0xff] %v15480_v4  ;;  %v15489_v60 = vcombine.low %v511_v16, %v523_v20 }
 0x17e   : > { %12594 = vmatprep.subr.msk.bf16.mxu1 %vm1754_vm0, %v15457_v26  ;;  %v15477_v26 = vcombine.high %v510_v14, %v522_v48  ;;  %v15491_v15 = vcombine.high %v534_v59, %v546_v21  ;;  %v15496_v14 = vcombine.high %v535_v41, %v547_v51  ;;  %v15500_v48 = vcombine.low %v534_v59, %v546_v21  ;;  %v594_v20 = vld [vmem:[#allocation4 + $0x3b0] sm:$0xff] }
 0x17f   : > { %17968 = vst [vmem:[#allocation159_spill] sm:$0xff] %v15474_v11  ;;  %17972 = vst [vmem:[#allocation163_spill] sm:$0xff] %v15489_v60  ;;  %v15504_v16 = vcombine.low %v535_v41, %v547_v51  ;;  %v606_v59 = vld [vmem:[#allocation4 + $0x410] sm:$0xff] }
 0x180   : > { %2188 = vmatpush1.bf16.msra.mxu0 %v15183_v54  ;;  %17969 = vst [vmem:[#allocation160_spill] sm:$0xff] %v15477_v26  ;;  %17973 = vst [vmem:[#allocation164_spill] sm:$0xff] %v15491_v15 }
 0x181   : > { %2231 = vmatpush1.bf16.msra.mxu1 %v15186_v37  ;;  %2257 = vmatprep.subr.bf16.mxu0 %v15463_v27  ;;  %v570_v27 = vld [vmem:[#allocation4 + $0x2f0] sm:$0xff]  ;;  %v571_v37 = vld [vmem:[#allocation4 + $0x2f8] sm:$0xff]  ;;  %17974 = vst [vmem:[#allocation165_spill] sm:$0xff] %v15496_v14  ;;  %17975 = vst [vmem:[#allocation166_spill] sm:$0xff] %v15500_v48 }
 0x182   : > { %2300 = vmatprep.subr.bf16.mxu1 %v15467_v3  ;;  %v559_v3 = vld [vmem:[#allocation4 + $0x298] sm:$0xff]  ;;  %17976 = vst [vmem:[#allocation167_spill] sm:$0xff] %v15504_v16  ;;  %v15512_v21 = vcombine.low %v558_v7, %v570_v27 }
 0x183   : > { %2204 = vmatmul.mubr.bf16.vlgmr.msra.gmra.mrb[16].mxu0 %v14967_v58  ;;  %v15509_v54 = vcombine.high %v559_v3, %v571_v37  ;;  %v15516_v41 = vcombine.low %v559_v3, %v571_v37 }
 0x184   : > { %2247 = vmatmul.mubr.bf16.vlgmr.msra.gmra.mrb[16].mxu1 %v14967_v58  ;;  %2258 = vmatpush1.bf16.msra.mxu0 %v15470_v9  ;;  %v15506_v9 = vcombine.high %v558_v7, %v570_v27  ;;  %17979 = vst [vmem:[#allocation170_spill] sm:$0xff] %v15512_v21  ;;  %v630_v7 = vld [vmem:[#allocation4 + $0x4d0] sm:$0xff] }
 0x185   : > { %12597 = vmatprep.mubr.msk.bf16.mxu0 %vm1750_vm5, %v14963_v52  ;;  %2301 = vmatpush1.bf16.msra.mxu1 %v15474_v11  ;;  %v582_v11 = vld [vmem:[#allocation4 + $0x350] sm:$0xff]  ;;  %17978 = vst [vmem:[#allocation169_spill] sm:$0xff] %v15509_v54  ;;  %17980 = vst [vmem:[#allocation171_spill] sm:$0xff] %v15516_v41 }
 0x186   : > { %12599 = vmatprep.mubr.msk.bf16.mxu1 %vm1750_vm5, %v14963_v52  ;;  %2259 = vmatprep.subr.bf16.mxu0 %v15477_v26  ;;  %17977 = vst [vmem:[#allocation168_spill] sm:$0xff] %v15506_v9  ;;  %v583_v52 = vld [vmem:[#allocation4 + $0x358] sm:$0xff]  ;;  %v15518_v51 = vcombine.high %v582_v11, %v594_v20  ;;  %v15524_v27 = vcombine.low %v582_v11, %v594_v20  ;;  %v654_v20 = vld [vmem:[#allocation4 + $0x590] sm:$0xff] }
 0x187   : > { %2302 = vmatprep.subr.bf16.mxu1 %v15480_v4  ;;  %v595_v26 = vld [vmem:[#allocation4 + $0x3b8] sm:$0xff]  ;;  %v15556_v4 = vpop.permute.xlu1 %14059 }
 0x188   : > { %2260 = vmatpush1.bf16.msra.mxu0 %v15484_v55  ;;  %v618_v55 = vld [vmem:[#allocation4 + $0x470] sm:$0xff]  ;;  %17981 = vst [vmem:[#allocation172_spill] sm:$0xff] %v15518_v51  ;;  %17983 = vst [vmem:[#allocation174_spill] sm:$0xff] %v15524_v27  ;;  %v15528_v37 = vcombine.low %v583_v52, %v595_v26 }
 0x189   : > { %2303 = vmatpush1.bf16.msra.mxu1 %v15489_v60  ;;  %2261 = vmatprep.subr.bf16.mxu0 %v15491_v15  ;;  %v607_v15 = vld [vmem:[#allocation4 + $0x418] sm:$0xff]  ;;  %v15530_v3 = vcombine.high %v606_v59, %v618_v55  ;;  %v15536_v11 = vcombine.low %v606_v59, %v618_v55  ;;  %v678_v59 = vld [vmem:[#allocation4 + $0x650] sm:$0xff] }
 0x18a   : > { %2304 = vmatprep.subr.bf16.mxu1 %v15496_v14  ;;  %v619_v60 = vld [vmem:[#allocation4 + $0x478] sm:$0xff]  ;;  %v15521_v14 = vcombine.high %v583_v52, %v595_v26  ;;  %17984 = vst [vmem:[#allocation175_spill] sm:$0xff] %v15528_v37 }
 0x18b   : > { %17985 = vst [vmem:[#allocation176_spill] sm:$0xff] %v15530_v3  ;;  %v15540_v26 = vcombine.low %v607_v15, %v619_v60 }
 0x18c   : > { %2262 = vmatpush1.bf16.msra.mxu0 %v15500_v48  ;;  %17982 = vst [vmem:[#allocation173_spill] sm:$0xff] %v15521_v14  ;;  %v642_v48 = vld [vmem:[#allocation4 + $0x530] sm:$0xff] }
 0x18d   : > { %2305 = vmatpush1.bf16.msra.mxu1 %v15504_v16  ;;  %2263 = vmatprep.subr.bf16.mxu0 %v15506_v9  ;;  %v631_v9 = vld [vmem:[#allocation4 + $0x4d8] sm:$0xff]  ;;  %17987 = vst [vmem:[#allocation178_spill] sm:$0xff] %v15540_v26  ;;  %v15542_v52 = vcombine.high %v630_v7, %v642_v48  ;;  %v15548_v55 = vcombine.low %v630_v7, %v642_v48 }
 0x18e   : > { %2306 = vmatprep.subr.bf16.mxu1 %v15509_v54  ;;  %v643_v16 = vld [vmem:[#allocation4 + $0x538] sm:$0xff]  ;;  %v15533_v54 = vcombine.high %v607_v15, %v619_v60 }
 0x18f   : > { %17988 = vst [vmem:[#allocation179_spill] sm:$0xff] %v15542_v52  ;;  %v15552_v60 = vcombine.low %v631_v9, %v643_v16 }
 0x190   : > { %2264 = vmatpush1.bf16.msra.mxu0 %v15512_v21  ;;  %17986 = vst [vmem:[#allocation177_spill] sm:$0xff] %v15533_v54  ;;  %v666_v21 = vld [vmem:[#allocation4 + $0x5f0] sm:$0xff] }
 0x191   : > { %2307 = vmatpush1.bf16.msra.mxu1 %v15516_v41  ;;  %2265 = vmatprep.subr.bf16.mxu0 %v15518_v51  ;;  %v655_v51 = vld [vmem:[#allocation4 + $0x598] sm:$0xff]  ;;  %v15554_v15 = vcombine.high %v654_v20, %v666_v21  ;;  %v15562_v48 = vcombine.low %v654_v20, %v666_v21 }
 0x192   : > { %2308 = vmatprep.subr.bf16.mxu1 %v15521_v14  ;;  %v667_v41 = vld [vmem:[#allocation4 + $0x5f8] sm:$0xff]  ;;  %v15545_v14 = vcombine.high %v631_v9, %v643_v16 }
 0x193   : > { %v15566_v9 = vcombine.low %v655_v51, %v667_v41 }
 0x194   : > { %2266 = vmatpush1.bf16.msra.mxu0 %v15524_v27  ;;  %17989 = vst [vmem:[#allocation180_spill] sm:$0xff] %v15545_v14  ;;  %v690_v27 = vld [vmem:[#allocation4 + $0x6b0] sm:$0x33] }
 0x195   : > { %2309 = vmatpush1.bf16.msra.mxu1 %v15528_v37  ;;  %2267 = vmatprep.subr.bf16.mxu0 %v15530_v3  ;;  %v679_v3 = vld [vmem:[#allocation4 + $0x658] sm:$0xff]  ;;  %v15568_v16 = vcombine.high %v678_v59, %v690_v27  ;;  %v12572_v7 = vcombine.low %v678_v59, %v690_v27 }
 0x196   : > { %2310 = vmatprep.subr.bf16.mxu1 %v15533_v54  ;;  %v691_v37 = vld [vmem:[#allocation4 + $0x6b8] sm:$0x33]  ;;  %v15559_v54 = vcombine.high %v655_v51, %v667_v41 }
 0x197   : > { %v15580_v21 = vsel %vm1754_vm0, %v12572_v7, 0  ;;  %v17999_v7 = vld [vmem:[#allocation29_spill] sm:$0xff] }
 0x198   : > { %2268 = vmatpush1.bf16.msra.mxu0 %v15536_v11 }
 0x199   : > { %2311 = vmatpush1.bf16.msra.mxu1 %v15540_v26  ;;  %2269 = vmatprep.subr.bf16.mxu0 %v15542_v52  ;;  %v15571_v52 = vcombine.high %v679_v3, %v691_v37  ;;  %v15573_v26 = vpop.permute.xlu1 %14069 }
 0x19a   : > { %2312 = vmatprep.subr.bf16.mxu1 %v15545_v14  ;;  %v12574_v14 = vcombine.low %v679_v3, %v691_v37  ;;  %v14072_v51 = vunpack.i.h.bf16 %v15573_v26  ;;  %v14071_v27 = vunpack.i.l.bf16 %v15573_v26  ;;  %v17998_v3 = vld [vmem:[#allocation28_spill] sm:$0xff] }
 0x19c   : > { %2270 = vmatpush1.bf16.msra.mxu0 %v15548_v55  ;;  %v15585_v41 = vsel %vm1754_vm0, %v12574_v14, 0  ;;  %v15593_v37 = vpack.c.bf16 %v14072_v51, %v14071_v27 }
 0x19d   : > { %2313 = vmatpush1.bf16.msra.mxu1 %v15552_v60  ;;  %2271 = vmatprep.subr.bf16.mxu0 %v15554_v15 }
 0x19e   : > { %2314 = vmatprep.subr.bf16.mxu1 %v15559_v54 }
 0x1a0   : > { %2272 = vmatpush1.bf16.msra.mxu0 %v15562_v48 }
 0x1a1   : > { %2315 = vmatpush1.bf16.msra.mxu1 %v15566_v9  ;;  %12596 = vmatprep.subr.msk.bf16.mxu0 %vm1754_vm0, %v15568_v16 }
 0x1a2   : > { %12598 = vmatprep.subr.msk.bf16.mxu1 %vm1754_vm0, %v15571_v52 }
 0x1a4   : > { %2274 = vmatpush1.bf16.msra.mxu0 %v15580_v21 }
 0x1a5   : > { %2317 = vmatpush1.bf16.msra.mxu1 %v15585_v41  ;;  %2348 = vmatprep.subr.bf16.mxu0 %v14815_v10  ;;  %v14055_v10 = vpop.permute.xlu0 %14054 }
 0x1a6   : > { %2391 = vmatprep.subr.bf16.mxu1 %v14828_v18  ;;  %v14056_v18 = vunpack.i.l.bf16 %v14055_v10 }
 0x1a7   : > { %2290 = vmatmul.mubr.bf16.vlgmr.msra.gmra.mrb[20].mxu0 %v14967_v58 }
 0x1a8   : > { %2333 = vmatmul.mubr.bf16.vlgmr.msra.gmra.mrb[20].mxu1 %v14967_v58  ;;  %2349 = vmatpush1.bf16.msra.mxu0 %v14817_v12  ;;  %v14057_v12 = vunpack.i.h.bf16 %v14055_v10  ;;  %v17997_v58 = vld [vmem:[#allocation26_spill] sm:$0xff]  ;;  %v18000_v10 = vld [vmem:[#allocation31_spill] sm:$0xff] }
 0x1a9   : > { %2392 = vmatpush1.bf16.msra.mxu1 %v14830_v19  ;;  %2350 = vmatprep.subr.bf16.mxu0 %v14833_v23  ;;  %v14062_v19 = vunpack.i.h.bf16 %v15556_v4  ;;  %v14061_v23 = vunpack.i.l.bf16 %v15556_v4 }
 0x1aa   : > { %2393 = vmatprep.subr.bf16.mxu1 %v14838_v28  ;;  %12601 = vmatprep.mubr.msk.bf16.mxu0 %vm1750_vm5, %v15593_v37  ;;  %v14433_v28 = vld [vmem:[%s14807_s18 + $0x11] ss:$2 sm:$0xf] }
 0x1ab   : > { %12603 = vmatprep.mubr.msk.bf16.mxu1 %vm1750_vm5, %v15593_v37 }
 0x1ac   : > { %2351 = vmatpush1.bf16.msra.mxu0 %v14835_v25  ;;  %v14065_v25 = vpop.permute.xlu0 %14064 }
 0x1ad   : > { %2394 = vmatpush1.bf16.msra.mxu1 %v14844_v32  ;;  %2352 = vmatprep.subr.bf16.mxu0 %v14840_v29  ;;  %v469_v29 = vsel %vm430_vm1, %v14433_v28, %v14057_v12  ;;  %v14434_v32 = vld [vmem:[%s14807_s18 + $0x1] ss:$2 sm:$0xff]  ;;  %s12251_s18 = sshll.u32 %s368_s21, 4  ;;  %s17587_s18 = int_to_ptr.vmem [resolvable:$true] %s12251_s18 }
 0x1ae   : > { %2395 = vmatprep.subr.bf16.mxu1 %v14849_v35  ;;  %v468_v35 = vsel %vm430_vm1, %v14434_v32, %v14056_v18  ;;  %v18004_v28 = vld [vmem:[#allocation19_spill] sm:$0xff]  ;;  %v18006_v32 = vld [vmem:[#allocation34_spill] sm:$0xff]  ;;  %vm3949_vm1 = vsmask.f32 2304  ;;  %s14520_s13 = scalar_lea.vmem %s17587_s18, 16  ;;  %p14527_p4 = scmp.lt.s32.totalorder %s17587_s18, %s14525_s27 }
 0x1af   : > { %p14521_p12 = scmp.ne.s32.totalorder %s17587_s18, %s14520_s13  ;;  %p14528_p7 = scmp.lt.s32.totalorder %s14526_s23, %s14520_s13 }
 0x1b0   : > { %2353 = vmatpush1.bf16.msra.mxu0 %v14853_v36  ;;  %v14067_v36 = vunpack.i.h.bf16 %v14065_v25 }
 0x1b1   : > { %2396 = vmatpush1.bf16.msra.mxu1 %v14859_v40  ;;  %2354 = vmatprep.subr.bf16.mxu0 %v14856_v39  ;;  %v14066_v39 = vunpack.i.l.bf16 %v14065_v25  ;;  %v17990_v40 = vld [vmem:[#allocation20_spill] sm:$0xff]  ;;  %v18003_v25 = vld [vmem:[#allocation18_spill] sm:$0xff]  ;;  %p14522_p2 = pnand %p14521_p12, %p18236_p1  ;;  %p14529_p8 = por %p14528_p7, %p14527_p4 }
 0x1b2   : > { %2397 = vmatprep.subr.bf16.mxu1 %v14862_v43  ;;  %v470_v43 = vsel %vm433_vm2, %v468_v35, %v14061_v23  ;;  %v18002_v23 = vld [vmem:[#allocation32_spill] sm:$0xff]  ;;  %v18007_v35 = vld [vmem:[#allocation35_spill] sm:$0xff] }
 0x1b3   : > { %p14523_p3 = pneg %p14522_p2 }
 0x1b4   : > { %2355 = vmatpush1.bf16.msra.mxu0 %v14865_v44  ;;  %v471_v44 = vsel %vm433_vm2, %v469_v29, %v14062_v19  ;;  %v18001_v19 = vld [vmem:[#allocation30_spill] sm:$0xff]  ;;  %v18005_v29 = vld [vmem:[#allocation33_spill] sm:$0xff] }
 0x1b5   : > { %2398 = vmatpush1.bf16.msra.mxu1 %v14871_v49  ;;  %2356 = vmatprep.subr.bf16.mxu0 %v14868_v47  ;;  %v17991_v47 = vld [vmem:[#allocation21_spill] sm:$0xff]  ;;  %v17992_v49 = vld [vmem:[#allocation23_spill] sm:$0xff]  ;;  %p14530_p11 = pnand %p14529_p8, %p14523_p3 }
 0x1b6   : > { %2399 = vmatprep.subr.bf16.mxu1 %v14874_v53  ;;  %v472_v53 = vsel %vm436_vm3, %v470_v43, %v14066_v39  ;;  %v18009_v39 = vld [vmem:[#allocation37_spill] sm:$0xff]  ;;  %v18011_v43 = vld [vmem:[#allocation39_spill] sm:$0xff] }
 0x1b8   : > { %2357 = vmatpush1.bf16.msra.mxu0 %v14879_v57  ;;  %v473_v57 = vsel %vm436_vm3, %v471_v44, %v14067_v36  ;;  %v18008_v36 = vld [vmem:[#allocation36_spill] sm:$0xff]  ;;  %vm4162_vm3 = vsmask.f32 7946 }
 0x1b9   : > { %2400 = vmatpush1.bf16.msra.mxu1 %v14887_v62  ;;  %2358 = vmatprep.subr.bf16.mxu0 %v14884_v61  ;;  %v17993_v61 = vld [vmem:[#allocation22_spill] sm:$0xff]  ;;  %v17994_v62 = vld [vmem:[#allocation24_spill] sm:$0xff] }
 0x1ba   : > { %2401 = vmatprep.subr.bf16.mxu1 %v14890_v1  ;;  %v474_v1 = vsel %vm439_vm4, %v472_v53, %v14071_v27  ;;  %v18012_v44 = vld [vmem:[#allocation40_spill] sm:$0xff]  ;;  %v18015_v53 = vld [vmem:[#allocation43_spill] sm:$0xff] }
 0x1bc   : > { %2359 = vmatpush1.bf16.msra.mxu0 %v14893_v2  ;;  %v475_v2 = vsel %vm439_vm4, %v473_v57, %v14072_v51  ;;  %v18016_v57 = vld [vmem:[#allocation44_spill] sm:$0xff] }
 0x1bd   : > { %2402 = vmatpush1.bf16.msra.mxu1 %v14899_v6  ;;  %2360 = vmatprep.subr.bf16.mxu0 %v14896_v5  ;;  %v17995_v5 = vld [vmem:[#allocation25_spill] sm:$0xff]  ;;  %v17996_v6 = vld [vmem:[#allocation27_spill] sm:$0xff]  ;;  %v15651_v20 = vpack.c.bf16 %v475_v2, %v474_v1  ;;  %v18020_v2 = vld [vmem:[#allocation48_spill] sm:$0xff] }
 0x1be   : > { %2403 = vmatprep.subr.bf16.mxu1 %v17990_v40  ;;  %v18010_v40 = vld [vmem:[#allocation38_spill] sm:$0xff]  ;;  %v18019_v1 = vld [vmem:[#allocation47_spill] sm:$0xff] }
 0x1c0   : > { %2361 = vmatpush1.bf16.msra.mxu0 %v17991_v47  ;;  %v18013_v47 = vld [vmem:[#allocation41_spill] sm:$0xff] }
 0x1c1   : > { %2404 = vmatpush1.bf16.msra.mxu1 %v17992_v49  ;;  %2362 = vmatprep.subr.bf16.mxu0 %v17993_v61  ;;  %v18014_v49 = vld [vmem:[#allocation42_spill] sm:$0xff]  ;;  %v18017_v61 = vld [vmem:[#allocation45_spill] sm:$0xff] }
 0x1c2   : > { %2405 = vmatprep.subr.bf16.mxu1 %v17994_v62  ;;  %v18018_v62 = vld [vmem:[#allocation46_spill] sm:$0xff] }
 0x1c4   : > { %2363 = vmatpush1.bf16.msra.mxu0 %v17995_v5  ;;  %v18021_v5 = vld [vmem:[#allocation49_spill] sm:$0xff] }
 0x1c5   : > { %2406 = vmatpush1.bf16.msra.mxu1 %v17996_v6  ;;  %12600 = vmatprep.subr.msk.bf16.mxu0 %vm1754_vm0, %v17997_v58  ;;  %v18022_v6 = vld [vmem:[#allocation50_spill] sm:$0xff]  ;;  %v18023_v58 = vld [vmem:[#allocation51_spill] sm:$0xff] }
 0x1c6   : > { %v15645_v4 = vpop.f32.mrb[0].mxu0  ;;  %v15647_v14 = vpop.f32.mrb[0].mxu1  ;;  %12602 = vmatprep.subr.msk.bf16.mxu1 %vm1754_vm0, %v17998_v3  ;;  %v18024_v3 = vld [vmem:[#allocation52_spill] sm:$0xff] }
 0x1c7   : > { %v15653_v26 = vpop.f32.mrb[1].mxu0  ;;  %v15655_v59 = vpop.f32.mrb[1].mxu1 }
 0x1c8   : > { %2365 = vmatpush1.bf16.msra.mxu0 %v17999_v7  ;;  %v15658_v51 = vpop.f32.mrb[2].mxu0  ;;  %v15660_v27 = vpop.f32.mrb[2].mxu1  ;;  %v18025_v7 = vld [vmem:[#allocation53_spill] sm:$0xff] }
 0x1c9   : > { %2408 = vmatpush1.bf16.msra.mxu1 %v18000_v10  ;;  %v15663_v12 = vpop.f32.mrb[3].mxu0  ;;  %v15665_v18 = vpop.f32.mrb[3].mxu1  ;;  %2434 = vmatprep.subr.bf16.mxu0 %v18001_v19  ;;  %v18026_v10 = vld [vmem:[#allocation54_spill] sm:$0xff]  ;;  %v18027_v19 = vld [vmem:[#allocation55_spill] sm:$0xff] }
 0x1ca   : > { %2477 = vmatprep.subr.bf16.mxu1 %v18002_v23  ;;  %v18028_v23 = vld [vmem:[#allocation56_spill] sm:$0xff] }
 0x1cb   : > { %2381 = vmatmul.mubr.bf16.vlgmr.msra.gmra.mrb[24].mxu0 %v15651_v20 }
 0x1cc   : > { %2424 = vmatmul.mubr.bf16.vlgmr.msra.gmra.mrb[24].mxu1 %v15651_v20  ;;  %2435 = vmatpush1.bf16.msra.mxu0 %v18003_v25  ;;  %v18029_v25 = vld [vmem:[#allocation57_spill] sm:$0xff] }
 0x1cd   : > { %12605 = vmatprep.mubr.msk.bf16.mxu0 %vm1750_vm5, %v15593_v37  ;;  %2478 = vmatpush1.bf16.msra.mxu1 %v18004_v28  ;;  %v18030_v28 = vld [vmem:[#allocation58_spill] sm:$0xff] }
 0x1ce   : > { %12607 = vmatprep.mubr.msk.bf16.mxu1 %vm1750_vm5, %v15593_v37  ;;  %2436 = vmatprep.subr.bf16.mxu0 %v18005_v29  ;;  %v18031_v29 = vld [vmem:[#allocation59_spill] sm:$0xff] }
 0x1cf   : > { %2479 = vmatprep.subr.bf16.mxu1 %v18006_v32  ;;  %v18032_v32 = vld [vmem:[#allocation60_spill] sm:$0xff] }
 0x1d0   : > { %2437 = vmatpush1.bf16.msra.mxu0 %v18007_v35  ;;  %v18033_v35 = vld [vmem:[#allocation61_spill] sm:$0xff] }
 0x1d1   : > { %2480 = vmatpush1.bf16.msra.mxu1 %v18008_v36  ;;  %2438 = vmatprep.subr.bf16.mxu0 %v18009_v39 }
 0x1d2   : > { %2481 = vmatprep.subr.bf16.mxu1 %v18010_v40  ;;  %v18034_v40 = vld [vmem:[#allocation62_spill] sm:$0xff] }
 0x1d4   : > { %2439 = vmatpush1.bf16.msra.mxu0 %v18011_v43 }
 0x1d5   : > { %2482 = vmatpush1.bf16.msra.mxu1 %v18012_v44  ;;  %2440 = vmatprep.subr.bf16.mxu0 %v18013_v47 }
 0x1d6   : > { %2483 = vmatprep.subr.bf16.mxu1 %v18014_v49 }
 0x1d8   : > { %2441 = vmatpush1.bf16.msra.mxu0 %v18015_v53  ;;  %v18035_v53 = vld [vmem:[#allocation63_spill] sm:$0xff] }
 0x1d9   : > { %2484 = vmatpush1.bf16.msra.mxu1 %v18016_v57  ;;  %2442 = vmatprep.subr.bf16.mxu0 %v18017_v61  ;;  %v18036_v57 = vld [vmem:[#allocation64_spill] sm:$0xff] }
 0x1da   : > { %2485 = vmatprep.subr.bf16.mxu1 %v18018_v62 }
 0x1dc   : > { %2443 = vmatpush1.bf16.msra.mxu0 %v18019_v1  ;;  %v18037_v1 = vld [vmem:[#allocation65_spill] sm:$0xff] }
 0x1dd   : > { %2486 = vmatpush1.bf16.msra.mxu1 %v18020_v2  ;;  %2444 = vmatprep.subr.bf16.mxu0 %v18021_v5  ;;  %v18038_v2 = vld [vmem:[#allocation66_spill] sm:$0xff]  ;;  %v18039_v5 = vld [vmem:[#allocation67_spill] sm:$0xff] }
 0x1de   : > { %2487 = vmatprep.subr.bf16.mxu1 %v18022_v6  ;;  %v18040_v6 = vld [vmem:[#allocation68_spill] sm:$0xff] }
 0x1e0   : > { %2445 = vmatpush1.bf16.msra.mxu0 %v18023_v58  ;;  %v18041_v58 = vld [vmem:[#allocation69_spill] sm:$0xff] }
 0x1e1   : > { %2488 = vmatpush1.bf16.msra.mxu1 %v18024_v3  ;;  %2446 = vmatprep.subr.bf16.mxu0 %v18025_v7  ;;  %v18042_v3 = vld [vmem:[#allocation70_spill] sm:$0xff]  ;;  %v18043_v7 = vld [vmem:[#allocation71_spill] sm:$0xff] }
 0x1e2   : > { %2489 = vmatprep.subr.bf16.mxu1 %v18026_v10  ;;  %v18044_v10 = vld [vmem:[#allocation72_spill] sm:$0xff] }
 0x1e4   : > { %2447 = vmatpush1.bf16.msra.mxu0 %v18027_v19  ;;  %v18045_v19 = vld [vmem:[#allocation73_spill] sm:$0xff] }
 0x1e5   : > { %2490 = vmatpush1.bf16.msra.mxu1 %v18028_v23  ;;  %2448 = vmatprep.subr.bf16.mxu0 %v18029_v25  ;;  %v18046_v23 = vld [vmem:[#allocation74_spill] sm:$0xff]  ;;  %v18047_v25 = vld [vmem:[#allocation75_spill] sm:$0xff] }
 0x1e6   : > { %2491 = vmatprep.subr.bf16.mxu1 %v18030_v28  ;;  %v18048_v28 = vld [vmem:[#allocation76_spill] sm:$0xff] }
 0x1e8   : > { %2449 = vmatpush1.bf16.msra.mxu0 %v18031_v29  ;;  %v18049_v29 = vld [vmem:[#allocation77_spill] sm:$0xff] }
 0x1e9   : > { %2492 = vmatpush1.bf16.msra.mxu1 %v18032_v32  ;;  %12604 = vmatprep.subr.msk.bf16.mxu0 %vm1754_vm0, %v18033_v35  ;;  %v18050_v32 = vld [vmem:[#allocation78_spill] sm:$0xff]  ;;  %v18051_v35 = vld [vmem:[#allocation79_spill] sm:$0xff] }
 0x1ea   : > { %v15707_v36 = vpop.f32.mrb[4].mxu0  ;;  %v15709_v39 = vpop.f32.mrb[4].mxu1  ;;  %12606 = vmatprep.subr.msk.bf16.mxu1 %vm1754_vm0, %v18034_v40  ;;  %v18052_v40 = vld [vmem:[#allocation84_spill] sm:$0xff] }
 0x1eb   : > { %v15713_v43 = vpop.f32.mrb[5].mxu0  ;;  %v15715_v44 = vpop.f32.mrb[5].mxu1 }
 0x1ec   : > { %v15717_v47 = vpop.f32.mrb[6].mxu0  ;;  %v15719_v49 = vpop.f32.mrb[6].mxu1  ;;  %2451 = vmatpush1.bf16.msra.mxu0 %v18035_v53  ;;  %v18053_v53 = vld [vmem:[#allocation87_spill] sm:$0xff] }
 0x1ed   : > { %2494 = vmatpush1.bf16.msra.mxu1 %v18036_v57  ;;  %v15723_v61 = vpop.f32.mrb[7].mxu0  ;;  %v15725_v62 = vpop.f32.mrb[7].mxu1  ;;  %2520 = vmatprep.subr.bf16.mxu0 %v18037_v1  ;;  %v18054_v57 = vld [vmem:[#allocation88_spill] sm:$0xff]  ;;  %v18060_v1 = vld [vmem:[#allocation94_spill] sm:$0xff] }
 0x1ee   : > { %2563 = vmatprep.subr.bf16.mxu1 %v18038_v2  ;;  %v18061_v2 = vld [vmem:[#allocation95_spill] sm:$0xff] }
 0x1ef   : > { %2467 = vmatmul.mubr.bf16.vlgmr.msra.gmra.mrb[28].mxu0 %v15651_v20 }
 0x1f0   : > { %2510 = vmatmul.mubr.bf16.vlgmr.msra.gmra.mrb[28].mxu1 %v15651_v20  ;;  %2521 = vmatpush1.bf16.msra.mxu0 %v18039_v5 }
 0x1f1   : > { %12609 = vmatprep.mubr.msk.bf16.mxu0 %vm1750_vm5, %v15593_v37  ;;  %2564 = vmatpush1.bf16.msra.mxu1 %v18040_v6 }
 0x1f2   : > { %12611 = vmatprep.mubr.msk.bf16.mxu1 %vm1750_vm5, %v15593_v37  ;;  %2522 = vmatprep.subr.bf16.mxu0 %v18041_v58 }
 0x1f3   : > { %2565 = vmatprep.subr.bf16.mxu1 %v18042_v3  ;;  %v18063_v3 = vld [vmem:[#allocation80_spill] sm:$0xff] }
 0x1f4   : > { %2523 = vmatpush1.bf16.msra.mxu0 %v18043_v7 }
 0x1f5   : > { %2566 = vmatpush1.bf16.msra.mxu1 %v18044_v10  ;;  %2524 = vmatprep.subr.bf16.mxu0 %v18045_v19  ;;  %v18064_v10 = vld [vmem:[#allocation81_spill] sm:$0xff] }
 0x1f6   : > { %2567 = vmatprep.subr.bf16.mxu1 %v18046_v23  ;;  %v18065_v23 = vld [vmem:[#allocation97_spill] sm:$0xff] }
 0x1f8   : > { %2525 = vmatpush1.bf16.msra.mxu0 %v18047_v25 }
 0x1f9   : > { %2568 = vmatpush1.bf16.msra.mxu1 %v18048_v28  ;;  %2526 = vmatprep.subr.bf16.mxu0 %v18049_v29  ;;  %v18066_v28 = vld [vmem:[#allocation98_spill] sm:$0xff]  ;;  %v18067_v29 = vld [vmem:[#allocation99_spill] sm:$0xff] }
 0x1fa   : > { %2569 = vmatprep.subr.bf16.mxu1 %v15139_v13  ;;  %v18055_v13 = vld [vmem:[#allocation89_spill] sm:$0xff] }
 0x1fc   : > { %2527 = vmatpush1.bf16.msra.mxu0 %v15146_v8  ;;  %v18056_v8 = vld [vmem:[#allocation90_spill] sm:$0xff] }
 0x1fd   : > { %2570 = vmatpush1.bf16.msra.mxu1 %v15148_v22  ;;  %2528 = vmatprep.subr.bf16.mxu0 %v18050_v32  ;;  %v18057_v22 = vld [vmem:[#allocation91_spill] sm:$0xff]  ;;  %v18068_v32 = vld [vmem:[#allocation100_spill] sm:$0xff] }
 0x1fe   : > { %2571 = vmatprep.subr.bf16.mxu1 %v18051_v35  ;;  %v18069_v35 = vld [vmem:[#allocation101_spill] sm:$0xff] }
 0x200   : > { %2529 = vmatpush1.bf16.msra.mxu0 %v15168_v46  ;;  %v18058_v46 = vld [vmem:[#allocation92_spill] sm:$0xff] }
 0x201   : > { %2572 = vmatpush1.bf16.msra.mxu1 %v15178_v38  ;;  %2530 = vmatprep.subr.bf16.mxu0 %v18052_v40  ;;  %v18059_v38 = vld [vmem:[#allocation93_spill] sm:$0xff]  ;;  %v18070_v40 = vld [vmem:[#allocation102_spill] sm:$0xff] }
 0x202   : > { %2573 = vmatprep.subr.bf16.mxu1 %v18053_v53  ;;  %v18071_v53 = vld [vmem:[#allocation103_spill] sm:$0xff] }
 0x204   : > { %2531 = vmatpush1.bf16.msra.mxu0 %v18054_v57  ;;  %v18072_v57 = vld [vmem:[#allocation104_spill] sm:$0xff] }
 0x205   : > { %2574 = vmatpush1.bf16.msra.mxu1 %v15196_v56  ;;  %2532 = vmatprep.subr.bf16.mxu0 %v15198_v50  ;;  %v18062_v50 = vld [vmem:[#allocation96_spill] sm:$0xff] }
 0x206   : > { %2575 = vmatprep.subr.bf16.mxu1 %v15201_v63 }
 0x208   : > { %2533 = vmatpush1.bf16.msra.mxu0 %v18055_v13  ;;  %v18073_v13 = vld [vmem:[#allocation105_spill] sm:$0xff] }
 0x209   : > { %2576 = vmatpush1.bf16.msra.mxu1 %v18056_v8  ;;  %2534 = vmatprep.subr.bf16.mxu0 %v18057_v22  ;;  %v18074_v8 = vld [vmem:[#allocation106_spill] sm:$0xff]  ;;  %v18075_v22 = vld [vmem:[#allocation107_spill] sm:$0xff] }
 0x20a   : > { %2577 = vmatprep.subr.bf16.mxu1 %v18058_v46  ;;  %v18076_v46 = vld [vmem:[#allocation108_spill] sm:$0xff] }
 0x20c   : > { %2535 = vmatpush1.bf16.msra.mxu0 %v18059_v38  ;;  %v18077_v38 = vld [vmem:[#allocation109_spill] sm:$0xff] }
 0x20d   : > { %2578 = vmatpush1.bf16.msra.mxu1 %v18060_v1  ;;  %12608 = vmatprep.subr.msk.bf16.mxu0 %vm1754_vm0, %v18061_v2  ;;  %v18078_v1 = vld [vmem:[#allocation110_spill] sm:$0xff]  ;;  %v18079_v2 = vld [vmem:[#allocation111_spill] sm:$0xff] }
 0x20e   : > { %v15767_v56 = vpop.f32.mrb[8].mxu0  ;;  %12610 = vmatprep.subr.msk.bf16.mxu1 %vm1754_vm0, %v18062_v50  ;;  %v18081_v50 = vld [vmem:[#allocation113_spill] sm:$0xff] }
 0x20f   : > { %v15771_v63 = vpop.f32.mrb[8].mxu1  ;;  %v15773_v5 = vpop.f32.mrb[9].mxu0 }
 0x210   : > { %v15775_v6 = vpop.f32.mrb[9].mxu1  ;;  %v15777_v58 = vpop.f32.mrb[10].mxu0  ;;  %2537 = vmatpush1.bf16.msra.mxu0 %v18063_v3  ;;  %v18082_v3 = vld [vmem:[#allocation114_spill] sm:$0xff] }
 0x211   : > { %v15780_v7 = vpop.f32.mrb[10].mxu1  ;;  %2580 = vmatpush1.bf16.msra.mxu1 %v18064_v10  ;;  %v15783_v19 = vpop.f32.mrb[11].mxu0  ;;  %2606 = vmatprep.subr.bf16.mxu0 %v18065_v23  ;;  %v18083_v10 = vld [vmem:[#allocation115_spill] sm:$0xff]  ;;  %v18084_v23 = vld [vmem:[#allocation116_spill] sm:$0xff] }
 0x212   : > { %v15786_v25 = vpop.f32.mrb[11].mxu1  ;;  %2649 = vmatprep.subr.bf16.mxu1 %v18066_v28  ;;  %v18085_v28 = vld [vmem:[#allocation117_spill] sm:$0xff] }
 0x213   : > { %2553 = vmatmul.mubr.bf16.vlgmr.msra.gmra.mrb[32].mxu0 %v15651_v20 }
 0x214   : > { %2596 = vmatmul.mubr.bf16.vlgmr.msra.gmra.mrb[32].mxu1 %v15651_v20  ;;  %2607 = vmatpush1.bf16.msra.mxu0 %v18067_v29  ;;  %v18086_v29 = vld [vmem:[#allocation118_spill] sm:$0xff] }
 0x215   : > { %12613 = vmatprep.mubr.msk.bf16.mxu0 %vm1750_vm5, %v15593_v37  ;;  %2650 = vmatpush1.bf16.msra.mxu1 %v18068_v32  ;;  %v18087_v32 = vld [vmem:[#allocation119_spill] sm:$0xff] }
 0x216   : > { %12615 = vmatprep.mubr.msk.bf16.mxu1 %vm1750_vm5, %v15593_v37  ;;  %2608 = vmatprep.subr.bf16.mxu0 %v18069_v35  ;;  %v18090_v35 = vld [vmem:[#allocation122_spill] sm:$0xff] }
 0x217   : > { %2651 = vmatprep.subr.bf16.mxu1 %v15252_v17  ;;  %v18080_v17 = vld [vmem:[#allocation112_spill] sm:$0xff] }
 0x218   : > { %2609 = vmatpush1.bf16.msra.mxu0 %v18070_v40  ;;  %v18091_v40 = vld [vmem:[#allocation123_spill] sm:$0xff] }
 0x219   : > { %2652 = vmatpush1.bf16.msra.mxu1 %v18071_v53  ;;  %2610 = vmatprep.subr.bf16.mxu0 %v18072_v57 }
 0x21a   : > { %2653 = vmatprep.subr.bf16.mxu1 %v18073_v13 }
 0x21c   : > { %2611 = vmatpush1.bf16.msra.mxu0 %v18074_v8  ;;  %v18093_v8 = vld [vmem:[#allocation82_spill] sm:$0xff] }
 0x21d   : > { %2654 = vmatpush1.bf16.msra.mxu1 %v18075_v22  ;;  %2612 = vmatprep.subr.bf16.mxu0 %v18076_v46  ;;  %v18094_v46 = vld [vmem:[#allocation83_spill] sm:$0xff] }
 0x21e   : > { %2655 = vmatprep.subr.bf16.mxu1 %v18077_v38 }
 0x220   : > { %2613 = vmatpush1.bf16.msra.mxu0 %v18078_v1  ;;  %v18095_v1 = vld [vmem:[#allocation125_spill] sm:$0xff] }
 0x221   : > { %2656 = vmatpush1.bf16.msra.mxu1 %v18079_v2  ;;  %2614 = vmatprep.subr.bf16.mxu0 %v18080_v17  ;;  %v18096_v17 = vld [vmem:[#allocation126_spill] sm:$0xff] }
 0x222   : > { %2657 = vmatprep.subr.bf16.mxu1 %v18081_v50  ;;  %v18097_v50 = vld [vmem:[#allocation127_spill] sm:$0xff] }
 0x224   : > { %2615 = vmatpush1.bf16.msra.mxu0 %v15296_v30  ;;  %v18088_v30 = vld [vmem:[#allocation120_spill] sm:$0xff] }
 0x225   : > { %2658 = vmatpush1.bf16.msra.mxu1 %v15300_v24  ;;  %2616 = vmatprep.subr.bf16.mxu0 %v18082_v3  ;;  %v18089_v24 = vld [vmem:[#allocation121_spill] sm:$0xff]  ;;  %v18098_v3 = vld [vmem:[#allocation128_spill] sm:$0xff] }
 0x226   : > { %2659 = vmatprep.subr.bf16.mxu1 %v18083_v10  ;;  %v18099_v10 = vld [vmem:[#allocation129_spill] sm:$0xff] }
 0x228   : > { %2617 = vmatpush1.bf16.msra.mxu0 %v18084_v23  ;;  %v18100_v23 = vld [vmem:[#allocation130_spill] sm:$0xff] }
 0x229   : > { %2660 = vmatpush1.bf16.msra.mxu1 %v15312_v0  ;;  %2618 = vmatprep.subr.bf16.mxu0 %v15314_v42  ;;  %v18092_v42 = vld [vmem:[#allocation124_spill] sm:$0xff] }
 0x22a   : > { %2661 = vmatprep.subr.bf16.mxu1 %v15317_v45 }
 0x22c   : > { %2619 = vmatpush1.bf16.msra.mxu0 %v18085_v28  ;;  %v18101_v28 = vld [vmem:[#allocation131_spill] sm:$0xff] }
 0x22d   : > { %2662 = vmatpush1.bf16.msra.mxu1 %v18086_v29  ;;  %2620 = vmatprep.subr.bf16.mxu0 %v18087_v32  ;;  %v18102_v29 = vld [vmem:[#allocation132_spill] sm:$0xff]  ;;  %v18103_v32 = vld [vmem:[#allocation133_spill] sm:$0xff] }
 0x22e   : > { %2663 = vmatprep.subr.bf16.mxu1 %v18088_v30  ;;  %v18104_v30 = vld [vmem:[#allocation134_spill] sm:$0xff] }
 0x230   : > { %2621 = vmatpush1.bf16.msra.mxu0 %v18089_v24  ;;  %v18105_v24 = vld [vmem:[#allocation135_spill] sm:$0xff] }
 0x231   : > { %2664 = vmatpush1.bf16.msra.mxu1 %v18090_v35  ;;  %12612 = vmatprep.subr.msk.bf16.mxu0 %vm1754_vm0, %v18091_v40  ;;  %v18106_v35 = vld [vmem:[#allocation136_spill] sm:$0xff]  ;;  %v18107_v40 = vld [vmem:[#allocation137_spill] sm:$0xff] }
 0x232   : > { %v15827_v0 = vpop.f32.mrb[12].mxu0  ;;  %12614 = vmatprep.subr.msk.bf16.mxu1 %vm1754_vm0, %v18092_v42  ;;  %v18108_v42 = vld [vmem:[#allocation138_spill] sm:$0xff] }
 0x233   : > { %v15831_v45 = vpop.f32.mrb[12].mxu1  ;;  %v15833_v53 = vpop.f32.mrb[13].mxu0 }
 0x234   : > { %v15835_v57 = vpop.f32.mrb[13].mxu1  ;;  %v15837_v13 = vpop.f32.mrb[14].mxu0  ;;  %2623 = vmatpush1.bf16.msra.mxu0 %v18093_v8  ;;  %v18109_v8 = vld [vmem:[#allocation139_spill] sm:$0xff] }
 0x235   : > { %v15840_v22 = vpop.f32.mrb[14].mxu1  ;;  %2666 = vmatpush1.bf16.msra.mxu1 %v18094_v46  ;;  %v15843_v38 = vpop.f32.mrb[15].mxu0  ;;  %2692 = vmatprep.subr.bf16.mxu0 %v18095_v1  ;;  %v18111_v46 = vld [vmem:[#allocation141_spill] sm:$0xff]  ;;  %v18112_v1 = vld [vmem:[#allocation142_spill] sm:$0xff] }
 0x236   : > { %v15846_v2 = vpop.f32.mrb[15].mxu1  ;;  %2735 = vmatprep.subr.bf16.mxu1 %v18096_v17  ;;  %v18113_v17 = vld [vmem:[#allocation143_spill] sm:$0xff] }
 0x237   : > { %2639 = vmatmul.mubr.bf16.vlgmr.msra.gmra.mrb[36].mxu0 %v15651_v20 }
 0x238   : > { %2682 = vmatmul.mubr.bf16.vlgmr.msra.gmra.mrb[36].mxu1 %v15651_v20  ;;  %2693 = vmatpush1.bf16.msra.mxu0 %v18097_v50  ;;  %v18114_v50 = vld [vmem:[#allocation144_spill] sm:$0xff] }
 0x239   : > { %12617 = vmatprep.mubr.msk.bf16.mxu0 %vm1750_vm5, %v15593_v37  ;;  %2736 = vmatpush1.bf16.msra.mxu1 %v18098_v3  ;;  %v18115_v3 = vld [vmem:[#allocation145_spill] sm:$0xff] }
 0x23a   : > { %12619 = vmatprep.mubr.msk.bf16.mxu1 %vm1750_vm5, %v15593_v37  ;;  %2694 = vmatprep.subr.bf16.mxu0 %v18099_v10  ;;  %v18116_v10 = vld [vmem:[#allocation146_spill] sm:$0xff] }
 0x23b   : > { %2737 = vmatprep.subr.bf16.mxu1 %v15368_v33  ;;  %v18110_v33 = vld [vmem:[#allocation140_spill] sm:$0xff] }
 0x23c   : > { %2695 = vmatpush1.bf16.msra.mxu0 %v18100_v23  ;;  %v18117_v23 = vld [vmem:[#allocation147_spill] sm:$0xff] }
 0x23d   : > { %2738 = vmatpush1.bf16.msra.mxu1 %v18101_v28  ;;  %2696 = vmatprep.subr.bf16.mxu0 %v18102_v29  ;;  %v18118_v28 = vld [vmem:[#allocation148_spill] sm:$0xff]  ;;  %v18119_v29 = vld [vmem:[#allocation149_spill] sm:$0xff] }
 0x23e   : > { %2739 = vmatprep.subr.bf16.mxu1 %v18103_v32  ;;  %v18120_v32 = vld [vmem:[#allocation150_spill] sm:$0xff] }
 0x240   : > { %2697 = vmatpush1.bf16.msra.mxu0 %v18104_v30  ;;  %v18123_v30 = vld [vmem:[#allocation153_spill] sm:$0xff] }
 0x241   : > { %2740 = vmatpush1.bf16.msra.mxu1 %v18105_v24  ;;  %2698 = vmatprep.subr.bf16.mxu0 %v18106_v35  ;;  %v18124_v24 = vld [vmem:[#allocation154_spill] sm:$0xff] }
 0x242   : > { %2741 = vmatprep.subr.bf16.mxu1 %v18107_v40  ;;  %v18125_v40 = vld [vmem:[#allocation155_spill] sm:$0xff] }
 0x244   : > { %2699 = vmatpush1.bf16.msra.mxu0 %v18108_v42 }
 0x245   : > { %2742 = vmatpush1.bf16.msra.mxu1 %v18109_v8  ;;  %2700 = vmatprep.subr.bf16.mxu0 %v18110_v33 }
 0x246   : > { %2743 = vmatprep.subr.bf16.mxu1 %v18111_v46 }
 0x248   : > { %2701 = vmatpush1.bf16.msra.mxu0 %v15412_v34  ;;  %v18121_v34 = vld [vmem:[#allocation151_spill] sm:$0xff] }
 0x249   : > { %2744 = vmatpush1.bf16.msra.mxu1 %v15416_v31  ;;  %2702 = vmatprep.subr.bf16.mxu0 %v18112_v1  ;;  %v18122_v31 = vld [vmem:[#allocation152_spill] sm:$0xff]  ;;  %v18130_v1 = vld [vmem:[#allocation85_spill] sm:$0xff] }
 0x24a   : > { %2745 = vmatprep.subr.bf16.mxu1 %v18113_v17 }
 0x24c   : > { %2703 = vmatpush1.bf16.msra.mxu0 %v18114_v50  ;;  %v18132_v50 = vld [vmem:[#allocation86_spill] sm:$0xff] }
 0x24d   : > { %2746 = vmatpush1.bf16.msra.mxu1 %v18115_v3  ;;  %2704 = vmatprep.subr.bf16.mxu0 %v18116_v10  ;;  %v18134_v10 = vld [vmem:[#allocation156_spill] sm:$0xff] }
 0x24e   : > { %2747 = vmatprep.subr.bf16.mxu1 %v18117_v23 }
 0x250   : > { %2705 = vmatpush1.bf16.msra.mxu0 %v18118_v28  ;;  %v18136_v28 = vld [vmem:[#allocation157_spill] sm:$0xff] }
 0x251   : > { %2748 = vmatpush1.bf16.msra.mxu1 %v18119_v29  ;;  %2706 = vmatprep.subr.bf16.mxu0 %v18120_v32  ;;  %v18137_v29 = vld [vmem:[#allocation158_spill] sm:$0xff]  ;;  %v18138_v32 = vld [vmem:[#allocation159_spill] sm:$0xff] }
 0x252   : > { %2749 = vmatprep.subr.bf16.mxu1 %v18121_v34  ;;  %v18139_v34 = vld [vmem:[#allocation160_spill] sm:$0xff] }
 0x254   : > { %2707 = vmatpush1.bf16.msra.mxu0 %v18122_v31  ;;  %v18140_v31 = vld [vmem:[#allocation161_spill] sm:$0xff] }
 0x255   : > { %2750 = vmatpush1.bf16.msra.mxu1 %v18123_v30  ;;  %12616 = vmatprep.subr.msk.bf16.mxu0 %vm1754_vm0, %v18124_v24  ;;  %v18141_v30 = vld [vmem:[#allocation162_spill] sm:$0xff]  ;;  %v18142_v24 = vld [vmem:[#allocation163_spill] sm:$0xff] }
 0x256   : > { %v15887_v35 = vpop.f32.mrb[16].mxu0  ;;  %12618 = vmatprep.subr.msk.bf16.mxu1 %vm1754_vm0, %v18125_v40  ;;  %v18143_v40 = vld [vmem:[#allocation164_spill] sm:$0xff] }
 0x257   : > { %v15891_v42 = vpop.f32.mrb[16].mxu1  ;;  %v15893_v8 = vpop.f32.mrb[17].mxu0 }
 0x258   : > { %18126 = vst [vmem:[#allocation20_spill] sm:$0xff] %v15891_v42  ;;  %18127 = vst [vmem:[#allocation21_spill] sm:$0xff] %v15893_v8  ;;  %v15895_v33 = vpop.f32.mrb[17].mxu1  ;;  %v15897_v46 = vpop.f32.mrb[18].mxu0  ;;  %2709 = vmatpush1.bf16.msra.mxu0 %v18130_v1  ;;  %v18144_v1 = vld [vmem:[#allocation165_spill] sm:$0xff] }
 0x259   : > { %18128 = vst [vmem:[#allocation23_spill] sm:$0xff] %v15895_v33  ;;  %18129 = vst [vmem:[#allocation22_spill] sm:$0xff] %v15897_v46  ;;  %v15900_v17 = vpop.f32.mrb[18].mxu1  ;;  %2752 = vmatpush1.bf16.msra.mxu1 %v18132_v50  ;;  %v15903_v3 = vpop.f32.mrb[19].mxu0  ;;  %2778 = vmatprep.subr.bf16.mxu0 %v18134_v10  ;;  %v18145_v50 = vld [vmem:[#allocation166_spill] sm:$0xff]  ;;  %v18146_v10 = vld [vmem:[#allocation167_spill] sm:$0xff] }
 0x25a   : > { %18131 = vst [vmem:[#allocation24_spill] sm:$0xff] %v15900_v17  ;;  %18133 = vst [vmem:[#allocation25_spill] sm:$0xff] %v15903_v3  ;;  %v15906_v23 = vpop.f32.mrb[19].mxu1  ;;  %2821 = vmatprep.subr.bf16.mxu1 %v18136_v28  ;;  %v18147_v28 = vld [vmem:[#allocation168_spill] sm:$0xff]  ;;  %v3109_v3 = vld [vmem:[#allocation2 + $0x20] sm:$0x1] }
 0x25b   : > { %18135 = vst [vmem:[#allocation27_spill] sm:$0xff] %v15906_v23  ;;  %2725 = vmatmul.mubr.bf16.vlgmr.msra.gmra.mrb[40].mxu0 %v15651_v20  ;;  %v3106_v23 = vld [vmem:[#allocation2 + $0x18] sm:$0x1]  ;;  %v3112_v17 = vld [vmem:[#allocation2 + $0x28] sm:$0x1] }
 0x25c   : > { %2768 = vmatmul.mubr.bf16.vlgmr.msra.gmra.mrb[40].mxu1 %v15651_v20  ;;  %2779 = vmatpush1.bf16.msra.mxu0 %v18137_v29  ;;  %v18148_v29 = vld [vmem:[#allocation169_spill] sm:$0xff]  ;;  %v3115_v46 = vld [vmem:[#allocation2 + $0x30] sm:$0x1]  ;;  %v3124_v8 = vld [vmem:[#allocation2 + $0x48] sm:$0x1] }
 0x25d   : > { %12621 = vmatprep.mubr.msk.bf16.mxu0 %vm1750_vm5, %v15593_v37  ;;  %2822 = vmatpush1.bf16.msra.mxu1 %v18138_v32  ;;  %v18150_v32 = vld [vmem:[#allocation171_spill] sm:$0xff]  ;;  %v3130_v42 = vld [vmem:[#allocation2 + $0x58] sm:$0x1] }
 0x25e   : > { %12623 = vmatprep.mubr.msk.bf16.mxu1 %vm1750_vm5, %v15593_v37  ;;  %2780 = vmatprep.subr.bf16.mxu0 %v18139_v34  ;;  %v18149_v37 = vld [vmem:[#allocation170_spill] sm:$0xff]  ;;  %v18151_v34 = vld [vmem:[#allocation172_spill] sm:$0xff]  ;;  %vm4375_vm5 = vcmask 1043459  }
 0x25f   : > { %2823 = vmatprep.subr.bf16.mxu1 %v18140_v31  ;;  %v18152_v31 = vld [vmem:[#allocation173_spill] sm:$0xff]  ;;  %vm16445_vm7 = vmand %vm4375_vm5, %vm4376_vm6 }
 0x260   : > { %2781 = vmatpush1.bf16.msra.mxu0 %v18141_v30  ;;  %v18153_v30 = vld [vmem:[#allocation174_spill] sm:$0xff]  ;;  %vm16518_vm11 = vmand %vm4375_vm5, %vm4589_vm9 }
 0x261   : > { %2824 = vmatpush1.bf16.msra.mxu1 %v18142_v24  ;;  %2782 = vmatprep.subr.bf16.mxu0 %v18143_v40  ;;  %v18154_v24 = vld [vmem:[#allocation175_spill] sm:$0xff]  ;;  %v18155_v40 = vld [vmem:[#allocation176_spill] sm:$0xff] }
 0x262   : > { %2825 = vmatprep.subr.bf16.mxu1 %v18144_v1  ;;  %v18156_v1 = vld [vmem:[#allocation177_spill] sm:$0xff] }
 0x264   : > { %2783 = vmatpush1.bf16.msra.mxu0 %v18145_v50  ;;  %v18157_v50 = vld [vmem:[#allocation178_spill] sm:$0xff] }
 0x265   : > { %2826 = vmatpush1.bf16.msra.mxu1 %v18146_v10  ;;  %2784 = vmatprep.subr.bf16.mxu0 %v18147_v28  ;;  %v18158_v10 = vld [vmem:[#allocation179_spill] sm:$0xff]  ;;  %v18159_v28 = vld [vmem:[#allocation180_spill] sm:$0xff] }
 0x266   : > { %2827 = vmatprep.subr.bf16.mxu1 %v18148_v29 }
 0x268   : > { %2785 = vmatpush1.bf16.msra.mxu0 %v18149_v37 }
 0x269   : > { %2828 = vmatpush1.bf16.msra.mxu1 %v18150_v32  ;;  %2786 = vmatprep.subr.bf16.mxu0 %v18151_v34  ;;  %v14603_v34 = vmov 1966171168  }
 0x26a   : > { %2829 = vmatprep.subr.bf16.mxu1 %v18152_v31  ;;  %v2929_v31 = vunpack.c.l.s4 %v14603_v34 }
 0x26c   : > { %2787 = vmatpush1.bf16.msra.mxu0 %v18153_v30 }
 0x26d   : > { %2830 = vmatpush1.bf16.msra.mxu1 %v18154_v24  ;;  %2788 = vmatprep.subr.bf16.mxu0 %v18155_v40  ;;  %v2931_v40 = vlaneseq }
 0x26e   : > { %2831 = vmatprep.subr.bf16.mxu1 %v18156_v1  ;;  %v15975_v1 = vld [vmem:[%s17629_s2] ss:$0 sm:$0xff] }
 0x270   : > { %2789 = vmatpush1.bf16.msra.mxu0 %v15536_v11 }
 0x271   : > { %2832 = vmatpush1.bf16.msra.mxu1 %v18157_v50  ;;  %2790 = vmatprep.subr.bf16.mxu0 %v18158_v10 }
 0x272   : > { %2833 = vmatprep.subr.bf16.mxu1 %v18159_v28 }
 0x274   : > { %2791 = vmatpush1.bf16.msra.mxu0 %v15548_v55 }
 0x275   : > { %2834 = vmatpush1.bf16.msra.mxu1 %v15552_v60  ;;  %2792 = vmatprep.subr.bf16.mxu0 %v15554_v15 }
 0x276   : > { %2835 = vmatprep.subr.bf16.mxu1 %v15559_v54 }
 0x278   : > { %2793 = vmatpush1.bf16.msra.mxu0 %v15562_v48 }
 0x279   : > { %2836 = vmatpush1.bf16.msra.mxu1 %v15566_v9  ;;  %12620 = vmatprep.subr.msk.bf16.mxu0 %vm1754_vm0, %v15568_v16 }
 0x27a   : > { %v15947_v11 = vpop.f32.mrb[20].mxu0  ;;  %12622 = vmatprep.subr.msk.bf16.mxu1 %vm1754_vm0, %v15571_v52  ;;  %vm3948_vm0 = vcmask 1042434  }
 0x27b   : > { %18160 = vst [vmem:[#allocation26_spill] sm:$0xff] %v15947_v11  ;;  %v15951_v29 = vpop.f32.mrb[20].mxu1  ;;  %v15953_v55 = vpop.f32.mrb[21].mxu0  ;;  %v3103_v11 = vld [vmem:[#allocation2 + $0x10] sm:$0x1]  ;;  %vm16292_vm2 = vmand %vm3948_vm0, %vm3949_vm1 }
 0x27c   : > { %18161 = vst [vmem:[#allocation28_spill] sm:$0xff] %v15951_v29  ;;  %18162 = vst [vmem:[#allocation29_spill] sm:$0xff] %v15953_v55  ;;  %v15955_v60 = vpop.f32.mrb[21].mxu1  ;;  %v15957_v15 = vpop.f32.mrb[22].mxu0  ;;  %2795 = vmatpush1.bf16.msra.mxu0 %v15580_v21 }
 0x27d   : > { %18163 = vst [vmem:[#allocation31_spill] sm:$0xff] %v15955_v60  ;;  %18164 = vst [vmem:[#allocation30_spill] sm:$0xff] %v15957_v15  ;;  %v15960_v54 = vpop.f32.mrb[22].mxu1  ;;  %2838 = vmatpush1.bf16.msra.mxu1 %v15585_v41  ;;  %v15963_v48 = vpop.f32.mrb[23].mxu0  ;;  %v14604_v15 = vmov 286326784  }
 0x27e   : > { %18165 = vst [vmem:[#allocation32_spill] sm:$0xff] %v15960_v54  ;;  %18166 = vst [vmem:[#allocation18_spill] sm:$0xff] %v15963_v48  ;;  %v15965_v9 = vpop.f32.mrb[23].mxu1  ;;  %v2932_v54 = vshrl.u32 %v2931_v40, 7 }
 0x27f   : > { %18167 = vst [vmem:[#allocation19_spill] sm:$0xff] %v15965_v9  ;;  %2811 = vmatmul.mubr.bf16.vlgmr.msra.gmra.mrb[44].mxu0 %v15651_v20  ;;  %vm16355_vm4 = vmand %vm3948_vm0, %vm4162_vm3  ;;  %vm5690_vm0 = vcmask 1046532  }
 0x280   : > { %2854 = vmatmul.mubr.bf16.vlgmr.msra.gmra.mrb[44].mxu1 %v15651_v20  ;;  %vm16921_vm3 = vmor %vm3949_vm1, %vm5760_vm14  ;;  %vm14606_vm1 = vmmov 0  }
 0x29e   : > { %v2382_v52 = vpop.f32.mrb[24].mxu0 }
 0x29f   : > { %v2864_v16 = vmax.f32 %v15645_v4, %v2382_v52  ;;  %v2425_v37 = vpop.f32.mrb[24].mxu1  ;;  %v2384_v32 = vpop.f32.mrb[25].mxu0 }
 0x2a0   : > { %v2866_v21 = vmax.f32 %v15647_v14, %v2425_v37  ;;  %v2865_v30 = vmax.f32 %v15653_v26, %v2384_v32  ;;  %v2427_v41 = vpop.f32.mrb[25].mxu1  ;;  %v2386_v24 = vpop.f32.mrb[26].mxu0  ;;  %v2930_v32 = vunpack.c.0.s8 %v2929_v31 }
 0x2a1   : > { %v2867_v20 = vmax.f32 %v15655_v59, %v2427_v41  ;;  %v2888_v4 = vmax.f32 %v15658_v51, %v2386_v24  ;;  %v2429_v50 = vpop.f32.mrb[26].mxu1  ;;  %v2388_v10 = vpop.f32.mrb[27].mxu0  ;;  %v2999_v59 = vunpack.c.l.s4 %v14604_v15 }
 0x2a2   : > { %v2913_v28 = vmax.f32 %v2864_v16, %v2865_v30  ;;  %v2890_v52 = vmax.f32 %v15660_v27, %v2429_v50  ;;  %v2889_v14 = vmax.f32 %v15663_v12, %v2388_v10  ;;  %v2431_v26 = vpop.f32.mrb[27].mxu1  ;;  %v15986_v24 = vsub.s32 %v2930_v32, %v2932_v54 }
 0x2a3   : > { %v3133_v37 = vmax.f32 %v2866_v21, %v2867_v20  ;;  %v2891_v34 = vmax.f32 %v15665_v18, %v2431_v26  ;;  %v3000_v31 = vunpack.c.0.s8 %v2999_v59 }
 0x2a4   : > { %v2921_v9 = vadd.f32 %v15975_v1, %v2913_v28  ;;  %v2914_v48 = vmax.f32 %v2888_v4, %v2889_v14 }
 0x2a5   : > { %v3135_v51 = vadd.f32 %v15975_v1, %v3133_v37  ;;  %v3134_v41 = vmax.f32 %v2890_v52, %v2891_v34  ;;  %v15990_v28 = vsub.s32 %v3000_v31, %v2932_v54 }
 0x2a6   : > { %v2922_v16 = vadd.f32 %v15975_v1, %v2914_v48  ;;  %v2923_v30 = vmax.f32 %v2921_v9, 0.0 }
 0x2a7   : > { %v3136_v27 = vadd.f32 %v15975_v1, %v3134_v41  ;;  %v3137_v21 = vmax.f32 %v3135_v51, 0.0 }
 0x2a8   : > { %v2924_v12 = vmax.f32 %v2922_v16, 0.0 }
 0x2a9   : > { %v3138_v18 = vmax.f32 %v3136_v27, 0.0 }
 0x2aa   : > { %v2925_v20 = vpack.c.bf16 %v2924_v12, %v2923_v30  ;;  %v12625_v50 = vpack.c.bf16 %v2924_v12, %v2924_v12 }
 0x2ab   : > { %v3139_v4 = vpack.c.bf16 %v3138_v18, %v3137_v21  ;;  %v12632_v40 = vpack.c.bf16 %v3138_v18, %v3138_v18 }
 0x2ac   : > { %v2934_v15 = vrot.slane %v2925_v20, %v15986_v24  ;;  %v2941_v10 = vrot.slane %v12625_v50, %v15986_v24 }
 0x2ad   : > { %v3148_v48 = vrot.slane %v3139_v4, %v15986_v24  ;;  %v15994_v9 = vrot.slane %v12632_v40, %v15986_v24 }
 0x2ae   : > { %v2942_v52 = vcombine.high %v2934_v15, %v2934_v15  ;;  %v2943_v14 = vcombine.high %v2941_v10, %v2941_v10  ;;  %v2950_v26 = vrot.slane %v2934_v15, %v15986_v24  ;;  %v2957_v37 = vrot.slane %v2941_v10, %v15986_v24 }
 0x2af   : > { %v3156_v32 = vcombine.high %v3148_v48, %v3148_v48  ;;  %v16001_v54 = vrot.slane %v3148_v48, %v15986_v24  ;;  %v16005_v59 = vrot.slane %v15994_v9, %v15986_v24 }
 0x2b0   : > { %v2964_v51 = vrot.slane %v2942_v52, %v15986_v24  ;;  %v2971_v41 = vrot.slane %v2943_v14, %v15986_v24  ;;  %v2972_v16 = vcombine.high %v2950_v26, %v2950_v26  ;;  %v2975_v27 = vunpack.i.h.s16 %v2950_v26 }
 0x2b1   : > { %v2983_v30 = vunpack.i.h.s16 %v2957_v37  ;;  %v12626_v12 = vpack.i.b16 %v2950_v26, %v2950_v26  ;;  %v12630_v31 = vpack.i.b16 %v2957_v37, %v2957_v37  ;;  %v16010_v21 = vrot.slane %v3156_v32, %v15986_v24 }
 0x2b2   : > { %v2973_v18 = vcombine.high %v2964_v51, %v2964_v51  ;;  %v2977_v20 = vunpack.i.h.s16 %v2964_v51  ;;  %v2979_v50 = vunpack.i.h.s16 %v2972_v16  ;;  %v2985_v4 = vunpack.i.h.s16 %v2971_v41 }
 0x2b3   : > { %v2987_v40 = vpack.i.b16 %v2975_v27, %v2975_v27  ;;  %v12627_v15 = vpack.i.b16 %v2964_v51, %v2964_v51  ;;  %v12628_v10 = vpack.i.b16 %v2972_v16, %v2972_v16  ;;  %v2995_v48 = vpack.i.b16 %v2983_v30, %v2983_v30  ;;  %v3097_v27 = vld [vmem:[#allocation2] sm:$0x1]  ;;  %v3100_v51 = vld [vmem:[#allocation2 + $0x8] sm:$0x1] }
 0x2b4   : > { %v2981_v34 = vunpack.i.h.s16 %v2973_v18  ;;  %v2989_v52 = vpack.i.b16 %v2977_v20, %v2977_v20  ;;  %v2991_v60 = vpack.i.b16 %v2979_v50, %v2979_v50  ;;  %v12629_v14 = vpack.i.b16 %v2973_v18, %v2973_v18  ;;  %v3121_v16 = vld [vmem:[#allocation2 + $0x40] sm:$0x1] }
 0x2b5   : > { %v12631_v37 = vpack.i.b16 %v2971_v41, %v2971_v41  ;;  %v2997_v32 = vpack.i.b16 %v2985_v4, %v2985_v4  ;;  %v3004_v55 = vrot.slane %v12626_v12, %v15990_v28  ;;  %v3011_v29 = vrot.slane %v2987_v40, %v15990_v28 }
 0x2b6   : > { %v2993_v30 = vpack.i.b16 %v2981_v34, %v2981_v34  ;;  %v3018_v20 = vrot.slane %v12627_v15, %v15990_v28  ;;  %v3025_v18 = vrot.slane %v2989_v52, %v15990_v28  ;;  %v3032_v50 = vrot.slane %v12628_v10, %v15990_v28  ;;  %v3118_v34 = vld [vmem:[#allocation2 + $0x38] sm:$0x1] }
 0x2b7   : > { %v3039_v41 = vrot.slane %v2991_v60, %v15990_v28  ;;  %v3046_v12 = vrot.slane %v12629_v14, %v15990_v28  ;;  %v3060_v4 = vrot.slane %v12630_v31, %v15990_v28  ;;  %v3067_v40 = vrot.slane %v2995_v48, %v15990_v28  ;;  %v3127_v60 = vld [vmem:[#allocation2 + $0x50] sm:$0x1] }
 0x2b8   : > { %v3053_v15 = vrot.slane %v2993_v30, %v15990_v28  ;;  %v3074_v52 = vrot.slane %v12631_v37, %v15990_v28  ;;  %v3081_v10 = vrot.slane %v2997_v32, %v15990_v28  ;;  %v3098_v33 = vsel %vm16014_vm8, %v3004_v55, %v3097_v27 }
 0x2b9   : > { %3099 = vst [vmem:[#allocation2] sm:$0x1] %v3098_v33  ;;  %v3101_v31 = vsel %vm16014_vm8, %v3011_v29, %v3100_v51  ;;  %v3104_v48 = vsel %vm16014_vm8, %v3018_v20, %v3103_v11  ;;  %v3107_v14 = vsel %vm16014_vm8, %v3025_v18, %v3106_v23  ;;  %v3110_v37 = vsel %vm16014_vm8, %v3032_v50, %v3109_v3 }
 0x2ba   : > { %3102 = vst [vmem:[#allocation2 + $0x8] sm:$0x1] %v3101_v31  ;;  %3105 = vst [vmem:[#allocation2 + $0x10] sm:$0x1] %v3104_v48  ;;  %v3113_v55 = vsel %vm16014_vm8, %v3039_v41, %v3112_v17  ;;  %v3116_v33 = vsel %vm16014_vm8, %v3046_v12, %v3115_v46  ;;  %v3119_v29 = vsel %vm16014_vm8, %v3053_v15, %v3118_v34  ;;  %v3189_v51 = vunpack.i.h.s16 %v16001_v54 }
 0x2bb   : > { %3108 = vst [vmem:[#allocation2 + $0x18] sm:$0x1] %v3107_v14  ;;  %3111 = vst [vmem:[#allocation2 + $0x20] sm:$0x1] %v3110_v37  ;;  %v3122_v11 = vsel %vm16014_vm8, %v3060_v4, %v3121_v16  ;;  %v3125_v3 = vsel %vm16014_vm8, %v3067_v40, %v3124_v8  ;;  %v3128_v23 = vsel %vm16014_vm8, %v3074_v52, %v3127_v60  ;;  %v3191_v16 = vunpack.i.h.s16 %v16010_v21 }
 0x2bc   : > { %3114 = vst [vmem:[#allocation2 + $0x28] sm:$0x1] %v3113_v55  ;;  %3117 = vst [vmem:[#allocation2 + $0x30] sm:$0x1] %v3116_v33  ;;  %v3131_v17 = vsel %vm16014_vm8, %v3081_v10, %v3130_v42  ;;  %v18170_v46 = vcombine.high %v15994_v9, %v15994_v9  ;;  %v3186_v27 = vcombine.high %v16001_v54, %v16001_v54  ;;  %v3197_v42 = vunpack.i.h.s16 %v16005_v59 }
 0x2bd   : > { %3120 = vst [vmem:[#allocation2 + $0x38] sm:$0x1] %v3119_v29  ;;  %3123 = vst [vmem:[#allocation2 + $0x40] sm:$0x1] %v3122_v11  ;;  %v3187_v8 = vcombine.high %v16010_v21, %v16010_v21  ;;  %v12633_v9 = vpack.i.b16 %v16001_v54, %v16001_v54  ;;  %v12634_v20 = vpack.i.b16 %v16010_v21, %v16010_v21  ;;  %v18196_v54 = vld [vmem:[#allocation30_spill] sm:$0xff] }
 0x2be   : > { %v3185_v32 = vrot.slane %v18170_v46, %v15986_v24  ;;  %3126 = vst [vmem:[#allocation2 + $0x48] sm:$0x1] %v3125_v3  ;;  %3129 = vst [vmem:[#allocation2 + $0x50] sm:$0x1] %v3128_v23  ;;  %v3193_v18 = vunpack.i.h.s16 %v3186_v27  ;;  %v3201_v41 = vpack.i.b16 %v3189_v51, %v3189_v51  ;;  %v3203_v12 = vpack.i.b16 %v3191_v16, %v3191_v16 }
 0x2bf   : > { %3132 = vst [vmem:[#allocation2 + $0x58] sm:$0x1] %v3131_v17  ;;  %v3195_v50 = vunpack.i.h.s16 %v3187_v8  ;;  %v12635_v4 = vpack.i.b16 %v3186_v27, %v3186_v27  ;;  %v12636_v40 = vpack.i.b16 %v3187_v8, %v3187_v8  ;;  %v12637_v34 = vpack.i.b16 %v16005_v59, %v16005_v59 }
 0x2c0   : > { %v3199_v30 = vunpack.i.h.s16 %v3185_v32  ;;  %v3209_v15 = vpack.i.b16 %v3197_v42, %v3197_v42  ;;  %v3205_v52 = vpack.i.b16 %v3193_v18, %v3193_v18  ;;  %v12638_v60 = vpack.i.b16 %v3185_v32, %v3185_v32  ;;  %v3310_v21 = vld [vmem:[#allocation2] sm:$0x1] }
 0x2c1   : > { %v3207_v10 = vpack.i.b16 %v3195_v50, %v3195_v50  ;;  %v3218_v48 = vrot.slane %v12633_v9, %v15990_v28  ;;  %v3225_v14 = vrot.slane %v3201_v41, %v15990_v28  ;;  %v3232_v37 = vrot.slane %v12634_v20, %v15990_v28  ;;  %v3313_v55 = vld [vmem:[#allocation2 + $0x8] sm:$0x1]  ;;  %v3316_v33 = vld [vmem:[#allocation2 + $0x10] sm:$0x1] }
 0x2c2   : > { %v3211_v31 = vpack.i.b16 %v3199_v30, %v3199_v30  ;;  %v3239_v59 = vrot.slane %v3203_v12, %v15990_v28  ;;  %v3319_v29 = vld [vmem:[#allocation2 + $0x18] sm:$0x1]  ;;  %v3246_v11 = vrot.slane %v12635_v4, %v15990_v28  ;;  %v3253_v3 = vrot.slane %v3205_v52, %v15990_v28  ;;  %v3322_v46 = vld [vmem:[#allocation2 + $0x20] sm:$0x1] }
 0x2c3   : > { %v3260_v23 = vrot.slane %v12636_v40, %v15990_v28  ;;  %v3267_v17 = vrot.slane %v3207_v10, %v15990_v28  ;;  %v3325_v32 = vld [vmem:[#allocation2 + $0x28] sm:$0x1]  ;;  %v3328_v27 = vld [vmem:[#allocation2 + $0x30] sm:$0x1]  ;;  %v3274_v8 = vrot.slane %v12637_v34, %v15990_v28  ;;  %v3281_v51 = vrot.slane %v3209_v15, %v15990_v28  ;;  %v2468_v34 = vpop.f32.mrb[28].mxu0  ;;  %v2511_v15 = vpop.f32.mrb[28].mxu1 }
 0x2c4   : > { %v3288_v16 = vrot.slane %v12638_v60, %v15990_v28  ;;  %v3295_v42 = vrot.slane %v3211_v31, %v15990_v28  ;;  %v3331_v30 = vld [vmem:[#allocation2 + $0x38] sm:$0x1]  ;;  %v3334_v9 = vld [vmem:[#allocation2 + $0x40] sm:$0x1]  ;;  %v3311_v18 = vsel %vm16073_vm10, %v3218_v48, %v3310_v21  ;;  %v3314_v50 = vsel %vm16073_vm10, %v3225_v14, %v3313_v55  ;;  %v2470_v21 = vpop.f32.mrb[29].mxu0  ;;  %v2513_v48 = vpop.f32.mrb[29].mxu1 }
 0x2c5   : > { %v3337_v20 = vld [vmem:[#allocation2 + $0x48] sm:$0x1]  ;;  %v3317_v41 = vsel %vm16073_vm10, %v3232_v37, %v3316_v33  ;;  %v3320_v12 = vsel %vm16073_vm10, %v3239_v59, %v3319_v29  ;;  %v3340_v4 = vld [vmem:[#allocation2 + $0x50] sm:$0x1]  ;;  %3312 = vst [vmem:[#allocation2] sm:$0x1] %v3311_v18  ;;  %v3323_v52 = vsel %vm16073_vm10, %v3246_v11, %v3322_v46  ;;  %v3326_v10 = vsel %vm16073_vm10, %v3253_v3, %v3325_v32 }
 0x2c6   : > { %v3343_v40 = vld [vmem:[#allocation2 + $0x58] sm:$0x1]  ;;  %3315 = vst [vmem:[#allocation2 + $0x8] sm:$0x1] %v3314_v50  ;;  %3318 = vst [vmem:[#allocation2 + $0x10] sm:$0x1] %v3317_v41  ;;  %v3329_v60 = vsel %vm16073_vm10, %v3260_v23, %v3328_v27  ;;  %v3332_v31 = vsel %vm16073_vm10, %v3267_v17, %v3331_v30  ;;  %v3335_v14 = vsel %vm16073_vm10, %v3274_v8, %v3334_v9 }
 0x2c7   : > { %3321 = vst [vmem:[#allocation2 + $0x18] sm:$0x1] %v3320_v12  ;;  %3324 = vst [vmem:[#allocation2 + $0x20] sm:$0x1] %v3323_v52  ;;  %v3338_v37 = vsel %vm16073_vm10, %v3281_v51, %v3337_v20  ;;  %v3341_v59 = vsel %vm16073_vm10, %v3288_v16, %v3340_v4  ;;  %v3344_v55 = vsel %vm16073_vm10, %v3295_v42, %v3343_v40  ;;  %v2472_v33 = vpop.f32.mrb[30].mxu0  ;;  %v2515_v29 = vpop.f32.mrb[30].mxu1 }
 0x2c8   : > { %3327 = vst [vmem:[#allocation2 + $0x28] sm:$0x1] %v3326_v10  ;;  %3330 = vst [vmem:[#allocation2 + $0x30] sm:$0x1] %v3329_v60  ;;  %v2868_v11 = vmax.f32 %v15707_v36, %v2468_v34  ;;  %v2870_v3 = vmax.f32 %v15709_v39, %v2511_v15  ;;  %v2869_v23 = vmax.f32 %v15713_v43, %v2470_v21  ;;  %v2474_v46 = vpop.f32.mrb[31].mxu0  ;;  %v2517_v32 = vpop.f32.mrb[31].mxu1 }
 0x2c9   : > { %3333 = vst [vmem:[#allocation2 + $0x38] sm:$0x1] %v3332_v31  ;;  %3336 = vst [vmem:[#allocation2 + $0x40] sm:$0x1] %v3335_v14  ;;  %v2871_v17 = vmax.f32 %v15715_v44, %v2513_v48  ;;  %v2892_v27 = vmax.f32 %v15717_v47, %v2472_v33  ;;  %v2894_v8 = vmax.f32 %v15719_v49, %v2515_v29 }
 0x2ca   : > { %3339 = vst [vmem:[#allocation2 + $0x48] sm:$0x1] %v3338_v37  ;;  %3342 = vst [vmem:[#allocation2 + $0x50] sm:$0x1] %v3341_v59  ;;  %v2893_v51 = vmax.f32 %v15723_v61, %v2474_v46  ;;  %v2895_v16 = vmax.f32 %v15725_v62, %v2517_v32  ;;  %v3346_v42 = vmax.f32 %v2868_v11, %v2869_v23  ;;  %v14073_v46 = vld [vmem:[#allocation7 + $0x40] sm:$0xff]  }
 0x2cb   : > { %3345 = vst [vmem:[#allocation2 + $0x58] sm:$0x1] %v3344_v55  ;;  %v3560_v30 = vmax.f32 %v2870_v3, %v2871_v17  ;;  %13230 = vmatprep.subr.bf16.mxu0 %v14073_v46  ;;  %v3545_v46 = vld [vmem:[#allocation2 + $0x38] sm:$0x2] }
 0x2cc   : > { %v3347_v9 = vmax.f32 %v2892_v27, %v2893_v51  ;;  %v3561_v36 = vmax.f32 %v2894_v8, %v2895_v16  ;;  %v3348_v39 = vadd.f32 %v15975_v1, %v3346_v42  ;;  %v14074_v16 = vld [vmem:[#allocation7] sm:$0xff]  }
 0x2cd   : > { %v3562_v43 = vadd.f32 %v15975_v1, %v3560_v30  ;;  %13231 = vmatpush3.bf16.msra.mxu0 %v14074_v16 }
 0x2ce   : > { %v3349_v44 = vadd.f32 %v15975_v1, %v3347_v9  ;;  %v3563_v20 = vadd.f32 %v15975_v1, %v3561_v36  ;;  %v3350_v18 = vmax.f32 %v3348_v39, 0.0 }
 0x2cf   : > { %v3564_v47 = vmax.f32 %v3562_v43, 0.0 }
 0x2d0   : > { %v3351_v50 = vmax.f32 %v3349_v44, 0.0  ;;  %v3565_v49 = vmax.f32 %v3563_v20, 0.0 }
 0x2d2   : > { %v3352_v41 = vpack.c.bf16 %v3351_v50, %v3350_v18  ;;  %v12639_v61 = vpack.c.bf16 %v3351_v50, %v3351_v50  ;;  %v3566_v12 = vpack.c.bf16 %v3565_v49, %v3564_v47  ;;  %v12646_v62 = vpack.c.bf16 %v3565_v49, %v3565_v49  ;;  %v3524_v47 = vld [vmem:[#allocation2] sm:$0x2]  ;;  %v3527_v50 = vld [vmem:[#allocation2 + $0x8] sm:$0x2] }
 0x2d4   : > { %v3361_v4 = vrot.slane %v3352_v41, %v15986_v24  ;;  %v3368_v40 = vrot.slane %v12639_v61, %v15986_v24  ;;  %v3575_v34 = vrot.slane %v3566_v12, %v15986_v24  ;;  %v16129_v15 = vrot.slane %v12646_v62, %v15986_v24  ;;  %v3530_v62 = vld [vmem:[#allocation2 + $0x10] sm:$0x2] }
 0x2d6   : > { %v3369_v52 = vcombine.high %v3361_v4, %v3361_v4  ;;  %v3370_v10 = vcombine.high %v3368_v40, %v3368_v40  ;;  %v3377_v60 = vrot.slane %v3361_v4, %v15986_v24  ;;  %v3384_v31 = vrot.slane %v3368_v40, %v15986_v24  ;;  %v3533_v4 = vld [vmem:[#allocation2 + $0x18] sm:$0x2]  ;;  %v14075_v40 = vld [vmem:[#allocation7 + $0x48] sm:$0xff]  }
 0x2d7   : > { %v3583_v21 = vcombine.high %v3575_v34, %v3575_v34  ;;  %v3584_v48 = vcombine.high %v16129_v15, %v16129_v15  ;;  %v16136_v14 = vrot.slane %v3575_v34, %v15986_v24  ;;  %v16140_v37 = vrot.slane %v16129_v15, %v15986_v24  ;;  %13232 = vmatprep.subr.bf16.mxu0 %v14075_v40 }
 0x2d8   : > { %v3391_v59 = vrot.slane %v3369_v52, %v15986_v24  ;;  %v3398_v55 = vrot.slane %v3370_v10, %v15986_v24  ;;  %v3399_v33 = vcombine.high %v3377_v60, %v3377_v60  ;;  %v3402_v29 = vunpack.i.h.s16 %v3377_v60 }
 0x2d9   : > { %v3410_v11 = vunpack.i.h.s16 %v3384_v31  ;;  %v12640_v3 = vpack.i.b16 %v3377_v60, %v3377_v60  ;;  %v12644_v23 = vpack.i.b16 %v3384_v31, %v3384_v31  ;;  %v16145_v17 = vrot.slane %v3583_v21, %v15986_v24  ;;  %v3536_v31 = vld [vmem:[#allocation2 + $0x20] sm:$0x2]  ;;  %v3539_v21 = vld [vmem:[#allocation2 + $0x28] sm:$0x2] }
 0x2da   : > { %v3400_v32 = vcombine.high %v3391_v59, %v3391_v59  ;;  %v3404_v27 = vunpack.i.h.s16 %v3391_v59  ;;  %v3406_v8 = vunpack.i.h.s16 %v3399_v33  ;;  %v3412_v51 = vunpack.i.h.s16 %v3398_v55 }
 0x2db   : > { %v3414_v42 = vpack.i.b16 %v3402_v29, %v3402_v29  ;;  %v12641_v30 = vpack.i.b16 %v3391_v59, %v3391_v59  ;;  %v12642_v9 = vpack.i.b16 %v3399_v33, %v3399_v33  ;;  %v16147_v36 = vpack.i.b16 %v3410_v11, %v3410_v11  ;;  %v14076_v59 = vld [vmem:[#allocation7 + $0x8] sm:$0xff]  }
 0x2dc   : > { %v3408_v39 = vunpack.i.h.s16 %v3400_v32  ;;  %v3416_v43 = vpack.i.b16 %v3404_v27, %v3404_v27  ;;  %v3418_v44 = vpack.i.b16 %v3406_v8, %v3406_v8  ;;  %v12643_v20 = vpack.i.b16 %v3400_v32, %v3400_v32  ;;  %v3548_v32 = vld [vmem:[#allocation2 + $0x40] sm:$0x2]  ;;  %13233 = vmatpush3.bf16.msra.mxu0 %v14076_v59 }
 0x2dd   : > { %v12645_v49 = vpack.i.b16 %v3398_v55, %v3398_v55  ;;  %v3424_v41 = vpack.i.b16 %v3412_v51, %v3412_v51  ;;  %v3431_v61 = vrot.slane %v12640_v3, %v15990_v28  ;;  %v3438_v12 = vrot.slane %v3414_v42, %v15990_v28  ;;  %v3542_v3 = vld [vmem:[#allocation2 + $0x30] sm:$0x2]  ;;  %v3551_v42 = vld [vmem:[#allocation2 + $0x48] sm:$0x2] }
 0x2de   : > { %v3420_v34 = vpack.i.b16 %v3408_v39, %v3408_v39  ;;  %v3445_v52 = vrot.slane %v12641_v30, %v15990_v28  ;;  %v3452_v10 = vrot.slane %v3416_v43, %v15990_v28  ;;  %v3459_v60 = vrot.slane %v12642_v9, %v15990_v28  ;;  %v3554_v30 = vld [vmem:[#allocation2 + $0x50] sm:$0x2]  ;;  %v3557_v9 = vld [vmem:[#allocation2 + $0x58] sm:$0x2] }
 0x2df   : > { %v3466_v55 = vrot.slane %v3418_v44, %v15990_v28  ;;  %v3473_v33 = vrot.slane %v12643_v20, %v15990_v28  ;;  %v3487_v29 = vrot.slane %v12644_v23, %v15990_v28  ;;  %v3494_v11 = vrot.slane %v16147_v36, %v15990_v28  ;;  %v14077_v44 = vld [vmem:[#allocation7 + $0x50] sm:$0xff]  }
 0x2e0   : > { %v3480_v27 = vrot.slane %v3420_v34, %v15990_v28  ;;  %v3501_v8 = vrot.slane %v12645_v49, %v15990_v28  ;;  %v3508_v51 = vrot.slane %v3424_v41, %v15990_v28  ;;  %v3525_v16 = vsel %vm16151_vm13, %v3431_v61, %v3524_v47  ;;  %v14078_v20 = vld [vmem:[#allocation7 + $0x10] sm:$0xff]   ;;  %v14079_v47 = vld [vmem:[#allocation7 + $0x58] sm:$0xff]   ;;  %13234 = vmatprep.subr.bf16.mxu0 %v14077_v44 }
 0x2e1   : > { %3526 = vst [vmem:[#allocation2] sm:$0x2] %v3525_v16  ;;  %v3528_v23 = vsel %vm16151_vm13, %v3438_v12, %v3527_v50  ;;  %v3531_v36 = vsel %vm16151_vm13, %v3445_v52, %v3530_v62  ;;  %v3534_v39 = vsel %vm16151_vm13, %v3452_v10, %v3533_v4  ;;  %v3537_v43 = vsel %vm16151_vm13, %v3459_v60, %v3536_v31  ;;  %v14080_v31 = vld [vmem:[#allocation7 + $0x18] sm:$0xff]  }
 0x2e2   : > { %3529 = vst [vmem:[#allocation2 + $0x8] sm:$0x2] %v3528_v23  ;;  %3532 = vst [vmem:[#allocation2 + $0x10] sm:$0x2] %v3531_v36  ;;  %v3540_v49 = vsel %vm16151_vm13, %v3466_v55, %v3539_v21  ;;  %v3543_v50 = vsel %vm16151_vm13, %v3473_v33, %v3542_v3  ;;  %v3546_v41 = vsel %vm16151_vm13, %v3480_v27, %v3545_v46  ;;  %v3616_v10 = vunpack.i.h.s16 %v16136_v14  ;;  %v14081_v55 = vld [vmem:[#allocation7 + $0x60] sm:$0xff]   ;;  %v14083_v36 = vld [vmem:[#allocation7 + $0x68] sm:$0xff]  }
 0x2e3   : > { %3535 = vst [vmem:[#allocation2 + $0x18] sm:$0x2] %v3534_v39  ;;  %3538 = vst [vmem:[#allocation2 + $0x20] sm:$0x2] %v3537_v43  ;;  %v3549_v61 = vsel %vm16151_vm13, %v3487_v29, %v3548_v32  ;;  %v3552_v12 = vsel %vm16151_vm13, %v3494_v11, %v3551_v42  ;;  %v3555_v62 = vsel %vm16151_vm13, %v3501_v8, %v3554_v30  ;;  %v3618_v60 = vunpack.i.h.s16 %v16145_v17  ;;  %v14082_v23 = vld [vmem:[#allocation7 + $0x20] sm:$0xff]  }
 0x2e4   : > { %3541 = vst [vmem:[#allocation2 + $0x28] sm:$0x2] %v3540_v49  ;;  %3544 = vst [vmem:[#allocation2 + $0x30] sm:$0x2] %v3543_v50  ;;  %v3558_v4 = vsel %vm16151_vm13, %v3508_v51, %v3557_v9  ;;  %v3612_v40 = vrot.slane %v3584_v48, %v15986_v24  ;;  %v3613_v34 = vcombine.high %v16136_v14, %v16136_v14  ;;  %13235 = vmatpush3.bf16.msra.mxu0 %v14078_v20 }
 0x2e5   : > { %3547 = vst [vmem:[#allocation2 + $0x38] sm:$0x2] %v3546_v41  ;;  %3550 = vst [vmem:[#allocation2 + $0x40] sm:$0x2] %v3549_v61  ;;  %v3614_v52 = vcombine.high %v16145_v17, %v16145_v17  ;;  %v3624_v21 = vunpack.i.h.s16 %v16140_v37  ;;  %v12647_v48 = vpack.i.b16 %v16136_v14, %v16136_v14  ;;  %v12648_v59 = vpack.i.b16 %v16145_v17, %v16145_v17 }
 0x2e6   : > { %3553 = vst [vmem:[#allocation2 + $0x48] sm:$0x2] %v3552_v12  ;;  %3556 = vst [vmem:[#allocation2 + $0x50] sm:$0x2] %v3555_v62  ;;  %v3626_v15 = vunpack.i.h.s16 %v3612_v40  ;;  %13236 = vmatprep.subr.bf16.mxu0 %v14079_v47  ;;  %v3620_v33 = vunpack.i.h.s16 %v3613_v34  ;;  %v3628_v11 = vpack.i.b16 %v3616_v10, %v3616_v10  ;;  %v3630_v3 = vpack.i.b16 %v3618_v60, %v3618_v60  ;;  %v16215_v9 = vpop.f32.mrb[32].mxu0 }
 0x2e7   : > { %3559 = vst [vmem:[#allocation2 + $0x58] sm:$0x2] %v3558_v4  ;;  %v3622_v29 = vunpack.i.h.s16 %v3614_v52  ;;  %v12649_v46 = vpack.i.b16 %v3613_v34, %v3613_v34  ;;  %v12650_v32 = vpack.i.b16 %v3614_v52, %v3614_v52  ;;  %v12651_v27 = vpack.i.b16 %v16140_v37, %v16140_v37 }
 0x2e8   : > { %v3636_v8 = vpack.i.b16 %v3624_v21, %v3624_v21  ;;  %v3632_v14 = vpack.i.b16 %v3620_v33, %v3620_v33  ;;  %v12652_v16 = vpack.i.b16 %v3612_v40, %v3612_v40  ;;  %v3638_v42 = vpack.i.b16 %v3626_v15, %v3626_v15  ;;  %v3737_v30 = vld [vmem:[#allocation2] sm:$0x2]  ;;  %13237 = vmatpush3.bf16.msra.mxu0 %v14080_v31 }
 0x2e9   : > { %v3634_v17 = vpack.i.b16 %v3622_v29, %v3622_v29  ;;  %v3645_v39 = vrot.slane %v12647_v48, %v15990_v28  ;;  %v3652_v37 = vrot.slane %v3628_v11, %v15990_v28  ;;  %v3659_v43 = vrot.slane %v12648_v59, %v15990_v28  ;;  %v3740_v20 = vld [vmem:[#allocation2 + $0x8] sm:$0x2]  ;;  %v3743_v47 = vld [vmem:[#allocation2 + $0x10] sm:$0x2]  ;;  %13238 = vmatprep.subr.bf16.mxu0 %v14081_v55 }
 0x2ea   : > { %v3666_v44 = vrot.slane %v3630_v3, %v15990_v28  ;;  %v3746_v49 = vld [vmem:[#allocation2 + $0x18] sm:$0x2]  ;;  %v3673_v50 = vrot.slane %v12649_v46, %v15990_v28  ;;  %v3680_v41 = vrot.slane %v3632_v14, %v15990_v28  ;;  %v3687_v61 = vrot.slane %v12650_v32, %v15990_v28  ;;  %v3749_v62 = vld [vmem:[#allocation2 + $0x20] sm:$0x2]  ;;  %v2597_v3 = vpop.f32.mrb[32].mxu1  ;;  %v2556_v46 = vpop.f32.mrb[33].mxu0 }
 0x2eb   : > { %v3694_v12 = vrot.slane %v3634_v17, %v15990_v28  ;;  %v3752_v4 = vld [vmem:[#allocation2 + $0x28] sm:$0x2]  ;;  %v3755_v40 = vld [vmem:[#allocation2 + $0x30] sm:$0x2]  ;;  %v3701_v34 = vrot.slane %v12651_v27, %v15990_v28  ;;  %v3708_v52 = vrot.slane %v3636_v8, %v15990_v28  ;;  %v3715_v10 = vrot.slane %v12652_v16, %v15990_v28  ;;  %v2599_v17 = vpop.f32.mrb[33].mxu1  ;;  %v2558_v16 = vpop.f32.mrb[34].mxu0 }
 0x2ec   : > { %v3722_v60 = vrot.slane %v3638_v42, %v15990_v28  ;;  %v3758_v31 = vld [vmem:[#allocation2 + $0x38] sm:$0x2]  ;;  %v3761_v21 = vld [vmem:[#allocation2 + $0x40] sm:$0x2]  ;;  %v3738_v48 = vsel %vm16211_vm15, %v3645_v39, %v3737_v30  ;;  %v3741_v59 = vsel %vm16211_vm15, %v3652_v37, %v3740_v20  ;;  %v3744_v55 = vsel %vm16211_vm15, %v3659_v43, %v3743_v47  ;;  %13239 = vmatpush3.bf16.msra.mxu0 %v14082_v23  ;;  %v2601_v37 = vpop.f32.mrb[34].mxu1  ;;  %v2560_v43 = vpop.f32.mrb[35].mxu0 }
 0x2ed   : > { %v3764_v15 = vld [vmem:[#allocation2 + $0x48] sm:$0x2]  ;;  %v3747_v33 = vsel %vm16211_vm15, %v3666_v44, %v3746_v49  ;;  %v3767_v29 = vld [vmem:[#allocation2 + $0x50] sm:$0x2]  ;;  %3739 = vst [vmem:[#allocation2] sm:$0x2] %v3738_v48  ;;  %v3750_v32 = vsel %vm16211_vm15, %v3673_v50, %v3749_v62  ;;  %v3753_v27 = vsel %vm16211_vm15, %v3680_v41, %v3752_v4  ;;  %v3756_v8 = vsel %vm16211_vm15, %v3687_v61, %v3755_v40 }
 0x2ee   : > { %v3770_v11 = vld [vmem:[#allocation2 + $0x58] sm:$0x2]  ;;  %3742 = vst [vmem:[#allocation2 + $0x8] sm:$0x2] %v3741_v59  ;;  %3745 = vst [vmem:[#allocation2 + $0x10] sm:$0x2] %v3744_v55  ;;  %v3759_v14 = vsel %vm16211_vm15, %v3694_v12, %v3758_v31  ;;  %13240 = vmatprep.subr.bf16.mxu0 %v14083_v36  ;;  %v3762_v42 = vsel %vm16211_vm15, %v3701_v34, %v3761_v21  ;;  %v3765_v30 = vsel %vm16211_vm15, %v3708_v52, %v3764_v15 }
 0x2ef   : > { %3748 = vst [vmem:[#allocation2 + $0x18] sm:$0x2] %v3747_v33  ;;  %3751 = vst [vmem:[#allocation2 + $0x20] sm:$0x2] %v3750_v32  ;;  %v3768_v23 = vsel %vm16211_vm15, %v3715_v10, %v3767_v29  ;;  %v3771_v39 = vsel %vm16211_vm15, %v3722_v60, %v3770_v11  ;;  %v2872_v36 = vmax.f32 %v15767_v56, %v16215_v9  ;;  %v2603_v49 = vpop.f32.mrb[35].mxu1  ;;  %v14084_v62 = vld [vmem:[#allocation7 + $0x28] sm:$0xff]  }
 0x2f0   : > { %3754 = vst [vmem:[#allocation2 + $0x28] sm:$0x2] %v3753_v27  ;;  %3757 = vst [vmem:[#allocation2 + $0x30] sm:$0x2] %v3756_v8  ;;  %v2874_v44 = vmax.f32 %v15771_v63, %v2597_v3  ;;  %v2873_v20 = vmax.f32 %v15773_v5, %v2556_v46  ;;  %v2875_v47 = vmax.f32 %v15775_v6, %v2599_v17  ;;  %13241 = vmatpush3.bf16.msra.mxu0 %v14084_v62  ;;  %v14085_v6 = vld [vmem:[#allocation7 + $0x70] sm:$0xff]   ;;  %v14087_v60 = vld [vmem:[#allocation7 + $0x78] sm:$0xff]  }
 0x2f1   : > { %3760 = vst [vmem:[#allocation2 + $0x38] sm:$0x2] %v3759_v14  ;;  %3763 = vst [vmem:[#allocation2 + $0x40] sm:$0x2] %v3762_v42  ;;  %v2896_v50 = vmax.f32 %v15777_v58, %v2558_v16  ;;  %v2898_v41 = vmax.f32 %v15780_v7, %v2601_v37  ;;  %v2897_v61 = vmax.f32 %v15783_v19, %v2560_v43  ;;  %v14086_v7 = vld [vmem:[#allocation7 + $0x30] sm:$0xff]   ;;  %13242 = vmatprep.subr.bf16.mxu0 %v14085_v6  ;;  %v14088_v59 = vld [vmem:[#allocation7 + $0x38] sm:$0xff]  }
 0x2f2   : > { %3766 = vst [vmem:[#allocation2 + $0x48] sm:$0x2] %v3765_v30  ;;  %3769 = vst [vmem:[#allocation2 + $0x50] sm:$0x2] %v3768_v23  ;;  %v2899_v12 = vmax.f32 %v15786_v25, %v2603_v49  ;;  %v3773_v4 = vmax.f32 %v2872_v36, %v2873_v20  ;;  %v3987_v40 = vmax.f32 %v2874_v44, %v2875_v47 }
 0x2f3   : > { %3772 = vst [vmem:[#allocation2 + $0x58] sm:$0x2] %v3771_v39  ;;  %v3774_v34 = vmax.f32 %v2896_v50, %v2897_v61 }
 0x2f4   : > { %v3988_v56 = vmax.f32 %v2898_v41, %v2899_v12  ;;  %v3775_v63 = vadd.f32 %v15975_v1, %v3773_v4  ;;  %v3989_v5 = vadd.f32 %v15975_v1, %v3987_v40  ;;  %13243 = vmatpush3.bf16.msra.mxu0 %v14086_v7  ;;  %v3954_v7 = vld [vmem:[#allocation2 + $0x8] sm:$0x4] }
 0x2f5   : > { %v3776_v9 = vadd.f32 %v15975_v1, %v3774_v34  ;;  %13244 = vmatprep.subr.bf16.mxu0 %v14087_v60 }
 0x2f6   : > { %v3990_v58 = vadd.f32 %v15975_v1, %v3988_v56  ;;  %v3777_v19 = vmax.f32 %v3775_v63, 0.0  ;;  %v3991_v52 = vmax.f32 %v3989_v5, 0.0  ;;  %v3951_v56 = vld [vmem:[#allocation2] sm:$0x4] }
 0x2f7   : > { %v3778_v25 = vmax.f32 %v3776_v9, 0.0 }
 0x2f8   : > { %v3992_v10 = vmax.f32 %v3990_v58, 0.0  ;;  %13245 = vmatpush3.bf16.msra.mxu0 %v14088_v59 }
 0x2f9   : > { %v3779_v31 = vpack.c.bf16 %v3778_v25, %v3777_v19  ;;  %v12653_v21 = vpack.c.bf16 %v3778_v25, %v3778_v25  ;;  %v3957_v19 = vld [vmem:[#allocation2 + $0x10] sm:$0x4] }
 0x2fa   : > { %v3993_v15 = vpack.c.bf16 %v3992_v10, %v3991_v52  ;;  %v12660_v48 = vpack.c.bf16 %v3992_v10, %v3992_v10 }
 0x2fb   : > { %v3788_v55 = vrot.slane %v3779_v31, %v15986_v24  ;;  %v3795_v33 = vrot.slane %v12653_v21, %v15986_v24  ;;  %v3960_v31 = vld [vmem:[#allocation2 + $0x18] sm:$0x4]  ;;  %v3963_v21 = vld [vmem:[#allocation2 + $0x20] sm:$0x4] }
 0x2fc   : > { %v4002_v1 = vrot.slane %v3993_v15, %v15986_v24  ;;  %v16270_v29 = vrot.slane %v12660_v48, %v15986_v24  ;;  %v3966_v15 = vld [vmem:[#allocation2 + $0x28] sm:$0x4] }
 0x2fd   : > { %v3796_v11 = vcombine.high %v3788_v55, %v3788_v55  ;;  %v3797_v3 = vcombine.high %v3795_v33, %v3795_v33  ;;  %v3804_v46 = vrot.slane %v3788_v55, %v15986_v24  ;;  %v3811_v32 = vrot.slane %v3795_v33, %v15986_v24 }
 0x2fe   : > { %v4010_v27 = vcombine.high %v4002_v1, %v4002_v1  ;;  %v4011_v8 = vcombine.high %v16270_v29, %v16270_v29  ;;  %v16277_v14 = vrot.slane %v4002_v1, %v15986_v24  ;;  %v16281_v17 = vrot.slane %v16270_v29, %v15986_v24  ;;  %v3969_v1 = vld [vmem:[#allocation2 + $0x30] sm:$0x4] }
 0x2ff   : > { %v3818_v16 = vrot.slane %v3796_v11, %v15986_v24  ;;  %v3825_v42 = vrot.slane %v3797_v3, %v15986_v24  ;;  %v3826_v30 = vcombine.high %v3804_v46, %v3804_v46  ;;  %v3829_v23 = vunpack.i.h.s16 %v3804_v46  ;;  %v3972_v11 = vld [vmem:[#allocation2 + $0x38] sm:$0x4]  ;;  %v3975_v3 = vld [vmem:[#allocation2 + $0x40] sm:$0x4] }
 0x300   : > { %v3837_v39 = vunpack.i.h.s16 %v3811_v32  ;;  %v12654_v37 = vpack.i.b16 %v3804_v46, %v3804_v46  ;;  %v12658_v43 = vpack.i.b16 %v3811_v32, %v3811_v32  ;;  %v16286_v36 = vrot.slane %v4010_v27, %v15986_v24 }
 0x301   : > { %v3827_v44 = vcombine.high %v3818_v16, %v3818_v16  ;;  %v3831_v20 = vunpack.i.h.s16 %v3818_v16  ;;  %v3833_v47 = vunpack.i.h.s16 %v3826_v30  ;;  %v3839_v49 = vunpack.i.h.s16 %v3825_v42 }
 0x302   : > { %v3841_v50 = vpack.i.b16 %v3829_v23, %v3829_v23  ;;  %v12655_v41 = vpack.i.b16 %v3818_v16, %v3818_v16  ;;  %v12656_v61 = vpack.i.b16 %v3826_v30, %v3826_v30  ;;  %v3849_v12 = vpack.i.b16 %v3837_v39, %v3837_v39  ;;  %v3981_v30 = vld [vmem:[#allocation2 + $0x50] sm:$0x4]  ;;  %v3984_v23 = vld [vmem:[#allocation2 + $0x58] sm:$0x4] }
 0x303   : > { %v3835_v62 = vunpack.i.h.s16 %v3827_v44  ;;  %v3843_v4 = vpack.i.b16 %v3831_v20, %v3831_v20  ;;  %v3845_v40 = vpack.i.b16 %v3833_v47, %v3833_v47  ;;  %v12657_v34 = vpack.i.b16 %v3827_v44, %v3827_v44 }
 0x304   : > { %v12659_v63 = vpack.i.b16 %v3825_v42, %v3825_v42  ;;  %v3851_v5 = vpack.i.b16 %v3839_v49, %v3839_v49  ;;  %v3858_v6 = vrot.slane %v12654_v37, %v15990_v28  ;;  %v3865_v9 = vrot.slane %v3841_v50, %v15990_v28  ;;  %v3978_v42 = vld [vmem:[#allocation2 + $0x48] sm:$0x4] }
 0x305   : > { %v3847_v52 = vpack.i.b16 %v3835_v62, %v3835_v62  ;;  %v3872_v25 = vrot.slane %v12655_v41, %v15990_v28  ;;  %v3879_v10 = vrot.slane %v3843_v4, %v15990_v28  ;;  %v3886_v60 = vrot.slane %v12656_v61, %v15990_v28 }
 0x306   : > { %v3893_v48 = vrot.slane %v3845_v40, %v15990_v28  ;;  %v3900_v59 = vrot.slane %v12657_v34, %v15990_v28  ;;  %v3914_v55 = vrot.slane %v12658_v43, %v15990_v28  ;;  %v3921_v33 = vrot.slane %v3849_v12, %v15990_v28 }
 0x307   : > { %v3907_v46 = vrot.slane %v3847_v52, %v15990_v28  ;;  %v3928_v32 = vrot.slane %v12659_v63, %v15990_v28  ;;  %v3935_v27 = vrot.slane %v3851_v5, %v15990_v28  ;;  %v3952_v16 = vsel %vm16292_vm2, %v3858_v6, %v3951_v56  ;;  %v14090_v52 = vld [vmem:[#allocation7 + $0x140] sm:$0xff]  }
 0x308   : > { %3953 = vst [vmem:[#allocation2] sm:$0x4] %v3952_v16  ;;  %v3955_v39 = vsel %vm16292_vm2, %v3865_v9, %v3954_v7  ;;  %v3958_v37 = vsel %vm16292_vm2, %v3872_v25, %v3957_v19  ;;  %v3961_v43 = vsel %vm16292_vm2, %v3879_v10, %v3960_v31  ;;  %v3964_v44 = vsel %vm16292_vm2, %v3886_v60, %v3963_v21  ;;  %v14092_v25 = vld [vmem:[#allocation7 + $0xc0] sm:$0xff]  }
 0x309   : > { %3956 = vst [vmem:[#allocation2 + $0x8] sm:$0x4] %v3955_v39  ;;  %3959 = vst [vmem:[#allocation2 + $0x10] sm:$0x4] %v3958_v37  ;;  %v3967_v20 = vsel %vm16292_vm2, %v3893_v48, %v3966_v15  ;;  %v3970_v47 = vsel %vm16292_vm2, %v3900_v59, %v3969_v1  ;;  %v3973_v49 = vsel %vm16292_vm2, %v3907_v46, %v3972_v11  ;;  %v4043_v34 = vunpack.i.h.s16 %v16277_v14  ;;  %v14094_v48 = vld [vmem:[#allocation7 + $0x80] sm:$0xff]  }
 0x30a   : > { %3962 = vst [vmem:[#allocation2 + $0x18] sm:$0x4] %v3961_v43  ;;  %3965 = vst [vmem:[#allocation2 + $0x20] sm:$0x4] %v3964_v44  ;;  %v3976_v50 = vsel %vm16292_vm2, %v3914_v55, %v3975_v3  ;;  %v3979_v41 = vsel %vm16292_vm2, %v3921_v33, %v3978_v42  ;;  %v3982_v61 = vsel %vm16292_vm2, %v3928_v32, %v3981_v30  ;;  %v4045_v56 = vunpack.i.h.s16 %v16286_v36  ;;  %v16345_v19 = vpop.f32.mrb[36].mxu0 }
 0x30b   : > { %3968 = vst [vmem:[#allocation2 + $0x28] sm:$0x4] %v3967_v20  ;;  %3971 = vst [vmem:[#allocation2 + $0x30] sm:$0x4] %v3970_v47  ;;  %v3985_v12 = vsel %vm16292_vm2, %v3935_v27, %v3984_v23  ;;  %v4039_v62 = vrot.slane %v4011_v8, %v15986_v24  ;;  %v4040_v4 = vcombine.high %v16277_v14, %v16277_v14  ;;  %v4051_v63 = vunpack.i.h.s16 %v16281_v17  ;;  %v16349_v15 = vpop.f32.mrb[36].mxu1 }
 0x30c   : > { %3974 = vst [vmem:[#allocation2 + $0x38] sm:$0x4] %v3973_v49  ;;  %3977 = vst [vmem:[#allocation2 + $0x40] sm:$0x4] %v3976_v50  ;;  %v4041_v40 = vcombine.high %v16286_v36, %v16286_v36  ;;  %v12661_v29 = vpack.i.b16 %v16277_v14, %v16277_v14  ;;  %v12662_v8 = vpack.i.b16 %v16286_v36, %v16286_v36  ;;  %v16351_v14 = vpop.f32.mrb[37].mxu0  ;;  %v16359_v3 = vpop.f32.mrb[37].mxu1  ;;  %13310 = vmatprep.subr.bf16.mxu0 %v14090_v52 }
 0x30d   : > { %3980 = vst [vmem:[#allocation2 + $0x48] sm:$0x4] %v3979_v41  ;;  %3983 = vst [vmem:[#allocation2 + $0x50] sm:$0x4] %v3982_v61  ;;  %v4053_v5 = vunpack.i.h.s16 %v4039_v62  ;;  %v4047_v6 = vunpack.i.h.s16 %v4040_v4  ;;  %v4055_v58 = vpack.i.b16 %v4043_v34, %v4043_v34  ;;  %v4057_v7 = vpack.i.b16 %v4045_v56, %v4045_v56  ;;  %13270 = vmatprep.subr.bf16.mxu1 %v14092_v25 }
 0x30e   : > { %3986 = vst [vmem:[#allocation2 + $0x58] sm:$0x4] %v3985_v12  ;;  %v4049_v9 = vunpack.i.h.s16 %v4041_v40  ;;  %v12663_v10 = vpack.i.b16 %v4040_v4, %v4040_v4  ;;  %v12664_v60 = vpack.i.b16 %v4041_v40, %v4041_v40  ;;  %v12665_v31 = vpack.i.b16 %v16281_v17, %v16281_v17  ;;  %v16361_v17 = vpop.f32.mrb[38].mxu0  ;;  %13271 = vmatpush3.bf16.msra.mxu1 %v14094_v48 }
 0x30f   : > { %v4063_v21 = vpack.i.b16 %v4051_v63, %v4051_v63  ;;  %v4059_v36 = vpack.i.b16 %v4047_v6, %v4047_v6  ;;  %v12666_v55 = vpack.i.b16 %v4039_v62, %v4039_v62  ;;  %v4065_v33 = vpack.i.b16 %v4053_v5, %v4053_v5  ;;  %v4164_v11 = vld [vmem:[#allocation2] sm:$0x4]  ;;  %v2687_v6 = vpop.f32.mrb[38].mxu1 }
 0x310   : > { %v4061_v59 = vpack.i.b16 %v4049_v9, %v4049_v9  ;;  %v4072_v46 = vrot.slane %v12661_v29, %v15990_v28  ;;  %v4079_v32 = vrot.slane %v4055_v58, %v15990_v28  ;;  %v4086_v27 = vrot.slane %v12662_v8, %v15990_v28  ;;  %v4167_v42 = vld [vmem:[#allocation2 + $0x8] sm:$0x4]  ;;  %v4170_v30 = vld [vmem:[#allocation2 + $0x10] sm:$0x4]  ;;  %v2646_v9 = vpop.f32.mrb[39].mxu0 }
 0x311   : > { %v4093_v16 = vrot.slane %v4057_v7, %v15990_v28  ;;  %v4173_v23 = vld [vmem:[#allocation2 + $0x18] sm:$0x4]  ;;  %v4100_v39 = vrot.slane %v12663_v10, %v15990_v28  ;;  %v4107_v37 = vrot.slane %v4059_v36, %v15990_v28  ;;  %v4114_v43 = vrot.slane %v12664_v60, %v15990_v28  ;;  %v4176_v20 = vld [vmem:[#allocation2 + $0x20] sm:$0x4]  ;;  %v2689_v10 = vpop.f32.mrb[39].mxu1  ;;  %v14097_v60 = vld [vmem:[#allocation7 + $0xc8] sm:$0xff]  }
 0x312   : > { %v4121_v44 = vrot.slane %v4061_v59, %v15990_v28  ;;  %v4179_v47 = vld [vmem:[#allocation2 + $0x28] sm:$0x4]  ;;  %v4182_v49 = vld [vmem:[#allocation2 + $0x30] sm:$0x4]  ;;  %v4128_v50 = vrot.slane %v12665_v31, %v15990_v28  ;;  %v4135_v41 = vrot.slane %v4063_v21, %v15990_v28  ;;  %v4142_v61 = vrot.slane %v12666_v55, %v15990_v28  ;;  %13272 = vmatprep.subr.bf16.mxu1 %v14097_v60 }
 0x313   : > { %v4149_v12 = vrot.slane %v4065_v33, %v15990_v28  ;;  %v4185_v62 = vld [vmem:[#allocation2 + $0x38] sm:$0x4]  ;;  %v4188_v4 = vld [vmem:[#allocation2 + $0x40] sm:$0x4]  ;;  %v4165_v34 = vsel %vm16355_vm4, %v4072_v46, %v4164_v11  ;;  %v4168_v56 = vsel %vm16355_vm4, %v4079_v32, %v4167_v42  ;;  %v4171_v63 = vsel %vm16355_vm4, %v4086_v27, %v4170_v30  ;;  %v14099_v31 = vld [vmem:[#allocation7 + $0x88] sm:$0xff]  }
 0x314   : > { %v4191_v40 = vld [vmem:[#allocation2 + $0x48] sm:$0x4]  ;;  %v4174_v5 = vsel %vm16355_vm4, %v4093_v16, %v4173_v23  ;;  %v4194_v29 = vld [vmem:[#allocation2 + $0x50] sm:$0x4]  ;;  %4166 = vst [vmem:[#allocation2] sm:$0x4] %v4165_v34  ;;  %v4177_v58 = vsel %vm16355_vm4, %v4100_v39, %v4176_v20  ;;  %v4180_v7 = vsel %vm16355_vm4, %v4107_v37, %v4179_v47  ;;  %v4183_v52 = vsel %vm16355_vm4, %v4114_v43, %v4182_v49 }
 0x315   : > { %v4197_v8 = vld [vmem:[#allocation2 + $0x58] sm:$0x4]  ;;  %4169 = vst [vmem:[#allocation2 + $0x8] sm:$0x4] %v4168_v56  ;;  %4172 = vst [vmem:[#allocation2 + $0x10] sm:$0x4] %v4171_v63  ;;  %v4186_v25 = vsel %vm16355_vm4, %v4121_v44, %v4185_v62  ;;  %v4189_v21 = vsel %vm16355_vm4, %v4128_v50, %v4188_v4  ;;  %v4192_v48 = vsel %vm16355_vm4, %v4135_v41, %v4191_v40  ;;  %13273 = vmatpush3.bf16.msra.mxu1 %v14099_v31 }
 0x316   : > { %4175 = vst [vmem:[#allocation2 + $0x18] sm:$0x4] %v4174_v5  ;;  %4178 = vst [vmem:[#allocation2 + $0x20] sm:$0x4] %v4177_v58  ;;  %v4195_v36 = vsel %vm16355_vm4, %v4142_v61, %v4194_v29  ;;  %v4198_v59 = vsel %vm16355_vm4, %v4149_v12, %v4197_v8  ;;  %v14101_v55 = vld [vmem:[#allocation7 + $0xd0] sm:$0xff]   ;;  %v2876_v33 = vmax.f32 %v15827_v0, %v16345_v19  ;;  %v14112_v49 = vld [vmem:[#allocation7 + $0xa0] sm:$0xff]  }
 0x317   : > { %4181 = vst [vmem:[#allocation2 + $0x28] sm:$0x4] %v4180_v7  ;;  %4184 = vst [vmem:[#allocation2 + $0x30] sm:$0x4] %v4183_v52  ;;  %v2878_v11 = vmax.f32 %v15831_v45, %v16349_v15  ;;  %v2877_v46 = vmax.f32 %v15833_v53, %v16351_v14  ;;  %v2879_v32 = vmax.f32 %v15835_v57, %v16359_v3  ;;  %v14103_v0 = vld [vmem:[#allocation7 + $0x90] sm:$0xff]   ;;  %13274 = vmatprep.subr.bf16.mxu1 %v14101_v55  ;;  %v14106_v15 = vld [vmem:[#allocation7 + $0xd8] sm:$0xff]  }
 0x318   : > { %4187 = vst [vmem:[#allocation2 + $0x38] sm:$0x4] %v4186_v25  ;;  %4190 = vst [vmem:[#allocation2 + $0x40] sm:$0x4] %v4189_v21  ;;  %v2900_v1 = vmax.f32 %v15837_v13, %v16361_v17  ;;  %v2902_v27 = vmax.f32 %v15840_v22, %v2687_v6  ;;  %v2901_v16 = vmax.f32 %v15843_v38, %v2646_v9  ;;  %v16415_v57 = vld [vmem:[%s17629_s2] ss:$0 sm:$0xff] }
 0x319   : > { %4193 = vst [vmem:[#allocation2 + $0x48] sm:$0x4] %v4192_v48  ;;  %4196 = vst [vmem:[#allocation2 + $0x50] sm:$0x4] %v4195_v36  ;;  %v2903_v42 = vmax.f32 %v15846_v2, %v2689_v10  ;;  %v4200_v19 = vmax.f32 %v2876_v33, %v2877_v46  ;;  %v4414_v45 = vmax.f32 %v2878_v11, %v2879_v32  ;;  %13275 = vmatpush3.bf16.msra.mxu1 %v14103_v0  ;;  %v14108_v3 = vld [vmem:[#allocation7 + $0x98] sm:$0xff]   ;;  %v14110_v17 = vld [vmem:[#allocation7 + $0xe0] sm:$0xff]  }
 0x31a   : > { %4199 = vst [vmem:[#allocation2 + $0x58] sm:$0x4] %v4198_v59  ;;  %v4201_v53 = vmax.f32 %v2900_v1, %v2901_v16  ;;  %13276 = vmatprep.subr.bf16.mxu1 %v14106_v15  ;;  %v14115_v50 = vld [vmem:[#allocation7 + $0xe8] sm:$0xff]   ;;  %v14120_v9 = vld [vmem:[#allocation7 + $0xf0] sm:$0xff]   ;;  %v4378_v15 = vld [vmem:[#allocation2] sm:$0x8] }
 0x31b   : > { %v4415_v14 = vmax.f32 %v2902_v27, %v2903_v42  ;;  %v4202_v13 = vadd.f32 %v16415_v57, %v4200_v19  ;;  %v4416_v22 = vadd.f32 %v16415_v57, %v4414_v45  ;;  %v14118_v63 = vld [vmem:[#allocation7 + $0xa8] sm:$0xff]   ;;  %v14122_v33 = vld [vmem:[#allocation7 + $0xb0] sm:$0xff]   ;;  %v14124_v27 = vld [vmem:[#allocation7 + $0xf8] sm:$0xff]  }
 0x31c   : > { %v4203_v38 = vadd.f32 %v16415_v57, %v4201_v53  ;;  %v4381_v53 = vld [vmem:[#allocation2 + $0x8] sm:$0x8] }
 0x31d   : > { %v4417_v2 = vadd.f32 %v16415_v57, %v4415_v14  ;;  %v4204_v30 = vmax.f32 %v4202_v13, 0.0  ;;  %v4418_v23 = vmax.f32 %v4416_v22, 0.0  ;;  %13277 = vmatpush3.bf16.msra.mxu1 %v14108_v3  ;;  %v4387_v3 = vld [vmem:[#allocation2 + $0x18] sm:$0x8] }
 0x31e   : > { %v4205_v39 = vmax.f32 %v4203_v38, 0.0  ;;  %13278 = vmatprep.subr.bf16.mxu1 %v14110_v17  ;;  %v4390_v17 = vld [vmem:[#allocation2 + $0x20] sm:$0x8] }
 0x31f   : > { %v4419_v37 = vmax.f32 %v4417_v2, 0.0  ;;  %v4384_v2 = vld [vmem:[#allocation2 + $0x10] sm:$0x8] }
 0x320   : > { %v4206_v43 = vpack.c.bf16 %v4205_v39, %v4204_v30  ;;  %v12667_v44 = vpack.c.bf16 %v4205_v39, %v4205_v39 }
 0x321   : > { %v4420_v20 = vpack.c.bf16 %v4419_v37, %v4418_v23  ;;  %v12674_v47 = vpack.c.bf16 %v4419_v37, %v4419_v37  ;;  %13279 = vmatpush3.bf16.msra.mxu1 %v14112_v49 }
 0x322   : > { %v4215_v41 = vrot.slane %v4206_v43, %v15986_v24  ;;  %v4222_v61 = vrot.slane %v12667_v44, %v15986_v24  ;;  %13280 = vmatprep.subr.bf16.mxu1 %v14115_v50  ;;  %v4393_v43 = vld [vmem:[#allocation2 + $0x28] sm:$0x8]  ;;  %v4396_v44 = vld [vmem:[#allocation2 + $0x30] sm:$0x8] }
 0x323   : > { %v4429_v12 = vrot.slane %v4420_v20, %v15986_v24  ;;  %v16425_v62 = vrot.slane %v12674_v47, %v15986_v24  ;;  %v14126_v20 = vld [vmem:[#allocation7 + $0xb8] sm:$0xff]  }
 0x324   : > { %v4223_v4 = vcombine.high %v4215_v41, %v4215_v41  ;;  %v4224_v40 = vcombine.high %v4222_v61, %v4222_v61  ;;  %v4231_v34 = vrot.slane %v4215_v41, %v15986_v24  ;;  %v4238_v56 = vrot.slane %v4222_v61, %v15986_v24  ;;  %v4399_v61 = vld [vmem:[#allocation2 + $0x38] sm:$0x8] }
 0x325   : > { %v4437_v5 = vcombine.high %v4429_v12, %v4429_v12  ;;  %v4438_v29 = vcombine.high %v16425_v62, %v16425_v62  ;;  %v16432_v8 = vrot.slane %v4429_v12, %v15986_v24  ;;  %v16436_v6 = vrot.slane %v16425_v62, %v15986_v24  ;;  %13281 = vmatpush3.bf16.msra.mxu1 %v14118_v63  ;;  %v4402_v12 = vld [vmem:[#allocation2 + $0x40] sm:$0x8] }
 0x326   : > { %v4245_v58 = vrot.slane %v4223_v4, %v15986_v24  ;;  %v4252_v7 = vrot.slane %v4224_v40, %v15986_v24  ;;  %v4253_v52 = vcombine.high %v4231_v34, %v4231_v34  ;;  %v4256_v25 = vunpack.i.h.s16 %v4231_v34  ;;  %13282 = vmatprep.subr.bf16.mxu1 %v14120_v9  ;;  %v14129_v4 = vld [vmem:[#allocation7 + $0x1c0] sm:$0xff]   ;;  %v4408_v9 = vld [vmem:[#allocation2 + $0x50] sm:$0x8] }
 0x327   : > { %v4264_v10 = vunpack.i.h.s16 %v4238_v56  ;;  %v12668_v60 = vpack.i.b16 %v4231_v34, %v4231_v34  ;;  %v12672_v31 = vpack.i.b16 %v4238_v56, %v4238_v56  ;;  %v16441_v21 = vrot.slane %v4437_v5, %v15986_v24  ;;  %v4405_v5 = vld [vmem:[#allocation2 + $0x48] sm:$0x8] }
 0x328   : > { %v4254_v48 = vcombine.high %v4245_v58, %v4245_v58  ;;  %v4258_v36 = vunpack.i.h.s16 %v4245_v58  ;;  %v4260_v59 = vunpack.i.h.s16 %v4253_v52  ;;  %v4266_v55 = vunpack.i.h.s16 %v4252_v7 }
 0x329   : > { %v4268_v11 = vpack.i.b16 %v4256_v25, %v4256_v25  ;;  %v12669_v46 = vpack.i.b16 %v4245_v58, %v4245_v58  ;;  %v12670_v32 = vpack.i.b16 %v4253_v52, %v4253_v52  ;;  %v4276_v1 = vpack.i.b16 %v4264_v10, %v4264_v10  ;;  %13283 = vmatpush3.bf16.msra.mxu1 %v14122_v33  ;;  %v4411_v58 = vld [vmem:[#allocation2 + $0x58] sm:$0x8] }
 0x32a   : > { %v4262_v16 = vunpack.i.h.s16 %v4254_v48  ;;  %v4270_v42 = vpack.i.b16 %v4258_v36, %v4258_v36  ;;  %v4272_v0 = vpack.i.b16 %v4260_v59, %v4260_v59  ;;  %v12671_v19 = vpack.i.b16 %v4254_v48, %v4254_v48  ;;  %13284 = vmatprep.subr.bf16.mxu1 %v14124_v27 }
 0x32b   : > { %v12673_v14 = vpack.i.b16 %v4252_v7, %v4252_v7  ;;  %v4278_v13 = vpack.i.b16 %v4266_v55, %v4266_v55  ;;  %v4285_v22 = vrot.slane %v12668_v60, %v15990_v28  ;;  %v4292_v38 = vrot.slane %v4268_v11, %v15990_v28 }
 0x32c   : > { %v4274_v30 = vpack.i.b16 %v4262_v16, %v4262_v16  ;;  %v4299_v23 = vrot.slane %v12669_v46, %v15990_v28  ;;  %v4306_v39 = vrot.slane %v4270_v42, %v15990_v28  ;;  %v4313_v37 = vrot.slane %v12670_v32, %v15990_v28 }
 0x32d   : > { %v4320_v47 = vrot.slane %v4272_v0, %v15990_v28  ;;  %v4327_v49 = vrot.slane %v12671_v19, %v15990_v28  ;;  %v4341_v50 = vrot.slane %v12672_v31, %v15990_v28  ;;  %v4348_v41 = vrot.slane %v4276_v1, %v15990_v28  ;;  %13285 = vmatpush3.bf16.msra.mxu1 %v14126_v20 }
 0x32e   : > { %v4334_v40 = vrot.slane %v4274_v30, %v15990_v28  ;;  %v4355_v34 = vrot.slane %v12673_v14, %v15990_v28  ;;  %v4362_v56 = vrot.slane %v4278_v13, %v15990_v28  ;;  %v4379_v63 = vsel %vm16445_vm7, %v4285_v22, %v4378_v15  ;;  %13350 = vmatprep.subr.bf16.mxu1 %v14129_v4  ;;  %v16495_v16 = vpop.f32.mrb[40].mxu0 }
 0x32f   : > { %4380 = vst [vmem:[#allocation2] sm:$0x8] %v4379_v63  ;;  %v4382_v7 = vsel %vm16445_vm7, %v4292_v38, %v4381_v53  ;;  %v4385_v52 = vsel %vm16445_vm7, %v4299_v23, %v4384_v2  ;;  %v4388_v25 = vsel %vm16445_vm7, %v4306_v39, %v4387_v3  ;;  %v4391_v10 = vsel %vm16445_vm7, %v4313_v37, %v4390_v17  ;;  %v16502_v19 = vpop.f32.mrb[40].mxu1  ;;  %v16504_v45 = vpop.f32.mrb[41].mxu0 }
 0x330   : > { %4383 = vst [vmem:[#allocation2 + $0x8] sm:$0x8] %v4382_v7  ;;  %4386 = vst [vmem:[#allocation2 + $0x10] sm:$0x8] %v4385_v52  ;;  %v4394_v60 = vsel %vm16445_vm7, %v4320_v47, %v4393_v43  ;;  %v4397_v31 = vsel %vm16445_vm7, %v4327_v49, %v4396_v44  ;;  %v4400_v48 = vsel %vm16445_vm7, %v4334_v40, %v4399_v61  ;;  %v4470_v1 = vunpack.i.h.s16 %v16432_v8  ;;  %v16506_v22 = vpop.f32.mrb[41].mxu1  ;;  %v16508_v38 = vpop.f32.mrb[42].mxu0 }
 0x331   : > { %4389 = vst [vmem:[#allocation2 + $0x18] sm:$0x8] %v4388_v25  ;;  %4392 = vst [vmem:[#allocation2 + $0x20] sm:$0x8] %v4391_v10  ;;  %v4403_v36 = vsel %vm16445_vm7, %v4341_v50, %v4402_v12  ;;  %v4406_v59 = vsel %vm16445_vm7, %v4348_v41, %v4405_v5  ;;  %v4409_v55 = vsel %vm16445_vm7, %v4355_v34, %v4408_v9  ;;  %v4472_v27 = vunpack.i.h.s16 %v16441_v21  ;;  %v16512_v30 = vpop.f32.mrb[42].mxu1  ;;  %v18190_v44 = vld [vmem:[#allocation25_spill] sm:$0xff] }
 0x332   : > { %4395 = vst [vmem:[#allocation2 + $0x28] sm:$0x8] %v4394_v60  ;;  %4398 = vst [vmem:[#allocation2 + $0x30] sm:$0x8] %v4397_v31  ;;  %v4412_v33 = vsel %vm16445_vm7, %v4362_v56, %v4411_v58  ;;  %v4466_v11 = vrot.slane %v4438_v29, %v15986_v24  ;;  %v4467_v46 = vcombine.high %v16432_v8, %v16432_v8  ;;  %v4478_v42 = vunpack.i.h.s16 %v16436_v6  ;;  %v2775_v47 = vpop.f32.mrb[43].mxu1 }
 0x333   : > { %4401 = vst [vmem:[#allocation2 + $0x38] sm:$0x8] %v4400_v48  ;;  %4404 = vst [vmem:[#allocation2 + $0x40] sm:$0x8] %v4403_v36  ;;  %v4468_v32 = vcombine.high %v16441_v21, %v16441_v21  ;;  %v12675_v29 = vpack.i.b16 %v16432_v8, %v16432_v8  ;;  %v12676_v0 = vpack.i.b16 %v16441_v21, %v16441_v21  ;;  %v16514_v21 = vpop.f32.mrb[43].mxu0 }
 0x334   : > { %4407 = vst [vmem:[#allocation2 + $0x48] sm:$0x8] %v4406_v59  ;;  %4410 = vst [vmem:[#allocation2 + $0x50] sm:$0x8] %v4409_v55  ;;  %v4480_v62 = vunpack.i.h.s16 %v4466_v11  ;;  %v4474_v15 = vunpack.i.h.s16 %v4467_v46  ;;  %v4482_v14 = vpack.i.b16 %v4470_v1, %v4470_v1  ;;  %v4484_v13 = vpack.i.b16 %v4472_v27, %v4472_v27 }
 0x335   : > { %4413 = vst [vmem:[#allocation2 + $0x58] sm:$0x8] %v4412_v33  ;;  %v4476_v53 = vunpack.i.h.s16 %v4468_v32  ;;  %v12677_v2 = vpack.i.b16 %v4467_v46, %v4467_v46  ;;  %v12678_v3 = vpack.i.b16 %v4468_v32, %v4468_v32  ;;  %v12679_v8 = vpack.i.b16 %v16436_v6, %v16436_v6 }
 0x336   : > { %v4490_v17 = vpack.i.b16 %v4478_v42, %v4478_v42  ;;  %v4486_v23 = vpack.i.b16 %v4474_v15, %v4474_v15  ;;  %v12680_v37 = vpack.i.b16 %v4466_v11, %v4466_v11  ;;  %v4492_v43 = vpack.i.b16 %v4480_v62, %v4480_v62  ;;  %v4591_v20 = vld [vmem:[#allocation2] sm:$0x8] }
 0x337   : > { %v4488_v39 = vpack.i.b16 %v4476_v53, %v4476_v53  ;;  %v4499_v49 = vrot.slane %v12675_v29, %v15990_v28  ;;  %v4506_v6 = vrot.slane %v4482_v14, %v15990_v28  ;;  %v4513_v50 = vrot.slane %v12676_v0, %v15990_v28  ;;  %v4594_v61 = vld [vmem:[#allocation2 + $0x8] sm:$0x8]  ;;  %v4597_v12 = vld [vmem:[#allocation2 + $0x10] sm:$0x8] }
 0x338   : > { %v4520_v41 = vrot.slane %v4484_v13, %v15990_v28  ;;  %v4600_v4 = vld [vmem:[#allocation2 + $0x18] sm:$0x8]  ;;  %v4527_v40 = vrot.slane %v12677_v2, %v15990_v28  ;;  %v4534_v34 = vrot.slane %v4486_v23, %v15990_v28  ;;  %v4541_v56 = vrot.slane %v12678_v3, %v15990_v28  ;;  %v4603_v5 = vld [vmem:[#allocation2 + $0x20] sm:$0x8]  ;;  %v18185_v14 = vld [vmem:[#allocation20_spill] sm:$0xff] }
 0x339   : > { %v4548_v63 = vrot.slane %v4488_v39, %v15990_v28  ;;  %v4606_v9 = vld [vmem:[#allocation2 + $0x28] sm:$0x8]  ;;  %v4609_v58 = vld [vmem:[#allocation2 + $0x30] sm:$0x8]  ;;  %v4555_v7 = vrot.slane %v12679_v8, %v15990_v28  ;;  %v4562_v52 = vrot.slane %v4490_v17, %v15990_v28  ;;  %v4569_v25 = vrot.slane %v12680_v37, %v15990_v28  ;;  %v18186_v2 = vld [vmem:[#allocation21_spill] sm:$0xff] }
 0x33a   : > { %v4576_v10 = vrot.slane %v4492_v43, %v15990_v28  ;;  %v4612_v60 = vld [vmem:[#allocation2 + $0x38] sm:$0x8]  ;;  %v4615_v31 = vld [vmem:[#allocation2 + $0x40] sm:$0x8]  ;;  %v4592_v36 = vsel %vm16518_vm11, %v4499_v49, %v4591_v20  ;;  %v4595_v59 = vsel %vm16518_vm11, %v4506_v6, %v4594_v61  ;;  %v4598_v55 = vsel %vm16518_vm11, %v4513_v50, %v4597_v12  ;;  %v18187_v8 = vld [vmem:[#allocation23_spill] sm:$0xff] }
 0x33b   : > { %v4618_v48 = vld [vmem:[#allocation2 + $0x48] sm:$0x8]  ;;  %v4601_v33 = vsel %vm16518_vm11, %v4520_v41, %v4600_v4  ;;  %v4621_v11 = vld [vmem:[#allocation2 + $0x50] sm:$0x8]  ;;  %4593 = vst [vmem:[#allocation2] sm:$0x8] %v4592_v36  ;;  %v4604_v32 = vsel %vm16518_vm11, %v4527_v40, %v4603_v5  ;;  %v4607_v1 = vsel %vm16518_vm11, %v4534_v34, %v4606_v9  ;;  %v4610_v27 = vsel %vm16518_vm11, %v4541_v56, %v4609_v58 }
 0x33c   : > { %v4624_v46 = vld [vmem:[#allocation2 + $0x58] sm:$0x8]  ;;  %4596 = vst [vmem:[#allocation2 + $0x8] sm:$0x8] %v4595_v59  ;;  %4599 = vst [vmem:[#allocation2 + $0x10] sm:$0x8] %v4598_v55  ;;  %v4613_v42 = vsel %vm16518_vm11, %v4548_v63, %v4612_v60  ;;  %v4616_v62 = vsel %vm16518_vm11, %v4555_v7, %v4615_v31  ;;  %v4619_v29 = vsel %vm16518_vm11, %v4562_v52, %v4618_v48 }
 0x33d   : > { %4602 = vst [vmem:[#allocation2 + $0x18] sm:$0x8] %v4601_v33  ;;  %4605 = vst [vmem:[#allocation2 + $0x20] sm:$0x8] %v4604_v32  ;;  %v4622_v0 = vsel %vm16518_vm11, %v4569_v25, %v4621_v11  ;;  %v4625_v15 = vsel %vm16518_vm11, %v4576_v10, %v4624_v46  ;;  %v2880_v53 = vmax.f32 %v15887_v35, %v16495_v16  ;;  %v18188_v23 = vld [vmem:[#allocation22_spill] sm:$0xff]  ;;  %v18189_v37 = vld [vmem:[#allocation24_spill] sm:$0xff] }
 0x33e   : > { %4608 = vst [vmem:[#allocation2 + $0x28] sm:$0x8] %v4607_v1  ;;  %4611 = vst [vmem:[#allocation2 + $0x30] sm:$0x8] %v4610_v27  ;;  %v2882_v13 = vmax.f32 %v18185_v14, %v16502_v19  ;;  %v2881_v3 = vmax.f32 %v18186_v2, %v16504_v45  ;;  %v2883_v17 = vmax.f32 %v18187_v8, %v16506_v22  ;;  %v18191_v49 = vld [vmem:[#allocation27_spill] sm:$0xff] }
 0x33f   : > { %4614 = vst [vmem:[#allocation2 + $0x38] sm:$0x8] %v4613_v42  ;;  %4617 = vst [vmem:[#allocation2 + $0x40] sm:$0x8] %v4616_v62  ;;  %v2904_v39 = vmax.f32 %v18188_v23, %v16508_v38  ;;  %v2906_v43 = vmax.f32 %v18189_v37, %v16512_v30  ;;  %v2905_v20 = vmax.f32 %v18190_v44, %v16514_v21 }
 0x340   : > { %4620 = vst [vmem:[#allocation2 + $0x48] sm:$0x8] %v4619_v29  ;;  %4623 = vst [vmem:[#allocation2 + $0x50] sm:$0x8] %v4622_v0  ;;  %v2907_v35 = vmax.f32 %v18191_v49, %v2775_v47  ;;  %v4627_v16 = vmax.f32 %v2880_v53, %v2881_v3  ;;  %v4838_v6 = vmax.f32 %v2882_v13, %v2883_v17 }
 0x341   : > { %4626 = vst [vmem:[#allocation2 + $0x58] sm:$0x8] %v4625_v15  ;;  %v4628_v19 = vmax.f32 %v2904_v39, %v2905_v20 }
 0x342   : > { %v4839_v50 = vmax.f32 %v2906_v43, %v2907_v35  ;;  %v4629_v45 = vadd.f32 %v16415_v57, %v4627_v16  ;;  %v4840_v41 = vadd.f32 %v16415_v57, %v4838_v6  ;;  %v5507_v61 = vld [vmem:[#allocation2] sm:$0xf] }
 0x343   : > { %v4630_v22 = vadd.f32 %v16415_v57, %v4628_v19  ;;  %v5509_v12 = vld [vmem:[#allocation2 + $0x8] sm:$0xf]  ;;  %v5526_v40 = vshrl.u32 %v5507_v61, 16  ;;  %v5529_v21 = vshll.u32 %v5507_v61, 16  ;;  %v16577_v58 = vld [vmem:[#allocation2 + $0x10] sm:$0xf] }
 0x344   : > { %v4841_v38 = vadd.f32 %v16415_v57, %v4839_v50  ;;  %v4631_v30 = vmax.f32 %v4629_v45, 0.0  ;;  %v4842_v4 = vmax.f32 %v4840_v41, 0.0  ;;  %v5540_v56 = vshrl.u32 %v5509_v12, 16  ;;  %v4802_v45 = vld [vmem:[#allocation2 + $0x4] sm:$0x1] }
 0x345   : > { %v4632_v34 = vmax.f32 %v4630_v22, 0.0  ;;  %v5543_v63 = vshll.u32 %v5509_v12, 16  ;;  %v5528_v5 = vrot.slane %v5526_v40, 4  ;;  %v5531_v9 = vrot.slane %v5529_v21, 5  ;;  %v4805_v12 = vld [vmem:[#allocation2 + $0xc] sm:$0x1] }
 0x346   : > { %v4843_v47 = vmax.f32 %v4841_v38, 0.0  ;;  %v16579_v31 = vrot.slane %v5540_v56, 4  ;;  %v5554_v36 = vshrl.u32 %v16577_v58, 16  ;;  %v5557_v27 = vshll.u32 %v16577_v58, 16  ;;  %v4814_v56 = vld [vmem:[#allocation2 + $0x24] sm:$0x1] }
 0x347   : > { %v4633_v7 = vpack.c.bf16 %v4632_v34, %v4631_v30  ;;  %v12681_v52 = vpack.c.bf16 %v4632_v34, %v4632_v34  ;;  %v5532_v60 = vor.u32 %v5531_v9, %v5528_v5  ;;  %v16581_v48 = vrot.slane %v5543_v63, 5  ;;  %v4808_v30 = vld [vmem:[#allocation2 + $0x14] sm:$0x1] }
 0x348   : > { %v4844_v25 = vpack.c.bf16 %v4843_v47, %v4842_v4  ;;  %v12688_v10 = vpack.c.bf16 %v4843_v47, %v4843_v47  ;;  %v16594_v1 = vrot.slane %v5554_v36, 4  ;;  %v4811_v4 = vld [vmem:[#allocation2 + $0x1c] sm:$0x1] }
 0x349   : > { %v4642_v59 = vrot.slane %v4633_v7, %v15986_v24  ;;  %v4649_v55 = vrot.slane %v12681_v52, %v15986_v24  ;;  %v16590_v46 = vrot.slane %v5532_v60, 4  ;;  %v5546_v32 = vor.u32 %v16581_v48, %v16579_v31  ;;  %v4817_v52 = vld [vmem:[#allocation2 + $0x2c] sm:$0x1] }
 0x34a   : > { %v4853_v33 = vrot.slane %v4844_v25, %v15986_v24  ;;  %v16588_v11 = vrot.slane %v12688_v10, %v15986_v24  ;;  %v4820_v25 = vld [vmem:[#allocation2 + $0x34] sm:$0x1]  ;;  %v4823_v10 = vld [vmem:[#allocation2 + $0x3c] sm:$0x1] }
 0x34b   : > { %v4650_v42 = vcombine.high %v4642_v59, %v4642_v59  ;;  %v4651_v62 = vcombine.high %v4649_v55, %v4649_v55  ;;  %v4658_v29 = vrot.slane %v4642_v59, %v15986_v24  ;;  %v4665_v0 = vrot.slane %v4649_v55, %v15986_v24 }
 0x34c   : > { %v4861_v15 = vcombine.high %v4853_v33, %v4853_v33  ;;  %v4862_v53 = vcombine.high %v16588_v11, %v16588_v11  ;;  %v16602_v14 = vrot.slane %v4853_v33, %v15986_v24  ;;  %v16606_v13 = vrot.slane %v16588_v11, %v15986_v24  ;;  %v4826_v33 = vld [vmem:[#allocation2 + $0x44] sm:$0x1] }
 0x34d   : > { %v4672_v2 = vrot.slane %v4650_v42, %v15986_v24  ;;  %v4679_v3 = vrot.slane %v4651_v62, %v15986_v24  ;;  %v4680_v8 = vcombine.high %v4658_v29, %v4658_v29  ;;  %v4683_v17 = vunpack.i.h.s16 %v4658_v29  ;;  %v4829_v42 = vld [vmem:[#allocation2 + $0x4c] sm:$0x1]  ;;  %v4832_v62 = vld [vmem:[#allocation2 + $0x54] sm:$0x1] }
 0x34e   : > { %v4691_v23 = vunpack.i.h.s16 %v4665_v0  ;;  %v12682_v39 = vpack.i.b16 %v4658_v29, %v4658_v29  ;;  %v12686_v37 = vpack.i.b16 %v4665_v0, %v4665_v0  ;;  %v16611_v43 = vrot.slane %v4861_v15, %v15986_v24 }
 0x34f   : > { %v4681_v44 = vcombine.high %v4672_v2, %v4672_v2  ;;  %v4685_v20 = vunpack.i.h.s16 %v4672_v2  ;;  %v4687_v49 = vunpack.i.h.s16 %v4680_v8  ;;  %v4693_v35 = vunpack.i.h.s16 %v4679_v3 }
 0x350   : > { %v4695_v16 = vpack.i.b16 %v4683_v17, %v4683_v17  ;;  %v12683_v6 = vpack.i.b16 %v4672_v2, %v4672_v2  ;;  %v12684_v19 = vpack.i.b16 %v4680_v8, %v4680_v8  ;;  %v4703_v50 = vpack.i.b16 %v4691_v23, %v4691_v23 }
 0x351   : > { %v4689_v41 = vunpack.i.h.s16 %v4681_v44  ;;  %v4697_v22 = vpack.i.b16 %v4685_v20, %v4685_v20  ;;  %v4699_v38 = vpack.i.b16 %v4687_v49, %v4687_v49  ;;  %v12685_v61 = vpack.i.b16 %v4681_v44, %v4681_v44 }
 0x352   : > { %v12687_v40 = vpack.i.b16 %v4679_v3, %v4679_v3  ;;  %v4705_v21 = vpack.i.b16 %v4693_v35, %v4693_v35  ;;  %v4712_v34 = vrot.slane %v12682_v39, %v15990_v28  ;;  %v4719_v47 = vrot.slane %v4695_v16, %v15990_v28  ;;  %v4835_v3 = vld [vmem:[#allocation2 + $0x5c] sm:$0x1]  ;;  %v16643_v35 = vpop.f32.mrb[44].mxu0 }
 0x353   : > { %v4701_v63 = vpack.i.b16 %v4689_v41, %v4689_v41  ;;  %v4726_v5 = vrot.slane %v12683_v6, %v15990_v28  ;;  %v4733_v9 = vrot.slane %v4697_v22, %v15990_v28  ;;  %v4740_v7 = vrot.slane %v12684_v19, %v15990_v28  ;;  %v16657_v41 = vpop.f32.mrb[45].mxu0 }
 0x354   : > { %v4747_v60 = vrot.slane %v4699_v38, %v15990_v28  ;;  %v4754_v36 = vrot.slane %v12685_v61, %v15990_v28  ;;  %v4768_v59 = vrot.slane %v12686_v37, %v15990_v28  ;;  %v4775_v55 = vrot.slane %v4703_v50, %v15990_v28  ;;  %v16667_v11 = vpop.f32.mrb[46].mxu0 }
 0x355   : > { %v4761_v29 = vrot.slane %v4701_v63, %v15990_v28  ;;  %v4782_v0 = vrot.slane %v12687_v40, %v15990_v28  ;;  %v4789_v15 = vrot.slane %v4705_v21, %v15990_v28  ;;  %v4803_v2 = vsel %vm16014_vm8, %v4712_v34, %v4802_v45  ;;  %v16655_v45 = vpop.f32.mrb[44].mxu1  ;;  %v16676_v34 = vpop.f32.mrb[47].mxu0 }
 0x356   : > { %4804 = vst [vmem:[#allocation2 + $0x4] sm:$0x1] %v4803_v2  ;;  %v4806_v8 = vsel %vm16014_vm8, %v4719_v47, %v4805_v12  ;;  %v4809_v17 = vsel %vm16014_vm8, %v4726_v5, %v4808_v30  ;;  %v4812_v23 = vsel %vm16014_vm8, %v4733_v9, %v4811_v4  ;;  %v4815_v39 = vsel %vm16014_vm8, %v4740_v7, %v4814_v56  ;;  %v16665_v12 = vpop.f32.mrb[45].mxu1 }
 0x357   : > { %4807 = vst [vmem:[#allocation2 + $0xc] sm:$0x1] %v4806_v8  ;;  %4810 = vst [vmem:[#allocation2 + $0x14] sm:$0x1] %v4809_v17  ;;  %v4818_v37 = vsel %vm16014_vm8, %v4747_v60, %v4817_v52  ;;  %v4821_v44 = vsel %vm16014_vm8, %v4754_v36, %v4820_v25  ;;  %v4824_v20 = vsel %vm16014_vm8, %v4761_v29, %v4823_v10  ;;  %v4894_v26 = vunpack.i.h.s16 %v16602_v14  ;;  %v16674_v21 = vpop.f32.mrb[46].mxu1 }
 0x358   : > { %4813 = vst [vmem:[#allocation2 + $0x1c] sm:$0x1] %v4812_v23  ;;  %4816 = vst [vmem:[#allocation2 + $0x24] sm:$0x1] %v4815_v39  ;;  %v4827_v49 = vsel %vm16014_vm8, %v4768_v59, %v4826_v33  ;;  %v4830_v16 = vsel %vm16014_vm8, %v4775_v55, %v4829_v42  ;;  %v4833_v6 = vsel %vm16014_vm8, %v4782_v0, %v4832_v62  ;;  %v4896_v61 = vunpack.i.h.s16 %v16611_v43  ;;  %v16678_v9 = vpop.f32.mrb[47].mxu1 }
 0x359   : > { %4819 = vst [vmem:[#allocation2 + $0x2c] sm:$0x1] %v4818_v37  ;;  %4822 = vst [vmem:[#allocation2 + $0x34] sm:$0x1] %v4821_v44  ;;  %v4836_v19 = vsel %vm16014_vm8, %v4789_v15, %v4835_v3  ;;  %v4890_v50 = vrot.slane %v4862_v53, %v15986_v24  ;;  %v4891_v22 = vcombine.high %v16602_v14, %v16602_v14  ;;  %v4902_v53 = vunpack.i.h.s16 %v16606_v13 }
 0x35a   : > { %4825 = vst [vmem:[#allocation2 + $0x3c] sm:$0x1] %v4824_v20  ;;  %4828 = vst [vmem:[#allocation2 + $0x44] sm:$0x1] %v4827_v49  ;;  %v4892_v38 = vcombine.high %v16611_v43, %v16611_v43  ;;  %v12689_v4 = vpack.i.b16 %v16602_v14, %v16602_v14  ;;  %v12690_v40 = vpack.i.b16 %v16611_v43, %v16611_v43  ;;  %vm5523_vm8 = vsmask.f32 7440 }
 0x35b   : > { %4831 = vst [vmem:[#allocation2 + $0x4c] sm:$0x1] %v4830_v16  ;;  %4834 = vst [vmem:[#allocation2 + $0x54] sm:$0x1] %v4833_v6  ;;  %v4904_v30 = vunpack.i.h.s16 %v4890_v50  ;;  %v4898_v47 = vunpack.i.h.s16 %v4891_v22  ;;  %v4906_v63 = vpack.i.b16 %v4894_v26, %v4894_v26  ;;  %v4908_v5 = vpack.i.b16 %v4896_v61, %v4896_v61 }
 0x35c   : > { %4837 = vst [vmem:[#allocation2 + $0x5c] sm:$0x1] %v4836_v19  ;;  %v4900_v56 = vunpack.i.h.s16 %v4892_v38  ;;  %v12691_v7 = vpack.i.b16 %v4891_v22, %v4891_v22  ;;  %v12692_v52 = vpack.i.b16 %v4892_v38, %v4892_v38  ;;  %v12693_v25 = vpack.i.b16 %v16606_v13, %v16606_v13 }
 0x35d   : > { %v4914_v10 = vpack.i.b16 %v4902_v53, %v4902_v53  ;;  %v4910_v14 = vpack.i.b16 %v4898_v47, %v4898_v47  ;;  %v12694_v36 = vpack.i.b16 %v4890_v50, %v4890_v50  ;;  %v4916_v43 = vpack.i.b16 %v4904_v30, %v4904_v30  ;;  %v5013_v59 = vld [vmem:[#allocation2 + $0x4] sm:$0x1] }
 0x35e   : > { %v4912_v60 = vpack.i.b16 %v4900_v56, %v4900_v56  ;;  %v4923_v55 = vrot.slane %v12689_v4, %v15990_v28  ;;  %v4930_v33 = vrot.slane %v4906_v63, %v15990_v28  ;;  %v4937_v42 = vrot.slane %v12690_v40, %v15990_v28  ;;  %v5016_v29 = vld [vmem:[#allocation2 + $0xc] sm:$0x1]  ;;  %v5019_v0 = vld [vmem:[#allocation2 + $0x14] sm:$0x1] }
 0x35f   : > { %v4944_v62 = vrot.slane %v4908_v5, %v15990_v28  ;;  %v5022_v15 = vld [vmem:[#allocation2 + $0x1c] sm:$0x1]  ;;  %v4951_v2 = vrot.slane %v12691_v7, %v15990_v28  ;;  %v4958_v13 = vrot.slane %v4910_v14, %v15990_v28  ;;  %v4965_v3 = vrot.slane %v12692_v52, %v15990_v28  ;;  %v5025_v17 = vld [vmem:[#allocation2 + $0x24] sm:$0x1] }
 0x360   : > { %v4972_v8 = vrot.slane %v4912_v60, %v15990_v28  ;;  %v5028_v23 = vld [vmem:[#allocation2 + $0x2c] sm:$0x1]  ;;  %v5031_v39 = vld [vmem:[#allocation2 + $0x34] sm:$0x1]  ;;  %v4979_v37 = vrot.slane %v12693_v25, %v15990_v28  ;;  %v4986_v44 = vrot.slane %v4914_v10, %v15990_v28  ;;  %v4993_v20 = vrot.slane %v12694_v36, %v15990_v28  ;;  %v18192_v52 = vld [vmem:[#allocation26_spill] sm:$0xff] }
 0x361   : > { %v5000_v49 = vrot.slane %v4916_v43, %v15990_v28  ;;  %v5034_v16 = vld [vmem:[#allocation2 + $0x3c] sm:$0x1]  ;;  %v5037_v6 = vld [vmem:[#allocation2 + $0x44] sm:$0x1]  ;;  %v5014_v50 = vsel %vm16073_vm10, %v4923_v55, %v5013_v59  ;;  %v5017_v22 = vsel %vm16073_vm10, %v4930_v33, %v5016_v29  ;;  %v5020_v38 = vsel %vm16073_vm10, %v4937_v42, %v5019_v0  ;;  %v18193_v10 = vld [vmem:[#allocation28_spill] sm:$0xff] }
 0x362   : > { %v5040_v19 = vld [vmem:[#allocation2 + $0x4c] sm:$0x1]  ;;  %v5023_v26 = vsel %vm16073_vm10, %v4944_v62, %v5022_v15  ;;  %v5043_v61 = vld [vmem:[#allocation2 + $0x54] sm:$0x1]  ;;  %5015 = vst [vmem:[#allocation2 + $0x4] sm:$0x1] %v5014_v50  ;;  %v5026_v30 = vsel %vm16073_vm10, %v4951_v2, %v5025_v17  ;;  %v5029_v4 = vsel %vm16073_vm10, %v4958_v13, %v5028_v23  ;;  %v5032_v40 = vsel %vm16073_vm10, %v4965_v3, %v5031_v39 }
 0x363   : > { %v5046_v53 = vld [vmem:[#allocation2 + $0x5c] sm:$0x1]  ;;  %5018 = vst [vmem:[#allocation2 + $0xc] sm:$0x1] %v5017_v22  ;;  %5021 = vst [vmem:[#allocation2 + $0x14] sm:$0x1] %v5020_v38  ;;  %v5035_v47 = vsel %vm16073_vm10, %v4972_v8, %v5034_v16  ;;  %v5038_v56 = vsel %vm16073_vm10, %v4979_v37, %v5037_v6  ;;  %v5041_v63 = vsel %vm16073_vm10, %v4986_v44, %v5040_v19 }
 0x364   : > { %5024 = vst [vmem:[#allocation2 + $0x1c] sm:$0x1] %v5023_v26  ;;  %5027 = vst [vmem:[#allocation2 + $0x24] sm:$0x1] %v5026_v30  ;;  %v5044_v5 = vsel %vm16073_vm10, %v4993_v20, %v5043_v61  ;;  %v5047_v7 = vsel %vm16073_vm10, %v5000_v49, %v5046_v53  ;;  %v2884_v25 = vmax.f32 %v18192_v52, %v16643_v35  ;;  %v18194_v60 = vld [vmem:[#allocation29_spill] sm:$0xff]  ;;  %v18195_v43 = vld [vmem:[#allocation31_spill] sm:$0xff] }
 0x365   : > { %5030 = vst [vmem:[#allocation2 + $0x2c] sm:$0x1] %v5029_v4  ;;  %5033 = vst [vmem:[#allocation2 + $0x34] sm:$0x1] %v5032_v40  ;;  %v2886_v14 = vmax.f32 %v18193_v10, %v16655_v45  ;;  %v2885_v36 = vmax.f32 %v18194_v60, %v16657_v41  ;;  %v2887_v59 = vmax.f32 %v18195_v43, %v16665_v12  ;;  %v5513_v55 = vld [vmem:[#allocation2 + $0x18] sm:$0xf] }
 0x366   : > { %5036 = vst [vmem:[#allocation2 + $0x3c] sm:$0x1] %v5035_v47  ;;  %5039 = vst [vmem:[#allocation2 + $0x44] sm:$0x1] %v5038_v56  ;;  %v2908_v33 = vmax.f32 %v18196_v54, %v16667_v11  ;;  %v18197_v42 = vld [vmem:[#allocation32_spill] sm:$0xff]  ;;  %v18198_v29 = vld [vmem:[#allocation18_spill] sm:$0xff] }
 0x367   : > { %5042 = vst [vmem:[#allocation2 + $0x4c] sm:$0x1] %v5041_v63  ;;  %5045 = vst [vmem:[#allocation2 + $0x54] sm:$0x1] %v5044_v5  ;;  %v2910_v62 = vmax.f32 %v18197_v42, %v16674_v21  ;;  %v2909_v0 = vmax.f32 %v18198_v29, %v16676_v34  ;;  %v18199_v35 = vld [vmem:[#allocation19_spill] sm:$0xff]  ;;  %v5049_v2 = vmax.f32 %v2884_v25, %v2885_v36  ;;  %v5547_v12 = vrot.slane %v5546_v32, 4 }
 0x368   : > { %5048 = vst [vmem:[#allocation2 + $0x5c] sm:$0x1] %v5047_v7  ;;  %v2911_v15 = vmax.f32 %v18199_v35, %v16678_v9  ;;  %v16734_v45 = vld [vmem:[#allocation2 + $0x20] sm:$0xf]  ;;  %v5260_v41 = vmax.f32 %v2886_v14, %v2887_v59  ;;  %v5559_v11 = vrot.slane %v5557_v27, 5  ;;  %v5568_v21 = vshrl.u32 %v5513_v55, 16  ;;  %vm16749_vm10 = vmor %vm4376_vm6, %vm5523_vm8 }
 0x369   : > { %v5050_v13 = vmax.f32 %v2908_v33, %v2909_v0  ;;  %v5571_v8 = vshll.u32 %v5513_v55, 16  ;;  %v5051_v34 = vadd.f32 %v16415_v57, %v5049_v2  ;;  %v5582_v23 = vshrl.u32 %v16734_v45, 16  ;;  %v5508_v48 = vld [vmem:[#allocation2 + $0x4] sm:$0x1]  ;;  %v14089_v33 = vld [vmem:[#allocation2] ss:$8 sps:$4 sm:$0xff]  }
 0x36a   : > { %v5261_v3 = vmax.f32 %v2910_v62, %v2911_v15  ;;  %v5262_v17 = vadd.f32 %v16415_v57, %v5260_v41  ;;  %v5560_v9 = vor.u32 %v5559_v11, %v16594_v1  ;;  %v5510_v32 = vld [vmem:[#allocation2 + $0xc] sm:$0x1]  ;;  %v5512_v58 = vld [vmem:[#allocation2 + $0x14] sm:$0x1]  ;;  %v5535_v44 = vshll.u32 %v5508_v48, 16  ;;  %v14091_v36 = vld [vmem:[#allocation7 + $0x100] sm:$0xff]  }
 0x36b   : > { %v5052_v39 = vadd.f32 %v16415_v57, %v5050_v13  ;;  %v5053_v27 = vmax.f32 %v5051_v34, 0.0  ;;  %v5549_v20 = vshll.u32 %v5510_v32, 16  ;;  %v5563_v19 = vshll.u32 %v5512_v58, 16  ;;  %v16755_v4 = vld [vmem:[#allocation2 + $0x1c] sm:$0x1]  ;;  %v14093_v42 = vld [vmem:[#allocation7 + $0x148] sm:$0xff]  }
 0x36c   : > { %v5263_v31 = vadd.f32 %v16415_v57, %v5261_v3  ;;  %v5264_v37 = vmax.f32 %v5262_v17, 0.0  ;;  %v16753_v6 = vrot.slane %v5560_v9, 4  ;;  %v5537_v50 = vrot.slane %v5535_v44, 5 }
 0x36d   : > { %v5054_v1 = vmax.f32 %v5052_v39, 0.0  ;;  %v5551_v57 = vrot.slane %v5549_v20, 5  ;;  %v5570_v22 = vrot.slane %v5568_v21, 4  ;;  %v5573_v38 = vrot.slane %v5571_v8, 5  ;;  %v14095_v8 = vld [vmem:[#allocation7 + $0x108] sm:$0xff]  }
 0x36e   : > { %v5265_v16 = vmax.f32 %v5263_v31, 0.0  ;;  %v5538_v40 = vsel %vm16749_vm10, %v16590_v46, %v5537_v50  ;;  %v16762_v56 = vrot.slane %v5563_v19, 5  ;;  %v5577_v60 = vshll.u32 %v16755_v4, 16  ;;  %v14098_v31 = vld [vmem:[#allocation7 + $0x150] sm:$0xff]   ;;  %v5227_v19 = vld [vmem:[#allocation2 + $0xc] sm:$0x2] }
 0x36f   : > { %v5055_v26 = vpack.c.bf16 %v5054_v1, %v5053_v27  ;;  %v12695_v61 = vpack.c.bf16 %v5054_v1, %v5054_v1  ;;  %v5552_v47 = vsel %vm16749_vm10, %v5547_v12, %v5551_v57  ;;  %v5574_v63 = vor.u32 %v5573_v38, %v5570_v22 }
 0x370   : > { %v5266_v53 = vpack.c.bf16 %v5265_v16, %v5264_v37  ;;  %v12702_v30 = vpack.c.bf16 %v5265_v16, %v5265_v16  ;;  %v12713_v10 = vcombine.low %v5538_v40, %v5552_v47  ;;  %v5566_v46 = vsel %vm16749_vm10, %v16753_v6, %v16762_v56  ;;  %v5224_v16 = vld [vmem:[#allocation2 + $0x4] sm:$0x2] }
 0x371   : > { %v5064_v5 = vrot.slane %v5055_v26, %v15986_v24  ;;  %v5071_v7 = vrot.slane %v12695_v61, %v15986_v24  ;;  %v16774_v14 = vrot.slane %v5574_v63, 4  ;;  %v5230_v26 = vld [vmem:[#allocation2 + $0x14] sm:$0x2]  ;;  %v5233_v61 = vld [vmem:[#allocation2 + $0x1c] sm:$0x2] }
 0x372   : > { %v5275_v52 = vrot.slane %v5266_v53, %v15986_v24  ;;  %v16768_v25 = vrot.slane %v12702_v30, %v15986_v24  ;;  %9884 = vmatprep.mubr.bf16.mxu0 %v12713_v10  ;;  %v14100_v53 = vld [vmem:[#allocation7 + $0x110] sm:$0xff]  }
 0x373   : > { %v5072_v43 = vcombine.high %v5064_v5, %v5064_v5  ;;  %v5073_v59 = vcombine.high %v5071_v7, %v5071_v7  ;;  %v5080_v55 = vrot.slane %v5064_v5, %v15986_v24  ;;  %v5087_v54 = vrot.slane %v5071_v7, %v15986_v24  ;;  %9885 = vmatmul.mubr.bf16.vlgmr.msra.gmra.mrb[48].mxu0 %v14089_v33  ;;  %v5236_v5 = vld [vmem:[#allocation2 + $0x24] sm:$0x2]  ;;  %v5239_v7 = vld [vmem:[#allocation2 + $0x2c] sm:$0x2] }
 0x374   : > { %v5283_v62 = vcombine.high %v5275_v52, %v5275_v52  ;;  %v5284_v29 = vcombine.high %v16768_v25, %v16768_v25  ;;  %v16782_v0 = vrot.slane %v5275_v52, %v15986_v24  ;;  %v16786_v35 = vrot.slane %v16768_v25, %v15986_v24  ;;  %13311 = vmatpush3.bf16.msra.mxu0 %v14091_v36  ;;  %v14102_v52 = vld [vmem:[#allocation7 + $0x158] sm:$0xff]   ;;  %v5248_v33 = vld [vmem:[#allocation2 + $0x44] sm:$0x2] }
 0x375   : > { %v5094_v15 = vrot.slane %v5072_v43, %v15986_v24  ;;  %v5101_v2 = vrot.slane %v5073_v59, %v15986_v24  ;;  %v5102_v41 = vcombine.high %v5080_v55, %v5080_v55  ;;  %v5105_v12 = vunpack.i.h.s16 %v5080_v55  ;;  %13312 = vmatprep.subr.bf16.mxu0 %v14093_v42 }
 0x376   : > { %v5113_v11 = vunpack.i.h.s16 %v5087_v54  ;;  %v12696_v13 = vpack.i.b16 %v5080_v55, %v5080_v55  ;;  %v12700_v3 = vpack.i.b16 %v5087_v54, %v5087_v54  ;;  %v16791_v21 = vrot.slane %v5283_v62, %v15986_v24  ;;  %v5242_v55 = vld [vmem:[#allocation2 + $0x34] sm:$0x2]  ;;  %v5245_v54 = vld [vmem:[#allocation2 + $0x3c] sm:$0x2] }
 0x377   : > { %v5103_v34 = vcombine.high %v5094_v15, %v5094_v15  ;;  %v5107_v17 = vunpack.i.h.s16 %v5094_v15  ;;  %v5109_v9 = vunpack.i.h.s16 %v5102_v41  ;;  %v5115_v39 = vunpack.i.h.s16 %v5101_v2 }
 0x378   : > { %v5117_v48 = vpack.i.b16 %v5105_v12, %v5105_v12  ;;  %v12697_v32 = vpack.i.b16 %v5094_v15, %v5094_v15  ;;  %v12698_v58 = vpack.i.b16 %v5102_v41, %v5102_v41  ;;  %v5125_v27 = vpack.i.b16 %v5113_v11, %v5113_v11  ;;  %13313 = vmatpush3.bf16.msra.mxu0 %v14095_v8  ;;  %v5251_v41 = vld [vmem:[#allocation2 + $0x4c] sm:$0x2]  ;;  %v5254_v12 = vld [vmem:[#allocation2 + $0x54] sm:$0x2]  ;;  %v5257_v11 = vld [vmem:[#allocation2 + $0x5c] sm:$0x2] }
 0x379   : > { %v5111_v37 = vunpack.i.h.s16 %v5103_v34  ;;  %v5119_v44 = vpack.i.b16 %v5107_v17, %v5107_v17  ;;  %v5121_v20 = vpack.i.b16 %v5109_v9, %v5109_v9  ;;  %v12699_v1 = vpack.i.b16 %v5103_v34, %v5103_v34  ;;  %13314 = vmatprep.subr.bf16.mxu0 %v14098_v31  ;;  %v14104_v17 = vld [vmem:[#allocation7 + $0x118] sm:$0xff]  }
 0x37a   : > { %v12701_v50 = vpack.i.b16 %v5101_v2, %v5101_v2  ;;  %v5127_v57 = vpack.i.b16 %v5115_v39, %v5115_v39  ;;  %v5134_v22 = vrot.slane %v12696_v13, %v15990_v28  ;;  %v5141_v38 = vrot.slane %v5117_v48, %v15990_v28 }
 0x37b   : > { %v5123_v30 = vpack.i.b16 %v5111_v37, %v5111_v37  ;;  %v5148_v40 = vrot.slane %v12697_v32, %v15990_v28  ;;  %v5155_v47 = vrot.slane %v5119_v44, %v15990_v28  ;;  %v5162_v63 = vrot.slane %v12698_v58, %v15990_v28  ;;  %v14107_v32 = vld [vmem:[#allocation7 + $0x160] sm:$0xff]  }
 0x37c   : > { %v5169_v10 = vrot.slane %v5121_v20, %v15990_v28  ;;  %v5176_v36 = vrot.slane %v12699_v1, %v15990_v28  ;;  %v5190_v43 = vrot.slane %v12700_v3, %v15990_v28  ;;  %v5197_v59 = vrot.slane %v5125_v27, %v15990_v28  ;;  %13315 = vmatpush3.bf16.msra.mxu0 %v14100_v53 }
 0x37d   : > { %v5183_v42 = vrot.slane %v5123_v30, %v15990_v28  ;;  %v5204_v62 = vrot.slane %v12701_v50, %v15990_v28  ;;  %v5211_v15 = vrot.slane %v5127_v57, %v15990_v28  ;;  %v5225_v2 = vsel %vm16151_vm13, %v5134_v22, %v5224_v16  ;;  %13316 = vmatprep.subr.bf16.mxu0 %v14102_v52 }
 0x37e   : > { %5226 = vst [vmem:[#allocation2 + $0x4] sm:$0x2] %v5225_v2  ;;  %v5228_v13 = vsel %vm16151_vm13, %v5141_v38, %v5227_v19  ;;  %v5231_v3 = vsel %vm16151_vm13, %v5148_v40, %v5230_v26  ;;  %v5234_v8 = vsel %vm16151_vm13, %v5155_v47, %v5233_v61  ;;  %v5237_v34 = vsel %vm16151_vm13, %v5162_v63, %v5236_v5  ;;  %v14111_v61 = vld [vmem:[#allocation7 + $0x168] sm:$0xff]  }
 0x37f   : > { %5229 = vst [vmem:[#allocation2 + $0xc] sm:$0x2] %v5228_v13  ;;  %5232 = vst [vmem:[#allocation2 + $0x14] sm:$0x2] %v5231_v3  ;;  %v5240_v9 = vsel %vm16151_vm13, %v5169_v10, %v5239_v7  ;;  %v5243_v39 = vsel %vm16151_vm13, %v5176_v36, %v5242_v55  ;;  %v5246_v31 = vsel %vm16151_vm13, %v5183_v42, %v5245_v54  ;;  %v5316_v16 = vunpack.i.h.s16 %v16782_v0  ;;  %v14113_v63 = vld [vmem:[#allocation7 + $0x128] sm:$0xff]   ;;  %v14116_v10 = vld [vmem:[#allocation7 + $0x170] sm:$0xff]  }
 0x380   : > { %5235 = vst [vmem:[#allocation2 + $0x1c] sm:$0x2] %v5234_v8  ;;  %5238 = vst [vmem:[#allocation2 + $0x24] sm:$0x2] %v5237_v34  ;;  %v5249_v48 = vsel %vm16151_vm13, %v5190_v43, %v5248_v33  ;;  %v5252_v58 = vsel %vm16151_vm13, %v5197_v59, %v5251_v41  ;;  %v5255_v27 = vsel %vm16151_vm13, %v5204_v62, %v5254_v12  ;;  %v5318_v19 = vunpack.i.h.s16 %v16791_v21 }
 0x381   : > { %5241 = vst [vmem:[#allocation2 + $0x2c] sm:$0x2] %v5240_v9  ;;  %5244 = vst [vmem:[#allocation2 + $0x34] sm:$0x2] %v5243_v39  ;;  %v5258_v37 = vsel %vm16151_vm13, %v5211_v15, %v5257_v11  ;;  %v5312_v44 = vrot.slane %v5284_v29, %v15986_v24  ;;  %v5313_v20 = vcombine.high %v16782_v0, %v16782_v0  ;;  %v5324_v18 = vunpack.i.h.s16 %v16786_v35  ;;  %v14109_v29 = vld [vmem:[#allocation7 + $0x120] sm:$0xff]  }
 0x382   : > { %5247 = vst [vmem:[#allocation2 + $0x3c] sm:$0x2] %v5246_v31  ;;  %5250 = vst [vmem:[#allocation2 + $0x44] sm:$0x2] %v5249_v48  ;;  %v5314_v1 = vcombine.high %v16791_v21, %v16791_v21  ;;  %v12703_v25 = vpack.i.b16 %v16782_v0, %v16782_v0  ;;  %v12704_v24 = vpack.i.b16 %v16791_v21, %v16791_v21  ;;  %13317 = vmatpush3.bf16.msra.mxu0 %v14104_v17  ;;  %v14119_v31 = vld [vmem:[#allocation7 + $0x130] sm:$0xff]   ;;  %vm5959_vm13 = vcmask 1045508  }
 0x383   : > { %5253 = vst [vmem:[#allocation2 + $0x4c] sm:$0x2] %v5252_v58  ;;  %5256 = vst [vmem:[#allocation2 + $0x54] sm:$0x2] %v5255_v27  ;;  %v5326_v50 = vunpack.i.h.s16 %v5312_v44  ;;  %v5320_v57 = vunpack.i.h.s16 %v5313_v20  ;;  %v5328_v38 = vpack.i.b16 %v5316_v16, %v5316_v16  ;;  %v5330_v26 = vpack.i.b16 %v5318_v19, %v5318_v19  ;;  %13318 = vmatprep.subr.bf16.mxu0 %v14107_v32 }
 0x384   : > { %5259 = vst [vmem:[#allocation2 + $0x5c] sm:$0x2] %v5258_v37  ;;  %v5322_v22 = vunpack.i.h.s16 %v5314_v1  ;;  %v12705_v53 = vpack.i.b16 %v5313_v20, %v5313_v20  ;;  %v12706_v30 = vpack.i.b16 %v5314_v1, %v5314_v1  ;;  %v12707_v40 = vpack.i.b16 %v16786_v35, %v16786_v35  ;;  %vm16897_vm2 = vmor %vm5958_vm12, %vm5959_vm13 }
 0x385   : > { %v5336_v47 = vpack.i.b16 %v5324_v18, %v5324_v18  ;;  %v5332_v5 = vpack.i.b16 %v5320_v57, %v5320_v57  ;;  %v12708_v7 = vpack.i.b16 %v5312_v44, %v5312_v44  ;;  %v5338_v52 = vpack.i.b16 %v5326_v50, %v5326_v50  ;;  %v5435_v21 = vld [vmem:[#allocation2 + $0x4] sm:$0x2]  ;;  %v5516_v44 = vld [vmem:[#allocation2 + $0x24] sm:$0x1]  ;;  %v5517_v18 = vld [vmem:[#allocation2 + $0x28] sm:$0xf] }
 0x386   : > { %v5334_v0 = vpack.i.b16 %v5322_v22, %v5322_v22  ;;  %v5345_v36 = vrot.slane %v12703_v25, %v15990_v28  ;;  %v5352_v43 = vrot.slane %v5328_v38, %v15990_v28  ;;  %v5359_v59 = vrot.slane %v12704_v24, %v15990_v28  ;;  %v5438_v54 = vld [vmem:[#allocation2 + $0xc] sm:$0x2]  ;;  %v5441_v33 = vld [vmem:[#allocation2 + $0x14] sm:$0x2]  ;;  %13319 = vmatpush3.bf16.msra.mxu0 %v14109_v29  ;;  %v5518_v50 = vld [vmem:[#allocation2 + $0x2c] sm:$0x1] }
 0x387   : > { %v5366_v55 = vrot.slane %v5330_v26, %v15990_v28  ;;  %v5444_v42 = vld [vmem:[#allocation2 + $0x1c] sm:$0x2]  ;;  %v5373_v35 = vrot.slane %v12705_v53, %v15990_v28  ;;  %v5380_v62 = vrot.slane %v5332_v5, %v15990_v28  ;;  %v5387_v15 = vrot.slane %v12706_v30, %v15990_v28  ;;  %v5447_v41 = vld [vmem:[#allocation2 + $0x24] sm:$0x2]  ;;  %13320 = vmatprep.subr.bf16.mxu0 %v14111_v61  ;;  %v5519_v25 = vld [vmem:[#allocation2 + $0x30] sm:$0xf] }
 0x388   : > { %v5394_v2 = vrot.slane %v5334_v0, %v15990_v28  ;;  %v5450_v12 = vld [vmem:[#allocation2 + $0x2c] sm:$0x2]  ;;  %v5453_v11 = vld [vmem:[#allocation2 + $0x34] sm:$0x2]  ;;  %v5401_v13 = vrot.slane %v12707_v40, %v15990_v28  ;;  %v5408_v3 = vrot.slane %v5336_v47, %v15990_v28  ;;  %v5415_v8 = vrot.slane %v12708_v7, %v15990_v28  ;;  %v14121_v38 = vld [vmem:[#allocation7 + $0x178] sm:$0xff]  }
 0x389   : > { %v5422_v34 = vrot.slane %v5338_v52, %v15990_v28  ;;  %v5456_v17 = vld [vmem:[#allocation2 + $0x3c] sm:$0x2]  ;;  %v5459_v9 = vld [vmem:[#allocation2 + $0x44] sm:$0x2]  ;;  %v5436_v48 = vsel %vm16211_vm15, %v5345_v36, %v5435_v21  ;;  %v5439_v32 = vsel %vm16211_vm15, %v5352_v43, %v5438_v54  ;;  %v5442_v58 = vsel %vm16211_vm15, %v5359_v59, %v5441_v33  ;;  %v5521_v40 = vld [vmem:[#allocation2 + $0x38] sm:$0xf] }
 0x38a   : > { %v5462_v39 = vld [vmem:[#allocation2 + $0x4c] sm:$0x2]  ;;  %v5445_v27 = vsel %vm16211_vm15, %v5366_v55, %v5444_v42  ;;  %v5465_v37 = vld [vmem:[#allocation2 + $0x54] sm:$0x2]  ;;  %5437 = vst [vmem:[#allocation2 + $0x4] sm:$0x2] %v5436_v48  ;;  %v5448_v20 = vsel %vm16211_vm15, %v5373_v35, %v5447_v41  ;;  %v5451_v1 = vsel %vm16211_vm15, %v5380_v62, %v5450_v12  ;;  %v5454_v16 = vsel %vm16211_vm15, %v5387_v15, %v5453_v11 }
 0x38b   : > { %v5468_v28 = vld [vmem:[#allocation2 + $0x5c] sm:$0x2]  ;;  %5440 = vst [vmem:[#allocation2 + $0xc] sm:$0x2] %v5439_v32  ;;  %5443 = vst [vmem:[#allocation2 + $0x14] sm:$0x2] %v5442_v58  ;;  %v5457_v19 = vsel %vm16211_vm15, %v5394_v2, %v5456_v17  ;;  %13321 = vmatpush3.bf16.msra.mxu0 %v14113_v63  ;;  %v5460_v24 = vsel %vm16211_vm15, %v5401_v13, %v5459_v9  ;;  %v5463_v29 = vsel %vm16211_vm15, %v5408_v3, %v5462_v39 }
 0x38c   : > { %5446 = vst [vmem:[#allocation2 + $0x1c] sm:$0x2] %v5445_v27  ;;  %5449 = vst [vmem:[#allocation2 + $0x24] sm:$0x2] %v5448_v20  ;;  %v5466_v57 = vsel %vm16211_vm15, %v5415_v8, %v5465_v37  ;;  %v5469_v22 = vsel %vm16211_vm15, %v5422_v34, %v5468_v28  ;;  %13322 = vmatprep.subr.bf16.mxu0 %v14116_v10  ;;  %v5579_v26 = vrot.slane %v5577_v60, 5  ;;  %v5584_v61 = vrot.slane %v5582_v23, 4 }
 0x38d   : > { %5452 = vst [vmem:[#allocation2 + $0x2c] sm:$0x2] %v5451_v1  ;;  %5455 = vst [vmem:[#allocation2 + $0x34] sm:$0x2] %v5454_v16  ;;  %v5585_v53 = vshll.u32 %v16734_v45, 16  ;;  %v5591_v30 = vshll.u32 %v5516_v44, 16 }
 0x38e   : > { %5458 = vst [vmem:[#allocation2 + $0x3c] sm:$0x2] %v5457_v19  ;;  %5461 = vst [vmem:[#allocation2 + $0x44] sm:$0x2] %v5460_v24  ;;  %v5596_v47 = vshrl.u32 %v5517_v18, 16  ;;  %v5599_v63 = vshll.u32 %v5517_v18, 16  ;;  %v5580_v52 = vsel %vm16749_vm10, %v16774_v14, %v5579_v26 }
 0x38f   : > { %5464 = vst [vmem:[#allocation2 + $0x4c] sm:$0x2] %v5463_v29  ;;  %5467 = vst [vmem:[#allocation2 + $0x54] sm:$0x2] %v5466_v57  ;;  %v5605_v51 = vshll.u32 %v5518_v50, 16  ;;  %v5610_v0 = vshrl.u32 %v5519_v25, 16  ;;  %13323 = vmatpush3.bf16.msra.mxu0 %v14119_v31  ;;  %v12714_v45 = vcombine.low %v5566_v46, %v5580_v52 }
 0x390   : > { %5470 = vst [vmem:[#allocation2 + $0x5c] sm:$0x2] %v5469_v22  ;;  %v5520_v5 = vld [vmem:[#allocation2 + $0x34] sm:$0x1]  ;;  %v5926_v7 = vld [vmem:[#allocation2] sm:$0xc]  ;;  %13324 = vmatprep.subr.bf16.mxu0 %v14121_v38 }
 0x391   : > { %v14096_v21 = vld [vmem:[#allocation2 + $0x10] ss:$8 sps:$4 sm:$0xff]   ;;  %v5587_v4 = vrot.slane %v5585_v53, 5  ;;  %v5593_v60 = vrot.slane %v5591_v30, 5  ;;  %v5522_v10 = vld [vmem:[#allocation2 + $0x3c] sm:$0x1]  ;;  %9892 = vmatprep.mubr.bf16.mxu0 %v12714_v45 }
 0x392   : > { %v5613_v36 = vshll.u32 %v5519_v25, 16  ;;  %v5598_v23 = vrot.slane %v5596_v47, 4  ;;  %v5601_v43 = vrot.slane %v5599_v63, 5  ;;  %v5607_v59 = vrot.slane %v5605_v51, 5  ;;  %v14123_v55 = vld [vmem:[#allocation7 + $0x138] sm:$0xff]   ;;  %v14125_v62 = vld [vmem:[#allocation7 + $0x240] sm:$0xff]   ;;  %9893 = vmatmul.mubr.bf16.gmra.mrb[52].mxu0 %v14096_v21 }
 0x393   : > { %v5928_v54 = vld [vmem:[#allocation2 + $0x8] sm:$0xc]  ;;  %v5588_v14 = vor.u32 %v5587_v4, %v5584_v61  ;;  %v5612_v33 = vrot.slane %v5610_v0, 4  ;;  %v5619_v35 = vshll.u32 %v5520_v5, 16  ;;  %v5744_v15 = vld [vmem:[#allocation2] sm:$0xe]  ;;  %13325 = vmatpush3.bf16.msra.mxu0 %v14123_v55 }
 0x394   : > { %v5615_v42 = vrot.slane %v5613_v36, 5  ;;  %vm5689_vm15 = vcmask 1042432   ;;  %v5602_v2 = vor.u32 %v5601_v43, %v5598_v23  ;;  %v5624_v41 = vshrl.u32 %v5521_v40, 16  ;;  %v5927_v56 = vld [vmem:[#allocation2 + $0x4] sm:$0x3]  ;;  %13390 = vmatprep.subr.bf16.mxu0 %v14125_v62 }
 0x395   : > { %v5627_v12 = vshll.u32 %v5521_v40, 16  ;;  %v5633_v6 = vshll.u32 %v5522_v10, 16  ;;  %v5589_v46 = vrot.slane %v5588_v14, 4  ;;  %v5621_v13 = vrot.slane %v5619_v35, 5  ;;  %v5929_v3 = vld [vmem:[#allocation2 + $0xc] sm:$0x3]  ;;  %vm16927_vm4 = vmor %vm5689_vm15, %vm5690_vm0 }
 0x396   : > { %v5616_v11 = vor.u32 %v5615_v42, %v5612_v33  ;;  %v12733_v8 = vrot.slane %v5926_v7, 10  ;;  %v5603_v34 = vrot.slane %v5602_v2, 4  ;;  %v5626_v17 = vrot.slane %v5624_v41, 4  ;;  %v5745_v37 = vld [vmem:[#allocation2 + $0x4] sm:$0x3] }
 0x397   : > { %v5629_v9 = vrot.slane %v5627_v12, 5  ;;  %v5635_v39 = vrot.slane %v5633_v6, 5  ;;  %v5594_v48 = vsel %vm16749_vm10, %v5589_v46, %v5593_v60  ;;  %v5963_v58 = vrot.slane %v5927_v56, 6  ;;  %v5746_v1 = vld [vmem:[#allocation2 + $0x8] sm:$0xe] }
 0x398   : > { %v5617_v32 = vrot.slane %v5616_v11, 4  ;;  %v12734_v27 = vrot.slane %v5928_v54, 10  ;;  %v5608_v28 = vsel %vm16749_vm10, %v5603_v34, %v5607_v59  ;;  %v5967_v20 = vrot.slane %v5929_v3, 6  ;;  %v14105_v18 = vld [vmem:[#allocation2 + $0x20] ss:$8 sps:$4 sm:$0xff]  }
 0x399   : > { %v5630_v44 = vor.u32 %v5629_v9, %v5626_v17  ;;  %v5763_v16 = vshrl.u32 %v5744_v15, 16  ;;  %v12715_v19 = vcombine.low %v5594_v48, %v5608_v28  ;;  %v16909_v25 = vsel %vm16897_vm2, %v12733_v8, %v5963_v58  ;;  %v5747_v24 = vld [vmem:[#allocation2 + $0xc] sm:$0x3]  ;;  %v5657_v61 = vld [vmem:[#allocation2] sm:$0xe] }
 0x39a   : > { %v5622_v50 = vsel %vm16749_vm10, %v5617_v32, %v5621_v13  ;;  %v5766_v29 = vshll.u32 %v5744_v15, 16  ;;  %v16913_v22 = vsel %vm16897_vm2, %v12734_v27, %v5967_v20  ;;  %v5772_v26 = vshrl.u32 %v5745_v37, 16  ;;  %v5659_v63 = vld [vmem:[#allocation2 + $0x8] sm:$0xe]  ;;  %v5658_v52 = vld [vmem:[#allocation2 + $0x4] sm:$0x1] }
 0x39b   : > { %v5631_v57 = vrot.slane %v5630_v44, 4  ;;  %v5765_v38 = vrot.slane %v5763_v16, 5  ;;  %9900 = vmatprep.mubr.bf16.mxu0 %v12715_v19  ;;  %v12741_v53 = vcombine.low %v16909_v25, %v16913_v22  ;;  %v5775_v40 = vshll.u32 %v5745_v37, 16  ;;  %v5660_v45 = vld [vmem:[#allocation2 + $0xc] sm:$0x1]  ;;  %v14131_v37 = vld [vmem:[#allocation7 + $0x180] sm:$0xff]  }
 0x39c   : > { %v5768_v30 = vrot.slane %v5766_v29, 6  ;;  %v5781_v47 = vshrl.u32 %v5746_v1, 16  ;;  %v5774_v5 = vrot.slane %v5772_v26, 5  ;;  %v5784_v0 = vshll.u32 %v5746_v1, 16  ;;  %9901 = vmatmul.mubr.bf16.gmra.mrb[56].mxu0 %v14105_v18  ;;  %v5748_v23 = vld [vmem:[#allocation2 + $0x10] sm:$0xe] }
 0x39d   : > { %v5636_v51 = vsel %vm16749_vm10, %v5631_v57, %v5635_v39  ;;  %v5790_v7 = vshrl.u32 %v5747_v24, 16  ;;  %v5777_v10 = vrot.slane %v5775_v40, 6  ;;  %v5793_v55 = vshll.u32 %v5747_v24, 16  ;;  %v5749_v33 = vld [vmem:[#allocation2 + $0x14] sm:$0x3]  ;;  %v14133_v57 = vld [vmem:[#allocation7 + $0x1c8] sm:$0xff]  }
 0x39e   : > { %v12716_v4 = vcombine.low %v5622_v50, %v5636_v51  ;;  %v5769_v60 = vor.u32 %v5768_v30, %v5765_v38  ;;  %v5783_v36 = vrot.slane %v5781_v47, 5  ;;  %v5786_v43 = vrot.slane %v5784_v0, 6  ;;  %v14114_v56 = vld [vmem:[#allocation2 + $0x30] ss:$8 sps:$4 sm:$0xff]   ;;  %v5751_v3 = vld [vmem:[#allocation2 + $0x1c] sm:$0x3] }
 0x39f   : > { %v5792_v59 = vrot.slane %v5790_v7, 5  ;;  %v12717_v14 = vrot.slane %v5657_v61, 9  ;;  %v5778_v35 = vor.u32 %v5777_v10, %v5774_v5  ;;  %v5694_v62 = vrot.slane %v5658_v52, 5  ;;  %v5750_v13 = vld [vmem:[#allocation2 + $0x18] sm:$0xe] }
 0x3a0   : > { %9908 = vmatprep.mubr.bf16.mxu0 %v12716_v4  ;;  %v5770_v42 = vrot.slane %v5769_v60, 4  ;;  %v12718_v15 = vrot.slane %v5659_v63, 9  ;;  %v5787_v2 = vor.u32 %v5786_v43, %v5783_v36  ;;  %v5795_v41 = vrot.slane %v5793_v55, 6  ;;  %v14117_v17 = vld [vmem:[#allocation2 + $0x8] ss:$8 sps:$4 sm:$0xff]  }
 0x3a1   : > { %v5698_v12 = vrot.slane %v5660_v45, 5  ;;  %v5799_v6 = vshrl.u32 %v5748_v23, 16  ;;  %v5695_v11 = vsel %vm16927_vm4, %v12717_v14, %v5694_v62  ;;  %v5802_v8 = vshll.u32 %v5748_v23, 16  ;;  %v5930_v58 = vld [vmem:[#allocation2 + $0x10] sm:$0xc]  ;;  %v14128_v45 = vld [vmem:[#allocation7 + $0x200] sm:$0xff]  }
 0x3a2   : > { %v5779_v46 = vsel %vm16921_vm3, %v5770_v42, %v5778_v35  ;;  %v5808_v34 = vshrl.u32 %v5749_v33, 16  ;;  %v5788_v9 = vrot.slane %v5787_v2, 4  ;;  %v5796_v39 = vor.u32 %v5795_v41, %v5792_v59  ;;  %v5932_v1 = vld [vmem:[#allocation2 + $0x18] sm:$0xc]  ;;  %v5661_v16 = vld [vmem:[#allocation2 + $0x10] sm:$0xe] }
 0x3a3   : > { %v5699_v48 = vsel %vm16927_vm4, %v12718_v15, %v5698_v12  ;;  %v5801_v32 = vrot.slane %v5799_v6, 5  ;;  %v5804_v28 = vrot.slane %v5802_v8, 6  ;;  %v5811_v20 = vshll.u32 %v5749_v33, 16  ;;  %v5931_v29 = vld [vmem:[#allocation2 + $0x14] sm:$0x3]  ;;  %v14130_v33 = vld [vmem:[#allocation7 + $0x248] sm:$0xff]  }
 0x3a4   : > { %v12725_v27 = vcombine.low %v5695_v11, %v5699_v48  ;;  %v5810_v44 = vrot.slane %v5808_v34, 5  ;;  %v5797_v19 = vsel %vm16921_vm3, %v5788_v9, %v5796_v39  ;;  %v5817_v18 = vshrl.u32 %v5750_v13, 16  ;;  %9909 = vmatmul.mubr.bf16.gmra.mrb[60].mxu0 %v14114_v56  ;;  %v5933_v40 = vld [vmem:[#allocation2 + $0x1c] sm:$0x3]  ;;  %v5663_v47 = vld [vmem:[#allocation2 + $0x18] sm:$0xe] }
 0x3a5   : > { %v5820_v50 = vshll.u32 %v5750_v13, 16  ;;  %v5826_v24 = vshrl.u32 %v5751_v3, 16  ;;  %v12729_v38 = vcombine.low %v5779_v46, %v5797_v19  ;;  %v5805_v26 = vor.u32 %v5804_v28, %v5801_v32  ;;  %10014 = vmatprep.mubr.bf16.mxu0 %v14117_v17  ;;  %v5662_v7 = vld [vmem:[#allocation2 + $0x14] sm:$0x1]  ;;  %v5664_v36 = vld [vmem:[#allocation2 + $0x1c] sm:$0x1] }
 0x3a6   : > { %v5813_v61 = vrot.slane %v5811_v20, 6  ;;  %v5829_v30 = vshll.u32 %v5751_v3, 16  ;;  %v5819_v63 = vrot.slane %v5817_v18, 5  ;;  %v12735_v0 = vrot.slane %v5930_v58, 10  ;;  %v5752_v14 = vld [vmem:[#allocation2 + $0x20] sm:$0xe] }
 0x3a7   : > { %v5822_v51 = vrot.slane %v5820_v50, 6  ;;  %v5828_v5 = vrot.slane %v5826_v24, 5  ;;  %9949 = vmatprep.mubr.bf16.mxu1 %v12729_v38  ;;  %v5806_v52 = vrot.slane %v5805_v26, 4  ;;  %v5971_v10 = vrot.slane %v5931_v29, 6  ;;  %v14136_v15 = vld [vmem:[#allocation7 + $0x188] sm:$0xff]   ;;  %v14138_v46 = vld [vmem:[#allocation7 + $0x1d0] sm:$0xff]  }
 0x3a8   : > { %v5814_v4 = vor.u32 %v5813_v61, %v5810_v44  ;;  %v5831_v60 = vrot.slane %v5829_v30, 6  ;;  %9950 = vmatmul.mubr.bf16.vlgmr.msra.gmra.mrb[48].mxu1 %v12725_v27  ;;  %v12736_v43 = vrot.slane %v5932_v1, 10  ;;  %v5975_v59 = vrot.slane %v5933_v40, 6  ;;  %v5753_v41 = vld [vmem:[#allocation2 + $0x24] sm:$0x3]  ;;  %v14140_v34 = vld [vmem:[#allocation7 + $0x190] sm:$0xff]  }
 0x3a9   : > { %v5823_v23 = vor.u32 %v5822_v51, %v5819_v63  ;;  %v12719_v55 = vrot.slane %v5661_v16, 9  ;;  %13351 = vmatpush3.bf16.msra.mxu1 %v14131_v37  ;;  %v16943_v62 = vsel %vm16897_vm2, %v12735_v0, %v5971_v10  ;;  %v5702_v2 = vrot.slane %v5662_v7, 5  ;;  %v14127_v12 = vld [vmem:[#allocation2 + $0x18] ss:$8 sps:$4 sm:$0xff]   ;;  %v5754_v17 = vld [vmem:[#allocation2 + $0x28] sm:$0xe] }
 0x3aa   : > { %v5815_v42 = vsel %vm16921_vm3, %v5806_v52, %v5814_v4  ;;  %v5832_v35 = vor.u32 %v5831_v60, %v5828_v5  ;;  %v16947_v56 = vsel %vm16897_vm2, %v12736_v43, %v5975_v59  ;;  %13352 = vmatprep.subr.bf16.mxu1 %v14133_v57  ;;  %v12720_v11 = vrot.slane %v5663_v47, 9  ;;  %v5934_v48 = vld [vmem:[#allocation2 + $0x20] sm:$0xc]  ;;  %v14132_v32 = vld [vmem:[#allocation7 + $0x208] sm:$0xff]   ;;  %v14142_v1 = vld [vmem:[#allocation7 + $0x1d8] sm:$0xff]  }
 0x3ab   : > { %v5824_v6 = vrot.slane %v5823_v23, 4  ;;  %v5706_v13 = vrot.slane %v5664_v36, 5  ;;  %v12742_v3 = vcombine.low %v16943_v62, %v16947_v56  ;;  %v5703_v8 = vsel %vm16927_vm4, %v12719_v55, %v5702_v2  ;;  %v5755_v37 = vld [vmem:[#allocation2 + $0x2c] sm:$0x3]  ;;  %v5936_v20 = vld [vmem:[#allocation2 + $0x28] sm:$0xc] }
 0x3ac   : > { %v5835_v9 = vshrl.u32 %v5752_v14, 16  ;;  %v5838_v39 = vshll.u32 %v5752_v14, 16  ;;  %v5844_v28 = vshrl.u32 %v5753_v41, 16  ;;  %v5847_v44 = vshll.u32 %v5753_v41, 16  ;;  %10015 = vmatmul.mubr.bf16.vlgmr.msra.gmra.mrb[64].mxu0 %v12741_v53  ;;  %v5935_v24 = vld [vmem:[#allocation2 + $0x24] sm:$0x3] }
 0x3ad   : > { %v5833_v58 = vsel %vm16921_vm3, %v5824_v6, %v5832_v35  ;;  %v5707_v27 = vsel %vm16927_vm4, %v12720_v11, %v5706_v13  ;;  %13353 = vmatpush3.bf16.msra.mxu1 %v14136_v15  ;;  %v5665_v29 = vld [vmem:[#allocation2 + $0x20] sm:$0xe]  ;;  %10022 = vmatprep.mubr.bf16.mxu0 %v14127_v12  ;;  %v5853_v26 = vshrl.u32 %v5754_v17, 16  ;;  %v5856_v61 = vshll.u32 %v5754_v17, 16  ;;  %v5667_v30 = vld [vmem:[#allocation2 + $0x28] sm:$0xe] }
 0x3ae   : > { %v12730_v16 = vcombine.low %v5815_v42, %v5833_v58  ;;  %v12726_v19 = vcombine.low %v5703_v8, %v5707_v27  ;;  %v5837_v18 = vrot.slane %v5835_v9, 5  ;;  %v5840_v50 = vrot.slane %v5838_v39, 6  ;;  %13391 = vmatpush3.bf16.msra.mxu0 %v14128_v45  ;;  %v14134_v40 = vld [vmem:[#allocation7 + $0x250] sm:$0xff]   ;;  %v5937_v53 = vld [vmem:[#allocation2 + $0x2c] sm:$0x3]  ;;  %13354 = vmatprep.subr.bf16.mxu1 %v14138_v46  ;;  %v14145_v60 = vld [vmem:[#allocation7 + $0x198] sm:$0xff]  }
 0x3af   : > { %v5846_v57 = vrot.slane %v5844_v28, 5  ;;  %v5849_v38 = vrot.slane %v5847_v44, 6  ;;  %13392 = vmatprep.subr.bf16.mxu0 %v14130_v33  ;;  %v5862_v25 = vshrl.u32 %v5755_v37, 16  ;;  %v5865_v22 = vshll.u32 %v5755_v37, 16  ;;  %v5756_v51 = vld [vmem:[#allocation2 + $0x30] sm:$0xe] }
 0x3b0   : > { %9957 = vmatprep.mubr.bf16.mxu1 %v12730_v16  ;;  %v5841_v47 = vor.u32 %v5840_v50, %v5837_v18  ;;  %v12737_v63 = vrot.slane %v5934_v48, 10  ;;  %v14137_v5 = vld [vmem:[#allocation7 + $0x210] sm:$0xff]   ;;  %v5855_v7 = vrot.slane %v5853_v26, 5  ;;  %v5858_v52 = vrot.slane %v5856_v61, 6  ;;  %v5666_v10 = vld [vmem:[#allocation2 + $0x24] sm:$0x1] }
 0x3b1   : > { %9958 = vmatmul.mubr.bf16.gmra.mrb[52].mxu1 %v12726_v19  ;;  %v5850_v0 = vor.u32 %v5849_v38, %v5846_v57  ;;  %v5979_v4 = vrot.slane %v5935_v24, 6  ;;  %v5864_v45 = vrot.slane %v5862_v25, 5  ;;  %v5867_v23 = vrot.slane %v5865_v22, 6  ;;  %v5668_v59 = vld [vmem:[#allocation2 + $0x2c] sm:$0x1]  ;;  %v14139_v55 = vld [vmem:[#allocation7 + $0x258] sm:$0xff]  }
 0x3b2   : > { %13355 = vmatpush3.bf16.msra.mxu1 %v14140_v34  ;;  %v5842_v36 = vrot.slane %v5841_v47, 4  ;;  %v12738_v43 = vrot.slane %v5936_v20, 10  ;;  %13393 = vmatpush3.bf16.msra.mxu0 %v14132_v32  ;;  %v5859_v14 = vor.u32 %v5858_v52, %v5855_v7  ;;  %v5983_v42 = vrot.slane %v5937_v53, 6  ;;  %v14147_v35 = vld [vmem:[#allocation7 + $0x1e0] sm:$0xff]   ;;  %v5757_v2 = vld [vmem:[#allocation2 + $0x34] sm:$0x3] }
 0x3b3   : > { %v16962_v33 = vsel %vm16897_vm2, %v12737_v63, %v5979_v4  ;;  %13356 = vmatprep.subr.bf16.mxu1 %v14142_v1  ;;  %v12721_v15 = vrot.slane %v5665_v29, 9  ;;  %13394 = vmatprep.subr.bf16.mxu0 %v14134_v40  ;;  %v14135_v41 = vld [vmem:[#allocation2 + $0x28] ss:$8 sps:$4 sm:$0xff]   ;;  %v5868_v6 = vor.u32 %v5867_v23, %v5864_v45  ;;  %v5710_v46 = vrot.slane %v5666_v10, 5  ;;  %v14141_v13 = vld [vmem:[#allocation7 + $0x218] sm:$0xff]   ;;  %v14149_v9 = vld [vmem:[#allocation7 + $0x1a0] sm:$0xff]  }
 0x3b4   : > { %v5851_v12 = vsel %vm16921_vm3, %v5842_v36, %v5850_v0  ;;  %v12722_v11 = vrot.slane %v5667_v30, 9  ;;  %v5860_v8 = vrot.slane %v5859_v14, 4  ;;  %v16968_v34 = vsel %vm16897_vm2, %v12738_v43, %v5983_v42  ;;  %10023 = vmatmul.mubr.bf16.gmra.mrb[68].mxu0 %v12742_v3  ;;  %v14143_v32 = vld [vmem:[#allocation7 + $0x260] sm:$0xff]   ;;  %v5758_v27 = vld [vmem:[#allocation2 + $0x38] sm:$0xe]  ;;  %v14151_v20 = vld [vmem:[#allocation7 + $0x1e8] sm:$0xff]  }
 0x3b5   : > { %v5714_v17 = vrot.slane %v5668_v59, 5  ;;  %v5871_v39 = vshrl.u32 %v5756_v51, 16  ;;  %v12743_v48 = vcombine.low %v16962_v33, %v16968_v34  ;;  %v5711_v58 = vsel %vm16927_vm4, %v12721_v15, %v5710_v46  ;;  %v5759_v37 = vld [vmem:[#allocation2 + $0x3c] sm:$0x3]  ;;  %10030 = vmatprep.mubr.bf16.mxu0 %v14135_v41  ;;  %v5938_v16 = vld [vmem:[#allocation2 + $0x30] sm:$0xc] }
 0x3b6   : > { %13357 = vmatpush3.bf16.msra.mxu1 %v14145_v60  ;;  %v5874_v28 = vshll.u32 %v5756_v51, 16  ;;  %v5880_v44 = vshrl.u32 %v5757_v2, 16  ;;  %13395 = vmatpush3.bf16.msra.mxu0 %v14137_v5  ;;  %v5869_v1 = vsel %vm16921_vm3, %v5860_v8, %v5868_v6  ;;  %v5883_v3 = vshll.u32 %v5757_v2, 16  ;;  %v5939_v19 = vld [vmem:[#allocation2 + $0x34] sm:$0x3]  ;;  %v14146_v26 = vld [vmem:[#allocation7 + $0x220] sm:$0xff]  }
 0x3b7   : > { %v5715_v62 = vsel %vm16927_vm4, %v12722_v11, %v5714_v17  ;;  %v5873_v56 = vrot.slane %v5871_v39, 5  ;;  %13396 = vmatprep.subr.bf16.mxu0 %v14139_v55  ;;  %v12731_v18 = vcombine.low %v5851_v12, %v5869_v1  ;;  %13358 = vmatprep.subr.bf16.mxu1 %v14147_v35  ;;  %v5940_v57 = vld [vmem:[#allocation2 + $0x38] sm:$0xc]  ;;  %v6462_v38 = vld [vmem:[#allocation2 + $0x8] sm:$0xc]  ;;  %v5889_v30 = vshrl.u32 %v5758_v27, 16 }
 0x3b8   : > { %v12727_v50 = vcombine.low %v5711_v58, %v5715_v62  ;;  %v5876_v24 = vrot.slane %v5874_v28, 6  ;;  %v5882_v29 = vrot.slane %v5880_v44, 5  ;;  %v5885_v61 = vrot.slane %v5883_v3, 6  ;;  %v5941_v25 = vld [vmem:[#allocation2 + $0x3c] sm:$0x3]  ;;  %v14148_v53 = vld [vmem:[#allocation7 + $0x268] sm:$0xff]  }
 0x3b9   : > { %v5892_v40 = vshll.u32 %v5758_v27, 16  ;;  %v5898_v47 = vshrl.u32 %v5759_v37, 16  ;;  %v6464_v22 = vld [vmem:[#allocation2 + $0x10] sm:$0xc]  ;;  %9965 = vmatprep.mubr.bf16.mxu1 %v12731_v18  ;;  %v5901_v51 = vshll.u32 %v5759_v37, 16  ;;  %v12739_v5 = vrot.slane %v5938_v16, 10 }
 0x3ba   : > { %13359 = vmatpush3.bf16.msra.mxu1 %v14149_v9  ;;  %v5877_v63 = vor.u32 %v5876_v24, %v5873_v56  ;;  %v5987_v0 = vrot.slane %v5939_v19, 6  ;;  %v14153_v7 = vld [vmem:[#allocation7 + $0x1a8] sm:$0xff]   ;;  %v5669_v4 = vld [vmem:[#allocation2 + $0x30] sm:$0xe]  ;;  %13397 = vmatpush3.bf16.msra.mxu0 %v14141_v13  ;;  %v14144_v60 = vld [vmem:[#allocation2 + $0x38] ss:$8 sps:$4 sm:$0xff]   ;;  %v5886_v10 = vor.u32 %v5885_v61, %v5882_v29 }
 0x3bb   : > { %v6463_v52 = vld [vmem:[#allocation2 + $0xc] sm:$0x3]  ;;  %9966 = vmatmul.mubr.bf16.gmra.mrb[56].mxu1 %v12727_v50  ;;  %v5891_v36 = vrot.slane %v5889_v30, 5  ;;  %v5894_v45 = vrot.slane %v5892_v40, 6  ;;  %v5900_v23 = vrot.slane %v5898_v47, 5  ;;  %v14155_v59 = vld [vmem:[#allocation7 + $0x1f0] sm:$0xff]   ;;  %13398 = vmatprep.subr.bf16.mxu0 %v14143_v32 }
 0x3bc   : > { %v6465_v43 = vld [vmem:[#allocation2 + $0x14] sm:$0x3]  ;;  %v5671_v55 = vld [vmem:[#allocation2 + $0x38] sm:$0xe]  ;;  %v5878_v14 = vrot.slane %v5877_v63, 4  ;;  %v5903_v42 = vrot.slane %v5901_v51, 6  ;;  %v16983_v35 = vsel %vm16897_vm2, %v12739_v5, %v5987_v0  ;;  %13360 = vmatprep.subr.bf16.mxu1 %v14151_v20  ;;  %10031 = vmatmul.mubr.bf16.gmra.mrb[72].mxu0 %v12743_v48 }
 0x3bd   : > { %v12740_v15 = vrot.slane %v5940_v57, 10  ;;  %v14157_v2 = vld [vmem:[#allocation7 + $0x1b0] sm:$0xff]   ;;  %v6198_v41 = vld [vmem:[#allocation2 + $0x8] sm:$0xe]  ;;  %v5895_v6 = vor.u32 %v5894_v45, %v5891_v36  ;;  %v5991_v46 = vrot.slane %v5941_v25, 6  ;;  %v12769_v11 = vrot.slane %v6462_v38, 10  ;;  %10038 = vmatprep.mubr.bf16.mxu0 %v14144_v60 }
 0x3be   : > { %v14150_v12 = vld [vmem:[#allocation7 + $0x228] sm:$0xff]   ;;  %v6496_v13 = vrot.slane %v6463_v52, 6  ;;  %v5670_v8 = vld [vmem:[#allocation2 + $0x34] sm:$0x1]  ;;  %v6200_v17 = vld [vmem:[#allocation2 + $0x10] sm:$0xe]  ;;  %v5887_v39 = vsel %vm16921_vm3, %v5878_v14, %v5886_v10  ;;  %v5904_v32 = vor.u32 %v5903_v42, %v5900_v23  ;;  %13361 = vmatpush3.bf16.msra.mxu1 %v14153_v7  ;;  %13399 = vmatpush3.bf16.msra.mxu0 %v14146_v26 }
 0x3bf   : > { %v14159_v9 = vld [vmem:[#allocation7 + $0x1f8] sm:$0xff]   ;;  %v14152_v58 = vld [vmem:[#allocation7 + $0x270] sm:$0xff]   ;;  %v12770_v27 = vrot.slane %v6464_v22, 10  ;;  %v6500_v37 = vrot.slane %v6465_v43, 6  ;;  %v6199_v44 = vld [vmem:[#allocation2 + $0xc] sm:$0x1]  ;;  %v5992_v1 = vsel %vm16897_vm2, %v12740_v15, %v5991_v46  ;;  %13400 = vmatprep.subr.bf16.mxu0 %v14148_v53  ;;  %13362 = vmatprep.subr.bf16.mxu1 %v14155_v59 }
 0x3c0   : > { %v5672_v28 = vld [vmem:[#allocation2 + $0x3c] sm:$0x1]  ;;  %v5896_v20 = vrot.slane %v5895_v6, 4  ;;  %v6497_v33 = vsel %vm16897_vm2, %v12769_v11, %v6496_v13  ;;  %v12723_v34 = vrot.slane %v5669_v4, 9  ;;  %v12744_v48 = vcombine.low %v16983_v35, %v5992_v1  ;;  %v6201_v16 = vld [vmem:[#allocation2 + $0x14] sm:$0x1] }
 0x3c1   : > { %v6501_v62 = vsel %vm16897_vm2, %v12770_v27, %v6500_v37  ;;  %v5718_v56 = vrot.slane %v5670_v8, 5  ;;  %v12724_v3 = vrot.slane %v5671_v55, 9  ;;  %v6282_v19 = vld [vmem:[#allocation2 + $0x8] sm:$0xe]  ;;  %v5722_v24 = vrot.slane %v5672_v28, 5  ;;  %v14154_v26 = vld [vmem:[#allocation7 + $0x230] sm:$0xff]  }
 0x3c2   : > { %v5905_v18 = vsel %vm16921_vm3, %v5896_v20, %v5904_v32  ;;  %v12777_v50 = vcombine.low %v6497_v33, %v6501_v62  ;;  %v12753_v29 = vrot.slane %v6198_v41, 9  ;;  %v6283_v57 = vld [vmem:[#allocation2 + $0xc] sm:$0x3]  ;;  %13363 = vmatpush3.bf16.msra.mxu1 %v14157_v2  ;;  %v6232_v30 = vrot.slane %v6199_v44, 5  ;;  %v6284_v47 = vld [vmem:[#allocation2 + $0x10] sm:$0xe]  ;;  %13401 = vmatpush3.bf16.msra.mxu0 %v14150_v12 }
 0x3c3   : > { %v12732_v38 = vcombine.low %v5887_v39, %v5905_v18  ;;  %v5719_v61 = vsel %vm16927_vm4, %v12723_v34, %v5718_v56  ;;  %v12754_v40 = vrot.slane %v6200_v17, 9  ;;  %v14156_v25 = vld [vmem:[#allocation7 + $0x278] sm:$0xff]   ;;  %v5723_v22 = vsel %vm16927_vm4, %v12724_v3, %v5722_v24  ;;  %13364 = vmatprep.subr.bf16.mxu1 %v14159_v9  ;;  %13402 = vmatprep.subr.bf16.mxu0 %v14152_v58  ;;  %v6285_v52 = vld [vmem:[#allocation2 + $0x14] sm:$0x3]  ;;  %v6468_v10 = vld [vmem:[#allocation2 + $0x20] sm:$0xc] }
 0x3c4   : > { %v6236_v53 = vrot.slane %v6201_v16, 5  ;;  %v6299_v63 = vshrl.u32 %v6282_v19, 16  ;;  %v6302_v51 = vshll.u32 %v6282_v19, 16  ;;  %v6466_v5 = vld [vmem:[#allocation2 + $0x18] sm:$0xc]  ;;  %v12728_v0 = vcombine.low %v5719_v61, %v5723_v22  ;;  %10039 = vmatmul.mubr.bf16.gmra.mrb[76].mxu0 %v12744_v48  ;;  %v14163_v2 = vld [vmem:[#allocation7 + $0x2c0] sm:$0xff]  }
 0x3c5   : > { %9973 = vmatprep.mubr.bf16.mxu1 %v12732_v38  ;;  %v6233_v7 = vsel %vm16927_vm4, %v12753_v29, %v6232_v30  ;;  %v6308_v4 = vshrl.u32 %v6283_v57, 16  ;;  %v6311_v60 = vshll.u32 %v6283_v57, 16  ;;  %v6317_v43 = vshrl.u32 %v6284_v47, 16  ;;  %v14161_v59 = vld [vmem:[#allocation7 + $0x1b8] sm:$0xff]   ;;  %v6050_v41 = vld [vmem:[#allocation2 + $0x8] sm:$0xf]  ;;  %10144 = vmatprep.mubr.bf16.mxu0 %v12777_v50 }
 0x3c6   : > { %v6237_v36 = vsel %vm16927_vm4, %v12754_v40, %v6236_v53  ;;  %v6301_v45 = vrot.slane %v6299_v63, 5  ;;  %v6304_v23 = vrot.slane %v6302_v51, 6  ;;  %v6467_v55 = vld [vmem:[#allocation2 + $0x1c] sm:$0x3]  ;;  %9974 = vmatmul.mubr.bf16.gmra.mrb[60].mxu1 %v12728_v0  ;;  %v6320_v15 = vshll.u32 %v6284_v47, 16  ;;  %13403 = vmatpush3.bf16.msra.mxu0 %v14154_v26  ;;  %v14160_v32 = vld [vmem:[#allocation7 + $0x340] sm:$0xff]  }
 0x3c7   : > { %v12761_v14 = vcombine.low %v6233_v7, %v6237_v36  ;;  %v6310_v42 = vrot.slane %v6308_v4, 5  ;;  %v6313_v35 = vrot.slane %v6311_v60, 6  ;;  %v14158_v12 = vld [vmem:[#allocation7 + $0x238] sm:$0xff]   ;;  %v6319_v46 = vrot.slane %v6317_v43, 5  ;;  %v6469_v8 = vld [vmem:[#allocation2 + $0x24] sm:$0x3]  ;;  %13404 = vmatprep.subr.bf16.mxu0 %v14156_v25  ;;  %13365 = vmatpush3.bf16.msra.mxu1 %v14161_v59 }
 0x3c8   : > { %v6305_v6 = vor.u32 %v6304_v23, %v6301_v45  ;;  %v6326_v11 = vshrl.u32 %v6285_v52, 16  ;;  %v6329_v13 = vshll.u32 %v6285_v52, 16  ;;  %v6052_v17 = vld [vmem:[#allocation2 + $0x10] sm:$0xf]  ;;  %v6322_v39 = vrot.slane %v6320_v15, 6  ;;  %13430 = vmatprep.subr.bf16.mxu1 %v14163_v2  ;;  %v14162_v51 = vld [vmem:[#allocation7 + $0x300] sm:$0xff]  }
 0x3c9   : > { %10079 = vmatprep.mubr.bf16.mxu1 %v12761_v14  ;;  %v6314_v9 = vor.u32 %v6313_v35, %v6310_v42  ;;  %v12771_v58 = vrot.slane %v6466_v5, 10  ;;  %v6504_v27 = vrot.slane %v6467_v55, 6  ;;  %v6051_v37 = vld [vmem:[#allocation2 + $0xc] sm:$0x1]  ;;  %v12772_v1 = vrot.slane %v6468_v10, 10 }
 0x3ca   : > { %v6306_v28 = vrot.slane %v6305_v6, 4  ;;  %v6328_v44 = vrot.slane %v6326_v11, 5  ;;  %v6331_v20 = vrot.slane %v6329_v13, 6  ;;  %v6053_v33 = vld [vmem:[#allocation2 + $0x14] sm:$0x1]  ;;  %v6323_v48 = vor.u32 %v6322_v39, %v6319_v46  ;;  %13405 = vmatpush3.bf16.msra.mxu0 %v14158_v12  ;;  %v14164_v4 = vld [vmem:[#allocation7 + $0x348] sm:$0xff]  }
 0x3cb   : > { %v6202_v34 = vld [vmem:[#allocation2 + $0x18] sm:$0xe]  ;;  %v6505_v62 = vsel %vm16897_vm2, %v12771_v58, %v6504_v27  ;;  %v6508_v56 = vrot.slane %v6469_v8, 6  ;;  %v6067_v3 = vshrl.u32 %v6050_v41, 16  ;;  %v6070_v18 = vshll.u32 %v6050_v41, 16  ;;  %13470 = vmatprep.subr.bf16.mxu0 %v14160_v32  ;;  %v14166_v35 = vld [vmem:[#allocation7 + $0x308] sm:$0xff]  }
 0x3cc   : > { %v6315_v16 = vsel %vm16921_vm3, %v6306_v28, %v6314_v9  ;;  %v6332_v19 = vor.u32 %v6331_v20, %v6328_v44  ;;  %v6076_v50 = vshll.u32 %v6051_v37, 16  ;;  %v6203_v24 = vld [vmem:[#allocation2 + $0x1c] sm:$0x1]  ;;  %v6204_v29 = vld [vmem:[#allocation2 + $0x20] sm:$0xe]  ;;  %v6324_v26 = vrot.slane %v6323_v48, 4 }
 0x3cd   : > { %v6205_v57 = vld [vmem:[#allocation2 + $0x24] sm:$0x1]  ;;  %v6286_v38 = vld [vmem:[#allocation2 + $0x18] sm:$0xe]  ;;  %v6509_v61 = vsel %vm16897_vm2, %v12772_v1, %v6508_v56  ;;  %v6069_v30 = vrot.slane %v6067_v3, 4  ;;  %v6081_v40 = vshrl.u32 %v6052_v17, 16 }
 0x3ce   : > { %v12778_v47 = vcombine.low %v6505_v62, %v6509_v61  ;;  %v6072_v25 = vrot.slane %v6070_v18, 5  ;;  %v6078_v22 = vrot.slane %v6076_v50, 5  ;;  %v6084_v53 = vshll.u32 %v6052_v17, 16  ;;  %v6287_v45 = vld [vmem:[#allocation2 + $0x1c] sm:$0x3]  ;;  %v14168_v8 = vld [vmem:[#allocation7 + $0x350] sm:$0xff]  }
 0x3cf   : > { %v6333_v63 = vsel %vm16921_vm3, %v6324_v26, %v6332_v19  ;;  %v6083_v5 = vrot.slane %v6081_v40, 4  ;;  %v6090_v0 = vshll.u32 %v6053_v33, 16  ;;  %v12755_v7 = vrot.slane %v6202_v34, 9  ;;  %v6288_v2 = vld [vmem:[#allocation2 + $0x20] sm:$0xe]  ;;  %v14167_v33 = vld [vmem:[#allocation7 + $0x2c8] sm:$0xff]  }
 0x3d0   : > { %v12765_v52 = vcombine.low %v6315_v16, %v6333_v63  ;;  %v6073_v60 = vor.u32 %v6072_v25, %v6069_v30  ;;  %v6086_v10 = vrot.slane %v6084_v53, 5  ;;  %v6240_v36 = vrot.slane %v6203_v24, 5  ;;  %v6289_v6 = vld [vmem:[#allocation2 + $0x24] sm:$0x3]  ;;  %v6470_v27 = vld [vmem:[#allocation2 + $0x28] sm:$0xc] }
 0x3d1   : > { %v6092_v23 = vrot.slane %v6090_v0, 5  ;;  %v12756_v43 = vrot.slane %v6204_v29, 9  ;;  %v6244_v59 = vrot.slane %v6205_v57, 5  ;;  %v6335_v55 = vshrl.u32 %v6286_v38, 16  ;;  %v14165_v39 = vld [vmem:[#allocation7 + $0x280] sm:$0xff]   ;;  %v14170_v34 = vld [vmem:[#allocation7 + $0x310] sm:$0xff]  }
 0x3d2   : > { %10145 = vmatmul.mubr.bf16.vlgmr.msra.gmra.mrb[80].mxu0 %v12765_v52  ;;  %v6074_v14 = vrot.slane %v6073_v60, 4  ;;  %v6087_v42 = vor.u32 %v6086_v10, %v6083_v5  ;;  %v6241_v15 = vsel %vm16927_vm4, %v12755_v7, %v6240_v36  ;;  %v6338_v41 = vshll.u32 %v6286_v38, 16  ;;  %v6472_v37 = vld [vmem:[#allocation2 + $0x30] sm:$0xc]  ;;  %v6471_v16 = vld [vmem:[#allocation2 + $0x2c] sm:$0x3] }
 0x3d3   : > { %10152 = vmatprep.mubr.bf16.mxu0 %v12778_v47  ;;  %13471 = vmatpush3.bf16.msra.mxu0 %v14162_v51  ;;  %v6245_v12 = vsel %vm16927_vm4, %v12756_v43, %v6244_v59  ;;  %v6337_v46 = vrot.slane %v6335_v55, 5  ;;  %v6344_v11 = vshrl.u32 %v6287_v45, 16  ;;  %v6347_v13 = vshll.u32 %v6287_v45, 16  ;;  %v6473_v19 = vld [vmem:[#allocation2 + $0x34] sm:$0x3]  ;;  %v14172_v18 = vld [vmem:[#allocation7 + $0x358] sm:$0xff]  }
 0x3d4   : > { %13472 = vmatprep.subr.bf16.mxu0 %v14164_v4  ;;  %v6079_v17 = vsel %vm16749_vm10, %v6074_v14, %v6078_v22  ;;  %v6088_v9 = vrot.slane %v6087_v42, 4  ;;  %v12762_v32 = vcombine.low %v6241_v15, %v6245_v12  ;;  %v6340_v58 = vrot.slane %v6338_v41, 6  ;;  %v6054_v38 = vld [vmem:[#allocation2 + $0x18] sm:$0xf]  ;;  %v6056_v26 = vld [vmem:[#allocation2 + $0x20] sm:$0xf] }
 0x3d5   : > { %v6346_v28 = vrot.slane %v6344_v11, 5  ;;  %v6349_v44 = vrot.slane %v6347_v13, 6  ;;  %v6353_v20 = vshrl.u32 %v6288_v2, 16  ;;  %v6356_v1 = vshll.u32 %v6288_v2, 16  ;;  %v14169_v25 = vld [vmem:[#allocation7 + $0x288] sm:$0xff]   ;;  %v14171_v0 = vld [vmem:[#allocation7 + $0x2d0] sm:$0xff]  }
 0x3d6   : > { %v6093_v48 = vsel %vm16749_vm10, %v6088_v9, %v6092_v23  ;;  %v6341_v62 = vor.u32 %v6340_v58, %v6337_v46  ;;  %v6362_v56 = vshrl.u32 %v6289_v6, 16  ;;  %v6365_v3 = vshll.u32 %v6289_v6, 16  ;;  %v6055_v22 = vld [vmem:[#allocation2 + $0x1c] sm:$0x1]  ;;  %v6206_v52 = vld [vmem:[#allocation2 + $0x28] sm:$0xe] }
 0x3d7   : > { %v12749_v50 = vcombine.low %v6079_v17, %v6093_v48  ;;  %13473 = vmatpush3.bf16.msra.mxu0 %v14166_v35  ;;  %v6350_v24 = vor.u32 %v6349_v44, %v6346_v28  ;;  %v6355_v29 = vrot.slane %v6353_v20, 5  ;;  %v6358_v57 = vrot.slane %v6356_v1, 6  ;;  %v14174_v7 = vld [vmem:[#allocation7 + $0x318] sm:$0xff]   ;;  %v6057_v10 = vld [vmem:[#allocation2 + $0x24] sm:$0x1]  ;;  %v14173_v58 = vld [vmem:[#allocation7 + $0x290] sm:$0xff]  }
 0x3d8   : > { %v6342_v61 = vrot.slane %v6341_v62, 4  ;;  %v6364_v30 = vrot.slane %v6362_v56, 5  ;;  %v6367_v40 = vrot.slane %v6365_v3, 6  ;;  %13474 = vmatprep.subr.bf16.mxu0 %v14168_v8  ;;  %v12773_v47 = vrot.slane %v6470_v27, 10  ;;  %v6207_v14 = vld [vmem:[#allocation2 + $0x2c] sm:$0x1] }
 0x3d9   : > { %10080 = vmatmul.mubr.bf16.vlgmr.msra.gmra.mrb[64].mxu1 %v12749_v50  ;;  %v6359_v53 = vor.u32 %v6358_v57, %v6355_v29  ;;  %v6512_v63 = vrot.slane %v6471_v16, 6  ;;  %v12774_v51 = vrot.slane %v6472_v37, 10  ;;  %v6516_v5 = vrot.slane %v6473_v19, 6  ;;  %v6208_v42 = vld [vmem:[#allocation2 + $0x30] sm:$0xe]  ;;  %v14176_v6 = vld [vmem:[#allocation7 + $0x360] sm:$0xff]  }
 0x3da   : > { %13431 = vmatpush3.bf16.msra.mxu1 %v14165_v39  ;;  %10087 = vmatprep.mubr.bf16.mxu1 %v12762_v32  ;;  %v6351_v4 = vsel %vm16921_vm3, %v6342_v61, %v6350_v24  ;;  %v6368_v60 = vor.u32 %v6367_v40, %v6364_v30  ;;  %v6095_v36 = vshrl.u32 %v6054_v38, 16  ;;  %v6098_v45 = vshll.u32 %v6054_v38, 16  ;;  %v6209_v12 = vld [vmem:[#allocation2 + $0x34] sm:$0x1]  ;;  %v6290_v17 = vld [vmem:[#allocation2 + $0x28] sm:$0xe] }
 0x3db   : > { %v6360_v23 = vrot.slane %v6359_v53, 4  ;;  %13432 = vmatprep.subr.bf16.mxu1 %v14167_v33  ;;  %v6513_v43 = vsel %vm16897_vm2, %v12773_v47, %v6512_v63  ;;  %v6517_v59 = vsel %vm16897_vm2, %v12774_v51, %v6516_v5  ;;  %13475 = vmatpush3.bf16.msra.mxu0 %v14170_v34  ;;  %v6104_v55 = vshll.u32 %v6055_v22, 16  ;;  %v6291_v37 = vld [vmem:[#allocation2 + $0x2c] sm:$0x3]  ;;  %v6292_v33 = vld [vmem:[#allocation2 + $0x30] sm:$0xe] }
 0x3dc   : > { %v12779_v35 = vcombine.low %v6513_v43, %v6517_v59  ;;  %13476 = vmatprep.subr.bf16.mxu0 %v14172_v18  ;;  %v6097_v15 = vrot.slane %v6095_v36, 4  ;;  %v6100_v2 = vrot.slane %v6098_v45, 5  ;;  %v6109_v41 = vshrl.u32 %v6056_v26, 16  ;;  %v14175_v34 = vld [vmem:[#allocation7 + $0x2d8] sm:$0xff]   ;;  %v14178_v48 = vld [vmem:[#allocation7 + $0x320] sm:$0xff]   ;;  %v14180_v19 = vld [vmem:[#allocation7 + $0x368] sm:$0xff]  }
 0x3dd   : > { %v6369_v46 = vsel %vm16921_vm3, %v6360_v23, %v6368_v60  ;;  %v17031_v11 = vrot.slane %v6104_v55, 5  ;;  %v6112_v13 = vshll.u32 %v6056_v26, 16  ;;  %v6118_v8 = vshll.u32 %v6057_v10, 16  ;;  %v6293_v24 = vld [vmem:[#allocation2 + $0x34] sm:$0x3]  ;;  %v14179_v22 = vld [vmem:[#allocation7 + $0x2e0] sm:$0xff]  }
 0x3de   : > { %v12766_v9 = vcombine.low %v6351_v4, %v6369_v46  ;;  %13433 = vmatpush3.bf16.msra.mxu1 %v14169_v25  ;;  %v6101_v39 = vor.u32 %v6100_v2, %v6097_v15  ;;  %v6111_v32 = vrot.slane %v6109_v41, 4  ;;  %v12757_v27 = vrot.slane %v6206_v52, 9  ;;  %v6474_v38 = vld [vmem:[#allocation2 + $0x38] sm:$0xc]  ;;  %v6476_v47 = vld [vmem:[#allocation2 + $0x40] sm:$0xc] }
 0x3df   : > { %13434 = vmatprep.subr.bf16.mxu1 %v14171_v0  ;;  %v6114_v28 = vrot.slane %v6112_v13, 5  ;;  %v6120_v44 = vrot.slane %v6118_v8, 5  ;;  %13477 = vmatpush3.bf16.msra.mxu0 %v14174_v7  ;;  %v6248_v20 = vrot.slane %v6207_v14, 5  ;;  %v12758_v1 = vrot.slane %v6208_v42, 9  ;;  %v14177_v25 = vld [vmem:[#allocation7 + $0x298] sm:$0xff]   ;;  %v14182_v52 = vld [vmem:[#allocation7 + $0x328] sm:$0xff]  }
 0x3e0   : > { %10153 = vmatmul.mubr.bf16.gmra.mrb[84].mxu0 %v12766_v9  ;;  %v6102_v62 = vrot.slane %v6101_v39, 4  ;;  %v6252_v56 = vrot.slane %v6209_v12, 5  ;;  %v6371_v3 = vshrl.u32 %v6290_v17, 16  ;;  %v6374_v16 = vshll.u32 %v6290_v17, 16  ;;  %13478 = vmatprep.subr.bf16.mxu0 %v14176_v6  ;;  %v6475_v0 = vld [vmem:[#allocation2 + $0x3c] sm:$0x3] }
 0x3e1   : > { %10160 = vmatprep.mubr.bf16.mxu0 %v12779_v35  ;;  %v6115_v18 = vor.u32 %v6114_v28, %v6111_v32  ;;  %v6249_v50 = vsel %vm16927_vm4, %v12757_v27, %v6248_v20  ;;  %v6380_v29 = vshrl.u32 %v6291_v37, 16  ;;  %v6383_v57 = vshll.u32 %v6291_v37, 16  ;;  %v6058_v7 = vld [vmem:[#allocation2 + $0x28] sm:$0xf]  ;;  %v6059_v45 = vld [vmem:[#allocation2 + $0x2c] sm:$0x1] }
 0x3e2   : > { %v6107_v26 = vsel %vm16749_vm10, %v6102_v62, %v17031_v11  ;;  %13435 = vmatpush3.bf16.msra.mxu1 %v14173_v58  ;;  %v6253_v61 = vsel %vm16927_vm4, %v12758_v1, %v6252_v56  ;;  %v6373_v30 = vrot.slane %v6371_v3, 5  ;;  %v6376_v40 = vrot.slane %v6374_v16, 6  ;;  %v14184_v23 = vld [vmem:[#allocation7 + $0x370] sm:$0xff]   ;;  %v6477_v14 = vld [vmem:[#allocation2 + $0x44] sm:$0x3]  ;;  %v14183_v9 = vld [vmem:[#allocation7 + $0x2e8] sm:$0xff]  }
 0x3e3   : > { %v6116_v53 = vrot.slane %v6115_v18, 4  ;;  %v12763_v63 = vcombine.low %v6249_v50, %v6253_v61  ;;  %v6382_v51 = vrot.slane %v6380_v29, 5  ;;  %v6385_v5 = vrot.slane %v6383_v57, 6  ;;  %13436 = vmatprep.subr.bf16.mxu1 %v14175_v34  ;;  %13479 = vmatpush3.bf16.msra.mxu0 %v14178_v48  ;;  %v6060_v12 = vld [vmem:[#allocation2 + $0x30] sm:$0xf]  ;;  %v14181_v6 = vld [vmem:[#allocation7 + $0x2a0] sm:$0xff]  }
 0x3e4   : > { %v6377_v4 = vor.u32 %v6376_v40, %v6373_v30  ;;  %v6389_v60 = vshrl.u32 %v6292_v33, 16  ;;  %v6392_v10 = vshll.u32 %v6292_v33, 16  ;;  %v6398_v36 = vshrl.u32 %v6293_v24, 16  ;;  %13480 = vmatprep.subr.bf16.mxu0 %v14180_v19  ;;  %v6061_v17 = vld [vmem:[#allocation2 + $0x34] sm:$0x1]  ;;  %v14185_v50 = vld [vmem:[#allocation7 + $0x2a8] sm:$0xff]  }
 0x3e5   : > { %v6121_v43 = vsel %vm16749_vm10, %v6116_v53, %v6120_v44  ;;  %v6386_v59 = vor.u32 %v6385_v5, %v6382_v51  ;;  %v6401_v55 = vshll.u32 %v6293_v24, 16  ;;  %v12775_v42 = vrot.slane %v6474_v38, 10  ;;  %v14186_v39 = vld [vmem:[#allocation7 + $0x330] sm:$0xff]   ;;  %v6210_v28 = vld [vmem:[#allocation2 + $0x38] sm:$0xe] }
 0x3e6   : > { %v12750_v35 = vcombine.low %v6107_v26, %v6121_v43  ;;  %v6378_v15 = vrot.slane %v6377_v4, 4  ;;  %v6391_v2 = vrot.slane %v6389_v60, 5  ;;  %v6394_v41 = vrot.slane %v6392_v10, 6  ;;  %13437 = vmatpush3.bf16.msra.mxu1 %v14177_v25  ;;  %v14188_v44 = vld [vmem:[#allocation7 + $0x378] sm:$0xff]   ;;  %v6212_v62 = vld [vmem:[#allocation2 + $0x40] sm:$0xe] }
 0x3e7   : > { %v6400_v46 = vrot.slane %v6398_v36, 5  ;;  %v6403_v11 = vrot.slane %v6401_v55, 6  ;;  %v6520_v13 = vrot.slane %v6475_v0, 6  ;;  %v12776_v8 = vrot.slane %v6476_v47, 10  ;;  %13438 = vmatprep.subr.bf16.mxu1 %v14179_v22  ;;  %13481 = vmatpush3.bf16.msra.mxu0 %v14182_v52  ;;  %v6211_v48 = vld [vmem:[#allocation2 + $0x3c] sm:$0x1] }
 0x3e8   : > { %10088 = vmatmul.mubr.bf16.gmra.mrb[68].mxu1 %v12750_v35  ;;  %v6387_v32 = vsel %vm16921_vm3, %v6378_v15, %v6386_v59  ;;  %v6395_v58 = vor.u32 %v6394_v41, %v6391_v2  ;;  %v6524_v27 = vrot.slane %v6477_v14, 6  ;;  %v6123_v37 = vshrl.u32 %v6058_v7, 16  ;;  %13482 = vmatprep.subr.bf16.mxu0 %v14184_v23  ;;  %v6213_v18 = vld [vmem:[#allocation2 + $0x44] sm:$0x1]  ;;  %v6294_v26 = vld [vmem:[#allocation2 + $0x38] sm:$0xe] }
 0x3e9   : > { %10095 = vmatprep.mubr.bf16.mxu1 %v12763_v63  ;;  %v6404_v20 = vor.u32 %v6403_v11, %v6400_v46  ;;  %v6521_v1 = vsel %vm16897_vm2, %v12775_v42, %v6520_v13  ;;  %v6126_v33 = vshll.u32 %v6058_v7, 16  ;;  %v6132_v34 = vshll.u32 %v6059_v45, 16  ;;  %v14187_v61 = vld [vmem:[#allocation7 + $0x2f0] sm:$0xff]   ;;  %v14190_v22 = vld [vmem:[#allocation7 + $0x338] sm:$0xff]   ;;  %v6296_v7 = vld [vmem:[#allocation2 + $0x40] sm:$0xe] }
 0x3ea   : > { %v6396_v56 = vrot.slane %v6395_v58, 4  ;;  %v6525_v3 = vsel %vm16897_vm2, %v12776_v8, %v6524_v27  ;;  %v6125_v16 = vrot.slane %v6123_v37, 4  ;;  %v6137_v19 = vshrl.u32 %v6060_v12, 16  ;;  %13439 = vmatpush3.bf16.msra.mxu1 %v14181_v6  ;;  %v6295_v0 = vld [vmem:[#allocation2 + $0x3c] sm:$0x3]  ;;  %v14192_v52 = vld [vmem:[#allocation7 + $0x440] sm:$0xff]  }
 0x3eb   : > { %v12780_v24 = vcombine.low %v6521_v1, %v6525_v3  ;;  %v6128_v29 = vrot.slane %v6126_v33, 5  ;;  %v6134_v57 = vrot.slane %v6132_v34, 5  ;;  %v6140_v38 = vshll.u32 %v6060_v12, 16  ;;  %13440 = vmatprep.subr.bf16.mxu1 %v14183_v9  ;;  %13483 = vmatpush3.bf16.msra.mxu0 %v14186_v39  ;;  %v14189_v45 = vld [vmem:[#allocation7 + $0x2b0] sm:$0xff]   ;;  %v6297_v55 = vld [vmem:[#allocation2 + $0x44] sm:$0x3] }
 0x3ec   : > { %v6405_v30 = vsel %vm16921_vm3, %v6396_v56, %v6404_v20  ;;  %v6139_v40 = vrot.slane %v6137_v19, 4  ;;  %v6146_v47 = vshll.u32 %v6061_v17, 16  ;;  %v12759_v25 = vrot.slane %v6210_v28, 9  ;;  %13484 = vmatprep.subr.bf16.mxu0 %v14188_v44  ;;  %v14191_v42 = vld [vmem:[#allocation7 + $0x2f8] sm:$0xff]   ;;  %v6815_v39 = vld [vmem:[#allocation2 + $0x10] sm:$0xe] }
 0x3ed   : > { %v12767_v53 = vcombine.low %v6387_v32, %v6405_v30  ;;  %v6129_v63 = vor.u32 %v6128_v29, %v6125_v16  ;;  %v6142_v51 = vrot.slane %v6140_v38, 5  ;;  %v6256_v5 = vrot.slane %v6211_v48, 5  ;;  %v6816_v28 = vld [vmem:[#allocation2 + $0x14] sm:$0x3]  ;;  %v14193_v44 = vld [vmem:[#allocation7 + $0x2b8] sm:$0xff]  }
 0x3ee   : > { %v6148_v4 = vrot.slane %v6146_v47, 5  ;;  %v12760_v60 = vrot.slane %v6212_v62, 9  ;;  %v6260_v10 = vrot.slane %v6213_v18, 5  ;;  %v6407_v36 = vshrl.u32 %v6294_v26, 16  ;;  %13441 = vmatpush3.bf16.msra.mxu1 %v14185_v50  ;;  %v6817_v48 = vld [vmem:[#allocation2 + $0x18] sm:$0xe] }
 0x3ef   : > { %10161 = vmatmul.mubr.bf16.gmra.mrb[88].mxu0 %v12767_v53  ;;  %v6130_v23 = vrot.slane %v6129_v63, 4  ;;  %v6143_v43 = vor.u32 %v6142_v51, %v6139_v40  ;;  %v6257_v59 = vsel %vm16927_vm4, %v12759_v25, %v6256_v5  ;;  %v6410_v14 = vshll.u32 %v6294_v26, 16  ;;  %13442 = vmatprep.subr.bf16.mxu1 %v14187_v61  ;;  %v14195_v62 = vld [vmem:[#allocation7 + $0x3c0] sm:$0xff]   ;;  %v6818_v50 = vld [vmem:[#allocation2 + $0x1c] sm:$0x3] }
 0x3f0   : > { %10168 = vmatprep.mubr.bf16.mxu0 %v12780_v24  ;;  %v6261_v35 = vsel %vm16927_vm4, %v12760_v60, %v6260_v10  ;;  %v6409_v15 = vrot.slane %v6407_v36, 5  ;;  %v6416_v2 = vshrl.u32 %v6295_v0, 16  ;;  %v6419_v41 = vshll.u32 %v6295_v0, 16  ;;  %13485 = vmatpush3.bf16.msra.mxu0 %v14190_v22  ;;  %v6062_v40 = vld [vmem:[#allocation2 + $0x38] sm:$0xf] }
 0x3f1   : > { %v6135_v12 = vsel %vm16749_vm10, %v6130_v23, %v6134_v57  ;;  %v6144_v6 = vrot.slane %v6143_v43, 4  ;;  %v12764_v46 = vcombine.low %v6257_v59, %v6261_v35  ;;  %v6412_v11 = vrot.slane %v6410_v14, 6  ;;  %13550 = vmatprep.subr.bf16.mxu0 %v14192_v52  ;;  %v6064_v10 = vld [vmem:[#allocation2 + $0x40] sm:$0xf] }
 0x3f2   : > { %v6418_v13 = vrot.slane %v6416_v2, 5  ;;  %v6421_v8 = vrot.slane %v6419_v41, 6  ;;  %v6425_v17 = vshrl.u32 %v6296_v7, 16  ;;  %v6428_v9 = vshll.u32 %v6296_v7, 16  ;;  %13443 = vmatpush3.bf16.msra.mxu1 %v14189_v45  ;;  %v6063_v7 = vld [vmem:[#allocation2 + $0x3c] sm:$0x1] }
 0x3f3   : > { %v6149_v32 = vsel %vm16749_vm10, %v6144_v6, %v6148_v4  ;;  %v6413_v58 = vor.u32 %v6412_v11, %v6409_v15  ;;  %v6434_v27 = vshrl.u32 %v6297_v55, 16  ;;  %v6437_v37 = vshll.u32 %v6297_v55, 16  ;;  %13444 = vmatprep.subr.bf16.mxu1 %v14191_v42  ;;  %v6065_v55 = vld [vmem:[#allocation2 + $0x44] sm:$0x1]  ;;  %v6583_v2 = vld [vmem:[#allocation2 + $0x10] sm:$0xf] }
 0x3f4   : > { %v12751_v20 = vcombine.low %v6135_v12, %v6149_v32  ;;  %v6422_v1 = vor.u32 %v6421_v8, %v6418_v13  ;;  %v6427_v33 = vrot.slane %v6425_v17, 5  ;;  %v6430_v34 = vrot.slane %v6428_v9, 6  ;;  %v6584_v11 = vld [vmem:[#allocation2 + $0x14] sm:$0x1]  ;;  %v6585_v13 = vld [vmem:[#allocation2 + $0x18] sm:$0xf] }
 0x3f5   : > { %v6414_v56 = vrot.slane %v6413_v58, 4  ;;  %v6436_v3 = vrot.slane %v6434_v27, 5  ;;  %v6439_v16 = vrot.slane %v6437_v37, 6  ;;  %v6832_v19 = vshrl.u32 %v6815_v39, 16  ;;  %v6586_v32 = vld [vmem:[#allocation2 + $0x1c] sm:$0x1] }
 0x3f6   : > { %10096 = vmatmul.mubr.bf16.gmra.mrb[72].mxu1 %v12751_v20  ;;  %v6431_v18 = vor.u32 %v6430_v34, %v6427_v33  ;;  %v6835_v24 = vshll.u32 %v6815_v39, 16  ;;  %v6841_v29 = vshrl.u32 %v6816_v28, 16  ;;  %v6844_v57 = vshll.u32 %v6816_v28, 16 }
 0x3f7   : > { %10103 = vmatprep.mubr.bf16.mxu1 %v12764_v46  ;;  %v6423_v38 = vsel %vm16921_vm3, %v6414_v56, %v6422_v1  ;;  %v6440_v26 = vor.u32 %v6439_v16, %v6436_v3  ;;  %v6834_v61 = vrot.slane %v6832_v19, 5  ;;  %v6850_v30 = vshrl.u32 %v6817_v48, 16  ;;  %13445 = vmatpush3.bf16.msra.mxu1 %v14193_v44  ;;  %v6731_v3 = vld [vmem:[#allocation2 + $0x10] sm:$0xe]  ;;  %v6732_v16 = vld [vmem:[#allocation2 + $0x14] sm:$0x1] }
 0x3f8   : > { %v6432_v47 = vrot.slane %v6431_v18, 4  ;;  %v6837_v25 = vrot.slane %v6835_v24, 6  ;;  %v6843_v22 = vrot.slane %v6841_v29, 5  ;;  %v6846_v53 = vrot.slane %v6844_v57, 6  ;;  %13510 = vmatprep.subr.bf16.mxu1 %v14195_v62  ;;  %v6733_v29 = vld [vmem:[#allocation2 + $0x18] sm:$0xe] }
 0x3f9   : > { %v6852_v63 = vrot.slane %v6850_v30, 5  ;;  %v6853_v51 = vshll.u32 %v6817_v48, 16  ;;  %v6859_v5 = vshrl.u32 %v6818_v50, 16  ;;  %v6862_v0 = vshll.u32 %v6818_v50, 16  ;;  %v6734_v30 = vld [vmem:[#allocation2 + $0x1c] sm:$0x1] }
 0x3fa   : > { %v6441_v52 = vsel %vm16921_vm3, %v6432_v47, %v6440_v26  ;;  %v6838_v4 = vor.u32 %v6837_v25, %v6834_v61  ;;  %v6847_v60 = vor.u32 %v6846_v53, %v6843_v22  ;;  %v6151_v36 = vshrl.u32 %v6062_v40, 16  ;;  %v6819_v53 = vld [vmem:[#allocation2 + $0x20] sm:$0xe] }
 0x3fb   : > { %v12768_v45 = vcombine.low %v6423_v38, %v6441_v52  ;;  %v6855_v23 = vrot.slane %v6853_v51, 6  ;;  %v6861_v43 = vrot.slane %v6859_v5, 5  ;;  %v6864_v59 = vrot.slane %v6862_v0, 6  ;;  %v6821_v52 = vld [vmem:[#allocation2 + $0x28] sm:$0xe] }
 0x3fc   : > { %v6839_v14 = vrot.slane %v6838_v4, 4  ;;  %v6153_v42 = vrot.slane %v6151_v36, 4  ;;  %v6154_v35 = vshll.u32 %v6062_v40, 16  ;;  %v6160_v15 = vshll.u32 %v6063_v7, 16 }
 0x3fd   : > { %10169 = vmatmul.mubr.bf16.gmra.mrb[92].mxu0 %v12768_v45  ;;  %v6856_v41 = vor.u32 %v6855_v23, %v6852_v63  ;;  %v6865_v12 = vor.u32 %v6864_v59, %v6861_v43  ;;  %v6165_v6 = vshrl.u32 %v6064_v10, 16  ;;  %v6168_v46 = vshll.u32 %v6064_v10, 16  ;;  %v6820_v63 = vld [vmem:[#allocation2 + $0x24] sm:$0x3] }
 0x3fe   : > { %v6848_v8 = vsel %vm16921_vm3, %v6839_v14, %v6847_v60  ;;  %v6156_v17 = vrot.slane %v6154_v35, 5  ;;  %v6162_v9 = vrot.slane %v6160_v15, 5  ;;  %v6174_v39 = vshll.u32 %v6065_v55, 16  ;;  %v6587_v55 = vld [vmem:[#allocation2 + $0x20] sm:$0xf] }
 0x3ff   : > { %v6857_v58 = vrot.slane %v6856_v41, 4  ;;  %v6167_v27 = vrot.slane %v6165_v6, 4  ;;  %v6170_v37 = vrot.slane %v6168_v46, 5  ;;  %v6600_v28 = vshrl.u32 %v6583_v2, 16  ;;  %v6822_v35 = vld [vmem:[#allocation2 + $0x2c] sm:$0x3] }
 0x400   : > { %v6157_v44 = vor.u32 %v6156_v17, %v6153_v42  ;;  %v6176_v20 = vrot.slane %v6174_v39, 5  ;;  %v6603_v1 = vshll.u32 %v6583_v2, 16  ;;  %v6609_v33 = vshll.u32 %v6584_v11, 16  ;;  %v14194_v41 = vld [vmem:[#allocation7 + $0x400] sm:$0xff]  }
 0x401   : > { %v6866_v34 = vsel %vm16921_vm3, %v6857_v58, %v6865_v12  ;;  %v6171_v48 = vor.u32 %v6170_v37, %v6167_v27  ;;  %v6602_v62 = vrot.slane %v6600_v28, 4  ;;  %v6614_v56 = vshrl.u32 %v6585_v13, 16  ;;  %v6588_v58 = vld [vmem:[#allocation2 + $0x24] sm:$0x1] }
 0x402   : > { %v12801_v19 = vcombine.low %v6848_v8, %v6866_v34  ;;  %v6158_v18 = vrot.slane %v6157_v44, 4  ;;  %v6605_v50 = vrot.slane %v6603_v1, 5  ;;  %v6611_v24 = vrot.slane %v6609_v33, 5  ;;  %v6589_v8 = vld [vmem:[#allocation2 + $0x28] sm:$0xf] }
 0x403   : > { %v6172_v57 = vrot.slane %v6171_v48, 4  ;;  %v6616_v38 = vrot.slane %v6614_v56, 4  ;;  %v6617_v26 = vshll.u32 %v6585_v13, 16  ;;  %v6623_v61 = vshll.u32 %v6586_v32, 16  ;;  %v14196_v13 = vld [vmem:[#allocation7 + $0x448] sm:$0xff]   ;;  %v14198_v48 = vld [vmem:[#allocation7 + $0x380] sm:$0xff]  }
 0x404   : > { %10274 = vmatprep.mubr.bf16.mxu0 %v12801_v19  ;;  %v6163_v40 = vsel %vm16749_vm10, %v6158_v18, %v6162_v9  ;;  %v6606_v47 = vor.u32 %v6605_v50, %v6602_v62  ;;  %v12789_v25 = vrot.slane %v6731_v3, 9  ;;  %v6765_v22 = vrot.slane %v6732_v16, 5  ;;  %v14197_v34 = vld [vmem:[#allocation2 + $0x10] ss:$8 sps:$4 sm:$0xff]   ;;  %v14199_v62 = vld [vmem:[#allocation7 + $0x408] sm:$0xff]  }
 0x405   : > { %v6177_v51 = vsel %vm16749_vm10, %v6172_v57, %v6176_v20  ;;  %v6619_v5 = vrot.slane %v6617_v26, 5  ;;  %v6625_v0 = vrot.slane %v6623_v61, 5  ;;  %v12790_v7 = vrot.slane %v6733_v29, 9  ;;  %v6735_v3 = vld [vmem:[#allocation2 + $0x20] sm:$0xe]  ;;  %v14201_v16 = vld [vmem:[#allocation7 + $0x450] sm:$0xff]  }
 0x406   : > { %v12752_v4 = vcombine.low %v6163_v40, %v6177_v51  ;;  %v6607_v60 = vrot.slane %v6606_v47, 4  ;;  %v6766_v10 = vsel %vm16927_vm4, %v12789_v25, %v6765_v22  ;;  %v6769_v36 = vrot.slane %v6734_v30, 5  ;;  %v6737_v57 = vld [vmem:[#allocation2 + $0x28] sm:$0xe]  ;;  %v6736_v40 = vld [vmem:[#allocation2 + $0x24] sm:$0x1] }
 0x407   : > { %v6620_v45 = vor.u32 %v6619_v5, %v6616_v38  ;;  %v6868_v23 = vshrl.u32 %v6819_v53, 16  ;;  %v6871_v43 = vshll.u32 %v6819_v53, 16  ;;  %v6877_v59 = vshrl.u32 %v6820_v63, 16  ;;  %v14200_v47 = vld [vmem:[#allocation7 + $0x3c8] sm:$0xff]   ;;  %v6823_v5 = vld [vmem:[#allocation2 + $0x30] sm:$0xe] }
 0x408   : > { %10104 = vmatmul.mubr.bf16.gmra.mrb[76].mxu1 %v12752_v4  ;;  %v6612_v14 = vsel %vm16749_vm10, %v6607_v60, %v6611_v24  ;;  %v6770_v42 = vsel %vm16927_vm4, %v12790_v7, %v6769_v36  ;;  %v6880_v15 = vshll.u32 %v6820_v63, 16  ;;  %v6886_v2 = vshrl.u32 %v6821_v52, 16  ;;  %v6590_v24 = vld [vmem:[#allocation2 + $0x2c] sm:$0x1]  ;;  %v14203_v60 = vld [vmem:[#allocation7 + $0x410] sm:$0xff]  }
 0x409   : > { %v6621_v12 = vrot.slane %v6620_v45, 4  ;;  %v12797_v6 = vcombine.low %v6766_v10, %v6770_v42  ;;  %v6870_v46 = vrot.slane %v6868_v23, 5  ;;  %v6873_v11 = vrot.slane %v6871_v43, 6  ;;  %v6738_v51 = vld [vmem:[#allocation2 + $0x2c] sm:$0x1] }
 0x40a   : > { %v6879_v17 = vrot.slane %v6877_v59, 5  ;;  %v6882_v9 = vrot.slane %v6880_v15, 6  ;;  %v6888_v39 = vrot.slane %v6886_v2, 5  ;;  %v6889_v32 = vshll.u32 %v6821_v52, 16  ;;  %v6824_v43 = vld [vmem:[#allocation2 + $0x34] sm:$0x3] }
 0x40b   : > { %v6626_v27 = vsel %vm16749_vm10, %v6621_v12, %v6625_v0  ;;  %10275 = vmatmul.mubr.bf16.vlgmr.msra.gmra.mrb[96].mxu0 %v12797_v6  ;;  %v6874_v37 = vor.u32 %v6873_v11, %v6870_v46  ;;  %v6895_v28 = vshrl.u32 %v6822_v35, 16  ;;  %v6898_v44 = vshll.u32 %v6822_v35, 16  ;;  %v14202_v59 = vld [vmem:[#allocation7 + $0x388] sm:$0xff]   ;;  %v14204_v15 = vld [vmem:[#allocation7 + $0x3d0] sm:$0xff]   ;;  %v14205_v2 = vld [vmem:[#allocation7 + $0x458] sm:$0xff]  }
 0x40c   : > { %v12785_v20 = vcombine.low %v6612_v14, %v6626_v27  ;;  %v6883_v1 = vor.u32 %v6882_v9, %v6879_v17  ;;  %v6891_v33 = vrot.slane %v6889_v32, 6  ;;  %13551 = vmatpush3.bf16.msra.mxu0 %v14194_v41  ;;  %v6628_v56 = vshrl.u32 %v6587_v55, 16  ;;  %v6825_v11 = vld [vmem:[#allocation2 + $0x38] sm:$0xe]  ;;  %v6826_v9 = vld [vmem:[#allocation2 + $0x3c] sm:$0x3] }
 0x40d   : > { %v6875_v19 = vrot.slane %v6874_v37, 4  ;;  %v6897_v18 = vrot.slane %v6895_v28, 5  ;;  %v6900_v50 = vrot.slane %v6898_v44, 6  ;;  %13552 = vmatprep.subr.bf16.mxu0 %v14196_v13  ;;  %v6631_v29 = vshll.u32 %v6587_v55, 16  ;;  %v14207_v13 = vld [vmem:[#allocation7 + $0x390] sm:$0xff]   ;;  %v14209_v27 = vld [vmem:[#allocation7 + $0x3d8] sm:$0xff]  }
 0x40e   : > { %10209 = vmatprep.mubr.bf16.mxu1 %v12785_v20  ;;  %v6892_v38 = vor.u32 %v6891_v33, %v6888_v39  ;;  %v6630_v26 = vrot.slane %v6628_v56, 4  ;;  %v6637_v61 = vshll.u32 %v6588_v58, 16  ;;  %v6642_v30 = vshrl.u32 %v6589_v8, 16  ;;  %v14210_v37 = vld [vmem:[#allocation7 + $0x460] sm:$0xff]   ;;  %v6591_v33 = vld [vmem:[#allocation2 + $0x30] sm:$0xf] }
 0x40f   : > { %v6884_v25 = vsel %vm16921_vm3, %v6875_v19, %v6883_v1  ;;  %v6901_v22 = vor.u32 %v6900_v50, %v6897_v18  ;;  %v6633_v53 = vrot.slane %v6631_v29, 5  ;;  %v6645_v63 = vshll.u32 %v6589_v8, 16  ;;  %v14208_v8 = vld [vmem:[#allocation7 + $0x418] sm:$0xff]  }
 0x410   : > { %v6893_v0 = vrot.slane %v6892_v38, 4  ;;  %10210 = vmatmul.mubr.bf16.vlgmr.msra.gmra.mrb[80].mxu1 %v14197_v34  ;;  %13553 = vmatpush3.bf16.msra.mxu0 %v14199_v62  ;;  %v6639_v7 = vrot.slane %v6637_v61, 5  ;;  %v6644_v52 = vrot.slane %v6642_v30, 4  ;;  %v6651_v4 = vshll.u32 %v6590_v24, 16  ;;  %v6592_v34 = vld [vmem:[#allocation2 + $0x34] sm:$0x1] }
 0x411   : > { %13511 = vmatpush3.bf16.msra.mxu1 %v14198_v48  ;;  %v6634_v10 = vor.u32 %v6633_v53, %v6630_v26  ;;  %v6647_v36 = vrot.slane %v6645_v63, 5  ;;  %v12791_v45 = vrot.slane %v6735_v3, 9  ;;  %v6773_v23 = vrot.slane %v6736_v40, 5  ;;  %13554 = vmatprep.subr.bf16.mxu0 %v14201_v16  ;;  %v14206_v24 = vld [vmem:[#allocation2 + $0x20] ss:$8 sps:$4 sm:$0xff]   ;;  %v14211_v29 = vld [vmem:[#allocation7 + $0x398] sm:$0xff]  }
 0x412   : > { %v6902_v55 = vsel %vm16921_vm3, %v6893_v0, %v6901_v22  ;;  %v6653_v14 = vrot.slane %v6651_v4, 5  ;;  %v12792_v42 = vrot.slane %v6737_v57, 9  ;;  %v6777_v35 = vrot.slane %v6738_v51, 5  ;;  %13512 = vmatprep.subr.bf16.mxu1 %v14200_v47  ;;  %v14212_v57 = vld [vmem:[#allocation7 + $0x420] sm:$0xff]   ;;  %v6593_v40 = vld [vmem:[#allocation2 + $0x38] sm:$0xf] }
 0x413   : > { %v12802_v41 = vcombine.low %v6884_v25, %v6902_v55  ;;  %v6635_v12 = vrot.slane %v6634_v10, 4  ;;  %v6648_v6 = vor.u32 %v6647_v36, %v6644_v52  ;;  %v6774_v46 = vsel %vm16927_vm4, %v12791_v45, %v6773_v23  ;;  %v6594_v47 = vld [vmem:[#allocation2 + $0x3c] sm:$0x1]  ;;  %v6739_v51 = vld [vmem:[#allocation2 + $0x30] sm:$0xe]  ;;  %v14213_v36 = vld [vmem:[#allocation7 + $0x3e0] sm:$0xff]  }
 0x414   : > { %v6778_v17 = vsel %vm16927_vm4, %v12792_v42, %v6777_v35  ;;  %v6904_v39 = vshrl.u32 %v6823_v5, 16  ;;  %v6907_v32 = vshll.u32 %v6823_v5, 16  ;;  %v6913_v58 = vshrl.u32 %v6824_v43, 16  ;;  %13555 = vmatpush3.bf16.msra.mxu0 %v14203_v60  ;;  %v6740_v5 = vld [vmem:[#allocation2 + $0x34] sm:$0x1] }
 0x415   : > { %10282 = vmatprep.mubr.bf16.mxu0 %v12802_v41  ;;  %v6640_v28 = vsel %vm16749_vm10, %v6635_v12, %v6639_v7  ;;  %v6649_v44 = vrot.slane %v6648_v6, 4  ;;  %v12798_v20 = vcombine.low %v6774_v46, %v6778_v17  ;;  %v6916_v1 = vshll.u32 %v6824_v43, 16  ;;  %13513 = vmatpush3.bf16.msra.mxu1 %v14202_v59  ;;  %v6741_v0 = vld [vmem:[#allocation2 + $0x38] sm:$0xe]  ;;  %v14214_v7 = vld [vmem:[#allocation7 + $0x468] sm:$0xff]  }
 0x416   : > { %v6906_v48 = vrot.slane %v6904_v39, 5  ;;  %v6909_v62 = vrot.slane %v6907_v32, 6  ;;  %v6915_v56 = vrot.slane %v6913_v58, 5  ;;  %v6922_v3 = vshrl.u32 %v6825_v11, 16  ;;  %13514 = vmatprep.subr.bf16.mxu1 %v14204_v15  ;;  %13556 = vmatprep.subr.bf16.mxu0 %v14205_v2  ;;  %v6742_v55 = vld [vmem:[#allocation2 + $0x3c] sm:$0x1] }
 0x417   : > { %v6654_v16 = vsel %vm16749_vm10, %v6649_v44, %v6653_v14  ;;  %10283 = vmatmul.mubr.bf16.gmra.mrb[100].mxu0 %v12798_v20  ;;  %v6918_v19 = vrot.slane %v6916_v1, 6  ;;  %v6925_v18 = vshll.u32 %v6825_v11, 16  ;;  %v6931_v50 = vshrl.u32 %v6826_v9, 16  ;;  %v6827_v2 = vld [vmem:[#allocation2 + $0x40] sm:$0xe]  ;;  %v14217_v41 = vld [vmem:[#allocation7 + $0x428] sm:$0xff]  }
 0x418   : > { %v12786_v38 = vcombine.low %v6640_v28, %v6654_v16  ;;  %v6910_v26 = vor.u32 %v6909_v62, %v6906_v48  ;;  %v6924_v61 = vrot.slane %v6922_v3, 5  ;;  %v6934_v30 = vshll.u32 %v6826_v9, 16  ;;  %13557 = vmatpush3.bf16.msra.mxu0 %v14208_v8  ;;  %v14219_v8 = vld [vmem:[#allocation7 + $0x470] sm:$0xff]   ;;  %v6828_v58 = vld [vmem:[#allocation2 + $0x44] sm:$0x3]  ;;  %v14220_v16 = vld [vmem:[#allocation7 + $0x3a8] sm:$0xff]  }
 0x419   : > { %v6919_v25 = vor.u32 %v6918_v19, %v6915_v56  ;;  %v6927_v22 = vrot.slane %v6925_v18, 6  ;;  %v6933_v53 = vrot.slane %v6931_v50, 5  ;;  %13515 = vmatpush3.bf16.msra.mxu1 %v14207_v13  ;;  %v6656_v63 = vshrl.u32 %v6591_v33, 16  ;;  %13558 = vmatprep.subr.bf16.mxu0 %v14210_v37  ;;  %v14216_v13 = vld [vmem:[#allocation7 + $0x3a0] sm:$0xff]   ;;  %v6829_v1 = vld [vmem:[#allocation2 + $0x48] sm:$0xe] }
 0x41a   : > { %10217 = vmatprep.mubr.bf16.mxu1 %v12786_v38  ;;  %v6911_v52 = vrot.slane %v6910_v26, 4  ;;  %v6936_v4 = vrot.slane %v6934_v30, 6  ;;  %v6659_v60 = vshll.u32 %v6591_v33, 16  ;;  %v6665_v10 = vshll.u32 %v6592_v34, 16  ;;  %13516 = vmatprep.subr.bf16.mxu1 %v14209_v27  ;;  %v14218_v27 = vld [vmem:[#allocation7 + $0x3e8] sm:$0xff]  }
 0x41b   : > { %v6928_v45 = vor.u32 %v6927_v22, %v6924_v61  ;;  %10218 = vmatmul.mubr.bf16.gmra.mrb[84].mxu1 %v14206_v24  ;;  %v6658_v23 = vrot.slane %v6656_v63, 4  ;;  %v6670_v43 = vshrl.u32 %v6593_v40, 16  ;;  %v6673_v59 = vshll.u32 %v6593_v40, 16  ;;  %v6830_v33 = vld [vmem:[#allocation2 + $0x4c] sm:$0x3]  ;;  %v14222_v40 = vld [vmem:[#allocation7 + $0x3f0] sm:$0xff]  }
 0x41c   : > { %v6920_v14 = vsel %vm16921_vm3, %v6911_v52, %v6919_v25  ;;  %v6937_v42 = vor.u32 %v6936_v4, %v6933_v53  ;;  %v6661_v35 = vrot.slane %v6659_v60, 5  ;;  %v6667_v15 = vrot.slane %v6665_v10, 5  ;;  %13559 = vmatpush3.bf16.msra.mxu0 %v14212_v57  ;;  %v6595_v3 = vld [vmem:[#allocation2 + $0x40] sm:$0xf]  ;;  %v6596_v30 = vld [vmem:[#allocation2 + $0x44] sm:$0x1] }
 0x41d   : > { %v6929_v12 = vrot.slane %v6928_v45, 4  ;;  %v6672_v6 = vrot.slane %v6670_v43, 4  ;;  %v6675_v46 = vrot.slane %v6673_v59, 5  ;;  %v6679_v11 = vshll.u32 %v6594_v47, 16  ;;  %13517 = vmatpush3.bf16.msra.mxu1 %v14211_v29  ;;  %13560 = vmatprep.subr.bf16.mxu0 %v14214_v7  ;;  %v14221_v29 = vld [vmem:[#allocation7 + $0x430] sm:$0xff]   ;;  %v14226_v59 = vld [vmem:[#allocation7 + $0x438] sm:$0xff]  }
 0x41e   : > { %v6662_v17 = vor.u32 %v6661_v35, %v6658_v23  ;;  %v12793_v9 = vrot.slane %v6739_v51, 9  ;;  %v6781_v39 = vrot.slane %v6740_v5, 5  ;;  %v12794_v32 = vrot.slane %v6741_v0, 9  ;;  %13518 = vmatprep.subr.bf16.mxu1 %v14213_v36  ;;  %v14215_v63 = vld [vmem:[#allocation2 + $0x30] ss:$8 sps:$4 sm:$0xff]  }
 0x41f   : > { %v6938_v37 = vsel %vm16921_vm3, %v6929_v12, %v6937_v42  ;;  %v6676_v28 = vor.u32 %v6675_v46, %v6672_v6  ;;  %v6681_v44 = vrot.slane %v6679_v11, 5  ;;  %v6785_v20 = vrot.slane %v6742_v55, 5  ;;  %v6597_v51 = vld [vmem:[#allocation2 + $0x48] sm:$0xf]  ;;  %v14223_v5 = vld [vmem:[#allocation7 + $0x478] sm:$0xff]   ;;  %v14225_v43 = vld [vmem:[#allocation7 + $0x3b0] sm:$0xff]  }
 0x420   : > { %v12803_v34 = vcombine.low %v6920_v14, %v6938_v37  ;;  %v6663_v48 = vrot.slane %v6662_v17, 4  ;;  %v6782_v62 = vsel %vm16927_vm4, %v12793_v9, %v6781_v39  ;;  %v6940_v56 = vshrl.u32 %v6827_v2, 16  ;;  %13561 = vmatpush3.bf16.msra.mxu0 %v14217_v41  ;;  %v6598_v60 = vld [vmem:[#allocation2 + $0x4c] sm:$0x1]  ;;  %v14228_v41 = vld [vmem:[#allocation7 + $0x3f8] sm:$0xff]   ;;  %v14229_v12 = vld [vmem:[#allocation7 + $0x540] sm:$0xff]  }
 0x421   : > { %v6677_v19 = vrot.slane %v6676_v28, 4  ;;  %v6786_v18 = vsel %vm16927_vm4, %v12794_v32, %v6785_v20  ;;  %v6943_v50 = vshll.u32 %v6827_v2, 16  ;;  %v6949_v24 = vshrl.u32 %v6828_v58, 16  ;;  %13519 = vmatpush3.bf16.msra.mxu1 %v14216_v13  ;;  %13562 = vmatprep.subr.bf16.mxu0 %v14219_v8  ;;  %v6744_v2 = vld [vmem:[#allocation2 + $0x44] sm:$0x1] }
 0x422   : > { %10290 = vmatprep.mubr.bf16.mxu0 %v12803_v34  ;;  %v6668_v57 = vsel %vm16749_vm10, %v6663_v48, %v6667_v15  ;;  %v12799_v38 = vcombine.low %v6782_v62, %v6786_v18  ;;  %v6942_v26 = vrot.slane %v6940_v56, 5  ;;  %v6952_v61 = vshll.u32 %v6828_v58, 16  ;;  %13520 = vmatprep.subr.bf16.mxu1 %v14218_v27  ;;  %v6743_v15 = vld [vmem:[#allocation2 + $0x40] sm:$0xe]  ;;  %v6745_v8 = vld [vmem:[#allocation2 + $0x48] sm:$0xe] }
 0x423   : > { %v6682_v47 = vsel %vm16749_vm10, %v6677_v19, %v6681_v44  ;;  %v6945_v25 = vrot.slane %v6943_v50, 6  ;;  %v6951_v22 = vrot.slane %v6949_v24, 5  ;;  %v6958_v53 = vshrl.u32 %v6829_v1, 16  ;;  %v6746_v58 = vld [vmem:[#allocation2 + $0x4c] sm:$0x1] }
 0x424   : > { %v12787_v0 = vcombine.low %v6668_v57, %v6682_v47  ;;  %10291 = vmatmul.mubr.bf16.gmra.mrb[104].mxu0 %v12799_v38  ;;  %v6954_v7 = vrot.slane %v6952_v61, 6  ;;  %v6961_v52 = vshll.u32 %v6829_v1, 16  ;;  %v6967_v4 = vshrl.u32 %v6830_v33, 16  ;;  %v7264_v20 = vld [vmem:[#allocation2 + $0x18] sm:$0xe] }
 0x425   : > { %v6946_v10 = vor.u32 %v6945_v25, %v6942_v26  ;;  %v6960_v36 = vrot.slane %v6958_v53, 5  ;;  %v6970_v45 = vshll.u32 %v6830_v33, 16  ;;  %v6684_v23 = vshrl.u32 %v6595_v3, 16  ;;  %13521 = vmatpush3.bf16.msra.mxu1 %v14220_v16  ;;  %13563 = vmatpush3.bf16.msra.mxu0 %v14221_v29  ;;  %v14230_v1 = vld [vmem:[#allocation7 + $0x3b8] sm:$0xff]   ;;  %v7266_v24 = vld [vmem:[#allocation2 + $0x20] sm:$0xe] }
 0x426   : > { %10225 = vmatprep.mubr.bf16.mxu1 %v12787_v0  ;;  %v6955_v55 = vor.u32 %v6954_v7, %v6951_v22  ;;  %v6963_v14 = vrot.slane %v6961_v52, 6  ;;  %v6969_v42 = vrot.slane %v6967_v4, 5  ;;  %v6687_v35 = vshll.u32 %v6595_v3, 16  ;;  %13522 = vmatprep.subr.bf16.mxu1 %v14222_v40  ;;  %v7265_v56 = vld [vmem:[#allocation2 + $0x1c] sm:$0x1]  ;;  %v14232_v3 = vld [vmem:[#allocation7 + $0x4c0] sm:$0xff]  }
 0x427   : > { %v6947_v6 = vrot.slane %v6946_v10, 4  ;;  %v6972_v46 = vrot.slane %v6970_v45, 6  ;;  %10226 = vmatmul.mubr.bf16.gmra.mrb[88].mxu1 %v14215_v63  ;;  %v6686_v11 = vrot.slane %v6684_v23, 4  ;;  %v6693_v13 = vshll.u32 %v6596_v30, 16  ;;  %13564 = vmatprep.subr.bf16.mxu0 %v14223_v5  ;;  %v7267_v61 = vld [vmem:[#allocation2 + $0x24] sm:$0x1] }
 0x428   : > { %v6964_v17 = vor.u32 %v6963_v14, %v6960_v36  ;;  %v6689_v9 = vrot.slane %v6687_v35, 5  ;;  %v6698_v39 = vshrl.u32 %v6597_v51, 16  ;;  %v6701_v32 = vshll.u32 %v6597_v51, 16  ;;  %v7116_v30 = vld [vmem:[#allocation2 + $0x18] sm:$0xf] }
 0x429   : > { %v6956_v27 = vsel %vm16921_vm3, %v6947_v6, %v6955_v55  ;;  %v6973_v37 = vor.u32 %v6972_v46, %v6969_v42  ;;  %v6695_v28 = vrot.slane %v6693_v13, 5  ;;  %v6707_v44 = vshll.u32 %v6598_v60, 16  ;;  %13523 = vmatpush3.bf16.msra.mxu1 %v14225_v43  ;;  %13565 = vmatpush3.bf16.msra.mxu0 %v14226_v59  ;;  %v7117_v53 = vld [vmem:[#allocation2 + $0x1c] sm:$0x1]  ;;  %v7118_v63 = vld [vmem:[#allocation2 + $0x20] sm:$0xf] }
 0x42a   : > { %v6965_v33 = vrot.slane %v6964_v17, 4  ;;  %v6690_v34 = vor.u32 %v6689_v9, %v6686_v11  ;;  %v6700_v48 = vrot.slane %v6698_v39, 4  ;;  %v6703_v62 = vrot.slane %v6701_v32, 5  ;;  %13524 = vmatprep.subr.bf16.mxu1 %v14228_v41  ;;  %13630 = vmatprep.subr.bf16.mxu0 %v14229_v12  ;;  %v7119_v52 = vld [vmem:[#allocation2 + $0x24] sm:$0x1] }
 0x42b   : > { %v6709_v16 = vrot.slane %v6707_v44, 5  ;;  %v12795_v19 = vrot.slane %v6743_v15, 9  ;;  %v6789_v18 = vrot.slane %v6744_v2, 5  ;;  %v12796_v50 = vrot.slane %v6745_v8, 9  ;;  %v7268_v4 = vld [vmem:[#allocation2 + $0x28] sm:$0xe] }
 0x42c   : > { %v6974_v29 = vsel %vm16921_vm3, %v6965_v33, %v6973_v37  ;;  %v6691_v57 = vrot.slane %v6690_v34, 4  ;;  %v6704_v38 = vor.u32 %v6703_v62, %v6700_v48  ;;  %v6793_v26 = vrot.slane %v6746_v58, 5  ;;  %v7269_v23 = vld [vmem:[#allocation2 + $0x2c] sm:$0x1]  ;;  %v7270_v43 = vld [vmem:[#allocation2 + $0x30] sm:$0xe] }
 0x42d   : > { %v12804_v40 = vcombine.low %v6956_v27, %v6974_v29  ;;  %v6790_v47 = vsel %vm16927_vm4, %v12795_v19, %v6789_v18  ;;  %v12825_v25 = vrot.slane %v7264_v20, 9  ;;  %v7298_v22 = vrot.slane %v7265_v56, 5  ;;  %13525 = vmatpush3.bf16.msra.mxu1 %v14230_v1  ;;  %v14224_v55 = vld [vmem:[#allocation2 + $0x40] ss:$8 sps:$4 sm:$0xff]   ;;  %v7271_v15 = vld [vmem:[#allocation2 + $0x34] sm:$0x1] }
 0x42e   : > { %v6696_v51 = vsel %vm16749_vm10, %v6691_v57, %v6695_v28  ;;  %v6705_v5 = vrot.slane %v6704_v38, 4  ;;  %v6794_v0 = vsel %vm16927_vm4, %v12796_v50, %v6793_v26  ;;  %v12826_v7 = vrot.slane %v7266_v24, 9  ;;  %13590 = vmatprep.subr.bf16.mxu1 %v14232_v3  ;;  %v14227_v12 = vld [vmem:[#allocation2 + $0x18] ss:$8 sps:$4 sm:$0xff]   ;;  %v6995_v11 = vld [vmem:[#allocation2 + $0x10] sm:$0xc] }
 0x42f   : > { %10298 = vmatprep.mubr.bf16.mxu0 %v12804_v40  ;;  %v12800_v60 = vcombine.low %v6790_v47, %v6794_v0  ;;  %v7299_v10 = vsel %vm16927_vm4, %v12825_v25, %v7298_v22  ;;  %v7302_v36 = vrot.slane %v7267_v61, 5  ;;  %v7133_v45 = vshrl.u32 %v7116_v30, 16  ;;  %v6996_v13 = vld [vmem:[#allocation2 + $0x14] sm:$0x3]  ;;  %v6997_v32 = vld [vmem:[#allocation2 + $0x18] sm:$0xc] }
 0x430   : > { %v6710_v59 = vsel %vm16749_vm10, %v6705_v5, %v6709_v16  ;;  %v7136_v14 = vshll.u32 %v7116_v30, 16  ;;  %v7142_v42 = vshll.u32 %v7117_v53, 16  ;;  %v7147_v35 = vshrl.u32 %v7118_v63, 16  ;;  %v6998_v44 = vld [vmem:[#allocation2 + $0x1c] sm:$0x3]  ;;  %v14231_v30 = vld [vmem:[#allocation7 + $0x500] sm:$0xff]  }
 0x431   : > { %v12788_v2 = vcombine.low %v6696_v51, %v6710_v59  ;;  %10299 = vmatmul.mubr.bf16.gmra.mrb[108].mxu0 %v12800_v60  ;;  %v7303_v41 = vsel %vm16927_vm4, %v12826_v7, %v7302_v36  ;;  %v7135_v6 = vrot.slane %v7133_v45, 4  ;;  %v7150_v46 = vshll.u32 %v7118_v63, 16  ;;  %v7120_v48 = vld [vmem:[#allocation2 + $0x28] sm:$0xf]  ;;  %v7121_v19 = vld [vmem:[#allocation2 + $0x2c] sm:$0x1] }
 0x432   : > { %v12833_v8 = vcombine.low %v7299_v10, %v7303_v41  ;;  %v7138_v17 = vrot.slane %v7136_v14, 5  ;;  %v7144_v9 = vrot.slane %v7142_v42, 5  ;;  %v7149_v39 = vrot.slane %v7147_v35, 4  ;;  %v7122_v18 = vld [vmem:[#allocation2 + $0x30] sm:$0xf]  ;;  %v14233_v63 = vld [vmem:[#allocation7 + $0x548] sm:$0xff]  }
 0x433   : > { %10233 = vmatprep.mubr.bf16.mxu1 %v12788_v2  ;;  %v7152_v58 = vrot.slane %v7150_v46, 5  ;;  %v7156_v27 = vshll.u32 %v7119_v52, 16  ;;  %v12827_v37 = vrot.slane %v7268_v4, 9  ;;  %v7306_v28 = vrot.slane %v7269_v23, 5  ;;  %v7123_v38 = vld [vmem:[#allocation2 + $0x34] sm:$0x1] }
 0x434   : > { %10404 = vmatprep.mubr.bf16.mxu0 %v12833_v8  ;;  %10234 = vmatmul.mubr.bf16.gmra.mrb[92].mxu1 %v14224_v55  ;;  %v7139_v20 = vor.u32 %v7138_v17, %v7135_v6  ;;  %v12828_v1 = vrot.slane %v7270_v43, 9  ;;  %v7310_v33 = vrot.slane %v7271_v15, 5  ;;  %v12805_v34 = vrot.slane %v6995_v11, 10  ;;  %v7272_v25 = vld [vmem:[#allocation2 + $0x38] sm:$0xe]  ;;  %v14234_v5 = vld [vmem:[#allocation7 + $0x480] sm:$0xff]  }
 0x435   : > { %10339 = vmatprep.mubr.bf16.mxu1 %v14227_v12  ;;  %v7153_v62 = vor.u32 %v7152_v58, %v7149_v39  ;;  %v7158_v56 = vrot.slane %v7156_v27, 5  ;;  %v7307_v3 = vsel %vm16927_vm4, %v12827_v37, %v7306_v28  ;;  %v7029_v16 = vrot.slane %v6996_v13, 6  ;;  %v7273_v22 = vld [vmem:[#allocation2 + $0x3c] sm:$0x1]  ;;  %v7274_v52 = vld [vmem:[#allocation2 + $0x40] sm:$0xe] }
 0x436   : > { %v7140_v50 = vrot.slane %v7139_v20, 4  ;;  %v7311_v24 = vsel %vm16927_vm4, %v12828_v1, %v7310_v33  ;;  %v12806_v29 = vrot.slane %v6997_v32, 10  ;;  %v7033_v57 = vrot.slane %v6998_v44, 6  ;;  %v7275_v4 = vld [vmem:[#allocation2 + $0x44] sm:$0x1]  ;;  %v14237_v35 = vld [vmem:[#allocation7 + $0x4c8] sm:$0xff]  }
 0x437   : > { %v7154_v26 = vrot.slane %v7153_v62, 4  ;;  %v12834_v61 = vcombine.low %v7307_v3, %v7311_v24  ;;  %v7030_v40 = vsel %vm16897_vm2, %v12805_v34, %v7029_v16  ;;  %v7161_v47 = vshrl.u32 %v7120_v48, 16  ;;  %v6999_v23 = vld [vmem:[#allocation2 + $0x20] sm:$0xc]  ;;  %v7000_v43 = vld [vmem:[#allocation2 + $0x24] sm:$0x3] }
 0x438   : > { %v7145_v53 = vsel %vm16749_vm10, %v7140_v50, %v7144_v9  ;;  %v7034_v51 = vsel %vm16897_vm2, %v12806_v29, %v7033_v57  ;;  %v7164_v0 = vshll.u32 %v7120_v48, 16  ;;  %v7170_v7 = vshll.u32 %v7121_v19, 16  ;;  %v7001_v15 = vld [vmem:[#allocation2 + $0x28] sm:$0xc]  ;;  %v7002_v13 = vld [vmem:[#allocation2 + $0x2c] sm:$0x3] }
 0x439   : > { %v7159_v60 = vsel %vm16749_vm10, %v7154_v26, %v7158_v56  ;;  %v12813_v10 = vcombine.low %v7030_v40, %v7034_v51  ;;  %v7163_v36 = vrot.slane %v7161_v47, 4  ;;  %v7175_v45 = vshrl.u32 %v7122_v18, 16  ;;  %v14235_v2 = vld [vmem:[#allocation7 + $0x508] sm:$0xff]   ;;  %v14238_v9 = vld [vmem:[#allocation7 + $0x550] sm:$0xff]   ;;  %v7124_v27 = vld [vmem:[#allocation2 + $0x38] sm:$0xf] }
 0x43a   : > { %v12821_v59 = vcombine.low %v7145_v53, %v7159_v60  ;;  %v7166_v55 = vrot.slane %v7164_v0, 5  ;;  %v17130_v14 = vrot.slane %v7170_v7, 5  ;;  %v7178_v42 = vshll.u32 %v7122_v18, 16  ;;  %v14236_v41 = vld [vmem:[#allocation2 + $0x28] ss:$8 sps:$4 sm:$0xff]  }
 0x43b   : > { %v7177_v12 = vrot.slane %v7175_v45, 4  ;;  %v7184_v6 = vshll.u32 %v7123_v38, 16  ;;  %v12829_v46 = vrot.slane %v7272_v25, 9  ;;  %v7314_v11 = vrot.slane %v7273_v22, 5  ;;  %v14239_v58 = vld [vmem:[#allocation7 + $0x488] sm:$0xff]   ;;  %v14241_v44 = vld [vmem:[#allocation7 + $0x4d0] sm:$0xff]  }
 0x43c   : > { %10405 = vmatmul.mubr.bf16.vlgmr.msra.gmra.mrb[112].mxu0 %v12821_v59  ;;  %10340 = vmatmul.mubr.bf16.vlgmr.msra.gmra.mrb[96].mxu1 %v12813_v10  ;;  %v7167_v8 = vor.u32 %v7166_v55, %v7163_v36  ;;  %v7180_v17 = vrot.slane %v7178_v42, 5  ;;  %v12830_v39 = vrot.slane %v7274_v52, 9  ;;  %v7318_v32 = vrot.slane %v7275_v4, 5  ;;  %v7125_v33 = vld [vmem:[#allocation2 + $0x3c] sm:$0x1] }
 0x43d   : > { %10412 = vmatprep.mubr.bf16.mxu0 %v12834_v61  ;;  %13631 = vmatpush3.bf16.msra.mxu0 %v14231_v30  ;;  %v7186_v37 = vrot.slane %v7184_v6, 5  ;;  %v17134_v28 = vsel %vm16927_vm4, %v12829_v46, %v7314_v11  ;;  %v12807_v20 = vrot.slane %v6999_v23, 10  ;;  %v7037_v1 = vrot.slane %v7000_v43, 6  ;;  %v7126_v3 = vld [vmem:[#allocation2 + $0x40] sm:$0xf]  ;;  %v14240_v30 = vld [vmem:[#allocation7 + $0x510] sm:$0xff]  }
 0x43e   : > { %13632 = vmatprep.subr.bf16.mxu0 %v14233_v63  ;;  %13591 = vmatpush3.bf16.msra.mxu1 %v14234_v5  ;;  %v7168_v34 = vrot.slane %v7167_v8, 4  ;;  %v7181_v48 = vor.u32 %v7180_v17, %v7177_v12  ;;  %v7319_v62 = vsel %vm16927_vm4, %v12830_v39, %v7318_v32  ;;  %v12808_v56 = vrot.slane %v7001_v15, 10  ;;  %v7127_v16 = vld [vmem:[#allocation2 + $0x44] sm:$0x1]  ;;  %v7276_v29 = vld [vmem:[#allocation2 + $0x48] sm:$0xe] }
 0x43f   : > { %10347 = vmatprep.mubr.bf16.mxu1 %v14236_v41  ;;  %13592 = vmatprep.subr.bf16.mxu1 %v14237_v35  ;;  %v12835_v19 = vcombine.low %v17134_v28, %v7319_v62  ;;  %v7038_v18 = vsel %vm16897_vm2, %v12807_v20, %v7037_v1  ;;  %v7041_v50 = vrot.slane %v7002_v13, 6  ;;  %v7189_v24 = vshrl.u32 %v7124_v27, 16  ;;  %v7277_v57 = vld [vmem:[#allocation2 + $0x4c] sm:$0x1]  ;;  %v7278_v38 = vld [vmem:[#allocation2 + $0x50] sm:$0xe] }
 0x440   : > { %v7173_v26 = vsel %vm16749_vm10, %v7168_v34, %v17130_v14  ;;  %v7182_v61 = vrot.slane %v7181_v48, 4  ;;  %v7192_v40 = vshll.u32 %v7124_v27, 16  ;;  %v7198_v47 = vshll.u32 %v7125_v33, 16  ;;  %v7279_v25 = vld [vmem:[#allocation2 + $0x54] sm:$0x1]  ;;  %v14242_v22 = vld [vmem:[#allocation7 + $0x558] sm:$0xff]  }
 0x441   : > { %13633 = vmatpush3.bf16.msra.mxu0 %v14235_v2  ;;  %v7042_v53 = vsel %vm16897_vm2, %v12808_v56, %v7041_v50  ;;  %v14245_v63 = vld [vmem:[#allocation2 + $0x38] ss:$8 sps:$4 sm:$0xff]   ;;  %v7191_v51 = vrot.slane %v7189_v24, 4  ;;  %v7203_v5 = vshrl.u32 %v7126_v3, 16  ;;  %v7206_v0 = vshll.u32 %v7126_v3, 16  ;;  %v14243_v43 = vld [vmem:[#allocation7 + $0x490] sm:$0xff]  }
 0x442   : > { %v7003_v7 = vld [vmem:[#allocation2 + $0x30] sm:$0xc]  ;;  %v7187_v52 = vsel %vm16749_vm10, %v7182_v61, %v7186_v37  ;;  %13634 = vmatprep.subr.bf16.mxu0 %v14238_v9  ;;  %13593 = vmatpush3.bf16.msra.mxu1 %v14239_v58  ;;  %v12814_v4 = vcombine.low %v7038_v18, %v7042_v53  ;;  %v7194_v60 = vrot.slane %v7192_v40, 5  ;;  %v7200_v10 = vrot.slane %v7198_v47, 5  ;;  %v7004_v36 = vld [vmem:[#allocation2 + $0x34] sm:$0x3] }
 0x443   : > { %v7005_v45 = vld [vmem:[#allocation2 + $0x38] sm:$0xc]  ;;  %v12822_v23 = vcombine.low %v7173_v26, %v7187_v52  ;;  %13594 = vmatprep.subr.bf16.mxu1 %v14241_v44  ;;  %v7205_v59 = vrot.slane %v7203_v5, 4  ;;  %v7208_v55 = vrot.slane %v7206_v0, 5  ;;  %v7212_v14 = vshll.u32 %v7127_v16, 16  ;;  %v14247_v39 = vld [vmem:[#allocation7 + $0x560] sm:$0xff]  }
 0x444   : > { %v7006_v42 = vld [vmem:[#allocation2 + $0x3c] sm:$0x3]  ;;  %10348 = vmatmul.mubr.bf16.gmra.mrb[100].mxu1 %v12814_v4  ;;  %v7195_v35 = vor.u32 %v7194_v60, %v7191_v51  ;;  %v12831_v2 = vrot.slane %v7276_v29, 9  ;;  %v7322_v41 = vrot.slane %v7277_v57, 5  ;;  %v12832_v12 = vrot.slane %v7278_v38, 9  ;;  %v14249_v56 = vld [vmem:[#allocation7 + $0x520] sm:$0xff]  }
 0x445   : > { %v14246_v15 = vld [vmem:[#allocation7 + $0x4d8] sm:$0xff]   ;;  %v7128_v6 = vld [vmem:[#allocation2 + $0x48] sm:$0xf]  ;;  %10413 = vmatmul.mubr.bf16.gmra.mrb[116].mxu0 %v12822_v23  ;;  %10355 = vmatprep.mubr.bf16.mxu1 %v14245_v63  ;;  %v7209_v11 = vor.u32 %v7208_v55, %v7205_v59  ;;  %v7214_v13 = vrot.slane %v7212_v14, 5  ;;  %v7326_v8 = vrot.slane %v7279_v25, 5  ;;  %v12809_v17 = vrot.slane %v7003_v7, 10 }
 0x446   : > { %v14244_v46 = vld [vmem:[#allocation7 + $0x518] sm:$0xff]   ;;  %10420 = vmatprep.mubr.bf16.mxu0 %v12835_v19  ;;  %13635 = vmatpush3.bf16.msra.mxu0 %v14240_v30  ;;  %v7196_v9 = vrot.slane %v7195_v35, 4  ;;  %v17150_v32 = vsel %vm16927_vm4, %v12831_v2, %v7322_v41  ;;  %v7045_v58 = vrot.slane %v7004_v36, 6  ;;  %v12810_v27 = vrot.slane %v7005_v45, 10  ;;  %v7129_v37 = vld [vmem:[#allocation2 + $0x4c] sm:$0x1] }
 0x447   : > { %13636 = vmatprep.subr.bf16.mxu0 %v14242_v22  ;;  %13595 = vmatpush3.bf16.msra.mxu1 %v14243_v43  ;;  %v7210_v28 = vrot.slane %v7209_v11, 4  ;;  %v7327_v44 = vsel %vm16927_vm4, %v12832_v12, %v7326_v8  ;;  %v14248_v20 = vld [vmem:[#allocation7 + $0x498] sm:$0xff]   ;;  %v7049_v1 = vrot.slane %v7006_v42, 6  ;;  %v7130_v33 = vld [vmem:[#allocation2 + $0x50] sm:$0xf]  ;;  %v7217_v34 = vshrl.u32 %v7128_v6, 16 }
 0x448   : > { %v7201_v48 = vsel %vm16749_vm10, %v7196_v9, %v7200_v10  ;;  %13596 = vmatprep.subr.bf16.mxu1 %v14246_v15  ;;  %v12836_v62 = vcombine.low %v17150_v32, %v7327_v44  ;;  %v14250_v3 = vld [vmem:[#allocation7 + $0x4e0] sm:$0xff]   ;;  %v7046_v16 = vsel %vm16897_vm2, %v12809_v17, %v7045_v58  ;;  %v7131_v19 = vld [vmem:[#allocation2 + $0x54] sm:$0x1]  ;;  %v7220_v18 = vshll.u32 %v7128_v6, 16  ;;  %v14251_v29 = vld [vmem:[#allocation7 + $0x568] sm:$0xff]   ;;  %v17165_v6 = vpop.f32.mrb[48].mxu0 }
 0x449   : > { %v7649_v50 = vld [vmem:[#allocation2 + $0x20] sm:$0xf]  ;;  %v7215_v24 = vsel %vm16749_vm10, %v7210_v28, %v7214_v13  ;;  %v7050_v57 = vsel %vm16897_vm2, %v12810_v27, %v7049_v1  ;;  %v14254_v26 = vld [vmem:[#allocation2 + $0x48] ss:$8 sps:$4 sm:$0xff]   ;;  %v7219_v61 = vrot.slane %v7217_v34, 4  ;;  %v7226_v30 = vshll.u32 %v7129_v37, 16 }
 0x44a   : > { %v14252_v38 = vld [vmem:[#allocation7 + $0x4a0] sm:$0xff]   ;;  %v7651_v47 = vld [vmem:[#allocation2 + $0x28] sm:$0xf]  ;;  %13637 = vmatpush3.bf16.msra.mxu0 %v14244_v46  ;;  %v12823_v25 = vcombine.low %v7201_v48, %v7215_v24  ;;  %v12815_v22 = vcombine.low %v7046_v16, %v7050_v57  ;;  %v7222_v53 = vrot.slane %v7220_v18, 5  ;;  %v7231_v63 = vshrl.u32 %v7130_v33, 16  ;;  %v14256_v15 = vld [vmem:[#allocation7 + $0x570] sm:$0xff]  }
 0x44b   : > { %v7650_v40 = vld [vmem:[#allocation2 + $0x24] sm:$0x1]  ;;  %v7652_v51 = vld [vmem:[#allocation2 + $0x2c] sm:$0x1]  ;;  %v7007_v5 = vld [vmem:[#allocation2 + $0x40] sm:$0xc]  ;;  %13638 = vmatprep.subr.bf16.mxu0 %v14247_v39  ;;  %13597 = vmatpush3.bf16.msra.mxu1 %v14248_v20 }
 0x44c   : > { %v17163_v0 = vrot.slane %v7226_v30, 5  ;;  %v7234_v7 = vshll.u32 %v7130_v33, 16  ;;  %v7240_v52 = vshll.u32 %v7131_v19, 16  ;;  %v7666_v4 = vshrl.u32 %v7649_v50, 16  ;;  %v7008_v60 = vld [vmem:[#allocation2 + $0x44] sm:$0x3]  ;;  %13598 = vmatprep.subr.bf16.mxu1 %v14250_v3  ;;  %10356 = vmatmul.mubr.bf16.gmra.mrb[104].mxu1 %v12815_v22 }
 0x44d   : > { %v14253_v10 = vld [vmem:[#allocation7 + $0x528] sm:$0xff]   ;;  %v7223_v36 = vor.u32 %v7222_v53, %v7219_v61  ;;  %v7233_v45 = vrot.slane %v7231_v63, 4  ;;  %v7669_v43 = vshll.u32 %v7649_v50, 16  ;;  %v7675_v59 = vshll.u32 %v7650_v40, 16  ;;  %10421 = vmatmul.mubr.bf16.gmra.mrb[120].mxu0 %v12823_v25  ;;  %10363 = vmatprep.mubr.bf16.mxu1 %v14254_v26  ;;  %v7528_v12 = vld [vmem:[#allocation2 + $0x18] sm:$0xc] }
 0x44e   : > { %v14255_v23 = vld [vmem:[#allocation7 + $0x4e8] sm:$0xff]   ;;  %v7236_v42 = vrot.slane %v7234_v7, 5  ;;  %v7242_v35 = vrot.slane %v7240_v52, 5  ;;  %v7668_v2 = vrot.slane %v7666_v4, 4  ;;  %v7680_v41 = vshrl.u32 %v7651_v47, 16  ;;  %10428 = vmatprep.mubr.bf16.mxu0 %v12836_v62  ;;  %13639 = vmatpush3.bf16.msra.mxu0 %v14249_v56  ;;  %v17169_v9 = vpop.f32.mrb[49].mxu0 }
 0x44f   : > { %v7009_v55 = vld [vmem:[#allocation2 + $0x48] sm:$0xc]  ;;  %v7010_v14 = vld [vmem:[#allocation2 + $0x4c] sm:$0x3]  ;;  %v7224_v46 = vrot.slane %v7223_v36, 4  ;;  %v7671_v13 = vrot.slane %v7669_v43, 5  ;;  %13640 = vmatprep.subr.bf16.mxu0 %v14251_v29  ;;  %13599 = vmatpush3.bf16.msra.mxu1 %v14252_v38 }
 0x450   : > { %v14257_v11 = vld [vmem:[#allocation7 + $0x4a8] sm:$0xff]   ;;  %v17167_v8 = vrot.slane %v7675_v59, 5  ;;  %v7683_v17 = vshll.u32 %v7651_v47, 16  ;;  %v7237_v39 = vor.u32 %v7236_v42, %v7233_v45  ;;  %v7682_v32 = vrot.slane %v7680_v41, 4  ;;  %v7529_v37 = vld [vmem:[#allocation2 + $0x1c] sm:$0x3]  ;;  %13600 = vmatprep.subr.bf16.mxu1 %v14255_v23 }
 0x451   : > { %v7689_v58 = vshll.u32 %v7652_v51, 16  ;;  %v12811_v27 = vrot.slane %v7007_v5, 10  ;;  %v17171_v28 = vpop.f32.mrb[50].mxu0  ;;  %v7229_v44 = vsel %vm16749_vm10, %v7224_v46, %v17163_v0  ;;  %v7672_v20 = vor.u32 %v7671_v13, %v7668_v2  ;;  %v14259_v33 = vld [vmem:[#allocation7 + $0x4f0] sm:$0xff]   ;;  %v7530_v48 = vld [vmem:[#allocation2 + $0x20] sm:$0xc] }
 0x452   : > { %v7685_v1 = vrot.slane %v7683_v17, 5  ;;  %v7053_v34 = vrot.slane %v7008_v60, 6  ;;  %v17176_v62 = vpop.f32.mrb[51].mxu0  ;;  %v7238_v56 = vrot.slane %v7237_v39, 4  ;;  %v14258_v3 = vld [vmem:[#allocation7 + $0x530] sm:$0xff]   ;;  %v12812_v19 = vrot.slane %v7009_v55, 10  ;;  %13641 = vmatpush3.bf16.msra.mxu0 %v14253_v10 }
 0x453   : > { %v7691_v16 = vrot.slane %v7689_v58, 5  ;;  %v7057_v18 = vrot.slane %v7010_v14, 6  ;;  %v14261_v50 = vld [vmem:[#allocation7 + $0x4b0] sm:$0xff]   ;;  %v7673_v24 = vrot.slane %v7672_v20, 4  ;;  %v7531_v38 = vld [vmem:[#allocation2 + $0x24] sm:$0x3]  ;;  %13642 = vmatprep.subr.bf16.mxu0 %v14256_v15  ;;  %13601 = vmatpush3.bf16.msra.mxu1 %v14257_v11 }
 0x454   : > { %v7686_v29 = vor.u32 %v7685_v1, %v7682_v32  ;;  %v7054_v57 = vsel %vm16897_vm2, %v12811_v27, %v7053_v34  ;;  %v12841_v26 = vrot.slane %v7528_v12, 10  ;;  %v7653_v61 = vld [vmem:[#allocation2 + $0x30] sm:$0xf]  ;;  %v7243_v30 = vsel %vm16749_vm10, %v7238_v56, %v7242_v35  ;;  %v7654_v22 = vld [vmem:[#allocation2 + $0x34] sm:$0x1]  ;;  %13602 = vmatprep.subr.bf16.mxu1 %v14259_v33  ;;  %v14260_v0 = vld [vmem:[#allocation7 + $0x578] sm:$0xff]  }
 0x455   : > { %v7058_v40 = vsel %vm16897_vm2, %v12812_v19, %v7057_v18  ;;  %v7562_v47 = vrot.slane %v7529_v37, 6  ;;  %v12842_v25 = vrot.slane %v7530_v48, 10  ;;  %v7655_v53 = vld [vmem:[#allocation2 + $0x38] sm:$0xf]  ;;  %v12824_v63 = vcombine.low %v7229_v44, %v7243_v30  ;;  %v7656_v36 = vld [vmem:[#allocation2 + $0x3c] sm:$0x1] }
 0x456   : > { %v7678_v51 = vsel %vm16749_vm10, %v7673_v24, %v17167_v8  ;;  %v7687_v5 = vrot.slane %v7686_v29, 4  ;;  %v12816_v7 = vcombine.low %v7054_v57, %v7058_v40  ;;  %v14263_v52 = vld [vmem:[#allocation7 + $0x4f8] sm:$0xff]   ;;  %v7566_v10 = vrot.slane %v7531_v38, 6  ;;  %13643 = vmatpush3.bf16.msra.mxu0 %v14258_v3  ;;  %v7350_v11 = vld [vmem:[#allocation2 + $0x20] sm:$0xe]  ;;  %v14268_v34 = vld [vmem:[#allocation7 + $0x608] sm:$0xff]  }
 0x457   : > { %v14262_v4 = vld [vmem:[#allocation7 + $0x538] sm:$0xff]   ;;  %v7563_v60 = vsel %vm16897_vm2, %v12841_v26, %v7562_v47  ;;  %v7694_v45 = vshrl.u32 %v7653_v61, 16  ;;  %v7697_v23 = vshll.u32 %v7653_v61, 16  ;;  %10429 = vmatmul.mubr.bf16.gmra.mrb[124].mxu0 %v12824_v63  ;;  %v7703_v55 = vshll.u32 %v7654_v22, 16  ;;  %13603 = vmatpush3.bf16.msra.mxu1 %v14261_v50  ;;  %v14265_v8 = vld [vmem:[#allocation7 + $0x600] sm:$0xff]  }
 0x458   : > { %v7692_v43 = vsel %vm16749_vm10, %v7687_v5, %v7691_v16  ;;  %10364 = vmatmul.mubr.bf16.gmra.mrb[108].mxu1 %v12816_v7  ;;  %v14266_v59 = vld [vmem:[#allocation7 + $0x4b8] sm:$0xff]   ;;  %v7708_v14 = vshrl.u32 %v7655_v53, 16  ;;  %v7711_v42 = vshll.u32 %v7655_v53, 16  ;;  %v7567_v2 = vsel %vm16897_vm2, %v12842_v25, %v7566_v10  ;;  %13644 = vmatprep.subr.bf16.mxu0 %v14260_v0  ;;  %v14267_v58 = vld [vmem:[#allocation7 + $0x5c0] sm:$0xff]   ;;  %v7532_v29 = vld [vmem:[#allocation2 + $0x28] sm:$0xc] }
 0x459   : > { %v7348_v35 = vld [vmem:[#allocation2 + $0x18] sm:$0xe]  ;;  %v12857_v15 = vcombine.low %v7678_v51, %v7692_v43  ;;  %v7696_v41 = vrot.slane %v7694_v45, 4  ;;  %v7699_v12 = vrot.slane %v7697_v23, 5  ;;  %v7349_v46 = vld [vmem:[#allocation2 + $0x1c] sm:$0x3]  ;;  %v12849_v13 = vcombine.low %v7563_v60, %v7567_v2  ;;  %13604 = vmatprep.subr.bf16.mxu1 %v14263_v52 }
 0x45a   : > { %v7705_v17 = vrot.slane %v7703_v55, 5  ;;  %v7710_v39 = vrot.slane %v7708_v14, 4  ;;  %v7713_v32 = vrot.slane %v7711_v42, 5  ;;  %v7717_v37 = vshll.u32 %v7656_v36, 16  ;;  %v14264_v1 = vld [vmem:[#allocation2 + $0x20] ss:$8 sps:$4 sm:$0xff]   ;;  %13645 = vmatpush3.bf16.msra.mxu0 %v14262_v4 }
 0x45b   : > { %10534 = vmatprep.mubr.bf16.mxu0 %v12857_v15  ;;  %v7700_v27 = vor.u32 %v7699_v12, %v7696_v41  ;;  %v7365_v44 = vshrl.u32 %v7348_v35, 16  ;;  %v7368_v20 = vshll.u32 %v7348_v35, 16  ;;  %10469 = vmatprep.mubr.bf16.mxu1 %v12849_v13  ;;  %v7351_v48 = vld [vmem:[#allocation2 + $0x24] sm:$0x3]  ;;  %v7374_v56 = vshrl.u32 %v7349_v46, 16  ;;  %v14272_v14 = vld [vmem:[#allocation7 + $0x610] sm:$0xff]  }
 0x45c   : > { %v7714_v33 = vor.u32 %v7713_v32, %v7710_v39  ;;  %v7377_v3 = vshll.u32 %v7349_v46, 16  ;;  %v7383_v16 = vshrl.u32 %v7350_v11, 16  ;;  %13605 = vmatpush3.bf16.msra.mxu1 %v14266_v59  ;;  %v7719_v18 = vrot.slane %v7717_v37, 5  ;;  %13907 = vmatprep.subr.bf16.mxu0 %v14265_v8  ;;  %v7533_v30 = vld [vmem:[#allocation2 + $0x2c] sm:$0x3]  ;;  %v14269_v32 = vld [vmem:[#allocation7 + $0x580] sm:$0xff]  }
 0x45d   : > { %v7701_v19 = vrot.slane %v7700_v27, 4  ;;  %v7367_v50 = vrot.slane %v7365_v44, 5  ;;  %v7370_v24 = vrot.slane %v7368_v20, 6  ;;  %13670 = vmatprep.subr.bf16.mxu1 %v14267_v58  ;;  %v7376_v38 = vrot.slane %v7374_v56, 5  ;;  %v7534_v53 = vld [vmem:[#allocation2 + $0x30] sm:$0xc] }
 0x45e   : > { %v7715_v57 = vrot.slane %v7714_v33, 4  ;;  %v7379_v26 = vrot.slane %v7377_v3, 6  ;;  %v7385_v61 = vrot.slane %v7383_v16, 5  ;;  %v7386_v25 = vshll.u32 %v7350_v11, 16  ;;  %v7535_v63 = vld [vmem:[#allocation2 + $0x34] sm:$0x3] }
 0x45f   : > { %v7706_v40 = vsel %vm16749_vm10, %v7701_v19, %v7705_v17  ;;  %v7371_v47 = vor.u32 %v7370_v24, %v7367_v50  ;;  %v7392_v22 = vshrl.u32 %v7351_v48, 16  ;;  %10535 = vmatmul.mubr.bf16.vlgmr.msra.gmra.mrb[128].mxu0 %v14264_v1  ;;  %v7395_v0 = vshll.u32 %v7351_v48, 16  ;;  %v7657_v52 = vld [vmem:[#allocation2 + $0x40] sm:$0xf]  ;;  %v7658_v45 = vld [vmem:[#allocation2 + $0x44] sm:$0x1] }
 0x460   : > { %v7720_v51 = vsel %vm16749_vm10, %v7715_v57, %v7719_v18  ;;  %v7380_v5 = vor.u32 %v7379_v26, %v7376_v38  ;;  %v12843_v7 = vrot.slane %v7532_v29, 10  ;;  %13908 = vmatpush3.bf16.msra.mxu0 %v14265_v8  ;;  %v7388_v10 = vrot.slane %v7386_v25, 6  ;;  %v7659_v15 = vld [vmem:[#allocation2 + $0x48] sm:$0xf]  ;;  %v7660_v2 = vld [vmem:[#allocation2 + $0x4c] sm:$0x1] }
 0x461   : > { %v12858_v4 = vcombine.low %v7706_v40, %v7720_v51  ;;  %v7372_v60 = vrot.slane %v7371_v47, 4  ;;  %v7394_v36 = vrot.slane %v7392_v22, 5  ;;  %13909 = vmatprep.subr.bf16.mxu0 %v14268_v34  ;;  %v7397_v23 = vrot.slane %v7395_v0, 6  ;;  %v7352_v17 = vld [vmem:[#allocation2 + $0x28] sm:$0xe]  ;;  %v14275_v20 = vld [vmem:[#allocation7 + $0x618] sm:$0xff]  }
 0x462   : > { %v7570_v43 = vrot.slane %v7533_v30, 6  ;;  %v12844_v59 = vrot.slane %v7534_v53, 10  ;;  %v7574_v55 = vrot.slane %v7535_v63, 6  ;;  %v7389_v35 = vor.u32 %v7388_v10, %v7385_v61  ;;  %v14270_v27 = vld [vmem:[#allocation2 + $0x30] ss:$8 sps:$4 sm:$0xff]   ;;  %v14271_v57 = vld [vmem:[#allocation7 + $0x5c8] sm:$0xff]  }
 0x463   : > { %10542 = vmatprep.mubr.bf16.mxu0 %v12858_v4  ;;  %v7381_v42 = vsel %vm16921_vm3, %v7372_v60, %v7380_v5  ;;  %v7722_v41 = vshrl.u32 %v7657_v52, 16  ;;  %v7725_v12 = vshll.u32 %v7657_v52, 16  ;;  %v7398_v46 = vor.u32 %v7397_v23, %v7394_v36  ;;  %v7353_v3 = vld [vmem:[#allocation2 + $0x2c] sm:$0x3]  ;;  %v7354_v18 = vld [vmem:[#allocation2 + $0x30] sm:$0xe] }
 0x464   : > { %v7571_v11 = vsel %vm16897_vm2, %v12843_v7, %v7570_v43  ;;  %v7575_v13 = vsel %vm16897_vm2, %v12844_v59, %v7574_v55  ;;  %v7731_v8 = vshll.u32 %v7658_v45, 16  ;;  %v7390_v39 = vrot.slane %v7389_v35, 4  ;;  %13910 = vmatpush3.bf16.msra.mxu0 %v14268_v34  ;;  %v7355_v50 = vld [vmem:[#allocation2 + $0x34] sm:$0x3]  ;;  %v7536_v30 = vld [vmem:[#allocation2 + $0x38] sm:$0xc] }
 0x465   : > { %v12850_v58 = vcombine.low %v7571_v11, %v7575_v13  ;;  %v7724_v37 = vrot.slane %v7722_v41, 4  ;;  %v7727_v44 = vrot.slane %v7725_v12, 5  ;;  %13911 = vmatprep.subr.bf16.mxu0 %v14272_v14  ;;  %v7736_v33 = vshrl.u32 %v7659_v15, 16  ;;  %v14273_v47 = vld [vmem:[#allocation7 + $0x588] sm:$0xff]   ;;  %v7537_v63 = vld [vmem:[#allocation2 + $0x3c] sm:$0x3] }
 0x466   : > { %v17203_v1 = vrot.slane %v7731_v8, 5  ;;  %v7739_v48 = vshll.u32 %v7659_v15, 16  ;;  %v7745_v56 = vshll.u32 %v7660_v2, 16  ;;  %v7399_v16 = vsel %vm16921_vm3, %v7390_v39, %v7398_v46  ;;  %v7538_v52 = vld [vmem:[#allocation2 + $0x40] sm:$0xc]  ;;  %v14274_v55 = vld [vmem:[#allocation7 + $0x5d0] sm:$0xff]  }
 0x467   : > { %v7728_v19 = vor.u32 %v7727_v44, %v7724_v37  ;;  %v7401_v24 = vshrl.u32 %v7352_v17, 16  ;;  %v7404_v34 = vshll.u32 %v7352_v17, 16  ;;  %v12837_v29 = vcombine.low %v7381_v42, %v7399_v16  ;;  %10543 = vmatmul.mubr.bf16.gmra.mrb[132].mxu0 %v14270_v27  ;;  %v14279_v4 = vld [vmem:[#allocation7 + $0x620] sm:$0xff]   ;;  %v7661_v43 = vld [vmem:[#allocation2 + $0x50] sm:$0xf]  ;;  %v17210_v15 = vpop.f32.mrb[52].mxu0 }
 0x468   : > { %v7738_v38 = vrot.slane %v7736_v33, 4  ;;  %v7741_v26 = vrot.slane %v7739_v48, 5  ;;  %v7747_v61 = vrot.slane %v7745_v56, 5  ;;  %13912 = vmatpush3.bf16.msra.mxu0 %v14272_v14  ;;  %v7410_v53 = vshrl.u32 %v7353_v3, 16  ;;  %v7539_v23 = vld [vmem:[#allocation2 + $0x44] sm:$0x3] }
 0x469   : > { %v7729_v40 = vrot.slane %v7728_v19, 4  ;;  %v7403_v25 = vrot.slane %v7401_v24, 5  ;;  %v7406_v22 = vrot.slane %v7404_v34, 6  ;;  %10470 = vmatmul.mubr.bf16.vlgmr.msra.gmra.mrb[112].mxu1 %v12837_v29  ;;  %13913 = vmatprep.subr.bf16.mxu0 %v14275_v20  ;;  %v7413_v5 = vshll.u32 %v7353_v3, 16  ;;  %v14276_v46 = vld [vmem:[#allocation7 + $0x590] sm:$0xff]   ;;  %v17212_v13 = vpop.f32.mrb[53].mxu0 }
 0x46a   : > { %v7742_v51 = vor.u32 %v7741_v26, %v7738_v38  ;;  %v7419_v0 = vshrl.u32 %v7354_v18, 16  ;;  %v7422_v7 = vshll.u32 %v7354_v18, 16  ;;  %13671 = vmatpush3.bf16.msra.mxu1 %v14269_v32  ;;  %10477 = vmatprep.mubr.bf16.mxu1 %v12850_v58  ;;  %v7412_v36 = vrot.slane %v7410_v53, 5  ;;  %v14278_v58 = vld [vmem:[#allocation7 + $0x5d8] sm:$0xff]   ;;  %v7662_v27 = vld [vmem:[#allocation2 + $0x54] sm:$0x1] }
 0x46b   : > { %v7734_v60 = vsel %vm16749_vm10, %v7729_v40, %v17203_v1  ;;  %v7407_v10 = vor.u32 %v7406_v22, %v7403_v25  ;;  %v7428_v45 = vshrl.u32 %v7355_v50, 16  ;;  %13672 = vmatprep.subr.bf16.mxu1 %v14271_v57  ;;  %v7415_v14 = vrot.slane %v7413_v5, 6  ;;  %v14282_v37 = vld [vmem:[#allocation7 + $0x628] sm:$0xff]   ;;  %v17216_v44 = vpop.f32.mrb[54].mxu0  ;;  %v7663_v56 = vld [vmem:[#allocation2 + $0x58] sm:$0xf] }
 0x46c   : > { %v7743_v59 = vrot.slane %v7742_v51, 4  ;;  %v7421_v42 = vrot.slane %v7419_v0, 5  ;;  %v7424_v35 = vrot.slane %v7422_v7, 6  ;;  %v7431_v12 = vshll.u32 %v7355_v50, 16  ;;  %13914 = vmatpush3.bf16.msra.mxu0 %v14275_v20  ;;  %v17218_v3 = vpop.f32.mrb[55].mxu0 }
 0x46d   : > { %v7408_v2 = vrot.slane %v7407_v10, 4  ;;  %v7430_v41 = vrot.slane %v7428_v45, 5  ;;  %v12845_v11 = vrot.slane %v7536_v30, 10  ;;  %v7416_v17 = vor.u32 %v7415_v14, %v7412_v36  ;;  %13915 = vmatprep.subr.bf16.mxu0 %v14279_v4  ;;  %v14277_v50 = vld [vmem:[#allocation2 + $0x40] ss:$8 sps:$4 sm:$0xff]  }
 0x46e   : > { %v7748_v8 = vsel %vm16749_vm10, %v7743_v59, %v7747_v61  ;;  %v7425_v39 = vor.u32 %v7424_v35, %v7421_v42  ;;  %v7578_v32 = vrot.slane %v7537_v63, 6  ;;  %13673 = vmatpush3.bf16.msra.mxu1 %v14273_v47  ;;  %v7433_v33 = vrot.slane %v7431_v12, 6  ;;  %v7664_v24 = vld [vmem:[#allocation2 + $0x5c] sm:$0x1]  ;;  %v7356_v30 = vld [vmem:[#allocation2 + $0x38] sm:$0xe] }
 0x46f   : > { %v12859_v1 = vcombine.low %v7734_v60, %v7748_v8  ;;  %v12846_v48 = vrot.slane %v7538_v52, 10  ;;  %v7582_v20 = vrot.slane %v7539_v23, 6  ;;  %13674 = vmatprep.subr.bf16.mxu1 %v14274_v55  ;;  %v7417_v16 = vsel %vm16921_vm3, %v7408_v2, %v7416_v17  ;;  %v14280_v61 = vld [vmem:[#allocation7 + $0x598] sm:$0xff]   ;;  %v14286_v63 = vld [vmem:[#allocation7 + $0x630] sm:$0xff]   ;;  %v14281_v52 = vld [vmem:[#allocation7 + $0x5e0] sm:$0xff]  }
 0x470   : > { %v7426_v19 = vrot.slane %v7425_v39, 4  ;;  %v7579_v18 = vsel %vm16897_vm2, %v12845_v11, %v7578_v32  ;;  %v7750_v34 = vshrl.u32 %v7661_v43, 16  ;;  %v7434_v29 = vor.u32 %v7433_v33, %v7430_v41  ;;  %13916 = vmatpush3.bf16.msra.mxu0 %v14279_v4  ;;  %v7357_v53 = vld [vmem:[#allocation2 + $0x3c] sm:$0x3]  ;;  %v7358_v60 = vld [vmem:[#allocation2 + $0x40] sm:$0xe] }
 0x471   : > { %10550 = vmatprep.mubr.bf16.mxu0 %v12859_v1  ;;  %v7583_v57 = vsel %vm16897_vm2, %v12846_v48, %v7582_v20  ;;  %v7753_v38 = vshll.u32 %v7661_v43, 16  ;;  %v7759_v26 = vshll.u32 %v7662_v27, 16  ;;  %v7764_v25 = vshrl.u32 %v7663_v56, 16  ;;  %13917 = vmatprep.subr.bf16.mxu0 %v14282_v37  ;;  %v7359_v45 = vld [vmem:[#allocation2 + $0x44] sm:$0x3]  ;;  %v17228_v43 = vpop.f32.mrb[56].mxu0 }
 0x472   : > { %v12851_v40 = vcombine.low %v7579_v18, %v7583_v57  ;;  %10551 = vmatmul.mubr.bf16.gmra.mrb[136].mxu0 %v14277_v50  ;;  %v7752_v47 = vrot.slane %v7750_v34, 4  ;;  %v7767_v22 = vshll.u32 %v7663_v56, 16  ;;  %v7435_v51 = vsel %vm16921_vm3, %v7426_v19, %v7434_v29  ;;  %13675 = vmatpush3.bf16.msra.mxu1 %v14276_v46  ;;  %v17230_v35 = vld [vmem:[#allocation2 + $0x48] sm:$0xc]  ;;  %v17232_v2 = vpop.f32.mrb[57].mxu0  ;;  %v14283_v8 = vld [vmem:[#allocation7 + $0x5a0] sm:$0xff]  }
 0x473   : > { %v7755_v5 = vrot.slane %v7753_v38, 5  ;;  %v7761_v0 = vrot.slane %v7759_v26, 5  ;;  %v7773_v7 = vshll.u32 %v7664_v24, 16  ;;  %v12838_v10 = vcombine.low %v7417_v16, %v7435_v51  ;;  %13676 = vmatprep.subr.bf16.mxu1 %v14278_v58  ;;  %v14289_v17 = vld [vmem:[#allocation7 + $0x638] sm:$0xff]   ;;  %v17234_v39 = vpop.f32.mrb[58].mxu0  ;;  %v14285_v48 = vld [vmem:[#allocation7 + $0x5e8] sm:$0xff]  }
 0x474   : > { %v7766_v4 = vrot.slane %v7764_v25, 4  ;;  %v7769_v36 = vrot.slane %v7767_v22, 5  ;;  %v7437_v23 = vshrl.u32 %v7356_v30, 16  ;;  %v7440_v14 = vshll.u32 %v7356_v30, 16  ;;  %13918 = vmatpush3.bf16.msra.mxu0 %v14282_v37  ;;  %v7541_v1 = vld [vmem:[#allocation2 + $0x4c] sm:$0x3] }
 0x475   : > { %v7756_v59 = vor.u32 %v7755_v5, %v7752_v47  ;;  %v7775_v55 = vrot.slane %v7773_v7, 5  ;;  %v7446_v42 = vshrl.u32 %v7357_v53, 16  ;;  %10478 = vmatmul.mubr.bf16.gmra.mrb[116].mxu1 %v12838_v10  ;;  %v7449_v46 = vshll.u32 %v7357_v53, 16  ;;  %13919 = vmatprep.subr.bf16.mxu0 %v14286_v63  ;;  %v7542_v33 = vld [vmem:[#allocation2 + $0x50] sm:$0xc]  ;;  %v17236_v20 = vpop.f32.mrb[59].mxu0 }
 0x476   : > { %v7770_v41 = vor.u32 %v7769_v36, %v7766_v4  ;;  %v7439_v12 = vrot.slane %v7437_v23, 5  ;;  %v7455_v11 = vshrl.u32 %v7358_v60, 16  ;;  %10485 = vmatprep.mubr.bf16.mxu1 %v12851_v40  ;;  %13677 = vmatpush3.bf16.msra.mxu1 %v14280_v61  ;;  %v7442_v58 = vrot.slane %v7440_v14, 6  ;;  %v7543_v50 = vld [vmem:[#allocation2 + $0x54] sm:$0x3]  ;;  %v14287_v38 = vld [vmem:[#allocation7 + $0x5a8] sm:$0xff]  }
 0x477   : > { %v7757_v32 = vrot.slane %v7756_v59, 4  ;;  %v7448_v27 = vrot.slane %v7446_v42, 5  ;;  %v7458_v37 = vshll.u32 %v7358_v60, 16  ;;  %13678 = vmatprep.subr.bf16.mxu1 %v14281_v52  ;;  %v7451_v16 = vrot.slane %v7449_v46, 6  ;;  %v8061_v26 = vld [vmem:[#allocation2 + $0x20] sm:$0xc] }
 0x478   : > { %v7771_v56 = vrot.slane %v7770_v41, 4  ;;  %v7457_v19 = vrot.slane %v7455_v11, 5  ;;  %v7464_v18 = vshrl.u32 %v7359_v45, 16  ;;  %v7443_v34 = vor.u32 %v7442_v58, %v7439_v12  ;;  %13920 = vmatpush3.bf16.msra.mxu0 %v14286_v63  ;;  %v14284_v25 = vld [vmem:[#allocation2 + $0x50] ss:$8 sps:$4 sm:$0xff]  }
 0x479   : > { %v7762_v24 = vsel %vm16749_vm10, %v7757_v32, %v7761_v0  ;;  %v7460_v29 = vrot.slane %v7458_v37, 6  ;;  %v7467_v57 = vshll.u32 %v7359_v45, 16  ;;  %v7452_v30 = vor.u32 %v7451_v16, %v7448_v27  ;;  %v8062_v22 = vld [vmem:[#allocation2 + $0x24] sm:$0x3]  ;;  %v8063_v53 = vld [vmem:[#allocation2 + $0x28] sm:$0xc]  ;;  %13921 = vmatprep.subr.bf16.mxu0 %v14289_v17 }
 0x47a   : > { %v7776_v61 = vsel %vm16749_vm10, %v7771_v56, %v7775_v55  ;;  %v7466_v40 = vrot.slane %v7464_v18, 5  ;;  %v12847_v47 = vrot.slane %v17230_v35, 10  ;;  %v7444_v5 = vrot.slane %v7443_v34, 4  ;;  %13679 = vmatpush3.bf16.msra.mxu1 %v14283_v8  ;;  %v8064_v52 = vld [vmem:[#allocation2 + $0x2c] sm:$0x3]  ;;  %v14288_v36 = vld [vmem:[#allocation7 + $0x5f0] sm:$0xff]  }
 0x47b   : > { %v12860_v51 = vcombine.low %v7762_v24, %v7776_v61  ;;  %v7461_v0 = vor.u32 %v7460_v29, %v7457_v19  ;;  %v7469_v7 = vrot.slane %v7467_v57, 6  ;;  %v7360_v60 = vld [vmem:[#allocation2 + $0x48] sm:$0xe]  ;;  %v7586_v63 = vrot.slane %v7541_v1, 6  ;;  %13680 = vmatprep.subr.bf16.mxu1 %v14285_v48  ;;  %v17243_v45 = vpop.f32.mrb[60].mxu0  ;;  %v17261_v56 = vpop.f32.mrb[48].mxu1 }
 0x47c   : > { %v12848_v10 = vrot.slane %v7542_v33, 10  ;;  %v7590_v4 = vrot.slane %v7543_v50, 6  ;;  %v12877_v49 = vrot.slane %v8061_v26, 10  ;;  %v7453_v23 = vsel %vm16921_vm3, %v7444_v5, %v7452_v30  ;;  %v7361_v42 = vld [vmem:[#allocation2 + $0x4c] sm:$0x3]  ;;  %13922 = vmatpush3.bf16.msra.mxu0 %v14289_v17  ;;  %v17247_v35 = vpop.f32.mrb[61].mxu0 }
 0x47d   : > { %10558 = vmatprep.mubr.bf16.mxu0 %v12860_v51  ;;  %v7462_v59 = vrot.slane %v7461_v0, 4  ;;  %v7470_v55 = vor.u32 %v7469_v7, %v7466_v40  ;;  %v8095_v14 = vrot.slane %v8062_v22, 6  ;;  %v7587_v41 = vsel %vm16897_vm2, %v12847_v47, %v7586_v63  ;;  %v7362_v8 = vld [vmem:[#allocation2 + $0x50] sm:$0xe]  ;;  %v17253_v32 = vpop.f32.mrb[62].mxu0  ;;  %v14291_v34 = vld [vmem:[#allocation7 + $0x5f8] sm:$0xff]  }
 0x47e   : > { %v7591_v12 = vsel %vm16897_vm2, %v12848_v10, %v7590_v4  ;;  %10559 = vmatmul.mubr.bf16.gmra.mrb[140].mxu0 %v14284_v25  ;;  %v12878_v46 = vrot.slane %v8063_v53, 10  ;;  %v8099_v11 = vrot.slane %v8064_v52, 6  ;;  %13681 = vmatpush3.bf16.msra.mxu1 %v14287_v38  ;;  %v7363_v37 = vld [vmem:[#allocation2 + $0x54] sm:$0x3]  ;;  %v7473_v1 = vshrl.u32 %v7360_v60, 16  ;;  %v17259_v48 = vpop.f32.mrb[63].mxu0 }
 0x47f   : > { %v7471_v58 = vsel %vm16921_vm3, %v7462_v59, %v7470_v55  ;;  %v12852_v27 = vcombine.low %v7587_v41, %v7591_v12  ;;  %v8096_v17 = vsel %vm16897_vm2, %v12877_v49, %v8095_v14  ;;  %v14290_v33 = vld [vmem:[#allocation7 + $0x5b0] sm:$0xff]   ;;  %13682 = vmatprep.subr.bf16.mxu1 %v14288_v36  ;;  %v7476_v18 = vshll.u32 %v7360_v60, 16  ;;  %v7881_v24 = vld [vmem:[#allocation2 + $0x20] sm:$0xe]  ;;  %v17265_v29 = vpop.f32.mrb[49].mxu1  ;;  %v14292_v60 = vld [vmem:[#allocation7 + $0x5b8] sm:$0xff]  }
 0x480   : > { %v12839_v16 = vcombine.low %v7453_v23, %v7471_v58  ;;  %v8100_v19 = vsel %vm16897_vm2, %v12878_v46, %v8099_v11  ;;  %v7482_v50 = vshrl.u32 %v7361_v42, 16  ;;  %v7475_v38 = vrot.slane %v7473_v1, 5  ;;  %v7882_v30 = vld [vmem:[#allocation2 + $0x24] sm:$0x3]  ;;  %v17267_v40 = vpop.f32.mrb[50].mxu1  ;;  %v17271_v23 = vpop.f32.mrb[64].mxu0 }
 0x481   : > { %v12885_v57 = vcombine.low %v8096_v17, %v8100_v19  ;;  %v7485_v26 = vshll.u32 %v7361_v42, 16  ;;  %v7491_v61 = vshrl.u32 %v7362_v8, 16  ;;  %v7478_v47 = vrot.slane %v7476_v18, 6  ;;  %v17269_v51 = vpop.f32.mrb[51].mxu1  ;;  %v7883_v49 = vld [vmem:[#allocation2 + $0x28] sm:$0xe] }
 0x482   : > { %10486 = vmatmul.mubr.bf16.gmra.mrb[120].mxu1 %v12839_v16  ;;  %v7484_v25 = vrot.slane %v7482_v50, 5  ;;  %v7494_v22 = vshll.u32 %v7362_v8, 16  ;;  %v7500_v53 = vshrl.u32 %v7363_v37, 16  ;;  %v7503_v7 = vshll.u32 %v7363_v37, 16  ;;  %v7884_v14 = vld [vmem:[#allocation2 + $0x2c] sm:$0x3] }
 0x483   : > { %10493 = vmatprep.mubr.bf16.mxu1 %v12852_v27  ;;  %13923 = vmatprep.mubr.bf16.mxu0 %v12885_v57  ;;  %v7487_v5 = vrot.slane %v7485_v26, 6  ;;  %v7493_v0 = vrot.slane %v7491_v61, 5  ;;  %v7898_v52 = vshrl.u32 %v7881_v24, 16  ;;  %v7479_v63 = vor.u32 %v7478_v47, %v7475_v38  ;;  %v17273_v12 = vpop.f32.mrb[65].mxu0  ;;  %v8065_v27 = vld [vmem:[#allocation2 + $0x30] sm:$0xc] }
 0x484   : > { %v7496_v10 = vrot.slane %v7494_v22, 6  ;;  %v7502_v4 = vrot.slane %v7500_v53, 5  ;;  %13683 = vmatpush3.bf16.msra.mxu1 %v14290_v33  ;;  %v7901_v36 = vshll.u32 %v7881_v24, 16  ;;  %v7505_v55 = vrot.slane %v7503_v7, 6  ;;  %v17275_v17 = vpop.f32.mrb[66].mxu0  ;;  %v17279_v57 = vpop.f32.mrb[52].mxu1 }
 0x485   : > { %v7488_v59 = vor.u32 %v7487_v5, %v7484_v25  ;;  %v7900_v42 = vrot.slane %v7898_v52, 5  ;;  %v7907_v41 = vshrl.u32 %v7882_v30, 16  ;;  %13684 = vmatprep.subr.bf16.mxu1 %v14291_v34  ;;  %v7480_v46 = vrot.slane %v7479_v63, 4  ;;  %v8066_v19 = vld [vmem:[#allocation2 + $0x34] sm:$0x3]  ;;  %v17277_v24 = vpop.f32.mrb[67].mxu0 }
 0x486   : > { %v7497_v11 = vor.u32 %v7496_v10, %v7493_v0  ;;  %v7903_v8 = vrot.slane %v7901_v36, 6  ;;  %v7910_v58 = vshll.u32 %v7882_v30, 16  ;;  %v7506_v37 = vor.u32 %v7505_v55, %v7502_v4  ;;  %v8067_v18 = vld [vmem:[#allocation2 + $0x38] sm:$0xc]  ;;  %v8068_v50 = vld [vmem:[#allocation2 + $0x3c] sm:$0x3] }
 0x487   : > { %v7909_v1 = vrot.slane %v7907_v41, 5  ;;  %v7916_v33 = vshrl.u32 %v7883_v49, 16  ;;  %v7919_v16 = vshll.u32 %v7883_v49, 16  ;;  %v7489_v34 = vsel %vm16921_vm3, %v7480_v46, %v7488_v59  ;;  %v8069_v30 = vld [vmem:[#allocation2 + $0x40] sm:$0xc]  ;;  %v17283_v25 = vpop.f32.mrb[53].mxu1 }
 0x488   : > { %v7498_v38 = vrot.slane %v7497_v11, 4  ;;  %v7904_v26 = vor.u32 %v7903_v8, %v7900_v42  ;;  %v7912_v61 = vrot.slane %v7910_v58, 6  ;;  %13685 = vmatpush3.bf16.msra.mxu1 %v14292_v60  ;;  %v8070_v47 = vld [vmem:[#allocation2 + $0x44] sm:$0x3]  ;;  %v7925_v5 = vshrl.u32 %v7884_v14, 16  ;;  %v17285_v52 = vpop.f32.mrb[54].mxu1 }
 0x489   : > { %v7918_v22 = vrot.slane %v7916_v33, 5  ;;  %v7921_v53 = vrot.slane %v7919_v16, 6  ;;  %v7928_v0 = vshll.u32 %v7884_v14, 16  ;;  %v8071_v7 = vld [vmem:[#allocation2 + $0x48] sm:$0xc]  ;;  %18208 = vst [vmem:[#allocation33_spill] sm:$0xff] %v17285_v52 }
 0x48a   : > { %v7507_v63 = vsel %vm16921_vm3, %v7498_v38, %v7506_v37  ;;  %v7905_v10 = vrot.slane %v7904_v26, 4  ;;  %v7913_v4 = vor.u32 %v7912_v61, %v7909_v1  ;;  %v12879_v49 = vrot.slane %v8065_v27, 10  ;;  %v8072_v36 = vld [vmem:[#allocation2 + $0x4c] sm:$0x3]  ;;  %v17289_v59 = vpop.f32.mrb[55].mxu1  ;;  %v17293_v37 = vpop.f32.mrb[68].mxu0 }
 0x48b   : > { %18209 = vst [vmem:[#allocation34_spill] sm:$0xff] %v17289_v59  ;;  %v12840_v60 = vcombine.low %v7489_v34, %v7507_v63  ;;  %v7922_v55 = vor.u32 %v7921_v53, %v7918_v22  ;;  %v7927_v42 = vrot.slane %v7925_v5, 5  ;;  %v7930_v41 = vrot.slane %v7928_v0, 6  ;;  %v7797_v46 = vld [vmem:[#allocation2 + $0x20] sm:$0xe]  ;;  %v17295_v61 = vpop.f32.mrb[69].mxu0 }
 0x48c   : > { %v7798_v11 = vld [vmem:[#allocation2 + $0x24] sm:$0x1]  ;;  %v7914_v14 = vsel %vm16921_vm3, %v7905_v10, %v7913_v4  ;;  %v8103_v8 = vrot.slane %v8066_v19, 6  ;;  %v12880_v58 = vrot.slane %v8067_v18, 10  ;;  %v8107_v33 = vrot.slane %v8068_v50, 6  ;;  %v17301_v5 = vpop.f32.mrb[70].mxu0 }
 0x48d   : > { %v7799_v16 = vld [vmem:[#allocation2 + $0x28] sm:$0xe]  ;;  %10494 = vmatmul.mubr.bf16.gmra.mrb[124].mxu1 %v12840_v60  ;;  %v7923_v27 = vrot.slane %v7922_v55, 4  ;;  %v7931_v1 = vor.u32 %v7930_v41, %v7927_v42  ;;  %v12881_v38 = vrot.slane %v8069_v30, 10  ;;  %v8111_v26 = vrot.slane %v8070_v47, 6  ;;  %v17307_v60 = vpop.f32.mrb[71].mxu0 }
 0x48e   : > { %v7800_v34 = vld [vmem:[#allocation2 + $0x2c] sm:$0x1]  ;;  %v8104_v22 = vsel %vm16897_vm2, %v12879_v49, %v8103_v8  ;;  %v8108_v53 = vsel %vm16897_vm2, %v12880_v58, %v8107_v33  ;;  %v12882_v19 = vrot.slane %v8071_v7, 10  ;;  %v8115_v18 = vrot.slane %v8072_v36, 6  ;;  %v7885_v50 = vld [vmem:[#allocation2 + $0x30] sm:$0xe] }
 0x48f   : > { %v7932_v0 = vsel %vm16921_vm3, %v7923_v27, %v7931_v1  ;;  %v12886_v63 = vcombine.low %v8104_v22, %v8108_v53  ;;  %v8112_v30 = vsel %vm16897_vm2, %v12881_v38, %v8111_v26  ;;  %v12861_v47 = vrot.slane %v7797_v46, 9  ;;  %v7886_v10 = vld [vmem:[#allocation2 + $0x34] sm:$0x3]  ;;  %v7887_v4 = vld [vmem:[#allocation2 + $0x38] sm:$0xe]  ;;  %v17311_v38 = vpop.f32.mrb[56].mxu1 }
 0x490   : > { %v12873_v49 = vcombine.low %v7914_v14, %v7932_v0  ;;  %v8116_v7 = vsel %vm16897_vm2, %v12882_v19, %v8115_v18  ;;  %v7831_v36 = vrot.slane %v7798_v11, 5  ;;  %v12862_v55 = vrot.slane %v7799_v16, 9  ;;  %v7888_v42 = vld [vmem:[#allocation2 + $0x3c] sm:$0x3]  ;;  %v8073_v27 = vld [vmem:[#allocation2 + $0x50] sm:$0xc] }
 0x491   : > { %13924 = vmatmul.mubr.bf16.vlgmr.msra.gmra.mrb[144].mxu0 %v12886_v63  ;;  %v12887_v41 = vcombine.low %v8112_v30, %v8116_v7  ;;  %v7835_v8 = vrot.slane %v7800_v34, 5  ;;  %v7934_v58 = vshrl.u32 %v7885_v50, 16  ;;  %v7937_v33 = vshll.u32 %v7885_v50, 16  ;;  %v8074_v1 = vld [vmem:[#allocation2 + $0x54] sm:$0x3]  ;;  %18210 = vst [vmem:[#allocation35_spill] sm:$0xff] %v17311_v38 }
 0x492   : > { %10599 = vmatprep.mubr.bf16.mxu1 %v12873_v49  ;;  %v7832_v46 = vsel %vm16927_vm4, %v12861_v47, %v7831_v36  ;;  %v7943_v14 = vshrl.u32 %v7886_v10, 16  ;;  %v7946_v26 = vshll.u32 %v7886_v10, 16  ;;  %v7952_v22 = vshrl.u32 %v7887_v4, 16  ;;  %v8075_v53 = vld [vmem:[#allocation2 + $0x58] sm:$0xc]  ;;  %v17315_v11 = vpop.f32.mrb[57].mxu1 }
 0x493   : > { %18211 = vst [vmem:[#allocation36_spill] sm:$0xff] %v17315_v11  ;;  %13927 = vmatprep.mubr.bf16.mxu0 %v12887_v41  ;;  %v7836_v16 = vsel %vm16927_vm4, %v12862_v55, %v7835_v8  ;;  %v7936_v34 = vrot.slane %v7934_v58, 5  ;;  %v7939_v19 = vrot.slane %v7937_v33, 6  ;;  %v7955_v18 = vshll.u32 %v7887_v4, 16  ;;  %v8076_v50 = vld [vmem:[#allocation2 + $0x5c] sm:$0x3] }
 0x494   : > { %v7801_v0 = vld [vmem:[#allocation2 + $0x30] sm:$0xe]  ;;  %v7802_v63 = vld [vmem:[#allocation2 + $0x34] sm:$0x1]  ;;  %v17319_v30 = vpop.f32.mrb[58].mxu1  ;;  %v12869_v49 = vcombine.low %v7832_v46, %v7836_v16  ;;  %v7945_v47 = vrot.slane %v7943_v14, 5  ;;  %v13334_v21 = vadd.f32 %v17295_v61, %v17293_v37 }
 0x495   : > { %18212 = vst [vmem:[#allocation37_spill] sm:$0xff] %v17319_v30  ;;  %v7948_v7 = vrot.slane %v7946_v26, 6  ;;  %v7954_v10 = vrot.slane %v7952_v22, 5  ;;  %v17321_v36 = vpop.f32.mrb[72].mxu0  ;;  %v17323_v38 = vpop.f32.mrb[59].mxu1  ;;  %v7940_v41 = vor.u32 %v7939_v19, %v7936_v34  ;;  %v7957_v11 = vrot.slane %v7955_v18, 6 }
 0x496   : > { %18213 = vst [vmem:[#allocation38_spill] sm:$0xff] %v17321_v36  ;;  %18214 = vst [vmem:[#allocation39_spill] sm:$0xff] %v17323_v38  ;;  %v7961_v59 = vshrl.u32 %v7888_v42, 16  ;;  %v7964_v55 = vshll.u32 %v7888_v42, 16  ;;  %v7803_v8 = vld [vmem:[#allocation2 + $0x38] sm:$0xe]  ;;  %10600 = vmatmul.mubr.bf16.vlgmr.msra.gmra.mrb[128].mxu1 %v12869_v49 }
 0x497   : > { %v17325_v58 = vpop.f32.mrb[73].mxu0  ;;  %v7949_v4 = vor.u32 %v7948_v7, %v7945_v47  ;;  %v12883_v33 = vrot.slane %v8073_v27, 10  ;;  %v8119_v52 = vrot.slane %v8074_v1, 6  ;;  %v12884_v30 = vrot.slane %v8075_v53, 10  ;;  %v7804_v46 = vld [vmem:[#allocation2 + $0x3c] sm:$0x1] }
 0x498   : > { %v17327_v14 = vpop.f32.mrb[74].mxu0  ;;  %v7941_v26 = vrot.slane %v7940_v41, 4  ;;  %v7958_v22 = vor.u32 %v7957_v11, %v7954_v10  ;;  %v7963_v16 = vrot.slane %v7961_v59, 5  ;;  %v7966_v36 = vrot.slane %v7964_v55, 6  ;;  %v7889_v38 = vld [vmem:[#allocation2 + $0x40] sm:$0xe] }
 0x499   : > { %v17329_v34 = vpop.f32.mrb[75].mxu0  ;;  %v8120_v42 = vsel %vm16897_vm2, %v12883_v33, %v8119_v52  ;;  %v8123_v19 = vrot.slane %v8076_v50, 6  ;;  %v12863_v18 = vrot.slane %v7801_v0, 9  ;;  %v7839_v49 = vrot.slane %v7802_v63, 5  ;;  %v7890_v47 = vld [vmem:[#allocation2 + $0x44] sm:$0x3] }
 0x49a   : > { %v7950_v27 = vsel %vm16921_vm3, %v7941_v26, %v7949_v4  ;;  %v7959_v1 = vrot.slane %v7958_v22, 4  ;;  %v7967_v53 = vor.u32 %v7966_v36, %v7963_v16  ;;  %v12864_v7 = vrot.slane %v7803_v8, 9  ;;  %v7891_v41 = vld [vmem:[#allocation2 + $0x48] sm:$0xe]  ;;  %v7892_v0 = vld [vmem:[#allocation2 + $0x4c] sm:$0x3] }
 0x49b   : > { %v8124_v59 = vsel %vm16897_vm2, %v12884_v30, %v8123_v19  ;;  %v7840_v11 = vsel %vm16927_vm4, %v12863_v18, %v7839_v49  ;;  %v7843_v10 = vrot.slane %v7804_v46, 5  ;;  %v7970_v55 = vshrl.u32 %v7889_v38, 16  ;;  %v17346_v30 = vld [vmem:[%s17631_s4] ss:$0 sm:$0xff]  ;;  %v7805_v46 = vld [vmem:[#allocation2 + $0x40] sm:$0xe] }
 0x49c   : > { %v7968_v52 = vsel %vm16921_vm3, %v7959_v1, %v7967_v53  ;;  %v12888_v50 = vcombine.low %v8120_v42, %v8124_v59  ;;  %v7973_v63 = vshll.u32 %v7889_v38, 16  ;;  %v7979_v33 = vshrl.u32 %v7890_v47, 16  ;;  %v17348_v26 = vpop.f32.mrb[76].mxu0  ;;  %v17350_v22 = vpop.f32.mrb[60].mxu1  ;;  %v7806_v18 = vld [vmem:[#allocation2 + $0x44] sm:$0x1] }
 0x49d   : > { %v12874_v4 = vcombine.low %v7950_v27, %v7968_v52  ;;  %v7844_v36 = vsel %vm16927_vm4, %v12864_v7, %v7843_v10  ;;  %v7972_v8 = vrot.slane %v7970_v55, 5  ;;  %v7982_v31 = vshll.u32 %v7890_v47, 16  ;;  %18215 = vst [vmem:[#allocation40_spill] sm:$0xff] %v17350_v22  ;;  %v7807_v49 = vld [vmem:[#allocation2 + $0x48] sm:$0xe]  ;;  %v17352_v27 = vpop.f32.mrb[77].mxu0 }
 0x49e   : > { %13928 = vmatmul.mubr.bf16.gmra.mrb[148].mxu0 %v12888_v50  ;;  %v12870_v16 = vcombine.low %v7840_v11, %v7844_v36  ;;  %v7975_v38 = vrot.slane %v7973_v63, 6  ;;  %v7981_v42 = vrot.slane %v7979_v33, 5  ;;  %v7988_v19 = vshrl.u32 %v7891_v41, 16  ;;  %18216 = vst [vmem:[#allocation41_spill] sm:$0xff] %v17352_v27  ;;  %v17354_v47 = vpop.f32.mrb[61].mxu1  ;;  %v17356_v10 = vpop.f32.mrb[78].mxu0 }
 0x49f   : > { %18217 = vst [vmem:[#allocation42_spill] sm:$0xff] %v17354_v47  ;;  %10607 = vmatprep.mubr.bf16.mxu1 %v12874_v4  ;;  %v7984_v1 = vrot.slane %v7982_v31, 6  ;;  %v7991_v53 = vshll.u32 %v7891_v41, 16  ;;  %v7997_v7 = vshrl.u32 %v7892_v0, 16  ;;  %v8000_v59 = vshll.u32 %v7892_v0, 16  ;;  %18218 = vst [vmem:[#allocation43_spill] sm:$0xff] %v17356_v10 }
 0x4a0   : > { %v17358_v55 = vpop.f32.mrb[62].mxu1  ;;  %10608 = vmatmul.mubr.bf16.gmra.mrb[132].mxu1 %v12870_v16  ;;  %v7976_v11 = vor.u32 %v7975_v38, %v7972_v8  ;;  %v7990_v52 = vrot.slane %v7988_v19, 5  ;;  %v13248_v50 = vadd.f32 %v17169_v9, %v17165_v6  ;;  %v13251_v63 = vadd.f32 %v17176_v62, %v17171_v28  ;;  %v7808_v33 = vld [vmem:[#allocation2 + $0x4c] sm:$0x1]  ;;  %v17364_v36 = vpop.f32.mrb[79].mxu0 }
 0x4a1   : > { %18219 = vst [vmem:[#allocation44_spill] sm:$0xff] %v17358_v55  ;;  %18220 = vst [vmem:[#allocation45_spill] sm:$0xff] %v17364_v36  ;;  %v17366_v4 = vpop.f32.mrb[63].mxu1  ;;  %v7985_v41 = vor.u32 %v7984_v1, %v7981_v42  ;;  %v7993_v0 = vrot.slane %v7991_v53, 6  ;;  %v7999_v31 = vrot.slane %v7997_v7, 5  ;;  %v8002_v47 = vrot.slane %v8000_v59, 6 }
 0x4a2   : > { %18221 = vst [vmem:[#allocation46_spill] sm:$0xff] %v17366_v4  ;;  %v7893_v22 = vld [vmem:[#allocation2 + $0x50] sm:$0xe]  ;;  %v7977_v55 = vrot.slane %v7976_v11, 4  ;;  %v17369_v8 = vadd.f32 %v13248_v50, %v17346_v30  ;;  %v17372_v16 = vadd.f32 %v13251_v63, %v17346_v30  ;;  %v12865_v6 = vrot.slane %v7805_v46, 9 }
 0x4a3   : > { %v7894_v9 = vld [vmem:[#allocation2 + $0x54] sm:$0x3]  ;;  %v7994_v28 = vor.u32 %v7993_v0, %v7990_v52  ;;  %v8003_v62 = vor.u32 %v8002_v47, %v7999_v31  ;;  %v7847_v38 = vrot.slane %v7806_v18, 5  ;;  %v12866_v19 = vrot.slane %v7807_v49, 9  ;;  %v7895_v36 = vld [vmem:[#allocation2 + $0x58] sm:$0xe] }
 0x4a4   : > { %v7986_v42 = vsel %vm16921_vm3, %v7977_v55, %v7985_v41  ;;  %v7851_v1 = vrot.slane %v7808_v33, 5  ;;  %v8006_v53 = vshrl.u32 %v7893_v22, 16  ;;  %v8009_v7 = vshll.u32 %v7893_v22, 16  ;;  %v7896_v52 = vld [vmem:[#allocation2 + $0x5c] sm:$0x3] }
 0x4a5   : > { %v7995_v59 = vrot.slane %v7994_v28, 4  ;;  %v7848_v11 = vsel %vm16927_vm4, %v12865_v6, %v7847_v38  ;;  %v8015_v50 = vshrl.u32 %v7894_v9, 16  ;;  %v8018_v63 = vshll.u32 %v7894_v9, 16  ;;  %v7809_v22 = vld [vmem:[#allocation2 + $0x50] sm:$0xe]  ;;  %v17382_v9 = vpop.f32.mrb[80].mxu0 }
 0x4a6   : > { %v7852_v46 = vsel %vm16927_vm4, %v12866_v19, %v7851_v1  ;;  %v8008_v47 = vrot.slane %v8006_v53, 5  ;;  %v8011_v18 = vrot.slane %v8009_v7, 6  ;;  %v8024_v49 = vshrl.u32 %v7895_v36, 16  ;;  %v7810_v38 = vld [vmem:[#allocation2 + $0x54] sm:$0x1]  ;;  %v13407_v27 = vpop.f32.mrb[81].mxu0 }
 0x4a7   : > { %v8004_v0 = vsel %vm16921_vm3, %v7995_v59, %v8003_v62  ;;  %v12871_v55 = vcombine.low %v7848_v11, %v7852_v46  ;;  %v8017_v33 = vrot.slane %v8015_v50, 5  ;;  %v8020_v41 = vrot.slane %v8018_v63, 6  ;;  %v7811_v7 = vld [vmem:[#allocation2 + $0x58] sm:$0xe]  ;;  %v7812_v11 = vld [vmem:[#allocation2 + $0x5c] sm:$0x1] }
 0x4a8   : > { %v12875_v31 = vcombine.low %v7986_v42, %v8004_v0  ;;  %v8012_v28 = vor.u32 %v8011_v18, %v8008_v47  ;;  %v8026_v4 = vrot.slane %v8024_v49, 5  ;;  %v8027_v6 = vshll.u32 %v7895_v36, 16  ;;  %v13409_v36 = vpop.f32.mrb[82].mxu0 }
 0x4a9   : > { %v8021_v10 = vor.u32 %v8020_v41, %v8017_v33  ;;  %v8033_v19 = vshrl.u32 %v7896_v52, 16  ;;  %v8036_v1 = vshll.u32 %v7896_v52, 16  ;;  %v13254_v53 = vadd.f32 %v17212_v13, %v17210_v15  ;;  %v13410_v18 = vpop.f32.mrb[83].mxu0 }
 0x4aa   : > { %10615 = vmatprep.mubr.bf16.mxu1 %v12875_v31  ;;  %v8013_v62 = vrot.slane %v8012_v28, 4  ;;  %v8029_v59 = vrot.slane %v8027_v6, 6  ;;  %v13257_v42 = vadd.f32 %v17218_v3, %v17216_v44  ;;  %v12867_v50 = vrot.slane %v7809_v22, 9 }
 0x4ab   : > { %10616 = vmatmul.mubr.bf16.gmra.mrb[136].mxu1 %v12871_v55  ;;  %v8035_v63 = vrot.slane %v8033_v19, 5  ;;  %v8038_v46 = vrot.slane %v8036_v1, 6  ;;  %v9895_v47 = vadd.f32 %v13254_v53, %v17346_v30  ;;  %v7855_v52 = vrot.slane %v7810_v38, 5  ;;  %v18222_v19 = vld [vmem:[#allocation33_spill] sm:$0xff]  ;;  %v18223_v1 = vld [vmem:[#allocation34_spill] sm:$0xff] }
 0x4ac   : > { %v8022_v15 = vsel %vm16921_vm3, %v8013_v62, %v8021_v10  ;;  %v8030_v13 = vor.u32 %v8029_v59, %v8026_v4  ;;  %v9898_v49 = vadd.f32 %v13257_v42, %v17346_v30  ;;  %v12868_v0 = vrot.slane %v7811_v7, 9  ;;  %v18227_v7 = vld [vmem:[#allocation37_spill] sm:$0xff]  ;;  %v18228_v62 = vld [vmem:[#allocation39_spill] sm:$0xff] }
 0x4ad   : > { %v8039_v33 = vor.u32 %v8038_v46, %v8035_v63  ;;  %v7856_v44 = vsel %vm16927_vm4, %v12867_v50, %v7855_v52  ;;  %v7859_v3 = vrot.slane %v7812_v11, 5  ;;  %v13260_v55 = vadd.f32 %v17232_v2, %v17228_v43  ;;  %v13366_v2 = vpop.f32.mrb[64].mxu1  ;;  %v18229_v42 = vld [vmem:[#allocation41_spill] sm:$0xff]  ;;  %v18230_v11 = vld [vmem:[#allocation43_spill] sm:$0xff]  ;;  %v18232_v63 = vld [vmem:[#allocation40_spill] sm:$0xff] }
 0x4ae   : > { %v8031_v41 = vrot.slane %v8030_v13, 4  ;;  %v13263_v22 = vadd.f32 %v17236_v20, %v17234_v39  ;;  %v13266_v31 = vadd.f32 %v17247_v35, %v17243_v45  ;;  %v13269_v10 = vadd.f32 %v17259_v48, %v17253_v32  ;;  %v13367_v32 = vpop.f32.mrb[65].mxu1  ;;  %v18234_v52 = vld [vmem:[#allocation44_spill] sm:$0xff] }
 0x4af   : > { %v7860_v4 = vsel %vm16927_vm4, %v12868_v0, %v7859_v3  ;;  %v9903_v28 = vadd.f32 %v13260_v55, %v17346_v30  ;;  %v13328_v6 = vadd.f32 %v17273_v12, %v17271_v23  ;;  %v13331_v43 = vadd.f32 %v17277_v24, %v17275_v17  ;;  %v13369_v12 = vpop.f32.mrb[66].mxu1 }
 0x4b0   : > { %v8040_v39 = vsel %vm16921_vm3, %v8031_v41, %v8039_v33  ;;  %v12872_v20 = vcombine.low %v7856_v44, %v7860_v4  ;;  %v9906_v45 = vadd.f32 %v13263_v22, %v17346_v30  ;;  %v9911_v35 = vadd.f32 %v13266_v31, %v17346_v30 }
 0x4b1   : > { %v12876_v54 = vcombine.low %v8022_v15, %v8040_v39  ;;  %v9914_v48 = vadd.f32 %v13269_v10, %v17346_v30  ;;  %v13288_v38 = vadd.f32 %v17265_v29, %v17261_v56  ;;  %v13291_v23 = vadd.f32 %v17269_v51, %v17267_v40  ;;  %v13370_v30 = vpop.f32.mrb[67].mxu1  ;;  %v18224_v40 = vld [vmem:[#allocation38_spill] sm:$0xff] }
 0x4b2   : > { %v13337_v17 = vadd.f32 %v17307_v60, %v17301_v5  ;;  %v13294_v24 = vadd.f32 %v17283_v25, %v17279_v57  ;;  %v13297_v53 = vadd.f32 %v18223_v1, %v18222_v19  ;;  %v13340_v51 = vadd.f32 %v17325_v58, %v18224_v40  ;;  %v18225_v60 = vld [vmem:[#allocation35_spill] sm:$0xff]  ;;  %v18226_v57 = vld [vmem:[#allocation36_spill] sm:$0xff]  ;;  %v18233_v58 = vld [vmem:[#allocation42_spill] sm:$0xff] }
 0x4b3   : > { %10623 = vmatprep.mubr.bf16.mxu1 %v12876_v54  ;;  %v9952_v56 = vadd.f32 %v13288_v38, %v17369_v8  ;;  %v9955_v29 = vadd.f32 %v13291_v23, %v17372_v16  ;;  %v13343_v37 = vadd.f32 %v17329_v34, %v17327_v14  ;;  %v13300_v25 = vadd.f32 %v18226_v57, %v18225_v60  ;;  %v18231_v16 = vld [vmem:[#allocation45_spill] sm:$0xff]  ;;  %v18235_v14 = vld [vmem:[#allocation46_spill] sm:$0xff]  ;;  %v13412_v0 = vpop.f32.mrb[84].mxu0 }
 0x4b4   : > { %10624 = vmatmul.mubr.bf16.gmra.mrb[140].mxu1 %v12872_v20  ;;  %v9960_v61 = vadd.f32 %v13294_v24, %v9895_v47  ;;  %v9963_v5 = vadd.f32 %v13297_v53, %v9898_v49  ;;  %v13303_v59 = vadd.f32 %v18228_v62, %v18227_v7  ;;  %v13346_v8 = vadd.f32 %v18229_v42, %v17348_v26  ;;  %v13413_v26 = vpop.f32.mrb[85].mxu0 }
 0x4b5   : > { %v13349_v50 = vadd.f32 %v18231_v16, %v18230_v11  ;;  %v13306_v46 = vadd.f32 %v18233_v58, %v18232_v63  ;;  %v13309_v34 = vadd.f32 %v18235_v14, %v18234_v52  ;;  %v9968_v47 = vadd.f32 %v13300_v25, %v9903_v28  ;;  %v13415_v10 = vpop.f32.mrb[86].mxu0  ;;  %v14293_v63 = vld [vmem:[#allocation9 + $0x40] sm:$0xff]  }
 0x4b6   : > { %v9971_v15 = vadd.f32 %v13303_v59, %v9906_v45  ;;  %v13408_v13 = vadd.f32 %v13407_v27, %v17382_v9  ;;  %v13411_v49 = vadd.f32 %v13410_v18, %v13409_v36  ;;  %v10017_v3 = vadd.f32 %v13328_v6, %v9952_v56  ;;  %v13416_v20 = vpop.f32.mrb[87].mxu0  ;;  %v14294_v58 = vld [vmem:[#allocation9 + $0xc0] sm:$0xff]   ;;  %13722 = vmatprep.subr.bf16.mxu1 %v14293_v63 }
 0x4b7   : > { %v9976_v33 = vadd.f32 %v13306_v46, %v9911_v35  ;;  %v9979_v44 = vadd.f32 %v13309_v34, %v9914_v48  ;;  %v13368_v55 = vadd.f32 %v13367_v32, %v13366_v2  ;;  %v10020_v41 = vadd.f32 %v13331_v43, %v9955_v29  ;;  %v14295_v46 = vld [vmem:[#allocation9] sm:$0xff]   ;;  %13744 = vmatprep.subr.bf16.mxu0 %v14294_v58 }
 0x4b8   : > { %v13371_v22 = vadd.f32 %v13370_v30, %v13369_v12  ;;  %v13414_v31 = vadd.f32 %v13413_v26, %v13412_v0  ;;  %v10025_v4 = vadd.f32 %v13334_v21, %v9960_v61  ;;  %v10028_v54 = vadd.f32 %v13337_v17, %v9963_v5  ;;  %v14296_v52 = vld [vmem:[#allocation9 + $0x80] sm:$0xff]   ;;  %13723 = vmatpush3.bf16.msra.mxu1 %v14295_v46 }
 0x4b9   : > { %v10082_v39 = vadd.f32 %v13368_v55, %v10017_v3  ;;  %v10033_v38 = vadd.f32 %v13340_v51, %v9968_v47  ;;  %v10036_v28 = vadd.f32 %v13343_v37, %v9971_v15  ;;  %v13417_v23 = vadd.f32 %v13416_v20, %v13415_v10  ;;  %13745 = vmatpush3.bf16.msra.mxu0 %v14296_v52  ;;  %v14297_v10 = vld [vmem:[#allocation9 + $0x48] sm:$0xff]   ;;  %v14310_v58 = vld [vmem:[#allocation9 + $0xe0] sm:$0xff]  }
 0x4ba   : > { %v10085_v45 = vadd.f32 %v13371_v22, %v10020_v41  ;;  %v10041_v27 = vadd.f32 %v13346_v8, %v9976_v33  ;;  %v10044_v9 = vadd.f32 %v13349_v50, %v9979_v44  ;;  %13724 = vmatprep.subr.bf16.mxu1 %v14297_v10  ;;  %v14316_v10 = vld [vmem:[#allocation9 + $0xa8] sm:$0xff]  }
 0x4bb   : > { %v17445_v36 = vadd.f32 %v13408_v13, %v10082_v39  ;;  %v13372_v6 = vpop.f32.mrb[68].mxu1 }
 0x4bc   : > { %v17447_v18 = vadd.f32 %v13411_v49, %v10085_v45  ;;  %v13373_v2 = vpop.f32.mrb[69].mxu1 }
 0x4bd   : > { %v13374_v43 = vadd.f32 %v13373_v2, %v13372_v6  ;;  %v13375_v35 = vpop.f32.mrb[70].mxu1  ;;  %v14302_v6 = vld [vmem:[#allocation9 + $0xd0] sm:$0xff]  }
 0x4be   : > { %v13376_v32 = vpop.f32.mrb[71].mxu1 }
 0x4bf   : > { %v10090_v48 = vadd.f32 %v13374_v43, %v10025_v4  ;;  %v13377_v12 = vadd.f32 %v13376_v32, %v13375_v35  ;;  %v14298_v4 = vld [vmem:[#allocation9 + $0xc8] sm:$0xff]   ;;  %v14304_v43 = vld [vmem:[#allocation9 + $0x90] sm:$0xff]  }
 0x4c0   : > { %13746 = vmatprep.subr.bf16.mxu0 %v14298_v4  ;;  %v14317_v4 = vld [vmem:[#allocation9 + $0x70] sm:$0xff]  }
 0x4c1   : > { %v10093_v21 = vadd.f32 %v13377_v12, %v10028_v54  ;;  %v17449_v24 = vadd.f32 %v13414_v31, %v10090_v48 }
 0x4c2   : > { %v13418_v17 = vpop.f32.mrb[88].mxu0 }
 0x4c3   : > { %v13419_v19 = vpop.f32.mrb[89].mxu0  ;;  %v17451_v1 = vadd.f32 %v13417_v23, %v10093_v21 }
 0x4c4   : > { %v13420_v53 = vadd.f32 %v13419_v19, %v13418_v17  ;;  %v13421_v30 = vpop.f32.mrb[90].mxu0 }
 0x4c5   : > { %v13422_v56 = vpop.f32.mrb[91].mxu0 }
 0x4c6   : > { %v13423_v29 = vadd.f32 %v13422_v56, %v13421_v30 }
 0x4c9   : > { %v13378_v40 = vpop.f32.mrb[72].mxu1 }
 0x4ca   : > { %v13379_v51 = vpop.f32.mrb[73].mxu1 }
 0x4cb   : > { %v13380_v37 = vadd.f32 %v13379_v51, %v13378_v40  ;;  %v13381_v61 = vpop.f32.mrb[74].mxu1 }
 0x4cc   : > { %v13382_v5 = vpop.f32.mrb[75].mxu1 }
 0x4cd   : > { %v10098_v60 = vadd.f32 %v13380_v37, %v10033_v38  ;;  %v13383_v57 = vadd.f32 %v13382_v5, %v13381_v61  ;;  %v14299_v38 = vld [vmem:[#allocation9 + $0x8] sm:$0xff]  }
 0x4ce   : > { %13725 = vmatpush3.bf16.msra.mxu1 %v14299_v38  ;;  %v14319_v38 = vld [vmem:[#allocation9 + $0x30] sm:$0xff]  }
 0x4cf   : > { %v10101_v25 = vadd.f32 %v13383_v57, %v10036_v28  ;;  %v17453_v7 = vadd.f32 %v13420_v53, %v10098_v60  ;;  %v14300_v28 = vld [vmem:[#allocation9 + $0x88] sm:$0xff]   ;;  %v14305_v60 = vld [vmem:[#allocation9 + $0x58] sm:$0xff]  }
 0x4d0   : > { %v13424_v62 = vpop.f32.mrb[92].mxu0  ;;  %13747 = vmatpush3.bf16.msra.mxu0 %v14300_v28  ;;  %v14306_v57 = vld [vmem:[#allocation9 + $0xd8] sm:$0xff]   ;;  %v14320_v28 = vld [vmem:[#allocation9 + $0xb0] sm:$0xff]  }
 0x4d1   : > { %v13425_v59 = vpop.f32.mrb[93].mxu0  ;;  %v17455_v42 = vadd.f32 %v13423_v29, %v10101_v25  ;;  %13748 = vmatprep.subr.bf16.mxu0 %v14302_v6 }
 0x4d2   : > { %v13426_v8 = vadd.f32 %v13425_v59, %v13424_v62  ;;  %v13427_v11 = vpop.f32.mrb[94].mxu0 }
 0x4d3   : > { %v13428_v16 = vpop.f32.mrb[95].mxu0 }
 0x4d4   : > { %v13429_v50 = vadd.f32 %v13428_v16, %v13427_v11  ;;  %13749 = vmatpush3.bf16.msra.mxu0 %v14304_v43  ;;  %v14307_v11 = vld [vmem:[#allocation9 + $0x18] sm:$0xff]  }
 0x4d5   : > { %13750 = vmatprep.subr.bf16.mxu0 %v14306_v57  ;;  %v14308_v16 = vld [vmem:[#allocation9 + $0x98] sm:$0xff]  }
 0x4d8   : > { %13751 = vmatpush3.bf16.msra.mxu0 %v14308_v16 }
 0x4d9   : > { %13752 = vmatprep.subr.bf16.mxu0 %v14310_v58 }
 0x4db   : > { %v13384_v14 = vpop.f32.mrb[76].mxu1 }
 0x4dc   : > { %v13385_v34 = vpop.f32.mrb[77].mxu1 }
 0x4dd   : > { %v13386_v47 = vadd.f32 %v13385_v34, %v13384_v14  ;;  %v13387_v15 = vpop.f32.mrb[78].mxu1  ;;  %v14312_v14 = vld [vmem:[#allocation9 + $0xa0] sm:$0xff]  }
 0x4de   : > { %v13388_v13 = vpop.f32.mrb[79].mxu1  ;;  %v13486_v49 = vpop.f32.mrb[96].mxu0  ;;  %13753 = vmatpush3.bf16.msra.mxu0 %v14312_v14 }
 0x4df   : > { %v10106_v0 = vadd.f32 %v13386_v47, %v10041_v27  ;;  %v13389_v33 = vadd.f32 %v13388_v13, %v13387_v15  ;;  %v13487_v44 = vpop.f32.mrb[97].mxu0  ;;  %v14301_v27 = vld [vmem:[#allocation9 + $0x50] sm:$0xff]  }
 0x4e0   : > { %v13488_v3 = vadd.f32 %v13487_v44, %v13486_v49  ;;  %v13489_v55 = vpop.f32.mrb[98].mxu0  ;;  %13726 = vmatprep.subr.bf16.mxu1 %v14301_v27 }
 0x4e1   : > { %v10109_v26 = vadd.f32 %v13389_v33, %v10044_v9  ;;  %v13490_v41 = vpop.f32.mrb[99].mxu0  ;;  %v17457_v22 = vadd.f32 %v13426_v8, %v10106_v0  ;;  %v14303_v9 = vld [vmem:[#allocation9 + $0x10] sm:$0xff]   ;;  %v14313_v0 = vld [vmem:[#allocation9 + $0x68] sm:$0xff]  }
 0x4e2   : > { %v13491_v31 = vadd.f32 %v13490_v41, %v13489_v55  ;;  %13727 = vmatpush3.bf16.msra.mxu1 %v14303_v9  ;;  %v14314_v33 = vld [vmem:[#allocation9 + $0xe8] sm:$0xff]   ;;  %v14322_v9 = vld [vmem:[#allocation9 + $0xf8] sm:$0xff]  }
 0x4e3   : > { %v13446_v39 = vpop.f32.mrb[80].mxu1  ;;  %v17459_v20 = vadd.f32 %v13429_v50, %v10109_v26  ;;  %13728 = vmatprep.subr.bf16.mxu1 %v14305_v60  ;;  %v14309_v50 = vld [vmem:[#allocation9 + $0x60] sm:$0xff]   ;;  %13754 = vmatprep.subr.bf16.mxu0 %v14314_v33 }
 0x4e4   : > { %v13447_v54 = vpop.f32.mrb[81].mxu1  ;;  %13755 = vmatpush3.bf16.msra.mxu0 %v14316_v10 }
 0x4e5   : > { %v13448_v45 = vadd.f32 %v13447_v54, %v13446_v39  ;;  %v13449_v23 = vpop.f32.mrb[82].mxu1  ;;  %v14318_v39 = vld [vmem:[#allocation9 + $0xf0] sm:$0xff]  }
 0x4e6   : > { %v13450_v2 = vpop.f32.mrb[83].mxu1  ;;  %13729 = vmatpush3.bf16.msra.mxu1 %v14307_v11  ;;  %13756 = vmatprep.subr.bf16.mxu0 %v14318_v39 }
 0x4e7   : > { %v10212_v35 = vadd.f32 %v13448_v45, %v17445_v36  ;;  %v13451_v32 = vadd.f32 %v13450_v2, %v13449_v23  ;;  %13730 = vmatprep.subr.bf16.mxu1 %v14309_v50  ;;  %v14321_v2 = vld [vmem:[#allocation9 + $0x78] sm:$0xff]  }
 0x4e8   : > { %13757 = vmatpush3.bf16.msra.mxu0 %v14320_v28 }
 0x4e9   : > { %v10215_v48 = vadd.f32 %v13451_v32, %v17447_v18  ;;  %v17463_v12 = vadd.f32 %v13488_v3, %v10212_v35  ;;  %13758 = vmatprep.subr.bf16.mxu0 %v14322_v9 }
 0x4ea   : > { %v13492_v21 = vpop.f32.mrb[100].mxu0 }
 0x4eb   : > { %v13493_v17 = vpop.f32.mrb[101].mxu0  ;;  %v17465_v19 = vadd.f32 %v13491_v31, %v10215_v48  ;;  %v14315_v31 = vld [vmem:[#allocation9 + $0x28] sm:$0xff]  }
 0x4ec   : > { %v13494_v53 = vadd.f32 %v13493_v17, %v13492_v21  ;;  %v13495_v30 = vpop.f32.mrb[102].mxu0 }
 0x4ed   : > { %v13496_v56 = vpop.f32.mrb[103].mxu0 }
 0x4ee   : > { %v13497_v29 = vadd.f32 %v13496_v56, %v13495_v30  ;;  %v13452_v40 = vpop.f32.mrb[84].mxu1  ;;  %v14323_v30 = vld [vmem:[#allocation9 + $0x38] sm:$0xff]  }
 0x4ef   : > { %v13453_v51 = vpop.f32.mrb[85].mxu1  ;;  %v14324_v56 = vld [vmem:[#allocation9 + $0xb8] sm:$0xff]  }
 0x4f0   : > { %v13454_v36 = vadd.f32 %v13453_v51, %v13452_v40  ;;  %v13455_v37 = vpop.f32.mrb[86].mxu1  ;;  %v14326_v40 = vld [vmem:[#allocation9 + $0x1c0] sm:$0xff]   ;;  %13759 = vmatpush3.bf16.msra.mxu0 %v14324_v56 }
 0x4f1   : > { %v13456_v61 = vpop.f32.mrb[87].mxu1  ;;  %13788 = vmatprep.subr.bf16.mxu0 %v14326_v40 }
 0x4f2   : > { %v10220_v5 = vadd.f32 %v13454_v36, %v17449_v24  ;;  %v13457_v18 = vadd.f32 %v13456_v61, %v13455_v37  ;;  %v14311_v24 = vld [vmem:[#allocation9 + $0x20] sm:$0xff]  }
 0x4f3   : > { %13731 = vmatpush3.bf16.msra.mxu1 %v14311_v24 }
 0x4f4   : > { %v10223_v25 = vadd.f32 %v13457_v18, %v17451_v1  ;;  %v17469_v62 = vadd.f32 %v13494_v53, %v10220_v5  ;;  %13732 = vmatprep.subr.bf16.mxu1 %v14313_v0 }
 0x4f6   : > { %v17471_v59 = vadd.f32 %v13497_v29, %v10223_v25  ;;  %v14325_v29 = vld [vmem:[#allocation9 + $0x140] sm:$0xff]  }
 0x4f7   : > { %v13498_v8 = vpop.f32.mrb[104].mxu0  ;;  %13733 = vmatpush3.bf16.msra.mxu1 %v14315_v31 }
 0x4f8   : > { %v13499_v63 = vpop.f32.mrb[105].mxu0  ;;  %13734 = vmatprep.subr.bf16.mxu1 %v14317_v4 }
 0x4f9   : > { %v13500_v46 = vadd.f32 %v13499_v63, %v13498_v8  ;;  %v13501_v52 = vpop.f32.mrb[106].mxu0 }
 0x4fa   : > { %v13502_v34 = vpop.f32.mrb[107].mxu0  ;;  %v13458_v1 = vpop.f32.mrb[88].mxu1 }
 0x4fb   : > { %v13503_v47 = vadd.f32 %v13502_v34, %v13501_v52  ;;  %v13459_v15 = vpop.f32.mrb[89].mxu1  ;;  %13735 = vmatpush3.bf16.msra.mxu1 %v14319_v38 }
 0x4fc   : > { %v13460_v13 = vadd.f32 %v13459_v15, %v13458_v1  ;;  %v13461_v49 = vpop.f32.mrb[90].mxu1  ;;  %13736 = vmatprep.subr.bf16.mxu1 %v14321_v2 }
 0x4fd   : > { %v13462_v44 = vpop.f32.mrb[91].mxu1 }
 0x4fe   : > { %v10228_v3 = vadd.f32 %v13460_v13, %v17453_v7  ;;  %v13463_v55 = vadd.f32 %v13462_v44, %v13461_v49 }
 0x4ff   : > { %13737 = vmatpush3.bf16.msra.mxu1 %v14323_v30 }
 0x500   : > { %v10231_v26 = vadd.f32 %v13463_v55, %v17455_v42  ;;  %v17475_v41 = vadd.f32 %v13500_v46, %v10228_v3  ;;  %13766 = vmatprep.subr.bf16.mxu1 %v14325_v29 }
 0x502   : > { %v17477_v54 = vadd.f32 %v13503_v47, %v10231_v26 }
 0x504   : > { %v13504_v7 = vpop.f32.mrb[108].mxu0 }
 0x505   : > { %v13505_v45 = vpop.f32.mrb[109].mxu0 }
 0x506   : > { %v13506_v23 = vadd.f32 %v13505_v45, %v13504_v7  ;;  %v13507_v27 = vpop.f32.mrb[110].mxu0 }
 0x507   : > { %v13508_v42 = vpop.f32.mrb[111].mxu0  ;;  %v13464_v6 = vpop.f32.mrb[92].mxu1 }
 0x508   : > { %v13509_v43 = vadd.f32 %v13508_v42, %v13507_v27  ;;  %v13465_v35 = vpop.f32.mrb[93].mxu1 }
 0x509   : > { %v13466_v32 = vadd.f32 %v13465_v35, %v13464_v6  ;;  %v13467_v48 = vpop.f32.mrb[94].mxu1 }
 0x50a   : > { %v13468_v21 = vpop.f32.mrb[95].mxu1 }
 0x50b   : > { %v10236_v17 = vadd.f32 %v13466_v32, %v17457_v22  ;;  %v13469_v53 = vadd.f32 %v13468_v21, %v13467_v48 }
 0x50d   : > { %v10239_v51 = vadd.f32 %v13469_v53, %v17459_v20  ;;  %v17481_v36 = vadd.f32 %v13506_v23, %v10236_v17 }
 0x50f   : > { %v13566_v37 = vpop.f32.mrb[112].mxu0  ;;  %v13526_v61 = vpop.f32.mrb[96].mxu1  ;;  %v10304_v5 = vadd.f32 %v13509_v43, %v10239_v51 }
 0x510   : > { %v13567_v18 = vpop.f32.mrb[113].mxu0  ;;  %v13527_v60 = vpop.f32.mrb[97].mxu1 }
 0x511   : > { %v13568_v57 = vadd.f32 %v13567_v18, %v13566_v37  ;;  %v13569_v22 = vpop.f32.mrb[114].mxu0  ;;  %v13528_v25 = vadd.f32 %v13527_v60, %v13526_v61  ;;  %v13529_v8 = vpop.f32.mrb[98].mxu1 }
 0x512   : > { %v13570_v11 = vpop.f32.mrb[115].mxu0  ;;  %v13530_v16 = vpop.f32.mrb[99].mxu1 }
 0x513   : > { %v13571_v50 = vadd.f32 %v13570_v11, %v13569_v22  ;;  %v10342_v20 = vadd.f32 %v13528_v25, %v17463_v12  ;;  %v13531_v63 = vadd.f32 %v13530_v16, %v13529_v8 }
 0x515   : > { %v10345_v58 = vadd.f32 %v13531_v63, %v17465_v19  ;;  %v17485_v46 = vadd.f32 %v13568_v57, %v10342_v20 }
 0x517   : > { %v13532_v52 = vpop.f32.mrb[100].mxu1  ;;  %v17487_v24 = vadd.f32 %v13571_v50, %v10345_v58 }
 0x518   : > { %v13572_v14 = vpop.f32.mrb[116].mxu0  ;;  %v13533_v34 = vpop.f32.mrb[101].mxu1 }
 0x519   : > { %v13573_v1 = vpop.f32.mrb[117].mxu0  ;;  %v13534_v47 = vadd.f32 %v13533_v34, %v13532_v52  ;;  %v13535_v15 = vpop.f32.mrb[102].mxu1 }
 0x51a   : > { %v13574_v13 = vadd.f32 %v13573_v1, %v13572_v14  ;;  %v13575_v49 = vpop.f32.mrb[118].mxu0  ;;  %v13536_v0 = vpop.f32.mrb[103].mxu1 }
 0x51b   : > { %v13576_v33 = vpop.f32.mrb[119].mxu0  ;;  %v10350_v44 = vadd.f32 %v13534_v47, %v17469_v62  ;;  %v13537_v12 = vadd.f32 %v13536_v0, %v13535_v15 }
 0x51c   : > { %v13577_v3 = vadd.f32 %v13576_v33, %v13575_v49 }
 0x51d   : > { %v10353_v19 = vadd.f32 %v13537_v12, %v17471_v59  ;;  %v17491_v55 = vadd.f32 %v13574_v13, %v10350_v44 }
 0x51f   : > { %v13538_v26 = vpop.f32.mrb[104].mxu1  ;;  %v17493_v31 = vadd.f32 %v13577_v3, %v10353_v19 }
 0x520   : > { %v13578_v10 = vpop.f32.mrb[120].mxu0  ;;  %v13539_v4 = vpop.f32.mrb[105].mxu1 }
 0x521   : > { %v13579_v39 = vpop.f32.mrb[121].mxu0  ;;  %v13540_v38 = vadd.f32 %v13539_v4, %v13538_v26  ;;  %v13541_v28 = vpop.f32.mrb[106].mxu1 }
 0x522   : > { %v13580_v7 = vadd.f32 %v13579_v39, %v13578_v10  ;;  %v13581_v45 = vpop.f32.mrb[122].mxu0  ;;  %v13542_v23 = vpop.f32.mrb[107].mxu1 }
 0x523   : > { %v13582_v27 = vpop.f32.mrb[123].mxu0  ;;  %v10358_v62 = vadd.f32 %v13540_v38, %v17475_v41  ;;  %v13543_v42 = vadd.f32 %v13542_v23, %v13541_v28 }
 0x524   : > { %v13583_v6 = vadd.f32 %v13582_v27, %v13581_v45 }
 0x525   : > { %v10361_v59 = vadd.f32 %v13543_v42, %v17477_v54  ;;  %v17497_v2 = vadd.f32 %v13580_v7, %v10358_v62 }
 0x527   : > { %v17499_v9 = vadd.f32 %v13583_v6, %v10361_v59 }
 0x52a   : > { %v13584_v43 = vpop.f32.mrb[124].mxu0 }
 0x52b   : > { %v13544_v35 = vpop.f32.mrb[108].mxu1  ;;  %v13585_v32 = vpop.f32.mrb[125].mxu0 }
 0x52c   : > { %v13545_v48 = vpop.f32.mrb[109].mxu1  ;;  %v13586_v21 = vadd.f32 %v13585_v32, %v13584_v43  ;;  %v13587_v17 = vpop.f32.mrb[126].mxu0 }
 0x52d   : > { %v13546_v53 = vadd.f32 %v13545_v48, %v13544_v35  ;;  %v13547_v30 = vpop.f32.mrb[110].mxu1  ;;  %v13588_v56 = vpop.f32.mrb[127].mxu0 }
 0x52e   : > { %v13548_v29 = vpop.f32.mrb[111].mxu1  ;;  %v13589_v40 = vadd.f32 %v13588_v56, %v13587_v17 }
 0x52f   : > { %v10366_v41 = vadd.f32 %v13546_v53, %v17481_v36  ;;  %v13549_v51 = vadd.f32 %v13548_v29, %v13547_v30 }
 0x531   : > { %v10369_v37 = vadd.f32 %v13549_v51, %v10304_v5  ;;  %v10431_v54 = vadd.f32 %v13586_v21, %v10366_v41 }
 0x532   : > { %v13646_v61 = vpop.f32.mrb[128].mxu0 }
 0x533   : > { %v17502_v18 = vadd.f32 %v13589_v40, %v10369_v37  ;;  %v13647_v60 = vpop.f32.mrb[129].mxu0 }
 0x534   : > { %v13648_v57 = vadd.f32 %v13647_v60, %v13646_v61  ;;  %v13649_v22 = vpop.f32.mrb[130].mxu0 }
 0x535   : > { %v13650_v25 = vpop.f32.mrb[131].mxu0 }
 0x536   : > { %v13651_v8 = vadd.f32 %v13650_v25, %v13649_v22 }
 0x53a   : > { %v13652_v11 = vpop.f32.mrb[132].mxu0 }
 0x53b   : > { %v13653_v16 = vpop.f32.mrb[133].mxu0 }
 0x53c   : > { %v13606_v50 = vpop.f32.mrb[112].mxu1  ;;  %v13654_v20 = vadd.f32 %v13653_v16, %v13652_v11  ;;  %v13655_v63 = vpop.f32.mrb[134].mxu0 }
 0x53d   : > { %v13607_v58 = vpop.f32.mrb[113].mxu1  ;;  %v13656_v52 = vpop.f32.mrb[135].mxu0 }
 0x53e   : > { %v13608_v14 = vadd.f32 %v13607_v58, %v13606_v50  ;;  %v13609_v36 = vpop.f32.mrb[114].mxu1  ;;  %v13657_v34 = vadd.f32 %v13656_v52, %v13655_v63 }
 0x53f   : > { %v13610_v5 = vpop.f32.mrb[115].mxu1 }
 0x540   : > { %v10472_v1 = vadd.f32 %v13608_v14, %v17485_v46  ;;  %v13611_v47 = vadd.f32 %v13610_v5, %v13609_v36 }
 0x542   : > { %v10475_v15 = vadd.f32 %v13611_v47, %v17487_v24  ;;  %v10537_v13 = vadd.f32 %v13648_v57, %v10472_v1 }
 0x544   : > { %v10540_v0 = vadd.f32 %v13651_v8, %v10475_v15 }
 0x545   : > { %v13658_v49 = vpop.f32.mrb[136].mxu0 }
 0x546   : > { %v13659_v33 = vpop.f32.mrb[137].mxu0 }
 0x547   : > { %v13660_v44 = vadd.f32 %v13659_v33, %v13658_v49  ;;  %v13661_v12 = vpop.f32.mrb[138].mxu0 }
 0x548   : > { %v13662_v3 = vpop.f32.mrb[139].mxu0  ;;  %v13612_v19 = vpop.f32.mrb[116].mxu1 }
 0x549   : > { %v13663_v26 = vadd.f32 %v13662_v3, %v13661_v12  ;;  %v13613_v10 = vpop.f32.mrb[117].mxu1 }
 0x54a   : > { %v13614_v4 = vadd.f32 %v13613_v10, %v13612_v19  ;;  %v13615_v39 = vpop.f32.mrb[118].mxu1 }
 0x54b   : > { %v13616_v38 = vpop.f32.mrb[119].mxu1 }
 0x54c   : > { %v10480_v28 = vadd.f32 %v13614_v4, %v17491_v55  ;;  %v13617_v7 = vadd.f32 %v13616_v38, %v13615_v39 }
 0x54e   : > { %v10483_v46 = vadd.f32 %v13617_v7, %v17493_v31  ;;  %v10545_v45 = vadd.f32 %v13654_v20, %v10480_v28 }
 0x550   : > { %v10548_v23 = vadd.f32 %v13657_v34, %v10483_v46 }
 0x551   : > { %v13664_v24 = vpop.f32.mrb[140].mxu0 }
 0x552   : > { %v13665_v27 = vpop.f32.mrb[141].mxu0 }
 0x553   : > { %v13666_v62 = vadd.f32 %v13665_v27, %v13664_v24  ;;  %v13667_v42 = vpop.f32.mrb[142].mxu0 }
 0x554   : > { %v13668_v6 = vpop.f32.mrb[143].mxu0 }
 0x555   : > { %v13618_v59 = vpop.f32.mrb[120].mxu1  ;;  %v13669_v43 = vadd.f32 %v13668_v6, %v13667_v42 }
 0x556   : > { %v13619_v35 = vpop.f32.mrb[121].mxu1 }
 0x557   : > { %v13620_v32 = vadd.f32 %v13619_v35, %v13618_v59  ;;  %v13621_v48 = vpop.f32.mrb[122].mxu1 }
 0x558   : > { %v13622_v21 = vpop.f32.mrb[123].mxu1 }
 0x559   : > { %v10488_v17 = vadd.f32 %v13620_v32, %v17497_v2  ;;  %v13623_v53 = vadd.f32 %v13622_v21, %v13621_v48  ;;  %v14327_v48 = vld [vmem:[#allocation9 + $0x100] sm:$0xff]  }
 0x55a   : > { %v14328_v21 = vld [vmem:[#allocation9 + $0x180] sm:$0xff]  }
 0x55b   : > { %v10491_v55 = vadd.f32 %v13623_v53, %v17499_v9  ;;  %v17510_v30 = vadd.f32 %v13660_v44, %v10488_v17 }
 0x55d   : > { %v17512_v31 = vadd.f32 %v13663_v26, %v10491_v55  ;;  %v14329_v55 = vld [vmem:[#allocation9 + $0x148] sm:$0xff]  }
 0x560   : > { %v13624_v56 = vpop.f32.mrb[124].mxu1 }
 0x561   : > { %v13625_v29 = vpop.f32.mrb[125].mxu1 }
 0x562   : > { %v13626_v40 = vadd.f32 %v13625_v29, %v13624_v56  ;;  %v13627_v41 = vpop.f32.mrb[126].mxu1  ;;  %v14330_v56 = vld [vmem:[#allocation9 + $0x1c8] sm:$0xff]  }
 0x563   : > { %v13628_v51 = vpop.f32.mrb[127].mxu1 }
 0x564   : > { %v10496_v37 = vadd.f32 %v13626_v40, %v10431_v54  ;;  %v13629_v61 = vadd.f32 %v13628_v51, %v13627_v41  ;;  %v13925_v60 = vpop.f32.mrb[144].mxu0 }
 0x565   : > { %v10666_v57 = vpop.f32.mrb[145].mxu0 }
 0x566   : > { %v10499_v22 = vadd.f32 %v13629_v61, %v17502_v18  ;;  %v13926_v25 = vpop.f32.mrb[146].mxu0  ;;  %v17515_v2 = vadd.f32 %v13666_v62, %v10496_v37 }
 0x567   : > { %v10669_v8 = vpop.f32.mrb[147].mxu0 }
 0x568   : > { %v17517_v9 = vadd.f32 %v13669_v43, %v10499_v22 }
 0x569   : > { %v13686_v11 = vpop.f32.mrb[128].mxu1 }
 0x56a   : > { %v13687_v16 = vpop.f32.mrb[129].mxu1 }
 0x56b   : > { %v13688_v50 = vadd.f32 %v13687_v16, %v13686_v11  ;;  %v13689_v20 = vpop.f32.mrb[130].mxu1 }
 0x56c   : > { %v13690_v63 = vpop.f32.mrb[131].mxu1 }
 0x56d   : > { %v10602_v58 = vadd.f32 %v13688_v50, %v10537_v13  ;;  %v13691_v52 = vadd.f32 %v13690_v63, %v13689_v20 }
 0x56f   : > { %v10667_v14 = vadd.f32 %v10666_v57, %v10602_v58  ;;  %v10605_v54 = vadd.f32 %v13691_v52, %v10540_v0  ;;  %v14332_v57 = vld [vmem:[#allocation9 + $0x188] sm:$0xff]   ;;  %v14335_v58 = vld [vmem:[#allocation9 + $0x110] sm:$0xff]  }
 0x570   : > { %v14336_v52 = vld [vmem:[#allocation9 + $0x190] sm:$0xff]  }
 0x571   : > { %v17519_v36 = vpop.f32.mrb[148].mxu0  ;;  %v10697_v34 = vmax.f32 %v10667_v14, 0.0  ;;  %v10670_v5 = vadd.f32 %v10669_v8, %v10605_v54  ;;  %v14334_v8 = vld [vmem:[#allocation9 + $0x1d0] sm:$0xff]  }
 0x572   : > { %v10682_v18 = vpop.f32.mrb[149].mxu0 }
 0x573   : > { %v17521_v1 = vpop.f32.mrb[150].mxu0  ;;  %v13692_v47 = vpop.f32.mrb[132].mxu1  ;;  %v10706_v15 = vrot.slane %v10697_v34, 1  ;;  %v10698_v49 = vmax.f32 %v10670_v5, 0.0  ;;  %v14337_v5 = vld [vmem:[#allocation9 + $0x158] sm:$0xff]  }
 0x574   : > { %v10685_v33 = vpop.f32.mrb[151].mxu0  ;;  %v13693_v44 = vpop.f32.mrb[133].mxu1 }
 0x575   : > { %v13694_v12 = vadd.f32 %v13693_v44, %v13692_v47  ;;  %v13695_v3 = vpop.f32.mrb[134].mxu1  ;;  %v10710_v19 = vrot.slane %v10698_v49, 1  ;;  %v10708_v4 = vmax.f32 %v10697_v34, %v10706_v15  ;;  %v14338_v47 = vld [vmem:[#allocation9 + $0x1d8] sm:$0xff]  }
 0x576   : > { %v13696_v26 = vpop.f32.mrb[135].mxu1 }
 0x577   : > { %v10610_v13 = vadd.f32 %v13694_v12, %v10545_v45  ;;  %v13697_v10 = vadd.f32 %v13696_v26, %v13695_v3  ;;  %v10712_v0 = vmax.f32 %v10698_v49, %v10710_v19  ;;  %v14339_v3 = vld [vmem:[#allocation9 + $0x118] sm:$0xff]  }
 0x578   : > { %v14340_v19 = vld [vmem:[#allocation9 + $0x198] sm:$0xff]  }
 0x579   : > { %v10675_v39 = vadd.f32 %v13925_v60, %v10610_v13  ;;  %v10613_v38 = vadd.f32 %v13697_v10, %v10548_v23  ;;  %v10713_v28 = vmax.f32 %v10708_v4, %v10712_v0  ;;  %v14331_v60 = vld [vmem:[#allocation9 + $0x108] sm:$0xff]   ;;  %v14341_v10 = vld [vmem:[#allocation9 + $0x160] sm:$0xff]  }
 0x57a   : > { %v14342_v4 = vld [vmem:[#allocation9 + $0x1e0] sm:$0xff]  }
 0x57b   : > { %v10699_v7 = vmax.f32 %v10675_v39, 0.0  ;;  %v10678_v46 = vadd.f32 %v13926_v25, %v10613_v38  ;;  %v10742_v24 = vrot.slane %v10713_v28, 2  ;;  %v10746_v27 = vrot.slane %v10713_v28, 6  ;;  %v14333_v25 = vld [vmem:[#allocation9 + $0x150] sm:$0xff]  }
 0x57c   : > { %v10744_v62 = vrot.slane %v10713_v28, 4  ;;  %v10769_v53 = vpack.c.bf16 %v10713_v28, %v10713_v28 }
 0x57d   : > { %v10715_v42 = vrot.slane %v10699_v7, 1  ;;  %v10700_v6 = vmax.f32 %v10678_v46, 0.0  ;;  %v10770_v43 = vpack.c.bf16 %v10742_v24, %v10742_v24  ;;  %v10772_v35 = vpack.c.bf16 %v10746_v27, %v10746_v27  ;;  %v14343_v46 = vld [vmem:[#allocation9 + $0x120] sm:$0xff]  }
 0x57e   : > { %v13698_v59 = vpop.f32.mrb[136].mxu1  ;;  %v10771_v32 = vpack.c.bf16 %v10744_v62, %v10744_v62  ;;  %v14344_v24 = vld [vmem:[#allocation9 + $0x1a0] sm:$0xff]   ;;  %v14345_v62 = vld [vmem:[#allocation9 + $0x168] sm:$0xff]  }
 0x57f   : > { %v10719_v45 = vrot.slane %v10700_v6, 1  ;;  %v13699_v17 = vpop.f32.mrb[137].mxu1  ;;  %11842 = vmatprep.mubr.bf16.mxu1 %v10770_v43  ;;  %11882 = vmatprep.mubr.bf16.mxu0 %v10772_v35  ;;  %v10717_v40 = vmax.f32 %v10699_v7, %v10715_v42  ;;  %v14346_v42 = vld [vmem:[#allocation9 + $0x1e8] sm:$0xff]   ;;  %v14349_v35 = vld [vmem:[#allocation9 + $0x170] sm:$0xff]  }
 0x580   : > { %v13700_v23 = vadd.f32 %v13699_v17, %v13698_v59  ;;  %v13701_v29 = vpop.f32.mrb[138].mxu1  ;;  %11843 = vmatmul.mubr.bf16.vlgmr.msra.gmra.mrb[144].mxu1 %v10769_v53  ;;  %11883 = vmatmul.mubr.bf16.vlgmr.msra.gmra.mrb[152].mxu0 %v10771_v32  ;;  %v14348_v43 = vld [vmem:[#allocation9 + $0x1a8] sm:$0xff]   ;;  %v14350_v32 = vld [vmem:[#allocation9 + $0x1f0] sm:$0xff]   ;;  %v14353_v53 = vld [vmem:[#allocation9 + $0x178] sm:$0xff]  }
 0x581   : > { %v10721_v41 = vmax.f32 %v10700_v6, %v10719_v45  ;;  %v13702_v51 = vpop.f32.mrb[139].mxu1  ;;  %13767 = vmatpush3.bf16.msra.mxu1 %v14327_v48  ;;  %13789 = vmatpush3.bf16.msra.mxu0 %v14328_v21  ;;  %v14352_v45 = vld [vmem:[#allocation9 + $0x1b0] sm:$0xff]  }
 0x582   : > { %v10618_v37 = vadd.f32 %v13700_v23, %v17510_v30  ;;  %v13703_v61 = vadd.f32 %v13702_v51, %v13701_v29  ;;  %13768 = vmatprep.subr.bf16.mxu1 %v14329_v55  ;;  %13790 = vmatprep.subr.bf16.mxu0 %v14330_v56  ;;  %v14354_v55 = vld [vmem:[#allocation9 + $0x1f8] sm:$0xff]  }
 0x583   : > { %v17524_v22 = vmax.f32 %v10717_v40, %v10721_v41  ;;  %v14355_v56 = vld [vmem:[#allocation9 + $0x138] sm:$0xff]   ;;  %v14357_v40 = vld [vmem:[#allocation9 + $0x240] sm:$0xff]  }
 0x584   : > { %v10683_v11 = vadd.f32 %v10682_v18, %v10618_v37  ;;  %v10621_v16 = vadd.f32 %v13703_v61, %v17512_v31  ;;  %v14356_v23 = vld [vmem:[#allocation9 + $0x1b8] sm:$0xff]   ;;  %v14358_v41 = vld [vmem:[#allocation9 + $0x2c0] sm:$0xff]  }
 0x585   : > { %v10749_v50 = vrot.slane %v17524_v22, 2  ;;  %v10753_v20 = vrot.slane %v17524_v22, 6  ;;  %13769 = vmatpush3.bf16.msra.mxu1 %v14331_v60  ;;  %13791 = vmatpush3.bf16.msra.mxu0 %v14332_v57  ;;  %v10751_v29 = vrot.slane %v17524_v22, 4  ;;  %v14359_v61 = vld [vmem:[#allocation9 + $0x200] sm:$0xff]   ;;  %v10773_v60 = vpack.c.bf16 %v17524_v22, %v17524_v22  ;;  %v14366_v22 = vld [vmem:[#allocation9 + $0x2d0] sm:$0xff]  }
 0x586   : > { %v10701_v63 = vmax.f32 %v10683_v11, 0.0  ;;  %v10686_v30 = vadd.f32 %v10685_v33, %v10621_v16  ;;  %13770 = vmatprep.subr.bf16.mxu1 %v14333_v25  ;;  %13792 = vmatprep.subr.bf16.mxu0 %v14334_v8  ;;  %v14360_v25 = vld [vmem:[#allocation9 + $0x280] sm:$0xff]   ;;  %v14361_v11 = vld [vmem:[#allocation9 + $0x248] sm:$0xff]  }
 0x587   : > { %v13704_v14 = vpop.f32.mrb[140].mxu1  ;;  %v10774_v54 = vpack.c.bf16 %v10749_v50, %v10749_v50  ;;  %v10776_v34 = vpack.c.bf16 %v10753_v20, %v10753_v20  ;;  %v10775_v57 = vpack.c.bf16 %v10751_v29, %v10751_v29  ;;  %v14362_v16 = vld [vmem:[#allocation9 + $0x2c8] sm:$0xff]   ;;  %v14406_v29 = vld [vmem:[#allocation9 + $0x3e0] sm:$0xff]  }
 0x588   : > { %v10724_v18 = vrot.slane %v10701_v63, 1  ;;  %v10702_v15 = vmax.f32 %v10686_v30, 0.0  ;;  %v13705_v31 = vpop.f32.mrb[141].mxu1  ;;  %v14363_v20 = vld [vmem:[#allocation9 + $0x208] sm:$0xff]   ;;  %v14365_v30 = vld [vmem:[#allocation9 + $0x250] sm:$0xff]  }
 0x589   : > { %v13706_v49 = vadd.f32 %v13705_v31, %v13704_v14  ;;  %v13707_v44 = vpop.f32.mrb[142].mxu1  ;;  %11922 = vmatprep.mubr.bf16.mxu1 %v10774_v54  ;;  %11962 = vmatprep.mubr.bf16.mxu0 %v10776_v34  ;;  %v14369_v14 = vld [vmem:[#allocation9 + $0x258] sm:$0xff]   ;;  %v14376_v31 = vld [vmem:[#allocation9 + $0x2a0] sm:$0xff]  }
 0x58a   : > { %v10728_v12 = vrot.slane %v10702_v15, 1  ;;  %v13708_v33 = vpop.f32.mrb[143].mxu1  ;;  %13771 = vmatpush3.bf16.msra.mxu1 %v14335_v58  ;;  %13793 = vmatpush3.bf16.msra.mxu0 %v14336_v52  ;;  %v10726_v0 = vmax.f32 %v10701_v63, %v10724_v18  ;;  %v14364_v63 = vld [vmem:[#allocation9 + $0x288] sm:$0xff]   ;;  %v14367_v58 = vld [vmem:[#allocation9 + $0x210] sm:$0xff]   ;;  %v14370_v54 = vld [vmem:[#allocation9 + $0x2d8] sm:$0xff]  }
 0x58b   : > { %v10626_v26 = vadd.f32 %v13706_v49, %v17515_v2  ;;  %v13709_v13 = vadd.f32 %v13708_v33, %v13707_v44  ;;  %13772 = vmatprep.subr.bf16.mxu1 %v14337_v5  ;;  %13794 = vmatprep.subr.bf16.mxu0 %v14338_v47  ;;  %v14368_v52 = vld [vmem:[#allocation9 + $0x290] sm:$0xff]   ;;  %v14371_v34 = vld [vmem:[#allocation9 + $0x218] sm:$0xff]   ;;  %v14373_v47 = vld [vmem:[#allocation9 + $0x260] sm:$0xff]  }
 0x58c   : > { %v10730_v39 = vmax.f32 %v10702_v15, %v10728_v12  ;;  %v14372_v5 = vld [vmem:[#allocation9 + $0x298] sm:$0xff]   ;;  %v14374_v18 = vld [vmem:[#allocation9 + $0x2e0] sm:$0xff]   ;;  %v14377_v49 = vld [vmem:[#allocation9 + $0x268] sm:$0xff]  }
 0x58d   : > { %v10691_v38 = vadd.f32 %v17519_v36, %v10626_v26  ;;  %v10629_v28 = vadd.f32 %v13709_v13, %v17517_v9  ;;  %v14347_v36 = vld [vmem:[#allocation9 + $0x128] sm:$0xff]   ;;  %v14375_v15 = vld [vmem:[#allocation9 + $0x220] sm:$0xff]   ;;  %v14383_v26 = vld [vmem:[#allocation9 + $0x230] sm:$0xff]  }
 0x58e   : > { %v17532_v7 = vmax.f32 %v10726_v0, %v10730_v39  ;;  %13773 = vmatpush3.bf16.msra.mxu1 %v14339_v3  ;;  %13795 = vmatpush3.bf16.msra.mxu0 %v14340_v19  ;;  %v14378_v44 = vld [vmem:[#allocation9 + $0x2e8] sm:$0xff]   ;;  %v14381_v3 = vld [vmem:[#allocation9 + $0x270] sm:$0xff]   ;;  %v14387_v0 = vld [vmem:[#allocation9 + $0x238] sm:$0xff]  }
 0x58f   : > { %v10703_v27 = vmax.f32 %v10691_v38, 0.0  ;;  %v10694_v2 = vadd.f32 %v17521_v1, %v10629_v28  ;;  %13774 = vmatprep.subr.bf16.mxu1 %v14341_v10  ;;  %13796 = vmatprep.subr.bf16.mxu0 %v14342_v4  ;;  %v14351_v1 = vld [vmem:[#allocation9 + $0x130] sm:$0xff]   ;;  %v14379_v12 = vld [vmem:[#allocation9 + $0x228] sm:$0xff]   ;;  %v14385_v10 = vld [vmem:[#allocation9 + $0x278] sm:$0xff]  }
 0x590   : > { %v10756_v51 = vrot.slane %v17532_v7, 2  ;;  %v10760_v37 = vrot.slane %v17532_v7, 6  ;;  %v14380_v33 = vld [vmem:[#allocation9 + $0x2a8] sm:$0xff]   ;;  %v14382_v19 = vld [vmem:[#allocation9 + $0x2f0] sm:$0xff]   ;;  %v14386_v4 = vld [vmem:[#allocation9 + $0x2f8] sm:$0xff]   ;;  %v10758_v28 = vrot.slane %v17532_v7, 4 }
 0x591   : > { %v10733_v6 = vrot.slane %v10703_v27, 1  ;;  %v10704_v59 = vmax.f32 %v10694_v2, 0.0  ;;  %v14384_v13 = vld [vmem:[#allocation9 + $0x2b0] sm:$0xff]   ;;  %v14388_v39 = vld [vmem:[#allocation9 + $0x2b8] sm:$0xff]   ;;  %v14389_v38 = vld [vmem:[#allocation9 + $0x340] sm:$0xff]  }
 0x592   : > { %13775 = vmatpush3.bf16.msra.mxu1 %v14343_v46  ;;  %13797 = vmatpush3.bf16.msra.mxu0 %v14344_v24  ;;  %v10778_v8 = vpack.c.bf16 %v10756_v51, %v10756_v51  ;;  %v10780_v50 = vpack.c.bf16 %v10760_v37, %v10760_v37  ;;  %v14390_v46 = vld [vmem:[#allocation9 + $0x3c0] sm:$0xff]   ;;  %v14409_v51 = vld [vmem:[#allocation9 + $0x368] sm:$0xff]  }
 0x593   : > { %v10737_v9 = vrot.slane %v10704_v59, 1  ;;  %13776 = vmatprep.subr.bf16.mxu1 %v14345_v62  ;;  %13798 = vmatprep.subr.bf16.mxu0 %v14346_v42  ;;  %v10735_v48 = vmax.f32 %v10703_v27, %v10733_v6  ;;  %v14391_v27 = vld [vmem:[#allocation9 + $0x300] sm:$0xff]   ;;  %v10777_v62 = vpack.c.bf16 %v17532_v7, %v17532_v7  ;;  %v10779_v6 = vpack.c.bf16 %v10758_v28, %v10758_v28  ;;  %v14399_v7 = vld [vmem:[#allocation9 + $0x310] sm:$0xff]   ;;  %v14410_v37 = vld [vmem:[#allocation9 + $0x3e8] sm:$0xff]  }
 0x594   : > { %v14392_v42 = vld [vmem:[#allocation9 + $0x380] sm:$0xff]  }
 0x595   : > { %v10739_v21 = vmax.f32 %v10704_v59, %v10737_v9  ;;  %v14393_v59 = vld [vmem:[#allocation9 + $0x348] sm:$0xff]  }
 0x596   : > { %13777 = vmatpush3.bf16.msra.mxu1 %v14347_v36  ;;  %13799 = vmatpush3.bf16.msra.mxu0 %v14348_v43  ;;  %v14394_v43 = vld [vmem:[#allocation9 + $0x3c8] sm:$0xff]  }
 0x597   : > { %v17535_v17 = vmax.f32 %v10735_v48, %v10739_v21  ;;  %13778 = vmatprep.subr.bf16.mxu1 %v14349_v35  ;;  %13800 = vmatprep.subr.bf16.mxu0 %v14350_v32  ;;  %v14395_v35 = vld [vmem:[#allocation9 + $0x308] sm:$0xff]   ;;  %v14397_v48 = vld [vmem:[#allocation9 + $0x350] sm:$0xff]  }
 0x598   : > { %v14396_v32 = vld [vmem:[#allocation9 + $0x388] sm:$0xff]   ;;  %v14398_v21 = vld [vmem:[#allocation9 + $0x3d0] sm:$0xff]  }
 0x599   : > { %v10763_v24 = vrot.slane %v17535_v17, 2  ;;  %v10767_v2 = vrot.slane %v17535_v17, 6 }
 0x59a   : > { %13779 = vmatpush3.bf16.msra.mxu1 %v14351_v1  ;;  %13801 = vmatpush3.bf16.msra.mxu0 %v14352_v45  ;;  %v14400_v1 = vld [vmem:[#allocation9 + $0x390] sm:$0xff]   ;;  %v14401_v45 = vld [vmem:[#allocation9 + $0x358] sm:$0xff]  }
 0x59b   : > { %13780 = vmatprep.subr.bf16.mxu1 %v14353_v53  ;;  %13802 = vmatprep.subr.bf16.mxu0 %v14354_v55  ;;  %v10782_v36 = vpack.c.bf16 %v10763_v24, %v10763_v24  ;;  %v10784_v9 = vpack.c.bf16 %v10767_v2, %v10767_v2  ;;  %v14402_v53 = vld [vmem:[#allocation9 + $0x3d8] sm:$0xff]  }
 0x59c   : > { %v14403_v55 = vld [vmem:[#allocation9 + $0x318] sm:$0xff]  }
 0x59e   : > { %13781 = vmatpush3.bf16.msra.mxu1 %v14355_v56  ;;  %13803 = vmatpush3.bf16.msra.mxu0 %v14356_v23  ;;  %v14404_v56 = vld [vmem:[#allocation9 + $0x398] sm:$0xff]   ;;  %v14405_v23 = vld [vmem:[#allocation9 + $0x360] sm:$0xff]  }
 0x59f   : > { %13810 = vmatprep.subr.bf16.mxu1 %v14357_v40  ;;  %13832 = vmatprep.subr.bf16.mxu0 %v14358_v41  ;;  %v14407_v40 = vld [vmem:[#allocation9 + $0x320] sm:$0xff]  }
 0x5a0   : > { %v14408_v41 = vld [vmem:[#allocation9 + $0x3a0] sm:$0xff]  }
 0x5a1   : > { %11923 = vmatmul.mubr.bf16.vlgmr.msra.gmra.mrb[148].mxu1 %v10773_v60  ;;  %11963 = vmatmul.mubr.bf16.vlgmr.msra.gmra.mrb[156].mxu0 %v10775_v57  ;;  %v14412_v60 = vld [vmem:[#allocation9 + $0x3a8] sm:$0xff]   ;;  %v14413_v57 = vld [vmem:[#allocation9 + $0x370] sm:$0xff]  }
 0x5a2   : > { %13811 = vmatpush3.bf16.msra.mxu1 %v14359_v61  ;;  %12002 = vmatprep.mubr.bf16.mxu1 %v10778_v8  ;;  %v14411_v61 = vld [vmem:[#allocation9 + $0x328] sm:$0xff]   ;;  %v14415_v8 = vld [vmem:[#allocation9 + $0x330] sm:$0xff]  }
 0x5a3   : > { %13833 = vmatpush3.bf16.msra.mxu0 %v14360_v25  ;;  %12042 = vmatprep.mubr.bf16.mxu0 %v10780_v50  ;;  %v14414_v25 = vld [vmem:[#allocation9 + $0x3f0] sm:$0xff]   ;;  %v14418_v50 = vld [vmem:[#allocation9 + $0x3f8] sm:$0xff]  }
 0x5a4   : > { %13812 = vmatprep.subr.bf16.mxu1 %v14361_v11  ;;  %13834 = vmatprep.subr.bf16.mxu0 %v14362_v16  ;;  %v14416_v11 = vld [vmem:[#allocation9 + $0x3b0] sm:$0xff]   ;;  %v14417_v16 = vld [vmem:[#allocation9 + $0x378] sm:$0xff]  }
 0x5a6   : > { %13813 = vmatpush3.bf16.msra.mxu1 %v14363_v20  ;;  %v14419_v20 = vld [vmem:[#allocation9 + $0x338] sm:$0xff]  }
 0x5a7   : > { %13835 = vmatpush3.bf16.msra.mxu0 %v14364_v63  ;;  %13814 = vmatprep.subr.bf16.mxu1 %v14365_v30  ;;  %v14420_v63 = vld [vmem:[#allocation9 + $0x3b8] sm:$0xff]   ;;  %v10765_v30 = vrot.slane %v17535_v17, 4 }
 0x5a8   : > { %13836 = vmatprep.subr.bf16.mxu0 %v14366_v22  ;;  %v10781_v22 = vpack.c.bf16 %v17535_v17, %v17535_v17  ;;  %v14423_v17 = vld [vmem:[%s17634_s7 + $0x10] sm:$0xff]  }
 0x5aa   : > { %13815 = vmatpush3.bf16.msra.mxu1 %v14367_v58  ;;  %v10783_v58 = vpack.c.bf16 %v10765_v30, %v10765_v30 }
 0x5ab   : > { %13837 = vmatpush3.bf16.msra.mxu0 %v14368_v52  ;;  %13816 = vmatprep.subr.bf16.mxu1 %v14369_v14  ;;  %v14421_v52 = vld [vmem:[%s17634_s7] sm:$0xff]   ;;  %v14605_v14 = vmov 0.0  }
 0x5ac   : > { %13838 = vmatprep.subr.bf16.mxu0 %v14370_v54  ;;  %v14422_v54 = vld [vmem:[%s17634_s7 + $0x8] sm:$0xff]  }
 0x5ae   : > { %13817 = vmatpush3.bf16.msra.mxu1 %v14371_v34  ;;  %v14424_v34 = vld [vmem:[%s17634_s7 + $0x18] sm:$0xff]  }
 0x5af   : > { %13839 = vmatpush3.bf16.msra.mxu0 %v14372_v5  ;;  %13818 = vmatprep.subr.bf16.mxu1 %v14373_v47  ;;  %v14425_v5 = vld [vmem:[%s17634_s7 + $0x20] sm:$0xff]   ;;  %v14426_v47 = vld [vmem:[%s17634_s7 + $0x28] sm:$0xff]  }
 0x5b0   : > { %13840 = vmatprep.subr.bf16.mxu0 %v14374_v18  ;;  %v14427_v18 = vld [vmem:[%s17634_s7 + $0x30] sm:$0xff]  }
 0x5b2   : > { %13819 = vmatpush3.bf16.msra.mxu1 %v14375_v15  ;;  %v14428_v15 = vld [vmem:[%s17634_s7 + $0x38] sm:$0xff]  }
 0x5b3   : > { %13841 = vmatpush3.bf16.msra.mxu0 %v14376_v31  ;;  %13820 = vmatprep.subr.bf16.mxu1 %v14377_v49 }
 0x5b4   : > { %13842 = vmatprep.subr.bf16.mxu0 %v14378_v44  ;;  %v11041_v44 = vld [vmem:[%s17633_s6] sm:$0x1] }
 0x5b6   : > { %13821 = vmatpush3.bf16.msra.mxu1 %v14379_v12 }
 0x5b7   : > { %13843 = vmatpush3.bf16.msra.mxu0 %v14380_v33  ;;  %13822 = vmatprep.subr.bf16.mxu1 %v14381_v3 }
 0x5b8   : > { %13844 = vmatprep.subr.bf16.mxu0 %v14382_v19 }
 0x5ba   : > { %13823 = vmatpush3.bf16.msra.mxu1 %v14383_v26 }
 0x5bb   : > { %13845 = vmatpush3.bf16.msra.mxu0 %v14384_v13  ;;  %13824 = vmatprep.subr.bf16.mxu1 %v14385_v10 }
 0x5bc   : > { %13846 = vmatprep.subr.bf16.mxu0 %v14386_v4 }
 0x5be   : > { %13825 = vmatpush3.bf16.msra.mxu1 %v14387_v0 }
 0x5bf   : > { %13847 = vmatpush3.bf16.msra.mxu0 %v14388_v39  ;;  %13854 = vmatprep.subr.bf16.mxu1 %v14389_v38 }
 0x5c0   : > { %13876 = vmatprep.subr.bf16.mxu0 %v14390_v46 }
 0x5c1   : > { %12003 = vmatmul.mubr.bf16.vlgmr.msra.gmra.mrb[152].mxu1 %v10777_v62 }
 0x5c2   : > { %12043 = vmatmul.mubr.bf16.vlgmr.msra.gmra.mrb[160].mxu0 %v10779_v6  ;;  %13855 = vmatpush3.bf16.msra.mxu1 %v14391_v27 }
 0x5c3   : > { %12082 = vmatprep.mubr.bf16.mxu1 %v10782_v36  ;;  %13877 = vmatpush3.bf16.msra.mxu0 %v14392_v42 }
 0x5c4   : > { %12122 = vmatprep.mubr.bf16.mxu0 %v10784_v9  ;;  %13856 = vmatprep.subr.bf16.mxu1 %v14393_v59 }
 0x5c5   : > { %13878 = vmatprep.subr.bf16.mxu0 %v14394_v43 }
 0x5c6   : > { %13857 = vmatpush3.bf16.msra.mxu1 %v14395_v35 }
 0x5c7   : > { %13879 = vmatpush3.bf16.msra.mxu0 %v14396_v32  ;;  %13858 = vmatprep.subr.bf16.mxu1 %v14397_v48 }
 0x5c8   : > { %13880 = vmatprep.subr.bf16.mxu0 %v14398_v21 }
 0x5ca   : > { %13859 = vmatpush3.bf16.msra.mxu1 %v14399_v7 }
 0x5cb   : > { %13881 = vmatpush3.bf16.msra.mxu0 %v14400_v1  ;;  %13860 = vmatprep.subr.bf16.mxu1 %v14401_v45 }
 0x5cc   : > { %13882 = vmatprep.subr.bf16.mxu0 %v14402_v53 }
 0x5ce   : > { %13861 = vmatpush3.bf16.msra.mxu1 %v14403_v55 }
 0x5cf   : > { %13883 = vmatpush3.bf16.msra.mxu0 %v14404_v56  ;;  %13862 = vmatprep.subr.bf16.mxu1 %v14405_v23 }
 0x5d0   : > { %13884 = vmatprep.subr.bf16.mxu0 %v14406_v29 }
 0x5d2   : > { %13863 = vmatpush3.bf16.msra.mxu1 %v14407_v40 }
 0x5d3   : > { %13885 = vmatpush3.bf16.msra.mxu0 %v14408_v41  ;;  %13864 = vmatprep.subr.bf16.mxu1 %v14409_v51 }
 0x5d4   : > { %13886 = vmatprep.subr.bf16.mxu0 %v14410_v37 }
 0x5d6   : > { %13865 = vmatpush3.bf16.msra.mxu1 %v14411_v61 }
 0x5d7   : > { %13887 = vmatpush3.bf16.msra.mxu0 %v14412_v60  ;;  %13866 = vmatprep.subr.bf16.mxu1 %v14413_v57 }
 0x5d8   : > { %13888 = vmatprep.subr.bf16.mxu0 %v14414_v25 }
 0x5da   : > { %13867 = vmatpush3.bf16.msra.mxu1 %v14415_v8 }
 0x5db   : > { %13889 = vmatpush3.bf16.msra.mxu0 %v14416_v11  ;;  %13868 = vmatprep.subr.bf16.mxu1 %v14417_v16 }
 0x5dc   : > { %13890 = vmatprep.subr.bf16.mxu0 %v14418_v50 }
 0x5de   : > { %13869 = vmatpush3.bf16.msra.mxu1 %v14419_v20 }
 0x5df   : > { %13891 = vmatpush3.bf16.msra.mxu0 %v14420_v63  ;;  %13931 = vmatprep.subr.bf16.mxu1 %v14605_v14  ;;  %v12148_v63 = vld [vmem:[%s17635_s8] sm:$0x1] }
 0x5e1   : > { %12083 = vmatmul.mubr.bf16.vlgmr.msra.gmra.mrb[156].mxu1 %v10781_v22 }
 0x5e2   : > { %12123 = vmatmul.mubr.bf16.vlgmr.msra.gmra.mrb[164].mxu0 %v10783_v58  ;;  %13932 = vmatpush3.bf16.msra.mxu1 %v14421_v52 }
 0x5e3   : > { %13933 = vmatprep.subr.bf16.mxu1 %v14605_v14  ;;  %13947 = vmatprep.mubr.msk.bf16.mxu1 %vm14606_vm1, %v14605_v14 }
 0x5e6   : > { %13934 = vmatpush3.bf16.msra.mxu1 %v14422_v54 }
 0x5e7   : > { %13935 = vmatprep.subr.bf16.mxu1 %v14605_v14 }
 0x5ea   : > { %13936 = vmatpush3.bf16.msra.mxu1 %v14423_v17 }
 0x5eb   : > { %13937 = vmatprep.subr.bf16.mxu1 %v14605_v14 }
 0x5ee   : > { %13938 = vmatpush3.bf16.msra.mxu1 %v14424_v34 }
 0x5ef   : > { %13939 = vmatprep.subr.bf16.mxu1 %v14605_v14 }
 0x5f2   : > { %13940 = vmatpush3.bf16.msra.mxu1 %v14425_v5 }
 0x5f3   : > { %13941 = vmatprep.subr.bf16.mxu1 %v14605_v14 }
 0x5f6   : > { %13942 = vmatpush3.bf16.msra.mxu1 %v14426_v47 }
 0x5f7   : > { %13943 = vmatprep.subr.bf16.mxu1 %v14605_v14 }
 0x5fa   : > { %13944 = vmatpush3.bf16.msra.mxu1 %v14427_v18 }
 0x5fb   : > { %13945 = vmatprep.subr.bf16.mxu1 %v14605_v14 }
 0x5fe   : > { %13946 = vmatpush3.bf16.msra.mxu1 %v14428_v15 }
 0x653   : > { %v13738_v31 = vpop.f32.mrb[144].mxu1  ;;  %v13760_v49 = vpop.f32.mrb[152].mxu0 }
 0x654   : > { %v13739_v12 = vpop.f32.mrb[145].mxu1  ;;  %v13761_v33 = vpop.f32.mrb[153].mxu0 }
 0x655   : > { %v13740_v3 = vadd.f32 %v13739_v12, %v13738_v31  ;;  %v13762_v19 = vadd.f32 %v13761_v33, %v13760_v49  ;;  %v13741_v26 = vpop.f32.mrb[146].mxu1  ;;  %v13763_v13 = vpop.f32.mrb[154].mxu0 }
 0x656   : > { %v13742_v10 = vpop.f32.mrb[147].mxu1  ;;  %v13764_v4 = vpop.f32.mrb[155].mxu0 }
 0x657   : > { %v11845_v0 = vadd.f32 %v13740_v3, %v11041_v44 }
 0x659   : > { %v11885_v39 = vadd.f32 %v13762_v19, %v11845_v0 }
 0x674   : > { %v13782_v38 = vpop.f32.mrb[148].mxu1  ;;  %v13804_v28 = vpop.f32.mrb[156].mxu0 }
 0x675   : > { %v13783_v46 = vpop.f32.mrb[149].mxu1  ;;  %v13805_v24 = vpop.f32.mrb[157].mxu0 }
 0x676   : > { %v13784_v27 = vadd.f32 %v13783_v46, %v13782_v38  ;;  %v13806_v2 = vadd.f32 %v13805_v24, %v13804_v28  ;;  %v13785_v62 = vpop.f32.mrb[150].mxu1  ;;  %v13807_v42 = vpop.f32.mrb[158].mxu0 }
 0x677   : > { %v13786_v6 = vpop.f32.mrb[151].mxu1  ;;  %v13808_v59 = vpop.f32.mrb[159].mxu0 }
 0x678   : > { %v11925_v36 = vadd.f32 %v13784_v27, %v11885_v39 }
 0x67a   : > { %v11965_v43 = vadd.f32 %v13806_v2, %v11925_v36 }
 0x694   : > { %v13826_v9 = vpop.f32.mrb[152].mxu1 }
 0x695   : > { %v13848_v35 = vpop.f32.mrb[160].mxu0  ;;  %v13827_v32 = vpop.f32.mrb[153].mxu1 }
 0x696   : > { %v13828_v48 = vadd.f32 %v13827_v32, %v13826_v9  ;;  %v13849_v21 = vpop.f32.mrb[161].mxu0  ;;  %v13829_v7 = vpop.f32.mrb[154].mxu1 }
 0x697   : > { %v13850_v1 = vadd.f32 %v13849_v21, %v13848_v35  ;;  %v13851_v45 = vpop.f32.mrb[162].mxu0  ;;  %v13830_v53 = vpop.f32.mrb[155].mxu1 }
 0x698   : > { %v12005_v55 = vadd.f32 %v13828_v48, %v11965_v43  ;;  %v13852_v56 = vpop.f32.mrb[163].mxu0 }
 0x69a   : > { %v12045_v23 = vadd.f32 %v13850_v1, %v12005_v55 }
 0x6b4   : > { %v13870_v29 = vpop.f32.mrb[156].mxu1 }
 0x6b5   : > { %v13892_v40 = vpop.f32.mrb[164].mxu0  ;;  %v13871_v41 = vpop.f32.mrb[157].mxu1 }
 0x6b6   : > { %v13872_v51 = vadd.f32 %v13871_v41, %v13870_v29  ;;  %v13893_v37 = vpop.f32.mrb[165].mxu0  ;;  %v13873_v61 = vpop.f32.mrb[158].mxu1 }
 0x6b7   : > { %v13894_v60 = vadd.f32 %v13893_v37, %v13892_v40  ;;  %v13895_v57 = vpop.f32.mrb[166].mxu0  ;;  %v13874_v25 = vpop.f32.mrb[159].mxu1 }
 0x6b8   : > { %v12085_v8 = vadd.f32 %v13872_v51, %v12045_v23  ;;  %v13896_v11 = vpop.f32.mrb[167].mxu0 }
 0x6ba   : > { %v12125_v16 = vadd.f32 %v13894_v60, %v12085_v8 }
 0x6bc   : > { %v12130_v50 = vmax.f32 %v12125_v16, 0.0 }
 0x6be   : > { %v12131_v20 = vpack.c.bf16 %v12130_v50, %v12130_v50 }
 0x6c0   : > { %13948 = vmatmul.mubr.bf16.vlgmr.msra.gmra.mrb[160].mxu1 %v12131_v20 }
 0x793   : > { %v12231_v30 = vpop.f32.mrb[160].mxu1 }
 0x794   : > { %v12232_v22 = vadd.f32 %v12231_v30, %v12148_v63  ;;  %v13949_v58 = vpop.f32.mrb[161].mxu1 }
 0x795   : > { %v12234_v52 = vpop.f32.mrb[162].mxu1 }
 0x796   : > { %12237 = vst [vmem:[%s368_s21] sm:$0x1] %v12232_v22  ;;  %v13950_v14 = vpop.f32.mrb[163].mxu1 }
 0x797   : > { %14533 = shalt.err (!%p14530_p11)
}
 0x798   : > { %s14534_s26 = scalar_lea.hbm %s17585_s16, 16  ;;  %s14538_s3 = scalar_lea.hbm %s17636_s9, 32 }
 0x799   : > { %p14535_p5 = scmp.ne.s32.totalorder %s17585_s16, %s14534_s26  ;;  %p14539_p9 = scmp.lt.u32.totalorder %s17585_s16, %s17636_s9 }
 0x79a   : > { %p14540_p10 = scmp.lt.u32.totalorder %s14538_s3, %s14534_s26  ;;  %p14542_p12 = scmp.lt.u32.totalorder %s14534_s26, %s17585_s16 }
 0x79b   : > { %p14536_p0 = pnand %p14535_p5, %p18236_p1 }
 0x79c   : > { %p14541_p13 = por %p14540_p10, %p14539_p9 }
 0x79d   : > { %p14537_p6 = pneg %p14536_p0 }
 0x79e   : > { %p14543_p2 = por %p14542_p12, %p14541_p13 }
 0x7a0   : > { %p14544_p3 = pnand %p14543_p2, %p14537_p6 }
 0x7a2   : > { %14547 = shalt.err (!%p14544_p3)
}
 0x7a3   : > { %13963 = dma.vmem_to_hbm [thread:$0]  (%p18236_p1), %s17587_s18, 16, %s17585_s16, %s12239_s22  }
 0x7a4 PF: > { %s18237_s17 = sld [smem:[#allocation17_spill]]  ;;  %p13985_p4 = scmp.ge.s32.totalorder %s14590_s12, 2 }
 0x7a5   : > { %s12263_s15 = sand.u32 1, %s14578_s30  }
 0x7a6   : > { %s12264_s21 = scalar_lea.sflag [#allocation6], %s12263_s15 }
 0x7aa   : > { %p18238_p7 = scmp.ne.s32.totalorder %s18237_s17, 0 }
 0x7ac   : > { %p13976_p8 = pnand %p13985_p4, %p18238_p7 }
 0x7ae   : > { %14573 = dma.done.wait (!%p13976_p8), %s12264_s21, 16  }
 0x7af   : > { %14575 = vsyncadd (!%p13976_p8), %s12264_s21, 4294967280  ;;  %s18239_s12 = sld [smem:[#allocation15_spill]]  ;;  %s18240_s20 = sld [smem:[#allocation14_spill]] }
 0x7b0   : > { %s18241_s11 = sld [smem:[#allocation16_spill]]  ;;  %s18242_s30 = smov %s14582_s10 }
 0x7b5   : > { %p21_p11 = scmp.ge.s32.totalorder %s18239_s12, 4   ;;  %s18243_s10 = smov %s18240_s20 }
 0x7b7   :  { %23 = sbr.rel (!%p21_p11) target bundleno = 7 (0x7), region = 119 }
 0x7be   :  { %12268 = vsyncpa [#allocation5], 1 }
 0x7bf   :  { %12270 = vsyncpa [#allocation5 + $0x1], 1 }
 0x7c0   :  { %12271 = vsyncpa [#allocation8], 1 }
 0x7c1   :  { %12272 = vsyncpa [#allocation6], 1 }
 0x7c2   :  { %12274 = vsyncpa [#allocation6 + $0x1], 1 }

</bundles_post_ra>
